<compile_context>
chip_gen: v7x
topology: tpu7x:2x2x1
jax: 0.10.0
libtpu: 0.0.40
codegen_flags: <defaults>
</compile_context>

<pallas_src>
import functools
import math

import jax
import jax.numpy as jnp
from jax.experimental import pallas as pl
from jax.experimental.pallas import tpu as pltpu

# ----------------------------- model hyper-parameters -----------------------------
D = 32                 # model / embedding dim
NQ = 8                 # number of object queries
NUM_HEADS = 4
DH = D // NUM_HEADS
NUM_LAYERS = 3         # decoder layers
KEY_LEVELS = (-1, -2, -3)          # low -> high res (matches the PyTorch default)
PIXEL_EMBEDDING_LEVELS = [0]       # high -> low res (single high-res level here)
IN_CH = 4
IMG = 32               # input spatial size

_MM_DTYPE = jnp.bfloat16   # MXU operand dtype (accumulation stays f32)


# ----------------------------- in-kernel helpers -----------------------------
def _dot(a, b):
    """a @ b on the MXU with bf16 operands, f32 accumulation."""
    return jnp.dot(a.astype(_MM_DTYPE), b.astype(_MM_DTYPE),
                   preferred_element_type=jnp.float32)


def _dot_t(a, b):
    """a @ b.T (contract last dims of both) without materializing a transpose."""
    return jax.lax.dot_general(a.astype(_MM_DTYPE), b.astype(_MM_DTYPE),
                               (((1,), (1,)), ((), ())),
                               preferred_element_type=jnp.float32)


def _layer_norm(x, g, b, eps=1e-5):
    mu = jnp.mean(x, axis=-1, keepdims=True)
    var = jnp.mean((x - mu) ** 2, axis=-1, keepdims=True)
    return (x - mu) * jax.lax.rsqrt(var + eps) * g + b


# ===================================================================================
# Kernel 1: fused linear  (matmul + bias + optional activation), whole-array blocks
# ===================================================================================
def _linear_kernel(x_ref, w_ref, b_ref, o_ref, *, act):
    out = _dot(x_ref[...], w_ref[...]) + b_ref[...]
    if act == "gelu":
        out = jax.nn.gelu(out)
    elif act == "relu":
        out = jnp.maximum(out, 0.0)
    o_ref[...] = out.astype(o_ref.dtype)


def fused_linear(x2d, w, b, act="none"):
    """x2d: (M, K) @ w: (K, N) + b (1, N), optional activation. Single launch, no padding."""
    M, _ = x2d.shape
    N = w.shape[1]
    return pl.pallas_call(
        functools.partial(_linear_kernel, act=act),
        out_shape=jax.ShapeDtypeStruct((M, N), jnp.float32),
    )(x2d, w, b)


# ===================================================================================
# Kernel 2: fused multi-head attention block, grid over batch only
#   q/k/v projections + per-head masked softmax attention + output projection
#   + residual + LayerNorm, all in one kernel; heads handled in-kernel.
# ===================================================================================
def _attn_block_kernel(q_ref, qpos_ref, k_ref, v_ref, bias_ref,
                       wq_ref, bq_ref, wk_ref, bk_ref, wv_ref, bv_ref,
                       wo_ref, bo_ref, g_ref, beta_ref, o_ref,
                       *, num_heads, scale):
    q_resid = q_ref[0]                       # (Nq, D)  residual path
    q_in = q_resid + qpos_ref[...]           # (Nq, D)  query + positional embedding
    k_in = k_ref[0]                          # (S,  D)
    v_in = v_ref[0]                          # (S,  D)
    bias = bias_ref[0]                       # (Nq, S)  additive attention bias (shared by heads)

    q = _dot(q_in, wq_ref[...]) + bq_ref[...]
    k = _dot(k_in, wk_ref[...]) + bk_ref[...]
    v = _dot(v_in, wv_ref[...]) + bv_ref[...]

    dh = q.shape[-1] // num_heads
    head_outs = []
    for h in range(num_heads):               # static, fully unrolled
        lo, hi = h * dh, (h + 1) * dh
        qh, kh, vh = q[:, lo:hi], k[:, lo:hi], v[:, lo:hi]
        s = _dot_t(qh, kh) * scale + bias                       # (Nq, S)
        m = jnp.max(s, axis=-1, keepdims=True)
        p = jnp.exp(s - m)
        inv = pl.reciprocal(jnp.sum(p, axis=-1, keepdims=True), approx=True)
        head_outs.append(_dot(p, vh) * inv)                     # (Nq, dh)
    attn = jnp.concatenate(head_outs, axis=-1)                  # (Nq, D)

    out = _dot(attn, wo_ref[...]) + bo_ref[...]
    y = _layer_norm(q_resid + out, g_ref[...], beta_ref[...])
    o_ref[0] = y.astype(o_ref.dtype)


def attention_block(queries, qpos, k, v, bias, params, prefix):
    """queries (B, Nq, D); k/v (B, S, D); bias (B, Nq, S) -> LayerNorm(queries + MHA(...))."""
    B, Nq, d = queries.shape
    S = k.shape[1]
    kern = functools.partial(_attn_block_kernel, num_heads=NUM_HEADS,
                             scale=1.0 / math.sqrt(DH))

    data_specs = [
        pl.BlockSpec((1, Nq, d), lambda b: (b, 0, 0)),   # queries
        pl.BlockSpec((Nq, d), lambda b: (0, 0)),          # query positional embedding
        pl.BlockSpec((1, S, d), lambda b: (b, 0, 0)),     # keys
        pl.BlockSpec((1, S, d), lambda b: (b, 0, 0)),     # values
        pl.BlockSpec((1, Nq, S), lambda b: (b, 0, 0)),    # additive bias (per-B, not per-head)
    ]
    weights, w_specs = [], []
    for m in ("q", "k", "v", "o"):
        wm, bm = params[f"{prefix}_w{m}"], params[f"{prefix}_b{m}"]
        weights += [wm, bm]
        w_specs += [pl.BlockSpec(wm.shape, lambda b: (0, 0)),
                    pl.BlockSpec(bm.shape, lambda b: (0, 0))]
    g, beta = params[f"{prefix}_ln_g"], params[f"{prefix}_ln_b"]
    weights += [g, beta]
    w_specs += [pl.BlockSpec(g.shape, lambda b: (0, 0)),
                pl.BlockSpec(beta.shape, lambda b: (0, 0))]

    return pl.pallas_call(
        kern,
        out_shape=jax.ShapeDtypeStruct((B, Nq, d), jnp.float32),
        grid=(B,),
        in_specs=data_specs + w_specs,
        out_specs=pl.BlockSpec((1, Nq, d), lambda b: (b, 0, 0)),
        compiler_params=pltpu.CompilerParams(dimension_semantics=("parallel",)),
    )(queries, qpos, k, v, bias, *weights)


# ===================================================================================
# Kernel 3: fused FFN block  (linear + GELU + linear + residual + LayerNorm)
# ===================================================================================
def _ffn_kernel(x_ref, w1_ref, b1_ref, w2_ref, b2_ref, g_ref, beta_ref, o_ref):
    x = x_ref[...]
    h = jax.nn.gelu(_dot(x, w1_ref[...]) + b1_ref[...])
    out = _dot(h, w2_ref[...]) + b2_ref[...]
    o_ref[...] = _layer_norm(x + out, g_ref[...], beta_ref[...]).astype(o_ref.dtype)


def ffn_block(queries, params, l):
    B, Nq, d = queries.shape
    x = queries.reshape(B * Nq, d)
    out = pl.pallas_call(
        _ffn_kernel,
        out_shape=jax.ShapeDtypeStruct((B * Nq, d), jnp.float32),
    )(x, params[f"ffn{l}_w1"], params[f"ffn{l}_b1"],
      params[f"ffn{l}_w2"], params[f"ffn{l}_b2"],
      params[f"ffn{l}_ln_g"], params[f"ffn{l}_ln_b"])
    return out.reshape(B, Nq, d)


# ===================================================================================
# Kernel 4: fused mask prediction  (3-layer mask-head MLP + per-pixel mask logits),
#            batched over B in the grid (no Python loop, no XLA transpose).
# ===================================================================================
def _predict_kernel(q_ref, pix_ref, w1_ref, b1_ref, w2_ref, b2_ref, w3_ref, b3_ref,
                    emb_ref, logit_ref):
    q = q_ref[0]                                                  # (Nq, D)
    h = jnp.maximum(_dot(q, w1_ref[...]) + b1_ref[...], 0.0)
    h = jnp.maximum(_dot(h, w2_ref[...]) + b2_ref[...], 0.0)
    e = _dot(h, w3_ref[...]) + b3_ref[...]                        # (Nq, D) mask embeddings
    pix = pix_ref[0]                                              # (P, D)
    emb_ref[0] = e.astype(emb_ref.dtype)
    logit_ref[0] = _dot_t(e, pix).astype(logit_ref.dtype)         # (Nq, P) lane-dense output


def predict_mask(queries, pixel_embed, params, hw):
    """queries (B, Nq, D), pixel_embed (B, P, D) -> (mask_embed, mask_logits (B, Nq, h, w))."""
    B, Nq, d = queries.shape
    P = pixel_embed.shape[1]
    weights = [params["mh_w1"], params["mh_b1"], params["mh_w2"], params["mh_b2"],
               params["mh_w3"], params["mh_b3"]]
    w_specs = [pl.BlockSpec(w.shape, lambda b, n=w.ndim: (0,) * n) for w in weights]

    mask_embed, logits = pl.pallas_call(
        _predict_kernel,
        out_shape=(jax.ShapeDtypeStruct((B, Nq, d), jnp.float32),
                   jax.ShapeDtypeStruct((B, Nq, P), jnp.float32)),
        grid=(B,),
        in_specs=[pl.BlockSpec((1, Nq, d), lambda b: (b, 0, 0)),
                  pl.BlockSpec((1, P, d), lambda b: (b, 0, 0))] + w_specs,
        out_specs=(pl.BlockSpec((1, Nq, d), lambda b: (b, 0, 0)),
                   pl.BlockSpec((1, Nq, P), lambda b: (b, 0, 0))),
        compiler_params=pltpu.CompilerParams(dimension_semantics=("parallel",)),
    )(queries, pixel_embed, *weights)
    return mask_embed, logits.reshape(B, Nq, hw[0], hw[1])


# ===================================================================================
# Backbone: 4-level pyramid of 2x2-stride-2 patchify convs (im2col + fused matmul+GELU)
# ===================================================================================
def patch_merge(x_nhwc, w, b):
    # TODO(synk): the 2x2 window gather (im2col) stays as an XLA reshape/transpose; only the
    # matmul + bias + GELU epilogue is fused into the Pallas kernel.
    B, H, W, C = x_nhwc.shape
    x = x_nhwc.reshape(B, H // 2, 2, W // 2, 2, C).transpose(0, 1, 3, 2, 4, 5)
    x = x.reshape(B * (H // 2) * (W // 2), 4 * C)
    out = fused_linear(x, w, b, act="gelu")
    return out.reshape(B, H // 2, W // 2, w.shape[1])


def backbone(x_nchw, params):
    x = jnp.transpose(x_nchw, (0, 2, 3, 1)).astype(jnp.float32)   # NCHW -> NHWC
    f0 = patch_merge(x, params["stem_w"], params["stem_b"])       # (B, 16, 16, D)
    f1 = patch_merge(f0, params["down1_w"], params["down1_b"])    # (B,  8,  8, D)
    f2 = patch_merge(f1, params["down2_w"], params["down2_b"])    # (B,  4,  4, D)
    f3 = patch_merge(f2, params["down3_w"], params["down3_b"])    # (B,  2,  2, D)
    return [f0, f1, f2, f3]   # high -> low res


# ===================================================================================
# Mask decoder
# ===================================================================================
def attn_bias_from_mask_logits(mask_logits, target_hw):
    """Downsample predicted masks to the key level and convert to additive attention bias."""
    B, Nq, H0, W0 = mask_logits.shape
    th, tw = target_hw
    prob = jax.nn.sigmoid(mask_logits)
    prob = prob.reshape(B, Nq, th, H0 // th, tw, W0 // tw).mean(axis=(3, 5))
    keep = (prob >= 0.5).reshape(B, Nq, th * tw)
    # Mask2Former rule: if a query masks out every key, fall back to full attention.
    all_masked = ~jnp.any(keep, axis=-1, keepdims=True)
    keep = keep | all_masked
    return jnp.where(keep, 0.0, -1e9).astype(jnp.float32)


def mask_decoder(key_feats, pixel_feats, manual_mask, params):
    """key_feats: low->high res list of (B, h, w, D); pixel_feats: list of (B, h, w, D)."""
    B = key_feats[0].shape[0]

    pf = pixel_feats[0]
    H0, W0 = pf.shape[1], pf.shape[2]
    pixel_embed = fused_linear(pf.reshape(B * H0 * W0, D),
                               params["pix_w"], params["pix_b"]).reshape(B, H0 * W0, D)

    key_k, key_v, key_hws = [], [], []
    for lvl, f in enumerate(key_feats):
        h, w = f.shape[1], f.shape[2]
        flat = f.reshape(B, h * w, D)
        key_k.append(flat + params["level_embed"][lvl])   # level positional embedding on K
        key_v.append(flat)
        key_hws.append((h, w))

    queries = jnp.broadcast_to(params["query_feat"][None], (B, NQ, D)).astype(jnp.float32)
    qpos = params["query_embed"]                          # (NQ, D)
    zero_bias = jnp.zeros((B, NQ, NQ), jnp.float32)       # hoisted out of the layer loop

    layers_mask_embeddings, layers_mask_logits = [], []
    mask_embed, mask_logits = predict_mask(queries, pixel_embed, params, (H0, W0))
    layers_mask_embeddings.append(mask_embed)
    layers_mask_logits.append(mask_logits)

    for l in range(NUM_LAYERS):
        lvl = l % len(key_feats)
        if l == 0 and manual_mask is not None:
            src_logits = jnp.where(manual_mask, 1e4, -1e4).astype(jnp.float32)
        else:
            src_logits = mask_logits
        bias = attn_bias_from_mask_logits(src_logits, key_hws[lvl])

        # masked cross-attention (+ residual + LN), one fused kernel
        queries = attention_block(queries, qpos, key_k[lvl], key_v[lvl], bias,
                                  params, f"ca{l}")
        # self-attention among queries (+ residual + LN), one fused kernel
        queries = attention_block(queries, qpos, queries + qpos, queries, zero_bias,
                                  params, f"sa{l}")
        # FFN (+ residual + LN), one fused kernel
        queries = ffn_block(queries, params, l)

        mask_embed, mask_logits = predict_mask(queries, pixel_embed, params, (H0, W0))
        layers_mask_embeddings.append(mask_embed)
        layers_mask_logits.append(mask_logits)

    return layers_mask_embeddings, layers_mask_logits


def maskformer_forward(x, params, manual_mask=None):
    """Equivalent of MaskFormer.forward: returns (layers_mask_embeddings, layers_mask_logits)."""
    feature_maps = backbone(x, params)                       # high -> low res
    key_feats = [feature_maps[i] for i in KEY_LEVELS]        # cytoolz.get(key_levels, ...)
    pixel_feats = [feature_maps[i] for i in PIXEL_EMBEDDING_LEVELS]
    return mask_decoder(key_feats, pixel_feats, manual_mask, params)


# ===================================================================================
# Deterministic parameter initialization (biases / LN params stored as (1, N) rows)
# ===================================================================================
def init_params(key):
    params = {}
    counter = [0]

    def nxt():
        counter[0] += 1
        return jax.random.fold_in(key, counter[0])

    def w(shape, scale=0.05):
        return (scale * jax.random.normal(nxt(), shape)).astype(jnp.float32)

    def zeros(shape):
        return jnp.zeros(shape, jnp.float32)

    def ones(shape):
        return jnp.ones(shape, jnp.float32)

    # backbone (patchify convs)
    params["stem_w"], params["stem_b"] = w((4 * IN_CH, D)), zeros((1, D))
    for name in ("down1", "down2", "down3"):
        params[f"{name}_w"], params[f"{name}_b"] = w((4 * D, D)), zeros((1, D))

    # decoder embeddings
    params["level_embed"] = w((len(KEY_LEVELS), D))
    params["query_feat"] = w((NQ, D))
    params["query_embed"] = w((NQ, D))
    params["pix_w"], params["pix_b"] = w((D, D)), zeros((1, D))

    # per-layer attention / FFN
    for l in range(NUM_LAYERS):
        for p in (f"ca{l}", f"sa{l}"):
            for m in ("q", "k", "v", "o"):
                params[f"{p}_w{m}"], params[f"{p}_b{m}"] = w((D, D)), zeros((1, D))
            params[f"{p}_ln_g"], params[f"{p}_ln_b"] = ones((1, D)), zeros((1, D))
        params[f"ffn{l}_w1"], params[f"ffn{l}_b1"] = w((D, 4 * D)), zeros((1, 4 * D))
        params[f"ffn{l}_w2"], params[f"ffn{l}_b2"] = w((4 * D, D)), zeros((1, D))
        params[f"ffn{l}_ln_g"], params[f"ffn{l}_ln_b"] = ones((1, D)), zeros((1, D))

    # mask head MLP
    params["mh_w1"], params["mh_b1"] = w((D, D)), zeros((1, D))
    params["mh_w2"], params["mh_b2"] = w((D, D)), zeros((1, D))
    params["mh_w3"], params["mh_b3"] = w((D, D)), zeros((1, D))
    return params


# ===================================================================================
if __name__ == "__main__":
    key = jax.random.PRNGKey(0)
    params = init_params(jax.random.fold_in(key, 1))
    x = jax.random.normal(jax.random.fold_in(key, 2), (2, IN_CH, IMG, IMG), jnp.float32)

    fwd = jax.jit(lambda inp, p: maskformer_forward(inp, p, manual_mask=None))
    layers_mask_embeddings, layers_mask_logits = fwd(x, params)

    for e in layers_mask_embeddings:
        jax.block_until_ready(e)
    for m in layers_mask_logits:
        jax.block_until_ready(m)

    assert len(layers_mask_embeddings) == NUM_LAYERS + 1
    assert layers_mask_embeddings[0].shape == (2, NQ, D)
    assert layers_mask_logits[0].shape == (2, NQ, IMG // 2, IMG // 2)
    assert all(bool(jnp.all(jnp.isfinite(m))) for m in layers_mask_logits)
    print("KERNEL_OK")
</pallas_src>

<mosaic_0001>
module attributes {stable_mosaic.version = 11 : i64} {
  func.func @_linear_kernel(%arg0: memref<512x16xf32, #tpu.memory_space<vmem>>, %arg1: memref<16x32xf32, #tpu.memory_space<vmem>>, %arg2: memref<1x32xf32, #tpu.memory_space<vmem>>, %arg3: memref<512x32xf32, #tpu.memory_space<vmem>>) attributes {dimension_semantics = [], scalar_prefetch = 0 : i64, scratch_operands = 0 : i64, tpu.core_type = #tpu.core_type<tc>} {
    %c0 = arith.constant 0 : index
    %c0_0 = arith.constant 0 : index
    %0 = vector.load %arg0[%c0, %c0_0] : memref<512x16xf32, #tpu.memory_space<vmem>>, vector<512x16xf32>
    %c0_1 = arith.constant 0 : index
    %c0_2 = arith.constant 0 : index
    %1 = vector.load %arg1[%c0_1, %c0_2] : memref<16x32xf32, #tpu.memory_space<vmem>>, vector<16x32xf32>
    %2 = arith.truncf %0 : vector<512x16xf32> to vector<512x16xbf16>
    %3 = arith.truncf %1 : vector<16x32xf32> to vector<16x32xbf16>
    %cst = arith.constant dense<0.000000e+00> : vector<512x32xf32>
    %4 = tpu.matmul %2, %3, %cst {dimension_numbers = #tpu.dot_dimension_numbers<[1], [0], [0], [1], [0, 0, 1, 1], [], []>} : vector<512x16xbf16>, vector<16x32xbf16>, vector<512x32xf32> -> vector<512x32xf32>
    %c0_3 = arith.constant 0 : index
    %c0_4 = arith.constant 0 : index
    %5 = vector.load %arg2[%c0_3, %c0_4] : memref<1x32xf32, #tpu.memory_space<vmem>>, vector<1x32xf32>
    %6 = vector.broadcast %5 : vector<1x32xf32> to vector<512x32xf32>
    %7 = arith.addf %4, %6 : vector<512x32xf32>
    %8 = arith.mulf %7, %7 : vector<512x32xf32>
    %9 = arith.mulf %7, %8 : vector<512x32xf32>
    %cst_5 = arith.constant 4.471500e-02 : f32
    %10 = vector.broadcast %cst_5 : f32 to vector<512x32xf32>
    %11 = arith.mulf %10, %9 : vector<512x32xf32>
    %12 = arith.addf %7, %11 : vector<512x32xf32>
    %cst_6 = arith.constant 0.797884583 : f32
    %13 = vector.broadcast %cst_6 : f32 to vector<512x32xf32>
    %14 = arith.mulf %13, %12 : vector<512x32xf32>
    %15 = math.tanh %14 : vector<512x32xf32>
    %cst_7 = arith.constant 1.000000e+00 : f32
    %16 = vector.broadcast %cst_7 : f32 to vector<512x32xf32>
    %17 = arith.addf %16, %15 : vector<512x32xf32>
    %cst_8 = arith.constant 5.000000e-01 : f32
    %18 = vector.broadcast %cst_8 : f32 to vector<512x32xf32>
    %19 = arith.mulf %18, %17 : vector<512x32xf32>
    %20 = arith.mulf %7, %19 : vector<512x32xf32>
    %c0_9 = arith.constant 0 : index
    %c0_10 = arith.constant 0 : index
    %21 = vector.load %arg3[%c0_9, %c0_10] : memref<512x32xf32, #tpu.memory_space<vmem>>, vector<512x32xf32>
    tpu.vector_store %arg3[%c0_9, %c0_10], %20 {strides = array<i32>} : memref<512x32xf32, #tpu.memory_space<vmem>>, vector<512x32xf32>,
    return
  }
}

module attributes {stable_mosaic.version = 11 : i64} {
  func.func @_linear_kernel(%arg0: memref<512x32xf32, #tpu.memory_space<vmem>>, %arg1: memref<32x32xf32, #tpu.memory_space<vmem>>, %arg2: memref<1x32xf32, #tpu.memory_space<vmem>>, %arg3: memref<512x32xf32, #tpu.memory_space<vmem>>) attributes {dimension_semantics = [], scalar_prefetch = 0 : i64, scratch_operands = 0 : i64, tpu.core_type = #tpu.core_type<tc>} {
    %c0 = arith.constant 0 : index
    %c0_0 = arith.constant 0 : index
    %0 = vector.load %arg0[%c0, %c0_0] : memref<512x32xf32, #tpu.memory_space<vmem>>, vector<512x32xf32>
    %c0_1 = arith.constant 0 : index
    %c0_2 = arith.constant 0 : index
    %1 = vector.load %arg1[%c0_1, %c0_2] : memref<32x32xf32, #tpu.memory_space<vmem>>, vector<32x32xf32>
    %2 = arith.truncf %0 : vector<512x32xf32> to vector<512x32xbf16>
    %3 = arith.truncf %1 : vector<32x32xf32> to vector<32x32xbf16>
    %cst = arith.constant dense<0.000000e+00> : vector<512x32xf32>
    %4 = tpu.matmul %2, %3, %cst {dimension_numbers = #tpu.dot_dimension_numbers<[1], [0], [0], [1], [0, 0, 1, 1], [], []>} : vector<512x32xbf16>, vector<32x32xbf16>, vector<512x32xf32> -> vector<512x32xf32>
    %c0_3 = arith.constant 0 : index
    %c0_4 = arith.constant 0 : index
    %5 = vector.load %arg2[%c0_3, %c0_4] : memref<1x32xf32, #tpu.memory_space<vmem>>, vector<1x32xf32>
    %6 = vector.broadcast %5 : vector<1x32xf32> to vector<512x32xf32>
    %7 = arith.addf %4, %6 : vector<512x32xf32>
    %c0_5 = arith.constant 0 : index
    %c0_6 = arith.constant 0 : index
    %8 = vector.load %arg3[%c0_5, %c0_6] : memref<512x32xf32, #tpu.memory_space<vmem>>, vector<512x32xf32>
    tpu.vector_store %arg3[%c0_5, %c0_6], %7 {strides = array<i32>} : memref<512x32xf32, #tpu.memory_space<vmem>>, vector<512x32xf32>,
    return
  }
}

module attributes {stable_mosaic.version = 11 : i64} {
  func.func @_predict_kernel(%arg0: i32, %arg1: memref<1x8x32xf32, #tpu.memory_space<vmem>>, %arg2: memref<1x256x32xf32, #tpu.memory_space<vmem>>, %arg3: memref<32x32xf32, #tpu.memory_space<vmem>>, %arg4: memref<1x32xf32, #tpu.memory_space<vmem>>, %arg5: memref<32x32xf32, #tpu.memory_space<vmem>>, %arg6: memref<1x32xf32, #tpu.memory_space<vmem>>, %arg7: memref<32x32xf32, #tpu.memory_space<vmem>>, %arg8: memref<1x32xf32, #tpu.memory_space<vmem>>, %arg9: memref<1x8x32xf32, #tpu.memory_space<vmem>>, %arg10: memref<1x8x256xf32, #tpu.memory_space<vmem>>) attributes {dimension_semantics = [#tpu.dimension_semantics<parallel>], iteration_bounds = array<i64: 2>, scalar_prefetch = 0 : i64, scratch_operands = 0 : i64, tpu.core_type = #tpu.core_type<tc>, window_params = [{transform_indices = @transform_0, window_bounds = array<i64: 1, 8, 32>}, {transform_indices = @transform_1, window_bounds = array<i64: 1, 256, 32>}, {pipeline_mode = #tpu.pipeline_mode<synchronous>, transform_indices = @transform_2, window_bounds = array<i64: 32, 32>}, {pipeline_mode = #tpu.pipeline_mode<synchronous>, transform_indices = @transform_3, window_bounds = array<i64: 1, 32>}, {pipeline_mode = #tpu.pipeline_mode<synchronous>, transform_indices = @transform_4, window_bounds = array<i64: 32, 32>}, {pipeline_mode = #tpu.pipeline_mode<synchronous>, transform_indices = @transform_5, window_bounds = array<i64: 1, 32>}, {pipeline_mode = #tpu.pipeline_mode<synchronous>, transform_indices = @transform_6, window_bounds = array<i64: 32, 32>}, {pipeline_mode = #tpu.pipeline_mode<synchronous>, transform_indices = @transform_7, window_bounds = array<i64: 1, 32>}, {transform_indices = @transform_8, window_bounds = array<i64: 1, 8, 32>}, {transform_indices = @transform_9, window_bounds = array<i64: 1, 8, 256>}]} {
    %c0 = arith.constant 0 : index
    %c0_0 = arith.constant 0 : index
    %c0_1 = arith.constant 0 : index
    %0 = vector.load %arg1[%c0, %c0_0, %c0_1] : memref<1x8x32xf32, #tpu.memory_space<vmem>>, vector<1x8x32xf32>
    %1 = vector.shape_cast %0 : vector<1x8x32xf32> to vector<8x32xf32>
    %c0_2 = arith.constant 0 : index
    %c0_3 = arith.constant 0 : index
    %2 = vector.load %arg3[%c0_2, %c0_3] : memref<32x32xf32, #tpu.memory_space<vmem>>, vector<32x32xf32>
    %3 = arith.truncf %1 : vector<8x32xf32> to vector<8x32xbf16>
    %4 = arith.truncf %2 : vector<32x32xf32> to vector<32x32xbf16>
    %cst = arith.constant dense<0.000000e+00> : vector<8x32xf32>
    %5 = tpu.matmul %3, %4, %cst {dimension_numbers = #tpu.dot_dimension_numbers<[1], [0], [0], [1], [0, 0, 1, 1], [], []>} : vector<8x32xbf16>, vector<32x32xbf16>, vector<8x32xf32> -> vector<8x32xf32>
    %c0_4 = arith.constant 0 : index
    %c0_5 = arith.constant 0 : index
    %6 = vector.load %arg4[%c0_4, %c0_5] : memref<1x32xf32, #tpu.memory_space<vmem>>, vector<1x32xf32>
    %7 = vector.broadcast %6 : vector<1x32xf32> to vector<8x32xf32>
    %8 = arith.addf %5, %7 : vector<8x32xf32>
    %cst_6 = arith.constant 0.000000e+00 : f32
    %9 = vector.broadcast %cst_6 : f32 to vector<8x32xf32>
    %10 = arith.maximumf %8, %9 : vector<8x32xf32>
    %c0_7 = arith.constant 0 : index
    %c0_8 = arith.constant 0 : index
    %11 = vector.load %arg5[%c0_7, %c0_8] : memref<32x32xf32, #tpu.memory_space<vmem>>, vector<32x32xf32>
    %12 = arith.truncf %10 : vector<8x32xf32> to vector<8x32xbf16>
    %13 = arith.truncf %11 : vector<32x32xf32> to vector<32x32xbf16>
    %cst_9 = arith.constant dense<0.000000e+00> : vector<8x32xf32>
    %14 = tpu.matmul %12, %13, %cst_9 {dimension_numbers = #tpu.dot_dimension_numbers<[1], [0], [0], [1], [0, 0, 1, 1], [], []>} : vector<8x32xbf16>, vector<32x32xbf16>, vector<8x32xf32> -> vector<8x32xf32>
    %c0_10 = arith.constant 0 : index
    %c0_11 = arith.constant 0 : index
    %15 = vector.load %arg6[%c0_10, %c0_11] : memref<1x32xf32, #tpu.memory_space<vmem>>, vector<1x32xf32>
    %16 = vector.broadcast %15 : vector<1x32xf32> to vector<8x32xf32>
    %17 = arith.addf %14, %16 : vector<8x32xf32>
    %cst_12 = arith.constant 0.000000e+00 : f32
    %18 = vector.broadcast %cst_12 : f32 to vector<8x32xf32>
    %19 = arith.maximumf %17, %18 : vector<8x32xf32>
    %c0_13 = arith.constant 0 : index
    %c0_14 = arith.constant 0 : index
    %20 = vector.load %arg7[%c0_13, %c0_14] : memref<32x32xf32, #tpu.memory_space<vmem>>, vector<32x32xf32>
    %21 = arith.truncf %19 : vector<8x32xf32> to vector<8x32xbf16>
    %22 = arith.truncf %20 : vector<32x32xf32> to vector<32x32xbf16>
    %cst_15 = arith.constant dense<0.000000e+00> : vector<8x32xf32>
    %23 = tpu.matmul %21, %22, %cst_15 {dimension_numbers = #tpu.dot_dimension_numbers<[1], [0], [0], [1], [0, 0, 1, 1], [], []>} : vector<8x32xbf16>, vector<32x32xbf16>, vector<8x32xf32> -> vector<8x32xf32>
    %c0_16 = arith.constant 0 : index
    %c0_17 = arith.constant 0 : index
    %24 = vector.load %arg8[%c0_16, %c0_17] : memref<1x32xf32, #tpu.memory_space<vmem>>, vector<1x32xf32>
    %25 = vector.broadcast %24 : vector<1x32xf32> to vector<8x32xf32>
    %26 = arith.addf %23, %25 : vector<8x32xf32>
    %c0_18 = arith.constant 0 : index
    %c0_19 = arith.constant 0 : index
    %c0_20 = arith.constant 0 : index
    %27 = vector.load %arg2[%c0_18, %c0_19, %c0_20] : memref<1x256x32xf32, #tpu.memory_space<vmem>>, vector<1x256x32xf32>
    %28 = vector.shape_cast %27 : vector<1x256x32xf32> to vector<256x32xf32>
    %c0_21 = arith.constant 0 : index
    %c0_22 = arith.constant 0 : index
    %c0_23 = arith.constant 0 : index
    %29 = vector.load %arg9[%c0_21, %c0_22, %c0_23] : memref<1x8x32xf32, #tpu.memory_space<vmem>>, vector<1x8x32xf32>
    %30 = vector.shape_cast %29 : vector<1x8x32xf32> to vector<8x32xf32>
    %31 = vector.shape_cast %26 : vector<8x32xf32> to vector<1x8x32xf32>
    tpu.vector_store %arg9[%c0_21, %c0_22, %c0_23], %31 {strides = array<i32>} : memref<1x8x32xf32, #tpu.memory_space<vmem>>, vector<1x8x32xf32>,
    %32 = arith.truncf %26 : vector<8x32xf32> to vector<8x32xbf16>
    %33 = arith.truncf %28 : vector<256x32xf32> to vector<256x32xbf16>
    %cst_24 = arith.constant dense<0.000000e+00> : vector<8x256xf32>
    %34 = tpu.matmul %32, %33, %cst_24 {dimension_numbers = #tpu.dot_dimension_numbers<[1], [1], [0], [0], [0, 0, 1, 0], [], []>} : vector<8x32xbf16>, vector<256x32xbf16>, vector<8x256xf32> -> vector<8x256xf32>
    %c0_25 = arith.constant 0 : index
    %c0_26 = arith.constant 0 : index
    %c0_27 = arith.constant 0 : index
    %35 = vector.load %arg10[%c0_25, %c0_26, %c0_27] : memref<1x8x256xf32, #tpu.memory_space<vmem>>, vector<1x8x256xf32>
    %36 = vector.shape_cast %35 : vector<1x8x256xf32> to vector<8x256xf32>
    %37 = vector.shape_cast %34 : vector<8x256xf32> to vector<1x8x256xf32>
    tpu.vector_store %arg10[%c0_25, %c0_26, %c0_27], %37 {strides = array<i32>} : memref<1x8x256xf32, #tpu.memory_space<vmem>>, vector<1x8x256xf32>,
    return
  }
  func.func @transform_0(%arg0: i32) -> (i32, i32, i32) {
    %c0_i32 = arith.constant 0 : i32
    %c0_i32_0 = arith.constant 0 : i32
    %c0_i32_1 = arith.constant 0 : i32
    return %arg0, %c0_i32, %c0_i32_0 : i32, i32, i32
  }
  func.func @transform_1(%arg0: i32) -> (i32, i32, i32) {
    %c0_i32 = arith.constant 0 : i32
    %c0_i32_0 = arith.constant 0 : i32
    %c0_i32_1 = arith.constant 0 : i32
    return %arg0, %c0_i32, %c0_i32_0 : i32, i32, i32
  }
  func.func @transform_2(%arg0: i32) -> (i32, i32) {
    %c0_i32 = arith.constant 0 : i32
    %c0_i32_0 = arith.constant 0 : i32
    %c0_i32_1 = arith.constant 0 : i32
    return %c0_i32, %c0_i32_0 : i32, i32
  }
  func.func @transform_3(%arg0: i32) -> (i32, i32) {
    %c0_i32 = arith.constant 0 : i32
    %c0_i32_0 = arith.constant 0 : i32
    %c0_i32_1 = arith.constant 0 : i32
    return %c0_i32, %c0_i32_0 : i32, i32
  }
  func.func @transform_4(%arg0: i32) -> (i32, i32) {
    %c0_i32 = arith.constant 0 : i32
    %c0_i32_0 = arith.constant 0 : i32
    %c0_i32_1 = arith.constant 0 : i32
    return %c0_i32, %c0_i32_0 : i32, i32
  }
  func.func @transform_5(%arg0: i32) -> (i32, i32) {
    %c0_i32 = arith.constant 0 : i32
    %c0_i32_0 = arith.constant 0 : i32
    %c0_i32_1 = arith.constant 0 : i32
    return %c0_i32, %c0_i32_0 : i32, i32
  }
  func.func @transform_6(%arg0: i32) -> (i32, i32) {
    %c0_i32 = arith.constant 0 : i32
    %c0_i32_0 = arith.constant 0 : i32
    %c0_i32_1 = arith.constant 0 : i32
    return %c0_i32, %c0_i32_0 : i32, i32
  }
  func.func @transform_7(%arg0: i32) -> (i32, i32) {
    %c0_i32 = arith.constant 0 : i32
    %c0_i32_0 = arith.constant 0 : i32
    %c0_i32_1 = arith.constant 0 : i32
    return %c0_i32, %c0_i32_0 : i32, i32
  }
  func.func @transform_8(%arg0: i32) -> (i32, i32, i32) {
    %c0_i32 = arith.constant 0 : i32
    %c0_i32_0 = arith.constant 0 : i32
    %c0_i32_1 = arith.constant 0 : i32
    return %arg0, %c0_i32, %c0_i32_0 : i32, i32, i32
  }
  func.func @transform_9(%arg0: i32) -> (i32, i32, i32) {
    %c0_i32 = arith.constant 0 : i32
    %c0_i32_0 = arith.constant 0 : i32
    %c0_i32_1 = arith.constant 0 : i32
    return %arg0, %c0_i32, %c0_i32_0 : i32, i32, i32
  }
}

module attributes {stable_mosaic.version = 11 : i64} {
  func.func @_linear_kernel(%arg0: memref<128x128xf32, #tpu.memory_space<vmem>>, %arg1: memref<128x32xf32, #tpu.memory_space<vmem>>, %arg2: memref<1x32xf32, #tpu.memory_space<vmem>>, %arg3: memref<128x32xf32, #tpu.memory_space<vmem>>) attributes {dimension_semantics = [], scalar_prefetch = 0 : i64, scratch_operands = 0 : i64, tpu.core_type = #tpu.core_type<tc>} {
    %c0 = arith.constant 0 : index
    %c0_0 = arith.constant 0 : index
    %0 = vector.load %arg0[%c0, %c0_0] : memref<128x128xf32, #tpu.memory_space<vmem>>, vector<128x128xf32>
    %c0_1 = arith.constant 0 : index
    %c0_2 = arith.constant 0 : index
    %1 = vector.load %arg1[%c0_1, %c0_2] : memref<128x32xf32, #tpu.memory_space<vmem>>, vector<128x32xf32>
    %2 = arith.truncf %0 : vector<128x128xf32> to vector<128x128xbf16>
    %3 = arith.truncf %1 : vector<128x32xf32> to vector<128x32xbf16>
    %cst = arith.constant dense<0.000000e+00> : vector<128x32xf32>
    %4 = tpu.matmul %2, %3, %cst {dimension_numbers = #tpu.dot_dimension_numbers<[1], [0], [0], [1], [0, 0, 1, 1], [], []>} : vector<128x128xbf16>, vector<128x32xbf16>, vector<128x32xf32> -> vector<128x32xf32>
    %c0_3 = arith.constant 0 : index
    %c0_4 = arith.constant 0 : index
    %5 = vector.load %arg2[%c0_3, %c0_4] : memref<1x32xf32, #tpu.memory_space<vmem>>, vector<1x32xf32>
    %6 = vector.broadcast %5 : vector<1x32xf32> to vector<128x32xf32>
    %7 = arith.addf %4, %6 : vector<128x32xf32>
    %8 = arith.mulf %7, %7 : vector<128x32xf32>
    %9 = arith.mulf %7, %8 : vector<128x32xf32>
    %cst_5 = arith.constant 4.471500e-02 : f32
    %10 = vector.broadcast %cst_5 : f32 to vector<128x32xf32>
    %11 = arith.mulf %10, %9 : vector<128x32xf32>
    %12 = arith.addf %7, %11 : vector<128x32xf32>
    %cst_6 = arith.constant 0.797884583 : f32
    %13 = vector.broadcast %cst_6 : f32 to vector<128x32xf32>
    %14 = arith.mulf %13, %12 : vector<128x32xf32>
    %15 = math.tanh %14 : vector<128x32xf32>
    %cst_7 = arith.constant 1.000000e+00 : f32
    %16 = vector.broadcast %cst_7 : f32 to vector<128x32xf32>
    %17 = arith.addf %16, %15 : vector<128x32xf32>
    %cst_8 = arith.constant 5.000000e-01 : f32
    %18 = vector.broadcast %cst_8 : f32 to vector<128x32xf32>
    %19 = arith.mulf %18, %17 : vector<128x32xf32>
    %20 = arith.mulf %7, %19 : vector<128x32xf32>
    %c0_9 = arith.constant 0 : index
    %c0_10 = arith.constant 0 : index
    %21 = vector.load %arg3[%c0_9, %c0_10] : memref<128x32xf32, #tpu.memory_space<vmem>>, vector<128x32xf32>
    tpu.vector_store %arg3[%c0_9, %c0_10], %20 {strides = array<i32>} : memref<128x32xf32, #tpu.memory_space<vmem>>, vector<128x32xf32>,
    return
  }
}

module attributes {stable_mosaic.version = 11 : i64} {
  func.func @_linear_kernel(%arg0: memref<32x128xf32, #tpu.memory_space<vmem>>, %arg1: memref<128x32xf32, #tpu.memory_space<vmem>>, %arg2: memref<1x32xf32, #tpu.memory_space<vmem>>, %arg3: memref<32x32xf32, #tpu.memory_space<vmem>>) attributes {dimension_semantics = [], scalar_prefetch = 0 : i64, scratch_operands = 0 : i64, tpu.core_type = #tpu.core_type<tc>} {
    %c0 = arith.constant 0 : index
    %c0_0 = arith.constant 0 : index
    %0 = vector.load %arg0[%c0, %c0_0] : memref<32x128xf32, #tpu.memory_space<vmem>>, vector<32x128xf32>
    %c0_1 = arith.constant 0 : index
    %c0_2 = arith.constant 0 : index
    %1 = vector.load %arg1[%c0_1, %c0_2] : memref<128x32xf32, #tpu.memory_space<vmem>>, vector<128x32xf32>
    %2 = arith.truncf %0 : vector<32x128xf32> to vector<32x128xbf16>
    %3 = arith.truncf %1 : vector<128x32xf32> to vector<128x32xbf16>
    %cst = arith.constant dense<0.000000e+00> : vector<32x32xf32>
    %4 = tpu.matmul %2, %3, %cst {dimension_numbers = #tpu.dot_dimension_numbers<[1], [0], [0], [1], [0, 0, 1, 1], [], []>} : vector<32x128xbf16>, vector<128x32xbf16>, vector<32x32xf32> -> vector<32x32xf32>
    %c0_3 = arith.constant 0 : index
    %c0_4 = arith.constant 0 : index
    %5 = vector.load %arg2[%c0_3, %c0_4] : memref<1x32xf32, #tpu.memory_space<vmem>>, vector<1x32xf32>
    %6 = vector.broadcast %5 : vector<1x32xf32> to vector<32x32xf32>
    %7 = arith.addf %4, %6 : vector<32x32xf32>
    %8 = arith.mulf %7, %7 : vector<32x32xf32>
    %9 = arith.mulf %7, %8 : vector<32x32xf32>
    %cst_5 = arith.constant 4.471500e-02 : f32
    %10 = vector.broadcast %cst_5 : f32 to vector<32x32xf32>
    %11 = arith.mulf %10, %9 : vector<32x32xf32>
    %12 = arith.addf %7, %11 : vector<32x32xf32>
    %cst_6 = arith.constant 0.797884583 : f32
    %13 = vector.broadcast %cst_6 : f32 to vector<32x32xf32>
    %14 = arith.mulf %13, %12 : vector<32x32xf32>
    %15 = math.tanh %14 : vector<32x32xf32>
    %cst_7 = arith.constant 1.000000e+00 : f32
    %16 = vector.broadcast %cst_7 : f32 to vector<32x32xf32>
    %17 = arith.addf %16, %15 : vector<32x32xf32>
    %cst_8 = arith.constant 5.000000e-01 : f32
    %18 = vector.broadcast %cst_8 : f32 to vector<32x32xf32>
    %19 = arith.mulf %18, %17 : vector<32x32xf32>
    %20 = arith.mulf %7, %19 : vector<32x32xf32>
    %c0_9 = arith.constant 0 : index
    %c0_10 = arith.constant 0 : index
    %21 = vector.load %arg3[%c0_9, %c0_10] : memref<32x32xf32, #tpu.memory_space<vmem>>, vector<32x32xf32>
    tpu.vector_store %arg3[%c0_9, %c0_10], %20 {strides = array<i32>} : memref<32x32xf32, #tpu.memory_space<vmem>>, vector<32x32xf32>,
    return
  }
}

module attributes {stable_mosaic.version = 11 : i64} {
  func.func @_linear_kernel(%arg0: memref<8x128xf32, #tpu.memory_space<vmem>>, %arg1: memref<128x32xf32, #tpu.memory_space<vmem>>, %arg2: memref<1x32xf32, #tpu.memory_space<vmem>>, %arg3: memref<8x32xf32, #tpu.memory_space<vmem>>) attributes {dimension_semantics = [], scalar_prefetch = 0 : i64, scratch_operands = 0 : i64, tpu.core_type = #tpu.core_type<tc>} {
    %c0 = arith.constant 0 : index
    %c0_0 = arith.constant 0 : index
    %0 = vector.load %arg0[%c0, %c0_0] : memref<8x128xf32, #tpu.memory_space<vmem>>, vector<8x128xf32>
    %c0_1 = arith.constant 0 : index
    %c0_2 = arith.constant 0 : index
    %1 = vector.load %arg1[%c0_1, %c0_2] : memref<128x32xf32, #tpu.memory_space<vmem>>, vector<128x32xf32>
    %2 = arith.truncf %0 : vector<8x128xf32> to vector<8x128xbf16>
    %3 = arith.truncf %1 : vector<128x32xf32> to vector<128x32xbf16>
    %cst = arith.constant dense<0.000000e+00> : vector<8x32xf32>
    %4 = tpu.matmul %2, %3, %cst {dimension_numbers = #tpu.dot_dimension_numbers<[1], [0], [0], [1], [0, 0, 1, 1], [], []>} : vector<8x128xbf16>, vector<128x32xbf16>, vector<8x32xf32> -> vector<8x32xf32>
    %c0_3 = arith.constant 0 : index
    %c0_4 = arith.constant 0 : index
    %5 = vector.load %arg2[%c0_3, %c0_4] : memref<1x32xf32, #tpu.memory_space<vmem>>, vector<1x32xf32>
    %6 = vector.broadcast %5 : vector<1x32xf32> to vector<8x32xf32>
    %7 = arith.addf %4, %6 : vector<8x32xf32>
    %8 = arith.mulf %7, %7 : vector<8x32xf32>
    %9 = arith.mulf %7, %8 : vector<8x32xf32>
    %cst_5 = arith.constant 4.471500e-02 : f32
    %10 = vector.broadcast %cst_5 : f32 to vector<8x32xf32>
    %11 = arith.mulf %10, %9 : vector<8x32xf32>
    %12 = arith.addf %7, %11 : vector<8x32xf32>
    %cst_6 = arith.constant 0.797884583 : f32
    %13 = vector.broadcast %cst_6 : f32 to vector<8x32xf32>
    %14 = arith.mulf %13, %12 : vector<8x32xf32>
    %15 = math.tanh %14 : vector<8x32xf32>
    %cst_7 = arith.constant 1.000000e+00 : f32
    %16 = vector.broadcast %cst_7 : f32 to vector<8x32xf32>
    %17 = arith.addf %16, %15 : vector<8x32xf32>
    %cst_8 = arith.constant 5.000000e-01 : f32
    %18 = vector.broadcast %cst_8 : f32 to vector<8x32xf32>
    %19 = arith.mulf %18, %17 : vector<8x32xf32>
    %20 = arith.mulf %7, %19 : vector<8x32xf32>
    %c0_9 = arith.constant 0 : index
    %c0_10 = arith.constant 0 : index
    %21 = vector.load %arg3[%c0_9, %c0_10] : memref<8x32xf32, #tpu.memory_space<vmem>>, vector<8x32xf32>
    tpu.vector_store %arg3[%c0_9, %c0_10], %20 {strides = array<i32>} : memref<8x32xf32, #tpu.memory_space<vmem>>, vector<8x32xf32>,
    return
  }
}

module attributes {stable_mosaic.version = 11 : i64} {
  func.func @_attn_block_kernel(%arg0: i32, %arg1: memref<1x8x32xf32, #tpu.memory_space<vmem>>, %arg2: memref<8x32xf32, #tpu.memory_space<vmem>>, %arg3: memref<1x4x32xf32, #tpu.memory_space<vmem>>, %arg4: memref<1x4x32xf32, #tpu.memory_space<vmem>>, %arg5: memref<1x8x4xf32, #tpu.memory_space<vmem>>, %arg6: memref<32x32xf32, #tpu.memory_space<vmem>>, %arg7: memref<1x32xf32, #tpu.memory_space<vmem>>, %arg8: memref<32x32xf32, #tpu.memory_space<vmem>>, %arg9: memref<1x32xf32, #tpu.memory_space<vmem>>, %arg10: memref<32x32xf32, #tpu.memory_space<vmem>>, %arg11: memref<1x32xf32, #tpu.memory_space<vmem>>, %arg12: memref<32x32xf32, #tpu.memory_space<vmem>>, %arg13: memref<1x32xf32, #tpu.memory_space<vmem>>, %arg14: memref<1x32xf32, #tpu.memory_space<vmem>>, %arg15: memref<1x32xf32, #tpu.memory_space<vmem>>, %arg16: memref<1x8x32xf32, #tpu.memory_space<vmem>>) attributes {dimension_semantics = [#tpu.dimension_semantics<parallel>], iteration_bounds = array<i64: 2>, scalar_prefetch = 0 : i64, scratch_operands = 0 : i64, tpu.core_type = #tpu.core_type<tc>, window_params = [{transform_indices = @transform_0, window_bounds = array<i64: 1, 8, 32>}, {pipeline_mode = #tpu.pipeline_mode<synchronous>, transform_indices = @transform_1, window_bounds = array<i64: 8, 32>}, {transform_indices = @transform_2, window_bounds = array<i64: 1, 4, 32>}, {transform_indices = @transform_3, window_bounds = array<i64: 1, 4, 32>}, {transform_indices = @transform_4, window_bounds = array<i64: 1, 8, 4>}, {pipeline_mode = #tpu.pipeline_mode<synchronous>, transform_indices = @transform_5, window_bounds = array<i64: 32, 32>}, {pipeline_mode = #tpu.pipeline_mode<synchronous>, transform_indices = @transform_6, window_bounds = array<i64: 1, 32>}, {pipeline_mode = #tpu.pipeline_mode<synchronous>, transform_indices = @transform_7, window_bounds = array<i64: 32, 32>}, {pipeline_mode = #tpu.pipeline_mode<synchronous>, transform_indices = @transform_8, window_bounds = array<i64: 1, 32>}, {pipeline_mode = #tpu.pipeline_mode<synchronous>, transform_indices = @transform_9, window_bounds = array<i64: 32, 32>}, {pipeline_mode = #tpu.pipeline_mode<synchronous>, transform_indices = @transform_10, window_bounds = array<i64: 1, 32>}, {pipeline_mode = #tpu.pipeline_mode<synchronous>, transform_indices = @transform_11, window_bounds = array<i64: 32, 32>}, {pipeline_mode = #tpu.pipeline_mode<synchronous>, transform_indices = @transform_12, window_bounds = array<i64: 1, 32>}, {pipeline_mode = #tpu.pipeline_mode<synchronous>, transform_indices = @transform_13, window_bounds = array<i64: 1, 32>}, {pipeline_mode = #tpu.pipeline_mode<synchronous>, transform_indices = @transform_14, window_bounds = array<i64: 1, 32>}, {transform_indices = @transform_15, window_bounds = array<i64: 1, 8, 32>}]} {
    %c0 = arith.constant 0 : index
    %c0_0 = arith.constant 0 : index
    %c0_1 = arith.constant 0 : index
    %0 = vector.load %arg1[%c0, %c0_0, %c0_1] : memref<1x8x32xf32, #tpu.memory_space<vmem>>, vector<1x8x32xf32>
    %1 = vector.shape_cast %0 : vector<1x8x32xf32> to vector<8x32xf32>
    %c0_2 = arith.constant 0 : index
    %c0_3 = arith.constant 0 : index
    %2 = vector.load %arg2[%c0_2, %c0_3] : memref<8x32xf32, #tpu.memory_space<vmem>>, vector<8x32xf32>
    %3 = arith.addf %1, %2 : vector<8x32xf32>
    %c0_4 = arith.constant 0 : index
    %c0_5 = arith.constant 0 : index
    %c0_6 = arith.constant 0 : index
    %4 = vector.load %arg3[%c0_4, %c0_5, %c0_6] : memref<1x4x32xf32, #tpu.memory_space<vmem>>, vector<1x4x32xf32>
    %5 = vector.shape_cast %4 : vector<1x4x32xf32> to vector<4x32xf32>
    %c0_7 = arith.constant 0 : index
    %c0_8 = arith.constant 0 : index
    %c0_9 = arith.constant 0 : index
    %6 = vector.load %arg4[%c0_7, %c0_8, %c0_9] : memref<1x4x32xf32, #tpu.memory_space<vmem>>, vector<1x4x32xf32>
    %7 = vector.shape_cast %6 : vector<1x4x32xf32> to vector<4x32xf32>
    %c0_10 = arith.constant 0 : index
    %c0_11 = arith.constant 0 : index
    %c0_12 = arith.constant 0 : index
    %8 = vector.load %arg5[%c0_10, %c0_11, %c0_12] : memref<1x8x4xf32, #tpu.memory_space<vmem>>, vector<1x8x4xf32>
    %9 = vector.shape_cast %8 : vector<1x8x4xf32> to vector<8x4xf32>
    %c0_13 = arith.constant 0 : index
    %c0_14 = arith.constant 0 : index
    %10 = vector.load %arg6[%c0_13, %c0_14] : memref<32x32xf32, #tpu.memory_space<vmem>>, vector<32x32xf32>
    %11 = arith.truncf %3 : vector<8x32xf32> to vector<8x32xbf16>
    %12 = arith.truncf %10 : vector<32x32xf32> to vector<32x32xbf16>
    %cst = arith.constant dense<0.000000e+00> : vector<8x32xf32>
    %13 = tpu.matmul %11, %12, %cst {dimension_numbers = #tpu.dot_dimension_numbers<[1], [0], [0], [1], [0, 0, 1, 1], [], []>} : vector<8x32xbf16>, vector<32x32xbf16>, vector<8x32xf32> -> vector<8x32xf32>
    %c0_15 = arith.constant 0 : index
    %c0_16 = arith.constant 0 : index
    %14 = vector.load %arg7[%c0_15, %c0_16] : memref<1x32xf32, #tpu.memory_space<vmem>>, vector<1x32xf32>
    %15 = vector.broadcast %14 : vector<1x32xf32> to vector<8x32xf32>
    %16 = arith.addf %13, %15 : vector<8x32xf32>
    %c0_17 = arith.constant 0 : index
    %c0_18 = arith.constant 0 : index
    %17 = vector.load %arg8[%c0_17, %c0_18] : memref<32x32xf32, #tpu.memory_space<vmem>>, vector<32x32xf32>
    %18 = arith.truncf %5 : vector<4x32xf32> to vector<4x32xbf16>
    %19 = arith.truncf %17 : vector<32x32xf32> to vector<32x32xbf16>
    %cst_19 = arith.constant dense<0.000000e+00> : vector<4x32xf32>
    %20 = tpu.matmul %18, %19, %cst_19 {dimension_numbers = #tpu.dot_dimension_numbers<[1], [0], [0], [1], [0, 0, 1, 1], [], []>} : vector<4x32xbf16>, vector<32x32xbf16>, vector<4x32xf32> -> vector<4x32xf32>
    %c0_20 = arith.constant 0 : index
    %c0_21 = arith.constant 0 : index
    %21 = vector.load %arg9[%c0_20, %c0_21] : memref<1x32xf32, #tpu.memory_space<vmem>>, vector<1x32xf32>
    %22 = vector.broadcast %21 : vector<1x32xf32> to vector<4x32xf32>
    %23 = arith.addf %20, %22 : vector<4x32xf32>
    %c0_22 = arith.constant 0 : index
    %c0_23 = arith.constant 0 : index
    %24 = vector.load %arg10[%c0_22, %c0_23] : memref<32x32xf32, #tpu.memory_space<vmem>>, vector<32x32xf32>
    %25 = arith.truncf %7 : vector<4x32xf32> to vector<4x32xbf16>
    %26 = arith.truncf %24 : vector<32x32xf32> to vector<32x32xbf16>
    %cst_24 = arith.constant dense<0.000000e+00> : vector<4x32xf32>
    %27 = tpu.matmul %25, %26, %cst_24 {dimension_numbers = #tpu.dot_dimension_numbers<[1], [0], [0], [1], [0, 0, 1, 1], [], []>} : vector<4x32xbf16>, vector<32x32xbf16>, vector<4x32xf32> -> vector<4x32xf32>
    %c0_25 = arith.constant 0 : index
    %c0_26 = arith.constant 0 : index
    %28 = vector.load %arg11[%c0_25, %c0_26] : memref<1x32xf32, #tpu.memory_space<vmem>>, vector<1x32xf32>
    %29 = vector.broadcast %28 : vector<1x32xf32> to vector<4x32xf32>
    %30 = arith.addf %27, %29 : vector<4x32xf32>
    %31 = vector.extract_strided_slice %16 {offsets = [0, 0], sizes = [8, 8], strides = [1, 1]} : vector<8x32xf32> to vector<8x8xf32>
    %32 = vector.extract_strided_slice %23 {offsets = [0, 0], sizes = [4, 8], strides = [1, 1]} : vector<4x32xf32> to vector<4x8xf32>
    %33 = vector.extract_strided_slice %30 {offsets = [0, 0], sizes = [4, 8], strides = [1, 1]} : vector<4x32xf32> to vector<4x8xf32>
    %34 = arith.truncf %31 : vector<8x8xf32> to vector<8x8xbf16>
    %35 = arith.truncf %32 : vector<4x8xf32> to vector<4x8xbf16>
    %cst_27 = arith.constant dense<0.000000e+00> : vector<8x4xf32>
    %36 = tpu.matmul %34, %35, %cst_27 {dimension_numbers = #tpu.dot_dimension_numbers<[1], [1], [0], [0], [0, 0, 1, 0], [], []>} : vector<8x8xbf16>, vector<4x8xbf16>, vector<8x4xf32> -> vector<8x4xf32>
    %cst_28 = arith.constant 0.353553385 : f32
    %37 = vector.broadcast %cst_28 : f32 to vector<8x4xf32>
    %38 = arith.mulf %36, %37 : vector<8x4xf32>
    %39 = arith.addf %38, %9 : vector<8x4xf32>
    %cst_29 = arith.constant dense<0xFF800000> : vector<8xf32>
    %40 = vector.multi_reduction <maximumf>, %39, %cst_29 [1] : vector<8x4xf32> to vector<8xf32>
    %41 = vector.shape_cast %40 : vector<8xf32> to vector<8x1xf32>
    %42 = vector.broadcast %41 : vector<8x1xf32> to vector<8x4xf32>
    %43 = arith.subf %39, %42 : vector<8x4xf32>
    %44 = math.exp %43 : vector<8x4xf32>
    %cst_30 = arith.constant dense<0.000000e+00> : vector<8xf32>
    %45 = vector.multi_reduction <add>, %44, %cst_30 [1] : vector<8x4xf32> to vector<8xf32>
    %46 = vector.shape_cast %45 : vector<8xf32> to vector<8x1xf32>
    %47 = tpu.reciprocal %46 {approx = true} : vector<8x1xf32> -> vector<8x1xf32>
    %48 = arith.truncf %44 : vector<8x4xf32> to vector<8x4xbf16>
    %49 = arith.truncf %33 : vector<4x8xf32> to vector<4x8xbf16>
    %cst_31 = arith.constant dense<0.000000e+00> : vector<8x8xf32>
    %50 = tpu.matmul %48, %49, %cst_31 {dimension_numbers = #tpu.dot_dimension_numbers<[1], [0], [0], [1], [0, 0, 1, 1], [], []>} : vector<8x4xbf16>, vector<4x8xbf16>, vector<8x8xf32> -> vector<8x8xf32>
    %51 = vector.broadcast %47 : vector<8x1xf32> to vector<8x8xf32>
    %52 = arith.mulf %50, %51 : vector<8x8xf32>
    %53 = vector.extract_strided_slice %16 {offsets = [0, 8], sizes = [8, 8], strides = [1, 1]} : vector<8x32xf32> to vector<8x8xf32>
    %54 = vector.extract_strided_slice %23 {offsets = [0, 8], sizes = [4, 8], strides = [1, 1]} : vector<4x32xf32> to vector<4x8xf32>
    %55 = vector.extract_strided_slice %30 {offsets = [0, 8], sizes = [4, 8], strides = [1, 1]} : vector<4x32xf32> to vector<4x8xf32>
    %56 = arith.truncf %53 : vector<8x8xf32> to vector<8x8xbf16>
    %57 = arith.truncf %54 : vector<4x8xf32> to vector<4x8xbf16>
    %cst_32 = arith.constant dense<0.000000e+00> : vector<8x4xf32>
    %58 = tpu.matmul %56, %57, %cst_32 {dimension_numbers = #tpu.dot_dimension_numbers<[1], [1], [0], [0], [0, 0, 1, 0], [], []>} : vector<8x8xbf16>, vector<4x8xbf16>, vector<8x4xf32> -> vector<8x4xf32>
    %cst_33 = arith.constant 0.353553385 : f32
    %59 = vector.broadcast %cst_33 : f32 to vector<8x4xf32>
    %60 = arith.mulf %58, %59 : vector<8x4xf32>
    %61 = arith.addf %60, %9 : vector<8x4xf32>
    %cst_34 = arith.constant dense<0xFF800000> : vector<8xf32>
    %62 = vector.multi_reduction <maximumf>, %61, %cst_34 [1] : vector<8x4xf32> to vector<8xf32>
    %63 = vector.shape_cast %62 : vector<8xf32> to vector<8x1xf32>
    %64 = vector.broadcast %63 : vector<8x1xf32> to vector<8x4xf32>
    %65 = arith.subf %61, %64 : vector<8x4xf32>
    %66 = math.exp %65 : vector<8x4xf32>
    %cst_35 = arith.constant dense<0.000000e+00> : vector<8xf32>
    %67 = vector.multi_reduction <add>, %66, %cst_35 [1] : vector<8x4xf32> to vector<8xf32>
    %68 = vector.shape_cast %67 : vector<8xf32> to vector<8x1xf32>
    %69 = tpu.reciprocal %68 {approx = true} : vector<8x1xf32> -> vector<8x1xf32>
    %70 = arith.truncf %66 : vector<8x4xf32> to vector<8x4xbf16>
    %71 = arith.truncf %55 : vector<4x8xf32> to vector<4x8xbf16>
    %cst_36 = arith.constant dense<0.000000e+00> : vector<8x8xf32>
    %72 = tpu.matmul %70, %71, %cst_36 {dimension_numbers = #tpu.dot_dimension_numbers<[1], [0], [0], [1], [0, 0, 1, 1], [], []>} : vector<8x4xbf16>, vector<4x8xbf16>, vector<8x8xf32> -> vector<8x8xf32>
    %73 = vector.broadcast %69 : vector<8x1xf32> to vector<8x8xf32>
    %74 = arith.mulf %72, %73 : vector<8x8xf32>
    %75 = vector.extract_strided_slice %16 {offsets = [0, 16], sizes = [8, 8], strides = [1, 1]} : vector<8x32xf32> to vector<8x8xf32>
    %76 = vector.extract_strided_slice %23 {offsets = [0, 16], sizes = [4, 8], strides = [1, 1]} : vector<4x32xf32> to vector<4x8xf32>
    %77 = vector.extract_strided_slice %30 {offsets = [0, 16], sizes = [4, 8], strides = [1, 1]} : vector<4x32xf32> to vector<4x8xf32>
    %78 = arith.truncf %75 : vector<8x8xf32> to vector<8x8xbf16>
    %79 = arith.truncf %76 : vector<4x8xf32> to vector<4x8xbf16>
    %cst_37 = arith.constant dense<0.000000e+00> : vector<8x4xf32>
    %80 = tpu.matmul %78, %79, %cst_37 {dimension_numbers = #tpu.dot_dimension_numbers<[1], [1], [0], [0], [0, 0, 1, 0], [], []>} : vector<8x8xbf16>, vector<4x8xbf16>, vector<8x4xf32> -> vector<8x4xf32>
    %cst_38 = arith.constant 0.353553385 : f32
    %81 = vector.broadcast %cst_38 : f32 to vector<8x4xf32>
    %82 = arith.mulf %80, %81 : vector<8x4xf32>
    %83 = arith.addf %82, %9 : vector<8x4xf32>
    %cst_39 = arith.constant dense<0xFF800000> : vector<8xf32>
    %84 = vector.multi_reduction <maximumf>, %83, %cst_39 [1] : vector<8x4xf32> to vector<8xf32>
    %85 = vector.shape_cast %84 : vector<8xf32> to vector<8x1xf32>
    %86 = vector.broadcast %85 : vector<8x1xf32> to vector<8x4xf32>
    %87 = arith.subf %83, %86 : vector<8x4xf32>
    %88 = math.exp %87 : vector<8x4xf32>
    %cst_40 = arith.constant dense<0.000000e+00> : vector<8xf32>
    %89 = vector.multi_reduction <add>, %88, %cst_40 [1] : vector<8x4xf32> to vector<8xf32>
    %90 = vector.shape_cast %89 : vector<8xf32> to vector<8x1xf32>
    %91 = tpu.reciprocal %90 {approx = true} : vector<8x1xf32> -> vector<8x1xf32>
    %92 = arith.truncf %88 : vector<8x4xf32> to vector<8x4xbf16>
    %93 = arith.truncf %77 : vector<4x8xf32> to vector<4x8xbf16>
    %cst_41 = arith.constant dense<0.000000e+00> : vector<8x8xf32>
    %94 = tpu.matmul %92, %93, %cst_41 {dimension_numbers = #tpu.dot_dimension_numbers<[1], [0], [0], [1], [0, 0, 1, 1], [], []>} : vector<8x4xbf16>, vector<4x8xbf16>, vector<8x8xf32> -> vector<8x8xf32>
    %95 = vector.broadcast %91 : vector<8x1xf32> to vector<8x8xf32>
    %96 = arith.mulf %94, %95 : vector<8x8xf32>
    %97 = vector.extract_strided_slice %16 {offsets = [0, 24], sizes = [8, 8], strides = [1, 1]} : vector<8x32xf32> to vector<8x8xf32>
    %98 = vector.extract_strided_slice %23 {offsets = [0, 24], sizes = [4, 8], strides = [1, 1]} : vector<4x32xf32> to vector<4x8xf32>
    %99 = vector.extract_strided_slice %30 {offsets = [0, 24], sizes = [4, 8], strides = [1, 1]} : vector<4x32xf32> to vector<4x8xf32>
    %100 = arith.truncf %97 : vector<8x8xf32> to vector<8x8xbf16>
    %101 = arith.truncf %98 : vector<4x8xf32> to vector<4x8xbf16>
    %cst_42 = arith.constant dense<0.000000e+00> : vector<8x4xf32>
    %102 = tpu.matmul %100, %101, %cst_42 {dimension_numbers = #tpu.dot_dimension_numbers<[1], [1], [0], [0], [0, 0, 1, 0], [], []>} : vector<8x8xbf16>, vector<4x8xbf16>, vector<8x4xf32> -> vector<8x4xf32>
    %cst_43 = arith.constant 0.353553385 : f32
    %103 = vector.broadcast %cst_43 : f32 to vector<8x4xf32>
    %104 = arith.mulf %102, %103 : vector<8x4xf32>
    %105 = arith.addf %104, %9 : vector<8x4xf32>
    %cst_44 = arith.constant dense<0xFF800000> : vector<8xf32>
    %106 = vector.multi_reduction <maximumf>, %105, %cst_44 [1] : vector<8x4xf32> to vector<8xf32>
    %107 = vector.shape_cast %106 : vector<8xf32> to vector<8x1xf32>
    %108 = vector.broadcast %107 : vector<8x1xf32> to vector<8x4xf32>
    %109 = arith.subf %105, %108 : vector<8x4xf32>
    %110 = math.exp %109 : vector<8x4xf32>
    %cst_45 = arith.constant dense<0.000000e+00> : vector<8xf32>
    %111 = vector.multi_reduction <add>, %110, %cst_45 [1] : vector<8x4xf32> to vector<8xf32>
    %112 = vector.shape_cast %111 : vector<8xf32> to vector<8x1xf32>
    %113 = tpu.reciprocal %112 {approx = true} : vector<8x1xf32> -> vector<8x1xf32>
    %114 = arith.truncf %110 : vector<8x4xf32> to vector<8x4xbf16>
    %115 = arith.truncf %99 : vector<4x8xf32> to vector<4x8xbf16>
    %cst_46 = arith.constant dense<0.000000e+00> : vector<8x8xf32>
    %116 = tpu.matmul %114, %115, %cst_46 {dimension_numbers = #tpu.dot_dimension_numbers<[1], [0], [0], [1], [0, 0, 1, 1], [], []>} : vector<8x4xbf16>, vector<4x8xbf16>, vector<8x8xf32> -> vector<8x8xf32>
    %117 = vector.broadcast %113 : vector<8x1xf32> to vector<8x8xf32>
    %118 = arith.mulf %116, %117 : vector<8x8xf32>
    %119 = tpu.concatenate %52, %74, %96, %118 in 1 : vector<8x8xf32>, vector<8x8xf32>, vector<8x8xf32>, vector<8x8xf32> -> vector<8x32xf32>
    %c0_47 = arith.constant 0 : index
    %c0_48 = arith.constant 0 : index
    %120 = vector.load %arg12[%c0_47, %c0_48] : memref<32x32xf32, #tpu.memory_space<vmem>>, vector<32x32xf32>
    %121 = arith.truncf %119 : vector<8x32xf32> to vector<8x32xbf16>
    %122 = arith.truncf %120 : vector<32x32xf32> to vector<32x32xbf16>
    %cst_49 = arith.constant dense<0.000000e+00> : vector<8x32xf32>
    %123 = tpu.matmul %121, %122, %cst_49 {dimension_numbers = #tpu.dot_dimension_numbers<[1], [0], [0], [1], [0, 0, 1, 1], [], []>} : vector<8x32xbf16>, vector<32x32xbf16>, vector<8x32xf32> -> vector<8x32xf32>
    %c0_50 = arith.constant 0 : index
    %c0_51 = arith.constant 0 : index
    %124 = vector.load %arg13[%c0_50, %c0_51] : memref<1x32xf32, #tpu.memory_space<vmem>>, vector<1x32xf32>
    %125 = vector.broadcast %124 : vector<1x32xf32> to vector<8x32xf32>
    %126 = arith.addf %123, %125 : vector<8x32xf32>
    %127 = arith.addf %1, %126 : vector<8x32xf32>
    %c0_52 = arith.constant 0 : index
    %c0_53 = arith.constant 0 : index
    %128 = vector.load %arg14[%c0_52, %c0_53] : memref<1x32xf32, #tpu.memory_space<vmem>>, vector<1x32xf32>
    %c0_54 = arith.constant 0 : index
    %c0_55 = arith.constant 0 : index
    %129 = vector.load %arg15[%c0_54, %c0_55] : memref<1x32xf32, #tpu.memory_space<vmem>>, vector<1x32xf32>
    %cst_56 = arith.constant dense<0.000000e+00> : vector<8xf32>
    %130 = vector.multi_reduction <add>, %127, %cst_56 [1] : vector<8x32xf32> to vector<8xf32>
    %131 = vector.shape_cast %130 : vector<8xf32> to vector<8x1xf32>
    %cst_57 = arith.constant 3.200000e+01 : f32
    %132 = vector.broadcast %cst_57 : f32 to vector<8x1xf32>
    %133 = arith.divf %131, %132 : vector<8x1xf32>
    %134 = vector.broadcast %133 : vector<8x1xf32> to vector<8x32xf32>
    %135 = arith.subf %127, %134 : vector<8x32xf32>
    %136 = arith.mulf %135, %135 : vector<8x32xf32>
    %cst_58 = arith.constant dense<0.000000e+00> : vector<8xf32>
    %137 = vector.multi_reduction <add>, %136, %cst_58 [1] : vector<8x32xf32> to vector<8xf32>
    %138 = vector.shape_cast %137 : vector<8xf32> to vector<8x1xf32>
    %cst_59 = arith.constant 3.200000e+01 : f32
    %139 = vector.broadcast %cst_59 : f32 to vector<8x1xf32>
    %140 = arith.divf %138, %139 : vector<8x1xf32>
    %141 = vector.broadcast %133 : vector<8x1xf32> to vector<8x32xf32>
    %142 = arith.subf %127, %141 : vector<8x32xf32>
    %cst_60 = arith.constant 9.99999974E-6 : f32
    %143 = vector.broadcast %cst_60 : f32 to vector<8x1xf32>
    %144 = arith.addf %140, %143 : vector<8x1xf32>
    %145 = math.rsqrt %144 : vector<8x1xf32>
    %146 = vector.broadcast %145 : vector<8x1xf32> to vector<8x32xf32>
    %147 = arith.mulf %142, %146 : vector<8x32xf32>
    %148 = vector.broadcast %128 : vector<1x32xf32> to vector<8x32xf32>
    %149 = arith.mulf %147, %148 : vector<8x32xf32>
    %150 = vector.broadcast %129 : vector<1x32xf32> to vector<8x32xf32>
    %151 = arith.addf %149, %150 : vector<8x32xf32>
    %c0_61 = arith.constant 0 : index
    %c0_62 = arith.constant 0 : index
    %c0_63 = arith.constant 0 : index
    %152 = vector.load %arg16[%c0_61, %c0_62, %c0_63] : memref<1x8x32xf32, #tpu.memory_space<vmem>>, vector<1x8x32xf32>
    %153 = vector.shape_cast %152 : vector<1x8x32xf32> to vector<8x32xf32>
    %154 = vector.shape_cast %151 : vector<8x32xf32> to vector<1x8x32xf32>
    tpu.vector_store %arg16[%c0_61, %c0_62, %c0_63], %154 {strides = array<i32>} : memref<1x8x32xf32, #tpu.memory_space<vmem>>, vector<1x8x32xf32>,
    return
  }
  func.func @transform_0(%arg0: i32) -> (i32, i32, i32) {
    %c0_i32 = arith.constant 0 : i32
    %c0_i32_0 = arith.constant 0 : i32
    %c0_i32_1 = arith.constant 0 : i32
    return %arg0, %c0_i32, %c0_i32_0 : i32, i32, i32
  }
  func.func @transform_1(%arg0: i32) -> (i32, i32) {
    %c0_i32 = arith.constant 0 : i32
    %c0_i32_0 = arith.constant 0 : i32
    %c0_i32_1 = arith.constant 0 : i32
    return %c0_i32, %c0_i32_0 : i32, i32
  }
  func.func @transform_2(%arg0: i32) -> (i32, i32, i32) {
    %c0_i32 = arith.constant 0 : i32
    %c0_i32_0 = arith.constant 0 : i32
    %c0_i32_1 = arith.constant 0 : i32
    return %arg0, %c0_i32, %c0_i32_0 : i32, i32, i32
  }
  func.func @transform_3(%arg0: i32) -> (i32, i32, i32) {
    %c0_i32 = arith.constant 0 : i32
    %c0_i32_0 = arith.constant 0 : i32
    %c0_i32_1 = arith.constant 0 : i32
    return %arg0, %c0_i32, %c0_i32_0 : i32, i32, i32
  }
  func.func @transform_4(%arg0: i32) -> (i32, i32, i32) {
    %c0_i32 = arith.constant 0 : i32
    %c0_i32_0 = arith.constant 0 : i32
    %c0_i32_1 = arith.constant 0 : i32
    return %arg0, %c0_i32, %c0_i32_0 : i32, i32, i32
  }
  func.func @transform_5(%arg0: i32) -> (i32, i32) {
    %c0_i32 = arith.constant 0 : i32
    %c0_i32_0 = arith.constant 0 : i32
    %c0_i32_1 = arith.constant 0 : i32
    return %c0_i32, %c0_i32_0 : i32, i32
  }
  func.func @transform_6(%arg0: i32) -> (i32, i32) {
    %c0_i32 = arith.constant 0 : i32
    %c0_i32_0 = arith.constant 0 : i32
    %c0_i32_1 = arith.constant 0 : i32
    return %c0_i32, %c0_i32_0 : i32, i32
  }
  func.func @transform_7(%arg0: i32) -> (i32, i32) {
    %c0_i32 = arith.constant 0 : i32
    %c0_i32_0 = arith.constant 0 : i32
    %c0_i32_1 = arith.constant 0 : i32
    return %c0_i32, %c0_i32_0 : i32, i32
  }
  func.func @transform_8(%arg0: i32) -> (i32, i32) {
    %c0_i32 = arith.constant 0 : i32
    %c0_i32_0 = arith.constant 0 : i32
    %c0_i32_1 = arith.constant 0 : i32
    return %c0_i32, %c0_i32_0 : i32, i32
  }
  func.func @transform_9(%arg0: i32) -> (i32, i32) {
    %c0_i32 = arith.constant 0 : i32
    %c0_i32_0 = arith.constant 0 : i32
    %c0_i32_1 = arith.constant 0 : i32
    return %c0_i32, %c0_i32_0 : i32, i32
  }
  func.func @transform_10(%arg0: i32) -> (i32, i32) {
    %c0_i32 = arith.constant 0 : i32
    %c0_i32_0 = arith.constant 0 : i32
    %c0_i32_1 = arith.constant 0 : i32
    return %c0_i32, %c0_i32_0 : i32, i32
  }
  func.func @transform_11(%arg0: i32) -> (i32, i32) {
    %c0_i32 = arith.constant 0 : i32
    %c0_i32_0 = arith.constant 0 : i32
    %c0_i32_1 = arith.constant 0 : i32
    return %c0_i32, %c0_i32_0 : i32, i32
  }
  func.func @transform_12(%arg0: i32) -> (i32, i32) {
    %c0_i32 = arith.constant 0 : i32
    %c0_i32_0 = arith.constant 0 : i32
    %c0_i32_1 = arith.constant 0 : i32
    return %c0_i32, %c0_i32_0 : i32, i32
  }
  func.func @transform_13(%arg0: i32) -> (i32, i32) {
    %c0_i32 = arith.constant 0 : i32
    %c0_i32_0 = arith.constant 0 : i32
    %c0_i32_1 = arith.constant 0 : i32
    return %c0_i32, %c0_i32_0 : i32, i32
  }
  func.func @transform_14(%arg0: i32) -> (i32, i32) {
    %c0_i32 = arith.constant 0 : i32
    %c0_i32_0 = arith.constant 0 : i32
    %c0_i32_1 = arith.constant 0 : i32
    return %c0_i32, %c0_i32_0 : i32, i32
  }
  func.func @transform_15(%arg0: i32) -> (i32, i32, i32) {
    %c0_i32 = arith.constant 0 : i32
    %c0_i32_0 = arith.constant 0 : i32
    %c0_i32_1 = arith.constant 0 : i32
    return %arg0, %c0_i32, %c0_i32_0 : i32, i32, i32
  }
}

module attributes {stable_mosaic.version = 11 : i64} {
  func.func @_ffn_kernel(%arg0: memref<16x32xf32, #tpu.memory_space<vmem>>, %arg1: memref<32x128xf32, #tpu.memory_space<vmem>>, %arg2: memref<1x128xf32, #tpu.memory_space<vmem>>, %arg3: memref<128x32xf32, #tpu.memory_space<vmem>>, %arg4: memref<1x32xf32, #tpu.memory_space<vmem>>, %arg5: memref<1x32xf32, #tpu.memory_space<vmem>>, %arg6: memref<1x32xf32, #tpu.memory_space<vmem>>, %arg7: memref<16x32xf32, #tpu.memory_space<vmem>>) attributes {dimension_semantics = [], scalar_prefetch = 0 : i64, scratch_operands = 0 : i64, tpu.core_type = #tpu.core_type<tc>} {
    %c0 = arith.constant 0 : index
    %c0_0 = arith.constant 0 : index
    %0 = vector.load %arg0[%c0, %c0_0] : memref<16x32xf32, #tpu.memory_space<vmem>>, vector<16x32xf32>
    %c0_1 = arith.constant 0 : index
    %c0_2 = arith.constant 0 : index
    %1 = vector.load %arg1[%c0_1, %c0_2] : memref<32x128xf32, #tpu.memory_space<vmem>>, vector<32x128xf32>
    %2 = arith.truncf %0 : vector<16x32xf32> to vector<16x32xbf16>
    %3 = arith.truncf %1 : vector<32x128xf32> to vector<32x128xbf16>
    %cst = arith.constant dense<0.000000e+00> : vector<16x128xf32>
    %4 = tpu.matmul %2, %3, %cst {dimension_numbers = #tpu.dot_dimension_numbers<[1], [0], [0], [1], [0, 0, 1, 1], [], []>} : vector<16x32xbf16>, vector<32x128xbf16>, vector<16x128xf32> -> vector<16x128xf32>
    %c0_3 = arith.constant 0 : index
    %c0_4 = arith.constant 0 : index
    %5 = vector.load %arg2[%c0_3, %c0_4] : memref<1x128xf32, #tpu.memory_space<vmem>>, vector<1x128xf32>
    %6 = vector.broadcast %5 : vector<1x128xf32> to vector<16x128xf32>
    %7 = arith.addf %4, %6 : vector<16x128xf32>
    %8 = arith.mulf %7, %7 : vector<16x128xf32>
    %9 = arith.mulf %7, %8 : vector<16x128xf32>
    %cst_5 = arith.constant 4.471500e-02 : f32
    %10 = vector.broadcast %cst_5 : f32 to vector<16x128xf32>
    %11 = arith.mulf %10, %9 : vector<16x128xf32>
    %12 = arith.addf %7, %11 : vector<16x128xf32>
    %cst_6 = arith.constant 0.797884583 : f32
    %13 = vector.broadcast %cst_6 : f32 to vector<16x128xf32>
    %14 = arith.mulf %13, %12 : vector<16x128xf32>
    %15 = math.tanh %14 : vector<16x128xf32>
    %cst_7 = arith.constant 1.000000e+00 : f32
    %16 = vector.broadcast %cst_7 : f32 to vector<16x128xf32>
    %17 = arith.addf %16, %15 : vector<16x128xf32>
    %cst_8 = arith.constant 5.000000e-01 : f32
    %18 = vector.broadcast %cst_8 : f32 to vector<16x128xf32>
    %19 = arith.mulf %18, %17 : vector<16x128xf32>
    %20 = arith.mulf %7, %19 : vector<16x128xf32>
    %c0_9 = arith.constant 0 : index
    %c0_10 = arith.constant 0 : index
    %21 = vector.load %arg3[%c0_9, %c0_10] : memref<128x32xf32, #tpu.memory_space<vmem>>, vector<128x32xf32>
    %22 = arith.truncf %20 : vector<16x128xf32> to vector<16x128xbf16>
    %23 = arith.truncf %21 : vector<128x32xf32> to vector<128x32xbf16>
    %cst_11 = arith.constant dense<0.000000e+00> : vector<16x32xf32>
    %24 = tpu.matmul %22, %23, %cst_11 {dimension_numbers = #tpu.dot_dimension_numbers<[1], [0], [0], [1], [0, 0, 1, 1], [], []>} : vector<16x128xbf16>, vector<128x32xbf16>, vector<16x32xf32> -> vector<16x32xf32>
    %c0_12 = arith.constant 0 : index
    %c0_13 = arith.constant 0 : index
    %25 = vector.load %arg4[%c0_12, %c0_13] : memref<1x32xf32, #tpu.memory_space<vmem>>, vector<1x32xf32>
    %26 = vector.broadcast %25 : vector<1x32xf32> to vector<16x32xf32>
    %27 = arith.addf %24, %26 : vector<16x32xf32>
    %28 = arith.addf %0, %27 : vector<16x32xf32>
    %c0_14 = arith.constant 0 : index
    %c0_15 = arith.constant 0 : index
    %29 = vector.load %arg5[%c0_14, %c0_15] : memref<1x32xf32, #tpu.memory_space<vmem>>, vector<1x32xf32>
    %c0_16 = arith.constant 0 : index
    %c0_17 = arith.constant 0 : index
    %30 = vector.load %arg6[%c0_16, %c0_17] : memref<1x32xf32, #tpu.memory_space<vmem>>, vector<1x32xf32>
    %cst_18 = arith.constant dense<0.000000e+00> : vector<16xf32>
    %31 = vector.multi_reduction <add>, %28, %cst_18 [1] : vector<16x32xf32> to vector<16xf32>
    %32 = vector.shape_cast %31 : vector<16xf32> to vector<16x1xf32>
    %cst_19 = arith.constant 3.200000e+01 : f32
    %33 = vector.broadcast %cst_19 : f32 to vector<16x1xf32>
    %34 = arith.divf %32, %33 : vector<16x1xf32>
    %35 = vector.broadcast %34 : vector<16x1xf32> to vector<16x32xf32>
    %36 = arith.subf %28, %35 : vector<16x32xf32>
    %37 = arith.mulf %36, %36 : vector<16x32xf32>
    %cst_20 = arith.constant dense<0.000000e+00> : vector<16xf32>
    %38 = vector.multi_reduction <add>, %37, %cst_20 [1] : vector<16x32xf32> to vector<16xf32>
    %39 = vector.shape_cast %38 : vector<16xf32> to vector<16x1xf32>
    %cst_21 = arith.constant 3.200000e+01 : f32
    %40 = vector.broadcast %cst_21 : f32 to vector<16x1xf32>
    %41 = arith.divf %39, %40 : vector<16x1xf32>
    %42 = vector.broadcast %34 : vector<16x1xf32> to vector<16x32xf32>
    %43 = arith.subf %28, %42 : vector<16x32xf32>
    %cst_22 = arith.constant 9.99999974E-6 : f32
    %44 = vector.broadcast %cst_22 : f32 to vector<16x1xf32>
    %45 = arith.addf %41, %44 : vector<16x1xf32>
    %46 = math.rsqrt %45 : vector<16x1xf32>
    %47 = vector.broadcast %46 : vector<16x1xf32> to vector<16x32xf32>
    %48 = arith.mulf %43, %47 : vector<16x32xf32>
    %49 = vector.broadcast %29 : vector<1x32xf32> to vector<16x32xf32>
    %50 = arith.mulf %48, %49 : vector<16x32xf32>
    %51 = vector.broadcast %30 : vector<1x32xf32> to vector<16x32xf32>
    %52 = arith.addf %50, %51 : vector<16x32xf32>
    %c0_23 = arith.constant 0 : index
    %c0_24 = arith.constant 0 : index
    %53 = vector.load %arg7[%c0_23, %c0_24] : memref<16x32xf32, #tpu.memory_space<vmem>>, vector<16x32xf32>
    tpu.vector_store %arg7[%c0_23, %c0_24], %52 {strides = array<i32>} : memref<16x32xf32, #tpu.memory_space<vmem>>, vector<16x32xf32>,
    return
  }
}

module attributes {stable_mosaic.version = 11 : i64} {
  func.func @_attn_block_kernel(%arg0: i32, %arg1: memref<1x8x32xf32, #tpu.memory_space<vmem>>, %arg2: memref<8x32xf32, #tpu.memory_space<vmem>>, %arg3: memref<1x8x32xf32, #tpu.memory_space<vmem>>, %arg4: memref<1x8x32xf32, #tpu.memory_space<vmem>>, %arg5: memref<1x8x8xf32, #tpu.memory_space<vmem>>, %arg6: memref<32x32xf32, #tpu.memory_space<vmem>>, %arg7: memref<1x32xf32, #tpu.memory_space<vmem>>, %arg8: memref<32x32xf32, #tpu.memory_space<vmem>>, %arg9: memref<1x32xf32, #tpu.memory_space<vmem>>, %arg10: memref<32x32xf32, #tpu.memory_space<vmem>>, %arg11: memref<1x32xf32, #tpu.memory_space<vmem>>, %arg12: memref<32x32xf32, #tpu.memory_space<vmem>>, %arg13: memref<1x32xf32, #tpu.memory_space<vmem>>, %arg14: memref<1x32xf32, #tpu.memory_space<vmem>>, %arg15: memref<1x32xf32, #tpu.memory_space<vmem>>, %arg16: memref<1x8x32xf32, #tpu.memory_space<vmem>>) attributes {dimension_semantics = [#tpu.dimension_semantics<parallel>], iteration_bounds = array<i64: 2>, scalar_prefetch = 0 : i64, scratch_operands = 0 : i64, tpu.core_type = #tpu.core_type<tc>, window_params = [{transform_indices = @transform_0, window_bounds = array<i64: 1, 8, 32>}, {pipeline_mode = #tpu.pipeline_mode<synchronous>, transform_indices = @transform_1, window_bounds = array<i64: 8, 32>}, {transform_indices = @transform_2, window_bounds = array<i64: 1, 8, 32>}, {transform_indices = @transform_3, window_bounds = array<i64: 1, 8, 32>}, {transform_indices = @transform_4, window_bounds = array<i64: 1, 8, 8>}, {pipeline_mode = #tpu.pipeline_mode<synchronous>, transform_indices = @transform_5, window_bounds = array<i64: 32, 32>}, {pipeline_mode = #tpu.pipeline_mode<synchronous>, transform_indices = @transform_6, window_bounds = array<i64: 1, 32>}, {pipeline_mode = #tpu.pipeline_mode<synchronous>, transform_indices = @transform_7, window_bounds = array<i64: 32, 32>}, {pipeline_mode = #tpu.pipeline_mode<synchronous>, transform_indices = @transform_8, window_bounds = array<i64: 1, 32>}, {pipeline_mode = #tpu.pipeline_mode<synchronous>, transform_indices = @transform_9, window_bounds = array<i64: 32, 32>}, {pipeline_mode = #tpu.pipeline_mode<synchronous>, transform_indices = @transform_10, window_bounds = array<i64: 1, 32>}, {pipeline_mode = #tpu.pipeline_mode<synchronous>, transform_indices = @transform_11, window_bounds = array<i64: 32, 32>}, {pipeline_mode = #tpu.pipeline_mode<synchronous>, transform_indices = @transform_12, window_bounds = array<i64: 1, 32>}, {pipeline_mode = #tpu.pipeline_mode<synchronous>, transform_indices = @transform_13, window_bounds = array<i64: 1, 32>}, {pipeline_mode = #tpu.pipeline_mode<synchronous>, transform_indices = @transform_14, window_bounds = array<i64: 1, 32>}, {transform_indices = @transform_15, window_bounds = array<i64: 1, 8, 32>}]} {
    %c0 = arith.constant 0 : index
    %c0_0 = arith.constant 0 : index
    %c0_1 = arith.constant 0 : index
    %0 = vector.load %arg1[%c0, %c0_0, %c0_1] : memref<1x8x32xf32, #tpu.memory_space<vmem>>, vector<1x8x32xf32>
    %1 = vector.shape_cast %0 : vector<1x8x32xf32> to vector<8x32xf32>
    %c0_2 = arith.constant 0 : index
    %c0_3 = arith.constant 0 : index
    %2 = vector.load %arg2[%c0_2, %c0_3] : memref<8x32xf32, #tpu.memory_space<vmem>>, vector<8x32xf32>
    %3 = arith.addf %1, %2 : vector<8x32xf32>
    %c0_4 = arith.constant 0 : index
    %c0_5 = arith.constant 0 : index
    %c0_6 = arith.constant 0 : index
    %4 = vector.load %arg3[%c0_4, %c0_5, %c0_6] : memref<1x8x32xf32, #tpu.memory_space<vmem>>, vector<1x8x32xf32>
    %5 = vector.shape_cast %4 : vector<1x8x32xf32> to vector<8x32xf32>
    %c0_7 = arith.constant 0 : index
    %c0_8 = arith.constant 0 : index
    %c0_9 = arith.constant 0 : index
    %6 = vector.load %arg4[%c0_7, %c0_8, %c0_9] : memref<1x8x32xf32, #tpu.memory_space<vmem>>, vector<1x8x32xf32>
    %7 = vector.shape_cast %6 : vector<1x8x32xf32> to vector<8x32xf32>
    %c0_10 = arith.constant 0 : index
    %c0_11 = arith.constant 0 : index
    %c0_12 = arith.constant 0 : index
    %8 = vector.load %arg5[%c0_10, %c0_11, %c0_12] : memref<1x8x8xf32, #tpu.memory_space<vmem>>, vector<1x8x8xf32>
    %9 = vector.shape_cast %8 : vector<1x8x8xf32> to vector<8x8xf32>
    %c0_13 = arith.constant 0 : index
    %c0_14 = arith.constant 0 : index
    %10 = vector.load %arg6[%c0_13, %c0_14] : memref<32x32xf32, #tpu.memory_space<vmem>>, vector<32x32xf32>
    %11 = arith.truncf %3 : vector<8x32xf32> to vector<8x32xbf16>
    %12 = arith.truncf %10 : vector<32x32xf32> to vector<32x32xbf16>
    %cst = arith.constant dense<0.000000e+00> : vector<8x32xf32>
    %13 = tpu.matmul %11, %12, %cst {dimension_numbers = #tpu.dot_dimension_numbers<[1], [0], [0], [1], [0, 0, 1, 1], [], []>} : vector<8x32xbf16>, vector<32x32xbf16>, vector<8x32xf32> -> vector<8x32xf32>
    %c0_15 = arith.constant 0 : index
    %c0_16 = arith.constant 0 : index
    %14 = vector.load %arg7[%c0_15, %c0_16] : memref<1x32xf32, #tpu.memory_space<vmem>>, vector<1x32xf32>
    %15 = vector.broadcast %14 : vector<1x32xf32> to vector<8x32xf32>
    %16 = arith.addf %13, %15 : vector<8x32xf32>
    %c0_17 = arith.constant 0 : index
    %c0_18 = arith.constant 0 : index
    %17 = vector.load %arg8[%c0_17, %c0_18] : memref<32x32xf32, #tpu.memory_space<vmem>>, vector<32x32xf32>
    %18 = arith.truncf %5 : vector<8x32xf32> to vector<8x32xbf16>
    %19 = arith.truncf %17 : vector<32x32xf32> to vector<32x32xbf16>
    %cst_19 = arith.constant dense<0.000000e+00> : vector<8x32xf32>
    %20 = tpu.matmul %18, %19, %cst_19 {dimension_numbers = #tpu.dot_dimension_numbers<[1], [0], [0], [1], [0, 0, 1, 1], [], []>} : vector<8x32xbf16>, vector<32x32xbf16>, vector<8x32xf32> -> vector<8x32xf32>
    %c0_20 = arith.constant 0 : index
    %c0_21 = arith.constant 0 : index
    %21 = vector.load %arg9[%c0_20, %c0_21] : memref<1x32xf32, #tpu.memory_space<vmem>>, vector<1x32xf32>
    %22 = vector.broadcast %21 : vector<1x32xf32> to vector<8x32xf32>
    %23 = arith.addf %20, %22 : vector<8x32xf32>
    %c0_22 = arith.constant 0 : index
    %c0_23 = arith.constant 0 : index
    %24 = vector.load %arg10[%c0_22, %c0_23] : memref<32x32xf32, #tpu.memory_space<vmem>>, vector<32x32xf32>
    %25 = arith.truncf %7 : vector<8x32xf32> to vector<8x32xbf16>
    %26 = arith.truncf %24 : vector<32x32xf32> to vector<32x32xbf16>
    %cst_24 = arith.constant dense<0.000000e+00> : vector<8x32xf32>
    %27 = tpu.matmul %25, %26, %cst_24 {dimension_numbers = #tpu.dot_dimension_numbers<[1], [0], [0], [1], [0, 0, 1, 1], [], []>} : vector<8x32xbf16>, vector<32x32xbf16>, vector<8x32xf32> -> vector<8x32xf32>
    %c0_25 = arith.constant 0 : index
    %c0_26 = arith.constant 0 : index
    %28 = vector.load %arg11[%c0_25, %c0_26] : memref<1x32xf32, #tpu.memory_space<vmem>>, vector<1x32xf32>
    %29 = vector.broadcast %28 : vector<1x32xf32> to vector<8x32xf32>
    %30 = arith.addf %27, %29 : vector<8x32xf32>
    %31 = vector.extract_strided_slice %16 {offsets = [0, 0], sizes = [8, 8], strides = [1, 1]} : vector<8x32xf32> to vector<8x8xf32>
    %32 = vector.extract_strided_slice %23 {offsets = [0, 0], sizes = [8, 8], strides = [1, 1]} : vector<8x32xf32> to vector<8x8xf32>
    %33 = vector.extract_strided_slice %30 {offsets = [0, 0], sizes = [8, 8], strides = [1, 1]} : vector<8x32xf32> to vector<8x8xf32>
    %34 = arith.truncf %31 : vector<8x8xf32> to vector<8x8xbf16>
    %35 = arith.truncf %32 : vector<8x8xf32> to vector<8x8xbf16>
    %cst_27 = arith.constant dense<0.000000e+00> : vector<8x8xf32>
    %36 = tpu.matmul %34, %35, %cst_27 {dimension_numbers = #tpu.dot_dimension_numbers<[1], [1], [0], [0], [0, 0, 1, 0], [], []>} : vector<8x8xbf16>, vector<8x8xbf16>, vector<8x8xf32> -> vector<8x8xf32>
    %cst_28 = arith.constant 0.353553385 : f32
    %37 = vector.broadcast %cst_28 : f32 to vector<8x8xf32>
    %38 = arith.mulf %36, %37 : vector<8x8xf32>
    %39 = arith.addf %38, %9 : vector<8x8xf32>
    %cst_29 = arith.constant dense<0xFF800000> : vector<8xf32>
    %40 = vector.multi_reduction <maximumf>, %39, %cst_29 [1] : vector<8x8xf32> to vector<8xf32>
    %41 = vector.shape_cast %40 : vector<8xf32> to vector<8x1xf32>
    %42 = vector.broadcast %41 : vector<8x1xf32> to vector<8x8xf32>
    %43 = arith.subf %39, %42 : vector<8x8xf32>
    %44 = math.exp %43 : vector<8x8xf32>
    %cst_30 = arith.constant dense<0.000000e+00> : vector<8xf32>
    %45 = vector.multi_reduction <add>, %44, %cst_30 [1] : vector<8x8xf32> to vector<8xf32>
    %46 = vector.shape_cast %45 : vector<8xf32> to vector<8x1xf32>
    %47 = tpu.reciprocal %46 {approx = true} : vector<8x1xf32> -> vector<8x1xf32>
    %48 = arith.truncf %44 : vector<8x8xf32> to vector<8x8xbf16>
    %49 = arith.truncf %33 : vector<8x8xf32> to vector<8x8xbf16>
    %cst_31 = arith.constant dense<0.000000e+00> : vector<8x8xf32>
    %50 = tpu.matmul %48, %49, %cst_31 {dimension_numbers = #tpu.dot_dimension_numbers<[1], [0], [0], [1], [0, 0, 1, 1], [], []>} : vector<8x8xbf16>, vector<8x8xbf16>, vector<8x8xf32> -> vector<8x8xf32>
    %51 = vector.broadcast %47 : vector<8x1xf32> to vector<8x8xf32>
    %52 = arith.mulf %50, %51 : vector<8x8xf32>
    %53 = vector.extract_strided_slice %16 {offsets = [0, 8], sizes = [8, 8], strides = [1, 1]} : vector<8x32xf32> to vector<8x8xf32>
    %54 = vector.extract_strided_slice %23 {offsets = [0, 8], sizes = [8, 8], strides = [1, 1]} : vector<8x32xf32> to vector<8x8xf32>
    %55 = vector.extract_strided_slice %30 {offsets = [0, 8], sizes = [8, 8], strides = [1, 1]} : vector<8x32xf32> to vector<8x8xf32>
    %56 = arith.truncf %53 : vector<8x8xf32> to vector<8x8xbf16>
    %57 = arith.truncf %54 : vector<8x8xf32> to vector<8x8xbf16>
    %cst_32 = arith.constant dense<0.000000e+00> : vector<8x8xf32>
    %58 = tpu.matmul %56, %57, %cst_32 {dimension_numbers = #tpu.dot_dimension_numbers<[1], [1], [0], [0], [0, 0, 1, 0], [], []>} : vector<8x8xbf16>, vector<8x8xbf16>, vector<8x8xf32> -> vector<8x8xf32>
    %cst_33 = arith.constant 0.353553385 : f32
    %59 = vector.broadcast %cst_33 : f32 to vector<8x8xf32>
    %60 = arith.mulf %58, %59 : vector<8x8xf32>
    %61 = arith.addf %60, %9 : vector<8x8xf32>
    %cst_34 = arith.constant dense<0xFF800000> : vector<8xf32>
    %62 = vector.multi_reduction <maximumf>, %61, %cst_34 [1] : vector<8x8xf32> to vector<8xf32>
    %63 = vector.shape_cast %62 : vector<8xf32> to vector<8x1xf32>
    %64 = vector.broadcast %63 : vector<8x1xf32> to vector<8x8xf32>
    %65 = arith.subf %61, %64 : vector<8x8xf32>
    %66 = math.exp %65 : vector<8x8xf32>
    %cst_35 = arith.constant dense<0.000000e+00> : vector<8xf32>
    %67 = vector.multi_reduction <add>, %66, %cst_35 [1] : vector<8x8xf32> to vector<8xf32>
    %68 = vector.shape_cast %67 : vector<8xf32> to vector<8x1xf32>
    %69 = tpu.reciprocal %68 {approx = true} : vector<8x1xf32> -> vector<8x1xf32>
    %70 = arith.truncf %66 : vector<8x8xf32> to vector<8x8xbf16>
    %71 = arith.truncf %55 : vector<8x8xf32> to vector<8x8xbf16>
    %cst_36 = arith.constant dense<0.000000e+00> : vector<8x8xf32>
    %72 = tpu.matmul %70, %71, %cst_36 {dimension_numbers = #tpu.dot_dimension_numbers<[1], [0], [0], [1], [0, 0, 1, 1], [], []>} : vector<8x8xbf16>, vector<8x8xbf16>, vector<8x8xf32> -> vector<8x8xf32>
    %73 = vector.broadcast %69 : vector<8x1xf32> to vector<8x8xf32>
    %74 = arith.mulf %72, %73 : vector<8x8xf32>
    %75 = vector.extract_strided_slice %16 {offsets = [0, 16], sizes = [8, 8], strides = [1, 1]} : vector<8x32xf32> to vector<8x8xf32>
    %76 = vector.extract_strided_slice %23 {offsets = [0, 16], sizes = [8, 8], strides = [1, 1]} : vector<8x32xf32> to vector<8x8xf32>
    %77 = vector.extract_strided_slice %30 {offsets = [0, 16], sizes = [8, 8], strides = [1, 1]} : vector<8x32xf32> to vector<8x8xf32>
    %78 = arith.truncf %75 : vector<8x8xf32> to vector<8x8xbf16>
    %79 = arith.truncf %76 : vector<8x8xf32> to vector<8x8xbf16>
    %cst_37 = arith.constant dense<0.000000e+00> : vector<8x8xf32>
    %80 = tpu.matmul %78, %79, %cst_37 {dimension_numbers = #tpu.dot_dimension_numbers<[1], [1], [0], [0], [0, 0, 1, 0], [], []>} : vector<8x8xbf16>, vector<8x8xbf16>, vector<8x8xf32> -> vector<8x8xf32>
    %cst_38 = arith.constant 0.353553385 : f32
    %81 = vector.broadcast %cst_38 : f32 to vector<8x8xf32>
    %82 = arith.mulf %80, %81 : vector<8x8xf32>
    %83 = arith.addf %82, %9 : vector<8x8xf32>
    %cst_39 = arith.constant dense<0xFF800000> : vector<8xf32>
    %84 = vector.multi_reduction <maximumf>, %83, %cst_39 [1] : vector<8x8xf32> to vector<8xf32>
    %85 = vector.shape_cast %84 : vector<8xf32> to vector<8x1xf32>
    %86 = vector.broadcast %85 : vector<8x1xf32> to vector<8x8xf32>
    %87 = arith.subf %83, %86 : vector<8x8xf32>
    %88 = math.exp %87 : vector<8x8xf32>
    %cst_40 = arith.constant dense<0.000000e+00> : vector<8xf32>
    %89 = vector.multi_reduction <add>, %88, %cst_40 [1] : vector<8x8xf32> to vector<8xf32>
    %90 = vector.shape_cast %89 : vector<8xf32> to vector<8x1xf32>
    %91 = tpu.reciprocal %90 {approx = true} : vector<8x1xf32> -> vector<8x1xf32>
    %92 = arith.truncf %88 : vector<8x8xf32> to vector<8x8xbf16>
    %93 = arith.truncf %77 : vector<8x8xf32> to vector<8x8xbf16>
    %cst_41 = arith.constant dense<0.000000e+00> : vector<8x8xf32>
    %94 = tpu.matmul %92, %93, %cst_41 {dimension_numbers = #tpu.dot_dimension_numbers<[1], [0], [0], [1], [0, 0, 1, 1], [], []>} : vector<8x8xbf16>, vector<8x8xbf16>, vector<8x8xf32> -> vector<8x8xf32>
    %95 = vector.broadcast %91 : vector<8x1xf32> to vector<8x8xf32>
    %96 = arith.mulf %94, %95 : vector<8x8xf32>
    %97 = vector.extract_strided_slice %16 {offsets = [0, 24], sizes = [8, 8], strides = [1, 1]} : vector<8x32xf32> to vector<8x8xf32>
    %98 = vector.extract_strided_slice %23 {offsets = [0, 24], sizes = [8, 8], strides = [1, 1]} : vector<8x32xf32> to vector<8x8xf32>
    %99 = vector.extract_strided_slice %30 {offsets = [0, 24], sizes = [8, 8], strides = [1, 1]} : vector<8x32xf32> to vector<8x8xf32>
    %100 = arith.truncf %97 : vector<8x8xf32> to vector<8x8xbf16>
    %101 = arith.truncf %98 : vector<8x8xf32> to vector<8x8xbf16>
    %cst_42 = arith.constant dense<0.000000e+00> : vector<8x8xf32>
    %102 = tpu.matmul %100, %101, %cst_42 {dimension_numbers = #tpu.dot_dimension_numbers<[1], [1], [0], [0], [0, 0, 1, 0], [], []>} : vector<8x8xbf16>, vector<8x8xbf16>, vector<8x8xf32> -> vector<8x8xf32>
    %cst_43 = arith.constant 0.353553385 : f32
    %103 = vector.broadcast %cst_43 : f32 to vector<8x8xf32>
    %104 = arith.mulf %102, %103 : vector<8x8xf32>
    %105 = arith.addf %104, %9 : vector<8x8xf32>
    %cst_44 = arith.constant dense<0xFF800000> : vector<8xf32>
    %106 = vector.multi_reduction <maximumf>, %105, %cst_44 [1] : vector<8x8xf32> to vector<8xf32>
    %107 = vector.shape_cast %106 : vector<8xf32> to vector<8x1xf32>
    %108 = vector.broadcast %107 : vector<8x1xf32> to vector<8x8xf32>
    %109 = arith.subf %105, %108 : vector<8x8xf32>
    %110 = math.exp %109 : vector<8x8xf32>
    %cst_45 = arith.constant dense<0.000000e+00> : vector<8xf32>
    %111 = vector.multi_reduction <add>, %110, %cst_45 [1] : vector<8x8xf32> to vector<8xf32>
    %112 = vector.shape_cast %111 : vector<8xf32> to vector<8x1xf32>
    %113 = tpu.reciprocal %112 {approx = true} : vector<8x1xf32> -> vector<8x1xf32>
    %114 = arith.truncf %110 : vector<8x8xf32> to vector<8x8xbf16>
    %115 = arith.truncf %99 : vector<8x8xf32> to vector<8x8xbf16>
    %cst_46 = arith.constant dense<0.000000e+00> : vector<8x8xf32>
    %116 = tpu.matmul %114, %115, %cst_46 {dimension_numbers = #tpu.dot_dimension_numbers<[1], [0], [0], [1], [0, 0, 1, 1], [], []>} : vector<8x8xbf16>, vector<8x8xbf16>, vector<8x8xf32> -> vector<8x8xf32>
    %117 = vector.broadcast %113 : vector<8x1xf32> to vector<8x8xf32>
    %118 = arith.mulf %116, %117 : vector<8x8xf32>
    %119 = tpu.concatenate %52, %74, %96, %118 in 1 : vector<8x8xf32>, vector<8x8xf32>, vector<8x8xf32>, vector<8x8xf32> -> vector<8x32xf32>
    %c0_47 = arith.constant 0 : index
    %c0_48 = arith.constant 0 : index
    %120 = vector.load %arg12[%c0_47, %c0_48] : memref<32x32xf32, #tpu.memory_space<vmem>>, vector<32x32xf32>
    %121 = arith.truncf %119 : vector<8x32xf32> to vector<8x32xbf16>
    %122 = arith.truncf %120 : vector<32x32xf32> to vector<32x32xbf16>
    %cst_49 = arith.constant dense<0.000000e+00> : vector<8x32xf32>
    %123 = tpu.matmul %121, %122, %cst_49 {dimension_numbers = #tpu.dot_dimension_numbers<[1], [0], [0], [1], [0, 0, 1, 1], [], []>} : vector<8x32xbf16>, vector<32x32xbf16>, vector<8x32xf32> -> vector<8x32xf32>
    %c0_50 = arith.constant 0 : index
    %c0_51 = arith.constant 0 : index
    %124 = vector.load %arg13[%c0_50, %c0_51] : memref<1x32xf32, #tpu.memory_space<vmem>>, vector<1x32xf32>
    %125 = vector.broadcast %124 : vector<1x32xf32> to vector<8x32xf32>
    %126 = arith.addf %123, %125 : vector<8x32xf32>
    %127 = arith.addf %1, %126 : vector<8x32xf32>
    %c0_52 = arith.constant 0 : index
    %c0_53 = arith.constant 0 : index
    %128 = vector.load %arg14[%c0_52, %c0_53] : memref<1x32xf32, #tpu.memory_space<vmem>>, vector<1x32xf32>
    %c0_54 = arith.constant 0 : index
    %c0_55 = arith.constant 0 : index
    %129 = vector.load %arg15[%c0_54, %c0_55] : memref<1x32xf32, #tpu.memory_space<vmem>>, vector<1x32xf32>
    %cst_56 = arith.constant dense<0.000000e+00> : vector<8xf32>
    %130 = vector.multi_reduction <add>, %127, %cst_56 [1] : vector<8x32xf32> to vector<8xf32>
    %131 = vector.shape_cast %130 : vector<8xf32> to vector<8x1xf32>
    %cst_57 = arith.constant 3.200000e+01 : f32
    %132 = vector.broadcast %cst_57 : f32 to vector<8x1xf32>
    %133 = arith.divf %131, %132 : vector<8x1xf32>
    %134 = vector.broadcast %133 : vector<8x1xf32> to vector<8x32xf32>
    %135 = arith.subf %127, %134 : vector<8x32xf32>
    %136 = arith.mulf %135, %135 : vector<8x32xf32>
    %cst_58 = arith.constant dense<0.000000e+00> : vector<8xf32>
    %137 = vector.multi_reduction <add>, %136, %cst_58 [1] : vector<8x32xf32> to vector<8xf32>
    %138 = vector.shape_cast %137 : vector<8xf32> to vector<8x1xf32>
    %cst_59 = arith.constant 3.200000e+01 : f32
    %139 = vector.broadcast %cst_59 : f32 to vector<8x1xf32>
    %140 = arith.divf %138, %139 : vector<8x1xf32>
    %141 = vector.broadcast %133 : vector<8x1xf32> to vector<8x32xf32>
    %142 = arith.subf %127, %141 : vector<8x32xf32>
    %cst_60 = arith.constant 9.99999974E-6 : f32
    %143 = vector.broadcast %cst_60 : f32 to vector<8x1xf32>
    %144 = arith.addf %140, %143 : vector<8x1xf32>
    %145 = math.rsqrt %144 : vector<8x1xf32>
    %146 = vector.broadcast %145 : vector<8x1xf32> to vector<8x32xf32>
    %147 = arith.mulf %142, %146 : vector<8x32xf32>
    %148 = vector.broadcast %128 : vector<1x32xf32> to vector<8x32xf32>
    %149 = arith.mulf %147, %148 : vector<8x32xf32>
    %150 = vector.broadcast %129 : vector<1x32xf32> to vector<8x32xf32>
    %151 = arith.addf %149, %150 : vector<8x32xf32>
    %c0_61 = arith.constant 0 : index
    %c0_62 = arith.constant 0 : index
    %c0_63 = arith.constant 0 : index
    %152 = vector.load %arg16[%c0_61, %c0_62, %c0_63] : memref<1x8x32xf32, #tpu.memory_space<vmem>>, vector<1x8x32xf32>
    %153 = vector.shape_cast %152 : vector<1x8x32xf32> to vector<8x32xf32>
    %154 = vector.shape_cast %151 : vector<8x32xf32> to vector<1x8x32xf32>
    tpu.vector_store %arg16[%c0_61, %c0_62, %c0_63], %154 {strides = array<i32>} : memref<1x8x32xf32, #tpu.memory_space<vmem>>, vector<1x8x32xf32>,
    return
  }
  func.func @transform_0(%arg0: i32) -> (i32, i32, i32) {
    %c0_i32 = arith.constant 0 : i32
    %c0_i32_0 = arith.constant 0 : i32
    %c0_i32_1 = arith.constant 0 : i32
    return %arg0, %c0_i32, %c0_i32_0 : i32, i32, i32
  }
  func.func @transform_1(%arg0: i32) -> (i32, i32) {
    %c0_i32 = arith.constant 0 : i32
    %c0_i32_0 = arith.constant 0 : i32
    %c0_i32_1 = arith.constant 0 : i32
    return %c0_i32, %c0_i32_0 : i32, i32
  }
  func.func @transform_2(%arg0: i32) -> (i32, i32, i32) {
    %c0_i32 = arith.constant 0 : i32
    %c0_i32_0 = arith.constant 0 : i32
    %c0_i32_1 = arith.constant 0 : i32
    return %arg0, %c0_i32, %c0_i32_0 : i32, i32, i32
  }
  func.func @transform_3(%arg0: i32) -> (i32, i32, i32) {
    %c0_i32 = arith.constant 0 : i32
    %c0_i32_0 = arith.constant 0 : i32
    %c0_i32_1 = arith.constant 0 : i32
    return %arg0, %c0_i32, %c0_i32_0 : i32, i32, i32
  }
  func.func @transform_4(%arg0: i32) -> (i32, i32, i32) {
    %c0_i32 = arith.constant 0 : i32
    %c0_i32_0 = arith.constant 0 : i32
    %c0_i32_1 = arith.constant 0 : i32
    return %arg0, %c0_i32, %c0_i32_0 : i32, i32, i32
  }
  func.func @transform_5(%arg0: i32) -> (i32, i32) {
    %c0_i32 = arith.constant 0 : i32
    %c0_i32_0 = arith.constant 0 : i32
    %c0_i32_1 = arith.constant 0 : i32
    return %c0_i32, %c0_i32_0 : i32, i32
  }
  func.func @transform_6(%arg0: i32) -> (i32, i32) {
    %c0_i32 = arith.constant 0 : i32
    %c0_i32_0 = arith.constant 0 : i32
    %c0_i32_1 = arith.constant 0 : i32
    return %c0_i32, %c0_i32_0 : i32, i32
  }
  func.func @transform_7(%arg0: i32) -> (i32, i32) {
    %c0_i32 = arith.constant 0 : i32
    %c0_i32_0 = arith.constant 0 : i32
    %c0_i32_1 = arith.constant 0 : i32
    return %c0_i32, %c0_i32_0 : i32, i32
  }
  func.func @transform_8(%arg0: i32) -> (i32, i32) {
    %c0_i32 = arith.constant 0 : i32
    %c0_i32_0 = arith.constant 0 : i32
    %c0_i32_1 = arith.constant 0 : i32
    return %c0_i32, %c0_i32_0 : i32, i32
  }
  func.func @transform_9(%arg0: i32) -> (i32, i32) {
    %c0_i32 = arith.constant 0 : i32
    %c0_i32_0 = arith.constant 0 : i32
    %c0_i32_1 = arith.constant 0 : i32
    return %c0_i32, %c0_i32_0 : i32, i32
  }
  func.func @transform_10(%arg0: i32) -> (i32, i32) {
    %c0_i32 = arith.constant 0 : i32
    %c0_i32_0 = arith.constant 0 : i32
    %c0_i32_1 = arith.constant 0 : i32
    return %c0_i32, %c0_i32_0 : i32, i32
  }
  func.func @transform_11(%arg0: i32) -> (i32, i32) {
    %c0_i32 = arith.constant 0 : i32
    %c0_i32_0 = arith.constant 0 : i32
    %c0_i32_1 = arith.constant 0 : i32
    return %c0_i32, %c0_i32_0 : i32, i32
  }
  func.func @transform_12(%arg0: i32) -> (i32, i32) {
    %c0_i32 = arith.constant 0 : i32
    %c0_i32_0 = arith.constant 0 : i32
    %c0_i32_1 = arith.constant 0 : i32
    return %c0_i32, %c0_i32_0 : i32, i32
  }
  func.func @transform_13(%arg0: i32) -> (i32, i32) {
    %c0_i32 = arith.constant 0 : i32
    %c0_i32_0 = arith.constant 0 : i32
    %c0_i32_1 = arith.constant 0 : i32
    return %c0_i32, %c0_i32_0 : i32, i32
  }
  func.func @transform_14(%arg0: i32) -> (i32, i32) {
    %c0_i32 = arith.constant 0 : i32
    %c0_i32_0 = arith.constant 0 : i32
    %c0_i32_1 = arith.constant 0 : i32
    return %c0_i32, %c0_i32_0 : i32, i32
  }
  func.func @transform_15(%arg0: i32) -> (i32, i32, i32) {
    %c0_i32 = arith.constant 0 : i32
    %c0_i32_0 = arith.constant 0 : i32
    %c0_i32_1 = arith.constant 0 : i32
    return %arg0, %c0_i32, %c0_i32_0 : i32, i32, i32
  }
}

module attributes {stable_mosaic.version = 11 : i64} {
  func.func @_attn_block_kernel(%arg0: i32, %arg1: memref<1x8x32xf32, #tpu.memory_space<vmem>>, %arg2: memref<8x32xf32, #tpu.memory_space<vmem>>, %arg3: memref<1x16x32xf32, #tpu.memory_space<vmem>>, %arg4: memref<1x16x32xf32, #tpu.memory_space<vmem>>, %arg5: memref<1x8x16xf32, #tpu.memory_space<vmem>>, %arg6: memref<32x32xf32, #tpu.memory_space<vmem>>, %arg7: memref<1x32xf32, #tpu.memory_space<vmem>>, %arg8: memref<32x32xf32, #tpu.memory_space<vmem>>, %arg9: memref<1x32xf32, #tpu.memory_space<vmem>>, %arg10: memref<32x32xf32, #tpu.memory_space<vmem>>, %arg11: memref<1x32xf32, #tpu.memory_space<vmem>>, %arg12: memref<32x32xf32, #tpu.memory_space<vmem>>, %arg13: memref<1x32xf32, #tpu.memory_space<vmem>>, %arg14: memref<1x32xf32, #tpu.memory_space<vmem>>, %arg15: memref<1x32xf32, #tpu.memory_space<vmem>>, %arg16: memref<1x8x32xf32, #tpu.memory_space<vmem>>) attributes {dimension_semantics = [#tpu.dimension_semantics<parallel>], iteration_bounds = array<i64: 2>, scalar_prefetch = 0 : i64, scratch_operands = 0 : i64, tpu.core_type = #tpu.core_type<tc>, window_params = [{transform_indices = @transform_0, window_bounds = array<i64: 1, 8, 32>}, {pipeline_mode = #tpu.pipeline_mode<synchronous>, transform_indices = @transform_1, window_bounds = array<i64: 8, 32>}, {transform_indices = @transform_2, window_bounds = array<i64: 1, 16, 32>}, {transform_indices = @transform_3, window_bounds = array<i64: 1, 16, 32>}, {transform_indices = @transform_4, window_bounds = array<i64: 1, 8, 16>}, {pipeline_mode = #tpu.pipeline_mode<synchronous>, transform_indices = @transform_5, window_bounds = array<i64: 32, 32>}, {pipeline_mode = #tpu.pipeline_mode<synchronous>, transform_indices = @transform_6, window_bounds = array<i64: 1, 32>}, {pipeline_mode = #tpu.pipeline_mode<synchronous>, transform_indices = @transform_7, window_bounds = array<i64: 32, 32>}, {pipeline_mode = #tpu.pipeline_mode<synchronous>, transform_indices = @transform_8, window_bounds = array<i64: 1, 32>}, {pipeline_mode = #tpu.pipeline_mode<synchronous>, transform_indices = @transform_9, window_bounds = array<i64: 32, 32>}, {pipeline_mode = #tpu.pipeline_mode<synchronous>, transform_indices = @transform_10, window_bounds = array<i64: 1, 32>}, {pipeline_mode = #tpu.pipeline_mode<synchronous>, transform_indices = @transform_11, window_bounds = array<i64: 32, 32>}, {pipeline_mode = #tpu.pipeline_mode<synchronous>, transform_indices = @transform_12, window_bounds = array<i64: 1, 32>}, {pipeline_mode = #tpu.pipeline_mode<synchronous>, transform_indices = @transform_13, window_bounds = array<i64: 1, 32>}, {pipeline_mode = #tpu.pipeline_mode<synchronous>, transform_indices = @transform_14, window_bounds = array<i64: 1, 32>}, {transform_indices = @transform_15, window_bounds = array<i64: 1, 8, 32>}]} {
    %c0 = arith.constant 0 : index
    %c0_0 = arith.constant 0 : index
    %c0_1 = arith.constant 0 : index
    %0 = vector.load %arg1[%c0, %c0_0, %c0_1] : memref<1x8x32xf32, #tpu.memory_space<vmem>>, vector<1x8x32xf32>
    %1 = vector.shape_cast %0 : vector<1x8x32xf32> to vector<8x32xf32>
    %c0_2 = arith.constant 0 : index
    %c0_3 = arith.constant 0 : index
    %2 = vector.load %arg2[%c0_2, %c0_3] : memref<8x32xf32, #tpu.memory_space<vmem>>, vector<8x32xf32>
    %3 = arith.addf %1, %2 : vector<8x32xf32>
    %c0_4 = arith.constant 0 : index
    %c0_5 = arith.constant 0 : index
    %c0_6 = arith.constant 0 : index
    %4 = vector.load %arg3[%c0_4, %c0_5, %c0_6] : memref<1x16x32xf32, #tpu.memory_space<vmem>>, vector<1x16x32xf32>
    %5 = vector.shape_cast %4 : vector<1x16x32xf32> to vector<16x32xf32>
    %c0_7 = arith.constant 0 : index
    %c0_8 = arith.constant 0 : index
    %c0_9 = arith.constant 0 : index
    %6 = vector.load %arg4[%c0_7, %c0_8, %c0_9] : memref<1x16x32xf32, #tpu.memory_space<vmem>>, vector<1x16x32xf32>
    %7 = vector.shape_cast %6 : vector<1x16x32xf32> to vector<16x32xf32>
    %c0_10 = arith.constant 0 : index
    %c0_11 = arith.constant 0 : index
    %c0_12 = arith.constant 0 : index
    %8 = vector.load %arg5[%c0_10, %c0_11, %c0_12] : memref<1x8x16xf32, #tpu.memory_space<vmem>>, vector<1x8x16xf32>
    %9 = vector.shape_cast %8 : vector<1x8x16xf32> to vector<8x16xf32>
    %c0_13 = arith.constant 0 : index
    %c0_14 = arith.constant 0 : index
    %10 = vector.load %arg6[%c0_13, %c0_14] : memref<32x32xf32, #tpu.memory_space<vmem>>, vector<32x32xf32>
    %11 = arith.truncf %3 : vector<8x32xf32> to vector<8x32xbf16>
    %12 = arith.truncf %10 : vector<32x32xf32> to vector<32x32xbf16>
    %cst = arith.constant dense<0.000000e+00> : vector<8x32xf32>
    %13 = tpu.matmul %11, %12, %cst {dimension_numbers = #tpu.dot_dimension_numbers<[1], [0], [0], [1], [0, 0, 1, 1], [], []>} : vector<8x32xbf16>, vector<32x32xbf16>, vector<8x32xf32> -> vector<8x32xf32>
    %c0_15 = arith.constant 0 : index
    %c0_16 = arith.constant 0 : index
    %14 = vector.load %arg7[%c0_15, %c0_16] : memref<1x32xf32, #tpu.memory_space<vmem>>, vector<1x32xf32>
    %15 = vector.broadcast %14 : vector<1x32xf32> to vector<8x32xf32>
    %16 = arith.addf %13, %15 : vector<8x32xf32>
    %c0_17 = arith.constant 0 : index
    %c0_18 = arith.constant 0 : index
    %17 = vector.load %arg8[%c0_17, %c0_18] : memref<32x32xf32, #tpu.memory_space<vmem>>, vector<32x32xf32>
    %18 = arith.truncf %5 : vector<16x32xf32> to vector<16x32xbf16>
    %19 = arith.truncf %17 : vector<32x32xf32> to vector<32x32xbf16>
    %cst_19 = arith.constant dense<0.000000e+00> : vector<16x32xf32>
    %20 = tpu.matmul %18, %19, %cst_19 {dimension_numbers = #tpu.dot_dimension_numbers<[1], [0], [0], [1], [0, 0, 1, 1], [], []>} : vector<16x32xbf16>, vector<32x32xbf16>, vector<16x32xf32> -> vector<16x32xf32>
    %c0_20 = arith.constant 0 : index
    %c0_21 = arith.constant 0 : index
    %21 = vector.load %arg9[%c0_20, %c0_21] : memref<1x32xf32, #tpu.memory_space<vmem>>, vector<1x32xf32>
    %22 = vector.broadcast %21 : vector<1x32xf32> to vector<16x32xf32>
    %23 = arith.addf %20, %22 : vector<16x32xf32>
    %c0_22 = arith.constant 0 : index
    %c0_23 = arith.constant 0 : index
    %24 = vector.load %arg10[%c0_22, %c0_23] : memref<32x32xf32, #tpu.memory_space<vmem>>, vector<32x32xf32>
    %25 = arith.truncf %7 : vector<16x32xf32> to vector<16x32xbf16>
    %26 = arith.truncf %24 : vector<32x32xf32> to vector<32x32xbf16>
    %cst_24 = arith.constant dense<0.000000e+00> : vector<16x32xf32>
    %27 = tpu.matmul %25, %26, %cst_24 {dimension_numbers = #tpu.dot_dimension_numbers<[1], [0], [0], [1], [0, 0, 1, 1], [], []>} : vector<16x32xbf16>, vector<32x32xbf16>, vector<16x32xf32> -> vector<16x32xf32>
    %c0_25 = arith.constant 0 : index
    %c0_26 = arith.constant 0 : index
    %28 = vector.load %arg11[%c0_25, %c0_26] : memref<1x32xf32, #tpu.memory_space<vmem>>, vector<1x32xf32>
    %29 = vector.broadcast %28 : vector<1x32xf32> to vector<16x32xf32>
    %30 = arith.addf %27, %29 : vector<16x32xf32>
    %31 = vector.extract_strided_slice %16 {offsets = [0, 0], sizes = [8, 8], strides = [1, 1]} : vector<8x32xf32> to vector<8x8xf32>
    %32 = vector.extract_strided_slice %23 {offsets = [0, 0], sizes = [16, 8], strides = [1, 1]} : vector<16x32xf32> to vector<16x8xf32>
    %33 = vector.extract_strided_slice %30 {offsets = [0, 0], sizes = [16, 8], strides = [1, 1]} : vector<16x32xf32> to vector<16x8xf32>
    %34 = arith.truncf %31 : vector<8x8xf32> to vector<8x8xbf16>
    %35 = arith.truncf %32 : vector<16x8xf32> to vector<16x8xbf16>
    %cst_27 = arith.constant dense<0.000000e+00> : vector<8x16xf32>
    %36 = tpu.matmul %34, %35, %cst_27 {dimension_numbers = #tpu.dot_dimension_numbers<[1], [1], [0], [0], [0, 0, 1, 0], [], []>} : vector<8x8xbf16>, vector<16x8xbf16>, vector<8x16xf32> -> vector<8x16xf32>
    %cst_28 = arith.constant 0.353553385 : f32
    %37 = vector.broadcast %cst_28 : f32 to vector<8x16xf32>
    %38 = arith.mulf %36, %37 : vector<8x16xf32>
    %39 = arith.addf %38, %9 : vector<8x16xf32>
    %cst_29 = arith.constant dense<0xFF800000> : vector<8xf32>
    %40 = vector.multi_reduction <maximumf>, %39, %cst_29 [1] : vector<8x16xf32> to vector<8xf32>
    %41 = vector.shape_cast %40 : vector<8xf32> to vector<8x1xf32>
    %42 = vector.broadcast %41 : vector<8x1xf32> to vector<8x16xf32>
    %43 = arith.subf %39, %42 : vector<8x16xf32>
    %44 = math.exp %43 : vector<8x16xf32>
    %cst_30 = arith.constant dense<0.000000e+00> : vector<8xf32>
    %45 = vector.multi_reduction <add>, %44, %cst_30 [1] : vector<8x16xf32> to vector<8xf32>
    %46 = vector.shape_cast %45 : vector<8xf32> to vector<8x1xf32>
    %47 = tpu.reciprocal %46 {approx = true} : vector<8x1xf32> -> vector<8x1xf32>
    %48 = arith.truncf %44 : vector<8x16xf32> to vector<8x16xbf16>
    %49 = arith.truncf %33 : vector<16x8xf32> to vector<16x8xbf16>
    %cst_31 = arith.constant dense<0.000000e+00> : vector<8x8xf32>
    %50 = tpu.matmul %48, %49, %cst_31 {dimension_numbers = #tpu.dot_dimension_numbers<[1], [0], [0], [1], [0, 0, 1, 1], [], []>} : vector<8x16xbf16>, vector<16x8xbf16>, vector<8x8xf32> -> vector<8x8xf32>
    %51 = vector.broadcast %47 : vector<8x1xf32> to vector<8x8xf32>
    %52 = arith.mulf %50, %51 : vector<8x8xf32>
    %53 = vector.extract_strided_slice %16 {offsets = [0, 8], sizes = [8, 8], strides = [1, 1]} : vector<8x32xf32> to vector<8x8xf32>
    %54 = vector.extract_strided_slice %23 {offsets = [0, 8], sizes = [16, 8], strides = [1, 1]} : vector<16x32xf32> to vector<16x8xf32>
    %55 = vector.extract_strided_slice %30 {offsets = [0, 8], sizes = [16, 8], strides = [1, 1]} : vector<16x32xf32> to vector<16x8xf32>
    %56 = arith.truncf %53 : vector<8x8xf32> to vector<8x8xbf16>
    %57 = arith.truncf %54 : vector<16x8xf32> to vector<16x8xbf16>
    %cst_32 = arith.constant dense<0.000000e+00> : vector<8x16xf32>
    %58 = tpu.matmul %56, %57, %cst_32 {dimension_numbers = #tpu.dot_dimension_numbers<[1], [1], [0], [0], [0, 0, 1, 0], [], []>} : vector<8x8xbf16>, vector<16x8xbf16>, vector<8x16xf32> -> vector<8x16xf32>
    %cst_33 = arith.constant 0.353553385 : f32
    %59 = vector.broadcast %cst_33 : f32 to vector<8x16xf32>
    %60 = arith.mulf %58, %59 : vector<8x16xf32>
    %61 = arith.addf %60, %9 : vector<8x16xf32>
    %cst_34 = arith.constant dense<0xFF800000> : vector<8xf32>
    %62 = vector.multi_reduction <maximumf>, %61, %cst_34 [1] : vector<8x16xf32> to vector<8xf32>
    %63 = vector.shape_cast %62 : vector<8xf32> to vector<8x1xf32>
    %64 = vector.broadcast %63 : vector<8x1xf32> to vector<8x16xf32>
    %65 = arith.subf %61, %64 : vector<8x16xf32>
    %66 = math.exp %65 : vector<8x16xf32>
    %cst_35 = arith.constant dense<0.000000e+00> : vector<8xf32>
    %67 = vector.multi_reduction <add>, %66, %cst_35 [1] : vector<8x16xf32> to vector<8xf32>
    %68 = vector.shape_cast %67 : vector<8xf32> to vector<8x1xf32>
    %69 = tpu.reciprocal %68 {approx = true} : vector<8x1xf32> -> vector<8x1xf32>
    %70 = arith.truncf %66 : vector<8x16xf32> to vector<8x16xbf16>
    %71 = arith.truncf %55 : vector<16x8xf32> to vector<16x8xbf16>
    %cst_36 = arith.constant dense<0.000000e+00> : vector<8x8xf32>
    %72 = tpu.matmul %70, %71, %cst_36 {dimension_numbers = #tpu.dot_dimension_numbers<[1], [0], [0], [1], [0, 0, 1, 1], [], []>} : vector<8x16xbf16>, vector<16x8xbf16>, vector<8x8xf32> -> vector<8x8xf32>
    %73 = vector.broadcast %69 : vector<8x1xf32> to vector<8x8xf32>
    %74 = arith.mulf %72, %73 : vector<8x8xf32>
    %75 = vector.extract_strided_slice %16 {offsets = [0, 16], sizes = [8, 8], strides = [1, 1]} : vector<8x32xf32> to vector<8x8xf32>
    %76 = vector.extract_strided_slice %23 {offsets = [0, 16], sizes = [16, 8], strides = [1, 1]} : vector<16x32xf32> to vector<16x8xf32>
    %77 = vector.extract_strided_slice %30 {offsets = [0, 16], sizes = [16, 8], strides = [1, 1]} : vector<16x32xf32> to vector<16x8xf32>
    %78 = arith.truncf %75 : vector<8x8xf32> to vector<8x8xbf16>
    %79 = arith.truncf %76 : vector<16x8xf32> to vector<16x8xbf16>
    %cst_37 = arith.constant dense<0.000000e+00> : vector<8x16xf32>
    %80 = tpu.matmul %78, %79, %cst_37 {dimension_numbers = #tpu.dot_dimension_numbers<[1], [1], [0], [0], [0, 0, 1, 0], [], []>} : vector<8x8xbf16>, vector<16x8xbf16>, vector<8x16xf32> -> vector<8x16xf32>
    %cst_38 = arith.constant 0.353553385 : f32
    %81 = vector.broadcast %cst_38 : f32 to vector<8x16xf32>
    %82 = arith.mulf %80, %81 : vector<8x16xf32>
    %83 = arith.addf %82, %9 : vector<8x16xf32>
    %cst_39 = arith.constant dense<0xFF800000> : vector<8xf32>
    %84 = vector.multi_reduction <maximumf>, %83, %cst_39 [1] : vector<8x16xf32> to vector<8xf32>
    %85 = vector.shape_cast %84 : vector<8xf32> to vector<8x1xf32>
    %86 = vector.broadcast %85 : vector<8x1xf32> to vector<8x16xf32>
    %87 = arith.subf %83, %86 : vector<8x16xf32>
    %88 = math.exp %87 : vector<8x16xf32>
    %cst_40 = arith.constant dense<0.000000e+00> : vector<8xf32>
    %89 = vector.multi_reduction <add>, %88, %cst_40 [1] : vector<8x16xf32> to vector<8xf32>
    %90 = vector.shape_cast %89 : vector<8xf32> to vector<8x1xf32>
    %91 = tpu.reciprocal %90 {approx = true} : vector<8x1xf32> -> vector<8x1xf32>
    %92 = arith.truncf %88 : vector<8x16xf32> to vector<8x16xbf16>
    %93 = arith.truncf %77 : vector<16x8xf32> to vector<16x8xbf16>
    %cst_41 = arith.constant dense<0.000000e+00> : vector<8x8xf32>
    %94 = tpu.matmul %92, %93, %cst_41 {dimension_numbers = #tpu.dot_dimension_numbers<[1], [0], [0], [1], [0, 0, 1, 1], [], []>} : vector<8x16xbf16>, vector<16x8xbf16>, vector<8x8xf32> -> vector<8x8xf32>
    %95 = vector.broadcast %91 : vector<8x1xf32> to vector<8x8xf32>
    %96 = arith.mulf %94, %95 : vector<8x8xf32>
    %97 = vector.extract_strided_slice %16 {offsets = [0, 24], sizes = [8, 8], strides = [1, 1]} : vector<8x32xf32> to vector<8x8xf32>
    %98 = vector.extract_strided_slice %23 {offsets = [0, 24], sizes = [16, 8], strides = [1, 1]} : vector<16x32xf32> to vector<16x8xf32>
    %99 = vector.extract_strided_slice %30 {offsets = [0, 24], sizes = [16, 8], strides = [1, 1]} : vector<16x32xf32> to vector<16x8xf32>
    %100 = arith.truncf %97 : vector<8x8xf32> to vector<8x8xbf16>
    %101 = arith.truncf %98 : vector<16x8xf32> to vector<16x8xbf16>
    %cst_42 = arith.constant dense<0.000000e+00> : vector<8x16xf32>
    %102 = tpu.matmul %100, %101, %cst_42 {dimension_numbers = #tpu.dot_dimension_numbers<[1], [1], [0], [0], [0, 0, 1, 0], [], []>} : vector<8x8xbf16>, vector<16x8xbf16>, vector<8x16xf32> -> vector<8x16xf32>
    %cst_43 = arith.constant 0.353553385 : f32
    %103 = vector.broadcast %cst_43 : f32 to vector<8x16xf32>
    %104 = arith.mulf %102, %103 : vector<8x16xf32>
    %105 = arith.addf %104, %9 : vector<8x16xf32>
    %cst_44 = arith.constant dense<0xFF800000> : vector<8xf32>
    %106 = vector.multi_reduction <maximumf>, %105, %cst_44 [1] : vector<8x16xf32> to vector<8xf32>
    %107 = vector.shape_cast %106 : vector<8xf32> to vector<8x1xf32>
    %108 = vector.broadcast %107 : vector<8x1xf32> to vector<8x16xf32>
    %109 = arith.subf %105, %108 : vector<8x16xf32>
    %110 = math.exp %109 : vector<8x16xf32>
    %cst_45 = arith.constant dense<0.000000e+00> : vector<8xf32>
    %111 = vector.multi_reduction <add>, %110, %cst_45 [1] : vector<8x16xf32> to vector<8xf32>
    %112 = vector.shape_cast %111 : vector<8xf32> to vector<8x1xf32>
    %113 = tpu.reciprocal %112 {approx = true} : vector<8x1xf32> -> vector<8x1xf32>
    %114 = arith.truncf %110 : vector<8x16xf32> to vector<8x16xbf16>
    %115 = arith.truncf %99 : vector<16x8xf32> to vector<16x8xbf16>
    %cst_46 = arith.constant dense<0.000000e+00> : vector<8x8xf32>
    %116 = tpu.matmul %114, %115, %cst_46 {dimension_numbers = #tpu.dot_dimension_numbers<[1], [0], [0], [1], [0, 0, 1, 1], [], []>} : vector<8x16xbf16>, vector<16x8xbf16>, vector<8x8xf32> -> vector<8x8xf32>
    %117 = vector.broadcast %113 : vector<8x1xf32> to vector<8x8xf32>
    %118 = arith.mulf %116, %117 : vector<8x8xf32>
    %119 = tpu.concatenate %52, %74, %96, %118 in 1 : vector<8x8xf32>, vector<8x8xf32>, vector<8x8xf32>, vector<8x8xf32> -> vector<8x32xf32>
    %c0_47 = arith.constant 0 : index
    %c0_48 = arith.constant 0 : index
    %120 = vector.load %arg12[%c0_47, %c0_48] : memref<32x32xf32, #tpu.memory_space<vmem>>, vector<32x32xf32>
    %121 = arith.truncf %119 : vector<8x32xf32> to vector<8x32xbf16>
    %122 = arith.truncf %120 : vector<32x32xf32> to vector<32x32xbf16>
    %cst_49 = arith.constant dense<0.000000e+00> : vector<8x32xf32>
    %123 = tpu.matmul %121, %122, %cst_49 {dimension_numbers = #tpu.dot_dimension_numbers<[1], [0], [0], [1], [0, 0, 1, 1], [], []>} : vector<8x32xbf16>, vector<32x32xbf16>, vector<8x32xf32> -> vector<8x32xf32>
    %c0_50 = arith.constant 0 : index
    %c0_51 = arith.constant 0 : index
    %124 = vector.load %arg13[%c0_50, %c0_51] : memref<1x32xf32, #tpu.memory_space<vmem>>, vector<1x32xf32>
    %125 = vector.broadcast %124 : vector<1x32xf32> to vector<8x32xf32>
    %126 = arith.addf %123, %125 : vector<8x32xf32>
    %127 = arith.addf %1, %126 : vector<8x32xf32>
    %c0_52 = arith.constant 0 : index
    %c0_53 = arith.constant 0 : index
    %128 = vector.load %arg14[%c0_52, %c0_53] : memref<1x32xf32, #tpu.memory_space<vmem>>, vector<1x32xf32>
    %c0_54 = arith.constant 0 : index
    %c0_55 = arith.constant 0 : index
    %129 = vector.load %arg15[%c0_54, %c0_55] : memref<1x32xf32, #tpu.memory_space<vmem>>, vector<1x32xf32>
    %cst_56 = arith.constant dense<0.000000e+00> : vector<8xf32>
    %130 = vector.multi_reduction <add>, %127, %cst_56 [1] : vector<8x32xf32> to vector<8xf32>
    %131 = vector.shape_cast %130 : vector<8xf32> to vector<8x1xf32>
    %cst_57 = arith.constant 3.200000e+01 : f32
    %132 = vector.broadcast %cst_57 : f32 to vector<8x1xf32>
    %133 = arith.divf %131, %132 : vector<8x1xf32>
    %134 = vector.broadcast %133 : vector<8x1xf32> to vector<8x32xf32>
    %135 = arith.subf %127, %134 : vector<8x32xf32>
    %136 = arith.mulf %135, %135 : vector<8x32xf32>
    %cst_58 = arith.constant dense<0.000000e+00> : vector<8xf32>
    %137 = vector.multi_reduction <add>, %136, %cst_58 [1] : vector<8x32xf32> to vector<8xf32>
    %138 = vector.shape_cast %137 : vector<8xf32> to vector<8x1xf32>
    %cst_59 = arith.constant 3.200000e+01 : f32
    %139 = vector.broadcast %cst_59 : f32 to vector<8x1xf32>
    %140 = arith.divf %138, %139 : vector<8x1xf32>
    %141 = vector.broadcast %133 : vector<8x1xf32> to vector<8x32xf32>
    %142 = arith.subf %127, %141 : vector<8x32xf32>
    %cst_60 = arith.constant 9.99999974E-6 : f32
    %143 = vector.broadcast %cst_60 : f32 to vector<8x1xf32>
    %144 = arith.addf %140, %143 : vector<8x1xf32>
    %145 = math.rsqrt %144 : vector<8x1xf32>
    %146 = vector.broadcast %145 : vector<8x1xf32> to vector<8x32xf32>
    %147 = arith.mulf %142, %146 : vector<8x32xf32>
    %148 = vector.broadcast %128 : vector<1x32xf32> to vector<8x32xf32>
    %149 = arith.mulf %147, %148 : vector<8x32xf32>
    %150 = vector.broadcast %129 : vector<1x32xf32> to vector<8x32xf32>
    %151 = arith.addf %149, %150 : vector<8x32xf32>
    %c0_61 = arith.constant 0 : index
    %c0_62 = arith.constant 0 : index
    %c0_63 = arith.constant 0 : index
    %152 = vector.load %arg16[%c0_61, %c0_62, %c0_63] : memref<1x8x32xf32, #tpu.memory_space<vmem>>, vector<1x8x32xf32>
    %153 = vector.shape_cast %152 : vector<1x8x32xf32> to vector<8x32xf32>
    %154 = vector.shape_cast %151 : vector<8x32xf32> to vector<1x8x32xf32>
    tpu.vector_store %arg16[%c0_61, %c0_62, %c0_63], %154 {strides = array<i32>} : memref<1x8x32xf32, #tpu.memory_space<vmem>>, vector<1x8x32xf32>,
    return
  }
  func.func @transform_0(%arg0: i32) -> (i32, i32, i32) {
    %c0_i32 = arith.constant 0 : i32
    %c0_i32_0 = arith.constant 0 : i32
    %c0_i32_1 = arith.constant 0 : i32
    return %arg0, %c0_i32, %c0_i32_0 : i32, i32, i32
  }
  func.func @transform_1(%arg0: i32) -> (i32, i32) {
    %c0_i32 = arith.constant 0 : i32
    %c0_i32_0 = arith.constant 0 : i32
    %c0_i32_1 = arith.constant 0 : i32
    return %c0_i32, %c0_i32_0 : i32, i32
  }
  func.func @transform_2(%arg0: i32) -> (i32, i32, i32) {
    %c0_i32 = arith.constant 0 : i32
    %c0_i32_0 = arith.constant 0 : i32
    %c0_i32_1 = arith.constant 0 : i32
    return %arg0, %c0_i32, %c0_i32_0 : i32, i32, i32
  }
  func.func @transform_3(%arg0: i32) -> (i32, i32, i32) {
    %c0_i32 = arith.constant 0 : i32
    %c0_i32_0 = arith.constant 0 : i32
    %c0_i32_1 = arith.constant 0 : i32
    return %arg0, %c0_i32, %c0_i32_0 : i32, i32, i32
  }
  func.func @transform_4(%arg0: i32) -> (i32, i32, i32) {
    %c0_i32 = arith.constant 0 : i32
    %c0_i32_0 = arith.constant 0 : i32
    %c0_i32_1 = arith.constant 0 : i32
    return %arg0, %c0_i32, %c0_i32_0 : i32, i32, i32
  }
  func.func @transform_5(%arg0: i32) -> (i32, i32) {
    %c0_i32 = arith.constant 0 : i32
    %c0_i32_0 = arith.constant 0 : i32
    %c0_i32_1 = arith.constant 0 : i32
    return %c0_i32, %c0_i32_0 : i32, i32
  }
  func.func @transform_6(%arg0: i32) -> (i32, i32) {
    %c0_i32 = arith.constant 0 : i32
    %c0_i32_0 = arith.constant 0 : i32
    %c0_i32_1 = arith.constant 0 : i32
    return %c0_i32, %c0_i32_0 : i32, i32
  }
  func.func @transform_7(%arg0: i32) -> (i32, i32) {
    %c0_i32 = arith.constant 0 : i32
    %c0_i32_0 = arith.constant 0 : i32
    %c0_i32_1 = arith.constant 0 : i32
    return %c0_i32, %c0_i32_0 : i32, i32
  }
  func.func @transform_8(%arg0: i32) -> (i32, i32) {
    %c0_i32 = arith.constant 0 : i32
    %c0_i32_0 = arith.constant 0 : i32
    %c0_i32_1 = arith.constant 0 : i32
    return %c0_i32, %c0_i32_0 : i32, i32
  }
  func.func @transform_9(%arg0: i32) -> (i32, i32) {
    %c0_i32 = arith.constant 0 : i32
    %c0_i32_0 = arith.constant 0 : i32
    %c0_i32_1 = arith.constant 0 : i32
    return %c0_i32, %c0_i32_0 : i32, i32
  }
  func.func @transform_10(%arg0: i32) -> (i32, i32) {
    %c0_i32 = arith.constant 0 : i32
    %c0_i32_0 = arith.constant 0 : i32
    %c0_i32_1 = arith.constant 0 : i32
    return %c0_i32, %c0_i32_0 : i32, i32
  }
  func.func @transform_11(%arg0: i32) -> (i32, i32) {
    %c0_i32 = arith.constant 0 : i32
    %c0_i32_0 = arith.constant 0 : i32
    %c0_i32_1 = arith.constant 0 : i32
    return %c0_i32, %c0_i32_0 : i32, i32
  }
  func.func @transform_12(%arg0: i32) -> (i32, i32) {
    %c0_i32 = arith.constant 0 : i32
    %c0_i32_0 = arith.constant 0 : i32
    %c0_i32_1 = arith.constant 0 : i32
    return %c0_i32, %c0_i32_0 : i32, i32
  }
  func.func @transform_13(%arg0: i32) -> (i32, i32) {
    %c0_i32 = arith.constant 0 : i32
    %c0_i32_0 = arith.constant 0 : i32
    %c0_i32_1 = arith.constant 0 : i32
    return %c0_i32, %c0_i32_0 : i32, i32
  }
  func.func @transform_14(%arg0: i32) -> (i32, i32) {
    %c0_i32 = arith.constant 0 : i32
    %c0_i32_0 = arith.constant 0 : i32
    %c0_i32_1 = arith.constant 0 : i32
    return %c0_i32, %c0_i32_0 : i32, i32
  }
  func.func @transform_15(%arg0: i32) -> (i32, i32, i32) {
    %c0_i32 = arith.constant 0 : i32
    %c0_i32_0 = arith.constant 0 : i32
    %c0_i32_1 = arith.constant 0 : i32
    return %arg0, %c0_i32, %c0_i32_0 : i32, i32, i32
  }
}

module attributes {stable_mosaic.version = 11 : i64} {
  func.func @_attn_block_kernel(%arg0: i32, %arg1: memref<1x8x32xf32, #tpu.memory_space<vmem>>, %arg2: memref<8x32xf32, #tpu.memory_space<vmem>>, %arg3: memref<1x64x32xf32, #tpu.memory_space<vmem>>, %arg4: memref<1x64x32xf32, #tpu.memory_space<vmem>>, %arg5: memref<1x8x64xf32, #tpu.memory_space<vmem>>, %arg6: memref<32x32xf32, #tpu.memory_space<vmem>>, %arg7: memref<1x32xf32, #tpu.memory_space<vmem>>, %arg8: memref<32x32xf32, #tpu.memory_space<vmem>>, %arg9: memref<1x32xf32, #tpu.memory_space<vmem>>, %arg10: memref<32x32xf32, #tpu.memory_space<vmem>>, %arg11: memref<1x32xf32, #tpu.memory_space<vmem>>, %arg12: memref<32x32xf32, #tpu.memory_space<vmem>>, %arg13: memref<1x32xf32, #tpu.memory_space<vmem>>, %arg14: memref<1x32xf32, #tpu.memory_space<vmem>>, %arg15: memref<1x32xf32, #tpu.memory_space<vmem>>, %arg16: memref<1x8x32xf32, #tpu.memory_space<vmem>>) attributes {dimension_semantics = [#tpu.dimension_semantics<parallel>], iteration_bounds = array<i64: 2>, scalar_prefetch = 0 : i64, scratch_operands = 0 : i64, tpu.core_type = #tpu.core_type<tc>, window_params = [{transform_indices = @transform_0, window_bounds = array<i64: 1, 8, 32>}, {pipeline_mode = #tpu.pipeline_mode<synchronous>, transform_indices = @transform_1, window_bounds = array<i64: 8, 32>}, {transform_indices = @transform_2, window_bounds = array<i64: 1, 64, 32>}, {transform_indices = @transform_3, window_bounds = array<i64: 1, 64, 32>}, {transform_indices = @transform_4, window_bounds = array<i64: 1, 8, 64>}, {pipeline_mode = #tpu.pipeline_mode<synchronous>, transform_indices = @transform_5, window_bounds = array<i64: 32, 32>}, {pipeline_mode = #tpu.pipeline_mode<synchronous>, transform_indices = @transform_6, window_bounds = array<i64: 1, 32>}, {pipeline_mode = #tpu.pipeline_mode<synchronous>, transform_indices = @transform_7, window_bounds = array<i64: 32, 32>}, {pipeline_mode = #tpu.pipeline_mode<synchronous>, transform_indices = @transform_8, window_bounds = array<i64: 1, 32>}, {pipeline_mode = #tpu.pipeline_mode<synchronous>, transform_indices = @transform_9, window_bounds = array<i64: 32, 32>}, {pipeline_mode = #tpu.pipeline_mode<synchronous>, transform_indices = @transform_10, window_bounds = array<i64: 1, 32>}, {pipeline_mode = #tpu.pipeline_mode<synchronous>, transform_indices = @transform_11, window_bounds = array<i64: 32, 32>}, {pipeline_mode = #tpu.pipeline_mode<synchronous>, transform_indices = @transform_12, window_bounds = array<i64: 1, 32>}, {pipeline_mode = #tpu.pipeline_mode<synchronous>, transform_indices = @transform_13, window_bounds = array<i64: 1, 32>}, {pipeline_mode = #tpu.pipeline_mode<synchronous>, transform_indices = @transform_14, window_bounds = array<i64: 1, 32>}, {transform_indices = @transform_15, window_bounds = array<i64: 1, 8, 32>}]} {
    %c0 = arith.constant 0 : index
    %c0_0 = arith.constant 0 : index
    %c0_1 = arith.constant 0 : index
    %0 = vector.load %arg1[%c0, %c0_0, %c0_1] : memref<1x8x32xf32, #tpu.memory_space<vmem>>, vector<1x8x32xf32>
    %1 = vector.shape_cast %0 : vector<1x8x32xf32> to vector<8x32xf32>
    %c0_2 = arith.constant 0 : index
    %c0_3 = arith.constant 0 : index
    %2 = vector.load %arg2[%c0_2, %c0_3] : memref<8x32xf32, #tpu.memory_space<vmem>>, vector<8x32xf32>
    %3 = arith.addf %1, %2 : vector<8x32xf32>
    %c0_4 = arith.constant 0 : index
    %c0_5 = arith.constant 0 : index
    %c0_6 = arith.constant 0 : index
    %4 = vector.load %arg3[%c0_4, %c0_5, %c0_6] : memref<1x64x32xf32, #tpu.memory_space<vmem>>, vector<1x64x32xf32>
    %5 = vector.shape_cast %4 : vector<1x64x32xf32> to vector<64x32xf32>
    %c0_7 = arith.constant 0 : index
    %c0_8 = arith.constant 0 : index
    %c0_9 = arith.constant 0 : index
    %6 = vector.load %arg4[%c0_7, %c0_8, %c0_9] : memref<1x64x32xf32, #tpu.memory_space<vmem>>, vector<1x64x32xf32>
    %7 = vector.shape_cast %6 : vector<1x64x32xf32> to vector<64x32xf32>
    %c0_10 = arith.constant 0 : index
    %c0_11 = arith.constant 0 : index
    %c0_12 = arith.constant 0 : index
    %8 = vector.load %arg5[%c0_10, %c0_11, %c0_12] : memref<1x8x64xf32, #tpu.memory_space<vmem>>, vector<1x8x64xf32>
    %9 = vector.shape_cast %8 : vector<1x8x64xf32> to vector<8x64xf32>
    %c0_13 = arith.constant 0 : index
    %c0_14 = arith.constant 0 : index
    %10 = vector.load %arg6[%c0_13, %c0_14] : memref<32x32xf32, #tpu.memory_space<vmem>>, vector<32x32xf32>
    %11 = arith.truncf %3 : vector<8x32xf32> to vector<8x32xbf16>
    %12 = arith.truncf %10 : vector<32x32xf32> to vector<32x32xbf16>
    %cst = arith.constant dense<0.000000e+00> : vector<8x32xf32>
    %13 = tpu.matmul %11, %12, %cst {dimension_numbers = #tpu.dot_dimension_numbers<[1], [0], [0], [1], [0, 0, 1, 1], [], []>} : vector<8x32xbf16>, vector<32x32xbf16>, vector<8x32xf32> -> vector<8x32xf32>
    %c0_15 = arith.constant 0 : index
    %c0_16 = arith.constant 0 : index
    %14 = vector.load %arg7[%c0_15, %c0_16] : memref<1x32xf32, #tpu.memory_space<vmem>>, vector<1x32xf32>
    %15 = vector.broadcast %14 : vector<1x32xf32> to vector<8x32xf32>
    %16 = arith.addf %13, %15 : vector<8x32xf32>
    %c0_17 = arith.constant 0 : index
    %c0_18 = arith.constant 0 : index
    %17 = vector.load %arg8[%c0_17, %c0_18] : memref<32x32xf32, #tpu.memory_space<vmem>>, vector<32x32xf32>
    %18 = arith.truncf %5 : vector<64x32xf32> to vector<64x32xbf16>
    %19 = arith.truncf %17 : vector<32x32xf32> to vector<32x32xbf16>
    %cst_19 = arith.constant dense<0.000000e+00> : vector<64x32xf32>
    %20 = tpu.matmul %18, %19, %cst_19 {dimension_numbers = #tpu.dot_dimension_numbers<[1], [0], [0], [1], [0, 0, 1, 1], [], []>} : vector<64x32xbf16>, vector<32x32xbf16>, vector<64x32xf32> -> vector<64x32xf32>
    %c0_20 = arith.constant 0 : index
    %c0_21 = arith.constant 0 : index
    %21 = vector.load %arg9[%c0_20, %c0_21] : memref<1x32xf32, #tpu.memory_space<vmem>>, vector<1x32xf32>
    %22 = vector.broadcast %21 : vector<1x32xf32> to vector<64x32xf32>
    %23 = arith.addf %20, %22 : vector<64x32xf32>
    %c0_22 = arith.constant 0 : index
    %c0_23 = arith.constant 0 : index
    %24 = vector.load %arg10[%c0_22, %c0_23] : memref<32x32xf32, #tpu.memory_space<vmem>>, vector<32x32xf32>
    %25 = arith.truncf %7 : vector<64x32xf32> to vector<64x32xbf16>
    %26 = arith.truncf %24 : vector<32x32xf32> to vector<32x32xbf16>
    %cst_24 = arith.constant dense<0.000000e+00> : vector<64x32xf32>
    %27 = tpu.matmul %25, %26, %cst_24 {dimension_numbers = #tpu.dot_dimension_numbers<[1], [0], [0], [1], [0, 0, 1, 1], [], []>} : vector<64x32xbf16>, vector<32x32xbf16>, vector<64x32xf32> -> vector<64x32xf32>
    %c0_25 = arith.constant 0 : index
    %c0_26 = arith.constant 0 : index
    %28 = vector.load %arg11[%c0_25, %c0_26] : memref<1x32xf32, #tpu.memory_space<vmem>>, vector<1x32xf32>
    %29 = vector.broadcast %28 : vector<1x32xf32> to vector<64x32xf32>
    %30 = arith.addf %27, %29 : vector<64x32xf32>
    %31 = vector.extract_strided_slice %16 {offsets = [0, 0], sizes = [8, 8], strides = [1, 1]} : vector<8x32xf32> to vector<8x8xf32>
    %32 = vector.extract_strided_slice %23 {offsets = [0, 0], sizes = [64, 8], strides = [1, 1]} : vector<64x32xf32> to vector<64x8xf32>
    %33 = vector.extract_strided_slice %30 {offsets = [0, 0], sizes = [64, 8], strides = [1, 1]} : vector<64x32xf32> to vector<64x8xf32>
    %34 = arith.truncf %31 : vector<8x8xf32> to vector<8x8xbf16>
    %35 = arith.truncf %32 : vector<64x8xf32> to vector<64x8xbf16>
    %cst_27 = arith.constant dense<0.000000e+00> : vector<8x64xf32>
    %36 = tpu.matmul %34, %35, %cst_27 {dimension_numbers = #tpu.dot_dimension_numbers<[1], [1], [0], [0], [0, 0, 1, 0], [], []>} : vector<8x8xbf16>, vector<64x8xbf16>, vector<8x64xf32> -> vector<8x64xf32>
    %cst_28 = arith.constant 0.353553385 : f32
    %37 = vector.broadcast %cst_28 : f32 to vector<8x64xf32>
    %38 = arith.mulf %36, %37 : vector<8x64xf32>
    %39 = arith.addf %38, %9 : vector<8x64xf32>
    %cst_29 = arith.constant dense<0xFF800000> : vector<8xf32>
    %40 = vector.multi_reduction <maximumf>, %39, %cst_29 [1] : vector<8x64xf32> to vector<8xf32>
    %41 = vector.shape_cast %40 : vector<8xf32> to vector<8x1xf32>
    %42 = vector.broadcast %41 : vector<8x1xf32> to vector<8x64xf32>
    %43 = arith.subf %39, %42 : vector<8x64xf32>
    %44 = math.exp %43 : vector<8x64xf32>
    %cst_30 = arith.constant dense<0.000000e+00> : vector<8xf32>
    %45 = vector.multi_reduction <add>, %44, %cst_30 [1] : vector<8x64xf32> to vector<8xf32>
    %46 = vector.shape_cast %45 : vector<8xf32> to vector<8x1xf32>
    %47 = tpu.reciprocal %46 {approx = true} : vector<8x1xf32> -> vector<8x1xf32>
    %48 = arith.truncf %44 : vector<8x64xf32> to vector<8x64xbf16>
    %49 = arith.truncf %33 : vector<64x8xf32> to vector<64x8xbf16>
    %cst_31 = arith.constant dense<0.000000e+00> : vector<8x8xf32>
    %50 = tpu.matmul %48, %49, %cst_31 {dimension_numbers = #tpu.dot_dimension_numbers<[1], [0], [0], [1], [0, 0, 1, 1], [], []>} : vector<8x64xbf16>, vector<64x8xbf16>, vector<8x8xf32> -> vector<8x8xf32>
    %51 = vector.broadcast %47 : vector<8x1xf32> to vector<8x8xf32>
    %52 = arith.mulf %50, %51 : vector<8x8xf32>
    %53 = vector.extract_strided_slice %16 {offsets = [0, 8], sizes = [8, 8], strides = [1, 1]} : vector<8x32xf32> to vector<8x8xf32>
    %54 = vector.extract_strided_slice %23 {offsets = [0, 8], sizes = [64, 8], strides = [1, 1]} : vector<64x32xf32> to vector<64x8xf32>
    %55 = vector.extract_strided_slice %30 {offsets = [0, 8], sizes = [64, 8], strides = [1, 1]} : vector<64x32xf32> to vector<64x8xf32>
    %56 = arith.truncf %53 : vector<8x8xf32> to vector<8x8xbf16>
    %57 = arith.truncf %54 : vector<64x8xf32> to vector<64x8xbf16>
    %cst_32 = arith.constant dense<0.000000e+00> : vector<8x64xf32>
    %58 = tpu.matmul %56, %57, %cst_32 {dimension_numbers = #tpu.dot_dimension_numbers<[1], [1], [0], [0], [0, 0, 1, 0], [], []>} : vector<8x8xbf16>, vector<64x8xbf16>, vector<8x64xf32> -> vector<8x64xf32>
    %cst_33 = arith.constant 0.353553385 : f32
    %59 = vector.broadcast %cst_33 : f32 to vector<8x64xf32>
    %60 = arith.mulf %58, %59 : vector<8x64xf32>
    %61 = arith.addf %60, %9 : vector<8x64xf32>
    %cst_34 = arith.constant dense<0xFF800000> : vector<8xf32>
    %62 = vector.multi_reduction <maximumf>, %61, %cst_34 [1] : vector<8x64xf32> to vector<8xf32>
    %63 = vector.shape_cast %62 : vector<8xf32> to vector<8x1xf32>
    %64 = vector.broadcast %63 : vector<8x1xf32> to vector<8x64xf32>
    %65 = arith.subf %61, %64 : vector<8x64xf32>
    %66 = math.exp %65 : vector<8x64xf32>
    %cst_35 = arith.constant dense<0.000000e+00> : vector<8xf32>
    %67 = vector.multi_reduction <add>, %66, %cst_35 [1] : vector<8x64xf32> to vector<8xf32>
    %68 = vector.shape_cast %67 : vector<8xf32> to vector<8x1xf32>
    %69 = tpu.reciprocal %68 {approx = true} : vector<8x1xf32> -> vector<8x1xf32>
    %70 = arith.truncf %66 : vector<8x64xf32> to vector<8x64xbf16>
    %71 = arith.truncf %55 : vector<64x8xf32> to vector<64x8xbf16>
    %cst_36 = arith.constant dense<0.000000e+00> : vector<8x8xf32>
    %72 = tpu.matmul %70, %71, %cst_36 {dimension_numbers = #tpu.dot_dimension_numbers<[1], [0], [0], [1], [0, 0, 1, 1], [], []>} : vector<8x64xbf16>, vector<64x8xbf16>, vector<8x8xf32> -> vector<8x8xf32>
    %73 = vector.broadcast %69 : vector<8x1xf32> to vector<8x8xf32>
    %74 = arith.mulf %72, %73 : vector<8x8xf32>
    %75 = vector.extract_strided_slice %16 {offsets = [0, 16], sizes = [8, 8], strides = [1, 1]} : vector<8x32xf32> to vector<8x8xf32>
    %76 = vector.extract_strided_slice %23 {offsets = [0, 16], sizes = [64, 8], strides = [1, 1]} : vector<64x32xf32> to vector<64x8xf32>
    %77 = vector.extract_strided_slice %30 {offsets = [0, 16], sizes = [64, 8], strides = [1, 1]} : vector<64x32xf32> to vector<64x8xf32>
    %78 = arith.truncf %75 : vector<8x8xf32> to vector<8x8xbf16>
    %79 = arith.truncf %76 : vector<64x8xf32> to vector<64x8xbf16>
    %cst_37 = arith.constant dense<0.000000e+00> : vector<8x64xf32>
    %80 = tpu.matmul %78, %79, %cst_37 {dimension_numbers = #tpu.dot_dimension_numbers<[1], [1], [0], [0], [0, 0, 1, 0], [], []>} : vector<8x8xbf16>, vector<64x8xbf16>, vector<8x64xf32> -> vector<8x64xf32>
    %cst_38 = arith.constant 0.353553385 : f32
    %81 = vector.broadcast %cst_38 : f32 to vector<8x64xf32>
    %82 = arith.mulf %80, %81 : vector<8x64xf32>
    %83 = arith.addf %82, %9 : vector<8x64xf32>
    %cst_39 = arith.constant dense<0xFF800000> : vector<8xf32>
    %84 = vector.multi_reduction <maximumf>, %83, %cst_39 [1] : vector<8x64xf32> to vector<8xf32>
    %85 = vector.shape_cast %84 : vector<8xf32> to vector<8x1xf32>
    %86 = vector.broadcast %85 : vector<8x1xf32> to vector<8x64xf32>
    %87 = arith.subf %83, %86 : vector<8x64xf32>
    %88 = math.exp %87 : vector<8x64xf32>
    %cst_40 = arith.constant dense<0.000000e+00> : vector<8xf32>
    %89 = vector.multi_reduction <add>, %88, %cst_40 [1] : vector<8x64xf32> to vector<8xf32>
    %90 = vector.shape_cast %89 : vector<8xf32> to vector<8x1xf32>
    %91 = tpu.reciprocal %90 {approx = true} : vector<8x1xf32> -> vector<8x1xf32>
    %92 = arith.truncf %88 : vector<8x64xf32> to vector<8x64xbf16>
    %93 = arith.truncf %77 : vector<64x8xf32> to vector<64x8xbf16>
    %cst_41 = arith.constant dense<0.000000e+00> : vector<8x8xf32>
    %94 = tpu.matmul %92, %93, %cst_41 {dimension_numbers = #tpu.dot_dimension_numbers<[1], [0], [0], [1], [0, 0, 1, 1], [], []>} : vector<8x64xbf16>, vector<64x8xbf16>, vector<8x8xf32> -> vector<8x8xf32>
    %95 = vector.broadcast %91 : vector<8x1xf32> to vector<8x8xf32>
    %96 = arith.mulf %94, %95 : vector<8x8xf32>
    %97 = vector.extract_strided_slice %16 {offsets = [0, 24], sizes = [8, 8], strides = [1, 1]} : vector<8x32xf32> to vector<8x8xf32>
    %98 = vector.extract_strided_slice %23 {offsets = [0, 24], sizes = [64, 8], strides = [1, 1]} : vector<64x32xf32> to vector<64x8xf32>
    %99 = vector.extract_strided_slice %30 {offsets = [0, 24], sizes = [64, 8], strides = [1, 1]} : vector<64x32xf32> to vector<64x8xf32>
    %100 = arith.truncf %97 : vector<8x8xf32> to vector<8x8xbf16>
    %101 = arith.truncf %98 : vector<64x8xf32> to vector<64x8xbf16>
    %cst_42 = arith.constant dense<0.000000e+00> : vector<8x64xf32>
    %102 = tpu.matmul %100, %101, %cst_42 {dimension_numbers = #tpu.dot_dimension_numbers<[1], [1], [0], [0], [0, 0, 1, 0], [], []>} : vector<8x8xbf16>, vector<64x8xbf16>, vector<8x64xf32> -> vector<8x64xf32>
    %cst_43 = arith.constant 0.353553385 : f32
    %103 = vector.broadcast %cst_43 : f32 to vector<8x64xf32>
    %104 = arith.mulf %102, %103 : vector<8x64xf32>
    %105 = arith.addf %104, %9 : vector<8x64xf32>
    %cst_44 = arith.constant dense<0xFF800000> : vector<8xf32>
    %106 = vector.multi_reduction <maximumf>, %105, %cst_44 [1] : vector<8x64xf32> to vector<8xf32>
    %107 = vector.shape_cast %106 : vector<8xf32> to vector<8x1xf32>
    %108 = vector.broadcast %107 : vector<8x1xf32> to vector<8x64xf32>
    %109 = arith.subf %105, %108 : vector<8x64xf32>
    %110 = math.exp %109 : vector<8x64xf32>
    %cst_45 = arith.constant dense<0.000000e+00> : vector<8xf32>
    %111 = vector.multi_reduction <add>, %110, %cst_45 [1] : vector<8x64xf32> to vector<8xf32>
    %112 = vector.shape_cast %111 : vector<8xf32> to vector<8x1xf32>
    %113 = tpu.reciprocal %112 {approx = true} : vector<8x1xf32> -> vector<8x1xf32>
    %114 = arith.truncf %110 : vector<8x64xf32> to vector<8x64xbf16>
    %115 = arith.truncf %99 : vector<64x8xf32> to vector<64x8xbf16>
    %cst_46 = arith.constant dense<0.000000e+00> : vector<8x8xf32>
    %116 = tpu.matmul %114, %115, %cst_46 {dimension_numbers = #tpu.dot_dimension_numbers<[1], [0], [0], [1], [0, 0, 1, 1], [], []>} : vector<8x64xbf16>, vector<64x8xbf16>, vector<8x8xf32> -> vector<8x8xf32>
    %117 = vector.broadcast %113 : vector<8x1xf32> to vector<8x8xf32>
    %118 = arith.mulf %116, %117 : vector<8x8xf32>
    %119 = tpu.concatenate %52, %74, %96, %118 in 1 : vector<8x8xf32>, vector<8x8xf32>, vector<8x8xf32>, vector<8x8xf32> -> vector<8x32xf32>
    %c0_47 = arith.constant 0 : index
    %c0_48 = arith.constant 0 : index
    %120 = vector.load %arg12[%c0_47, %c0_48] : memref<32x32xf32, #tpu.memory_space<vmem>>, vector<32x32xf32>
    %121 = arith.truncf %119 : vector<8x32xf32> to vector<8x32xbf16>
    %122 = arith.truncf %120 : vector<32x32xf32> to vector<32x32xbf16>
    %cst_49 = arith.constant dense<0.000000e+00> : vector<8x32xf32>
    %123 = tpu.matmul %121, %122, %cst_49 {dimension_numbers = #tpu.dot_dimension_numbers<[1], [0], [0], [1], [0, 0, 1, 1], [], []>} : vector<8x32xbf16>, vector<32x32xbf16>, vector<8x32xf32> -> vector<8x32xf32>
    %c0_50 = arith.constant 0 : index
    %c0_51 = arith.constant 0 : index
    %124 = vector.load %arg13[%c0_50, %c0_51] : memref<1x32xf32, #tpu.memory_space<vmem>>, vector<1x32xf32>
    %125 = vector.broadcast %124 : vector<1x32xf32> to vector<8x32xf32>
    %126 = arith.addf %123, %125 : vector<8x32xf32>
    %127 = arith.addf %1, %126 : vector<8x32xf32>
    %c0_52 = arith.constant 0 : index
    %c0_53 = arith.constant 0 : index
    %128 = vector.load %arg14[%c0_52, %c0_53] : memref<1x32xf32, #tpu.memory_space<vmem>>, vector<1x32xf32>
    %c0_54 = arith.constant 0 : index
    %c0_55 = arith.constant 0 : index
    %129 = vector.load %arg15[%c0_54, %c0_55] : memref<1x32xf32, #tpu.memory_space<vmem>>, vector<1x32xf32>
    %cst_56 = arith.constant dense<0.000000e+00> : vector<8xf32>
    %130 = vector.multi_reduction <add>, %127, %cst_56 [1] : vector<8x32xf32> to vector<8xf32>
    %131 = vector.shape_cast %130 : vector<8xf32> to vector<8x1xf32>
    %cst_57 = arith.constant 3.200000e+01 : f32
    %132 = vector.broadcast %cst_57 : f32 to vector<8x1xf32>
    %133 = arith.divf %131, %132 : vector<8x1xf32>
    %134 = vector.broadcast %133 : vector<8x1xf32> to vector<8x32xf32>
    %135 = arith.subf %127, %134 : vector<8x32xf32>
    %136 = arith.mulf %135, %135 : vector<8x32xf32>
    %cst_58 = arith.constant dense<0.000000e+00> : vector<8xf32>
    %137 = vector.multi_reduction <add>, %136, %cst_58 [1] : vector<8x32xf32> to vector<8xf32>
    %138 = vector.shape_cast %137 : vector<8xf32> to vector<8x1xf32>
    %cst_59 = arith.constant 3.200000e+01 : f32
    %139 = vector.broadcast %cst_59 : f32 to vector<8x1xf32>
    %140 = arith.divf %138, %139 : vector<8x1xf32>
    %141 = vector.broadcast %133 : vector<8x1xf32> to vector<8x32xf32>
    %142 = arith.subf %127, %141 : vector<8x32xf32>
    %cst_60 = arith.constant 9.99999974E-6 : f32
    %143 = vector.broadcast %cst_60 : f32 to vector<8x1xf32>
    %144 = arith.addf %140, %143 : vector<8x1xf32>
    %145 = math.rsqrt %144 : vector<8x1xf32>
    %146 = vector.broadcast %145 : vector<8x1xf32> to vector<8x32xf32>
    %147 = arith.mulf %142, %146 : vector<8x32xf32>
    %148 = vector.broadcast %128 : vector<1x32xf32> to vector<8x32xf32>
    %149 = arith.mulf %147, %148 : vector<8x32xf32>
    %150 = vector.broadcast %129 : vector<1x32xf32> to vector<8x32xf32>
    %151 = arith.addf %149, %150 : vector<8x32xf32>
    %c0_61 = arith.constant 0 : index
    %c0_62 = arith.constant 0 : index
    %c0_63 = arith.constant 0 : index
    %152 = vector.load %arg16[%c0_61, %c0_62, %c0_63] : memref<1x8x32xf32, #tpu.memory_space<vmem>>, vector<1x8x32xf32>
    %153 = vector.shape_cast %152 : vector<1x8x32xf32> to vector<8x32xf32>
    %154 = vector.shape_cast %151 : vector<8x32xf32> to vector<1x8x32xf32>
    tpu.vector_store %arg16[%c0_61, %c0_62, %c0_63], %154 {strides = array<i32>} : memref<1x8x32xf32, #tpu.memory_space<vmem>>, vector<1x8x32xf32>,
    return
  }
  func.func @transform_0(%arg0: i32) -> (i32, i32, i32) {
    %c0_i32 = arith.constant 0 : i32
    %c0_i32_0 = arith.constant 0 : i32
    %c0_i32_1 = arith.constant 0 : i32
    return %arg0, %c0_i32, %c0_i32_0 : i32, i32, i32
  }
  func.func @transform_1(%arg0: i32) -> (i32, i32) {
    %c0_i32 = arith.constant 0 : i32
    %c0_i32_0 = arith.constant 0 : i32
    %c0_i32_1 = arith.constant 0 : i32
    return %c0_i32, %c0_i32_0 : i32, i32
  }
  func.func @transform_2(%arg0: i32) -> (i32, i32, i32) {
    %c0_i32 = arith.constant 0 : i32
    %c0_i32_0 = arith.constant 0 : i32
    %c0_i32_1 = arith.constant 0 : i32
    return %arg0, %c0_i32, %c0_i32_0 : i32, i32, i32
  }
  func.func @transform_3(%arg0: i32) -> (i32, i32, i32) {
    %c0_i32 = arith.constant 0 : i32
    %c0_i32_0 = arith.constant 0 : i32
    %c0_i32_1 = arith.constant 0 : i32
    return %arg0, %c0_i32, %c0_i32_0 : i32, i32, i32
  }
  func.func @transform_4(%arg0: i32) -> (i32, i32, i32) {
    %c0_i32 = arith.constant 0 : i32
    %c0_i32_0 = arith.constant 0 : i32
    %c0_i32_1 = arith.constant 0 : i32
    return %arg0, %c0_i32, %c0_i32_0 : i32, i32, i32
  }
  func.func @transform_5(%arg0: i32) -> (i32, i32) {
    %c0_i32 = arith.constant 0 : i32
    %c0_i32_0 = arith.constant 0 : i32
    %c0_i32_1 = arith.constant 0 : i32
    return %c0_i32, %c0_i32_0 : i32, i32
  }
  func.func @transform_6(%arg0: i32) -> (i32, i32) {
    %c0_i32 = arith.constant 0 : i32
    %c0_i32_0 = arith.constant 0 : i32
    %c0_i32_1 = arith.constant 0 : i32
    return %c0_i32, %c0_i32_0 : i32, i32
  }
  func.func @transform_7(%arg0: i32) -> (i32, i32) {
    %c0_i32 = arith.constant 0 : i32
    %c0_i32_0 = arith.constant 0 : i32
    %c0_i32_1 = arith.constant 0 : i32
    return %c0_i32, %c0_i32_0 : i32, i32
  }
  func.func @transform_8(%arg0: i32) -> (i32, i32) {
    %c0_i32 = arith.constant 0 : i32
    %c0_i32_0 = arith.constant 0 : i32
    %c0_i32_1 = arith.constant 0 : i32
    return %c0_i32, %c0_i32_0 : i32, i32
  }
  func.func @transform_9(%arg0: i32) -> (i32, i32) {
    %c0_i32 = arith.constant 0 : i32
    %c0_i32_0 = arith.constant 0 : i32
    %c0_i32_1 = arith.constant 0 : i32
    return %c0_i32, %c0_i32_0 : i32, i32
  }
  func.func @transform_10(%arg0: i32) -> (i32, i32) {
    %c0_i32 = arith.constant 0 : i32
    %c0_i32_0 = arith.constant 0 : i32
    %c0_i32_1 = arith.constant 0 : i32
    return %c0_i32, %c0_i32_0 : i32, i32
  }
  func.func @transform_11(%arg0: i32) -> (i32, i32) {
    %c0_i32 = arith.constant 0 : i32
    %c0_i32_0 = arith.constant 0 : i32
    %c0_i32_1 = arith.constant 0 : i32
    return %c0_i32, %c0_i32_0 : i32, i32
  }
  func.func @transform_12(%arg0: i32) -> (i32, i32) {
    %c0_i32 = arith.constant 0 : i32
    %c0_i32_0 = arith.constant 0 : i32
    %c0_i32_1 = arith.constant 0 : i32
    return %c0_i32, %c0_i32_0 : i32, i32
  }
  func.func @transform_13(%arg0: i32) -> (i32, i32) {
    %c0_i32 = arith.constant 0 : i32
    %c0_i32_0 = arith.constant 0 : i32
    %c0_i32_1 = arith.constant 0 : i32
    return %c0_i32, %c0_i32_0 : i32, i32
  }
  func.func @transform_14(%arg0: i32) -> (i32, i32) {
    %c0_i32 = arith.constant 0 : i32
    %c0_i32_0 = arith.constant 0 : i32
    %c0_i32_1 = arith.constant 0 : i32
    return %c0_i32, %c0_i32_0 : i32, i32
  }
  func.func @transform_15(%arg0: i32) -> (i32, i32, i32) {
    %c0_i32 = arith.constant 0 : i32
    %c0_i32_0 = arith.constant 0 : i32
    %c0_i32_1 = arith.constant 0 : i32
    return %arg0, %c0_i32, %c0_i32_0 : i32, i32, i32
  }
}

</mosaic_0001>

<bundles_post_ra>
// kernel: _lambda_.22
= control target key start
LH: loop header
LB: loop body
LE: loop exit
PB: predicated region body
PF: predicated region fallthrough
CT: control target
= control target key end

     0   :  { %vm124_vm0 = vcmask 261120   ;;  %s1298_s1 = inlined_call_operand.vmem [shape: f32[32,32], index: 1, kind: input, shape index: {}]   ;;  %s1299_s0 = inlined_call_operand.vmem [shape: f32[512,32], index: 0, kind: input, shape index: {}]   ;;  %s1300_s2 = inlined_call_operand.vmem [shape: f32[1,32], index: 2, kind: input, shape index: {}]   ;;  %s1301_s3 = inlined_call_operand.vmem [shape: f32[512,32], index: 3, kind: output, shape index: {}]  }
   0x1   :  { %v79_v0 = vld [vmem:[%s1298_s1] sm:$0xff]  ;;  %v80_v1 = vld [vmem:[%s1298_s1 + $0x8] sm:$0xff]  ;;  %v81_v2 = vld [vmem:[%s1298_s1 + $0x10] sm:$0xff] }
   0x2   :  { %v115_v3 = vpack.c.bf16 %v80_v1, %v79_v0  ;;  %v82_v4 = vld [vmem:[%s1298_s1 + $0x18] sm:$0xff]  ;;  %v15_v5 = vld [vmem:[%s1299_s0] sm:$0xff]  ;;  %v16_v6 = vld [vmem:[%s1299_s0 + $0x8] sm:$0xff] }
   0x3   :  { %v116_v7 = vpack.c.bf16 %v82_v4, %v81_v2  ;;  %v83_v8 = vpack.c.bf16 %v16_v6, %v15_v5  ;;  %v47_v9 = vld [vmem:[%s1299_s0 + $0x100] sm:$0xff]  ;;  %v48_v10 = vld [vmem:[%s1299_s0 + $0x108] sm:$0xff]  ;;  %v17_v12 = vld [vmem:[%s1299_s0 + $0x10] sm:$0xff] }
   0x4   :  { %645 = vmatprep.subr.bf16.mxu0 %v115_v3  ;;  %713 = vmatprep.subr.bf16.mxu1 %v115_v3  ;;  %v99_v11 = vpack.c.bf16 %v48_v10, %v47_v9  ;;  %v18_v13 = vld [vmem:[%s1299_s0 + $0x18] sm:$0xff]  ;;  %v49_v14 = vld [vmem:[%s1299_s0 + $0x110] sm:$0xff]  ;;  %v19_v16 = vld [vmem:[%s1299_s0 + $0x20] sm:$0xff] }
   0x5   :  { %646 = vmatpush3.bf16.msra.mxu0 %v115_v3  ;;  %715 = vmatpush3.bf16.msra.mxu1 %v115_v3  ;;  %v50_v15 = vld [vmem:[%s1299_s0 + $0x118] sm:$0xff]  ;;  %v20_v17 = vld [vmem:[%s1299_s0 + $0x28] sm:$0xff]  ;;  %v51_v18 = vld [vmem:[%s1299_s0 + $0x120] sm:$0xff]  ;;  %v84_v20 = vpack.c.bf16 %v18_v13, %v17_v12 }
   0x6   :  { %647 = vmatprep.subr.bf16.mxu0 %v116_v7  ;;  %714 = vmatprep.subr.bf16.mxu1 %v116_v7  ;;  %v52_v19 = vld [vmem:[%s1299_s0 + $0x128] sm:$0xff]  ;;  %v100_v21 = vpack.c.bf16 %v50_v15, %v49_v14  ;;  %v85_v22 = vpack.c.bf16 %v20_v17, %v19_v16  ;;  %v21_v24 = vld [vmem:[%s1299_s0 + $0x30] sm:$0xff]  ;;  %v22_v25 = vld [vmem:[%s1299_s0 + $0x38] sm:$0xff] }
   0x7   :  { %649 = vmatprep.mubr.msk.bf16.mxu0 %vm124_vm0, %v83_v8  ;;  %681 = vmatprep.mubr.msk.bf16.mxu1 %vm124_vm0, %v99_v11  ;;  %v101_v23 = vpack.c.bf16 %v52_v19, %v51_v18  ;;  %v53_v26 = vld [vmem:[%s1299_s0 + $0x130] sm:$0xff]  ;;  %v54_v27 = vld [vmem:[%s1299_s0 + $0x138] sm:$0xff]  ;;  %v23_v28 = vld [vmem:[%s1299_s0 + $0x40] sm:$0xff]  ;;  %v86_v32 = vpack.c.bf16 %v22_v25, %v21_v24 }
   0x8   :  { %v24_v29 = vld [vmem:[%s1299_s0 + $0x48] sm:$0xff]  ;;  %v55_v30 = vld [vmem:[%s1299_s0 + $0x140] sm:$0xff]  ;;  %v102_v33 = vpack.c.bf16 %v54_v27, %v53_v26  ;;  %v25_v36 = vld [vmem:[%s1299_s0 + $0x50] sm:$0xff] }
   0x9   :  { %648 = vmatpush3.bf16.msra.mxu0 %v116_v7  ;;  %716 = vmatpush3.bf16.msra.mxu1 %v116_v7  ;;  %v56_v31 = vld [vmem:[%s1299_s0 + $0x148] sm:$0xff]  ;;  %v87_v34 = vpack.c.bf16 %v24_v29, %v23_v28  ;;  %v26_v37 = vld [vmem:[%s1299_s0 + $0x58] sm:$0xff]  ;;  %v57_v38 = vld [vmem:[%s1299_s0 + $0x150] sm:$0xff] }
   0xa   :  { %v103_v35 = vpack.c.bf16 %v56_v31, %v55_v30  ;;  %v58_v39 = vld [vmem:[%s1299_s0 + $0x158] sm:$0xff]  ;;  %v27_v40 = vld [vmem:[%s1299_s0 + $0x60] sm:$0xff]  ;;  %v28_v41 = vld [vmem:[%s1299_s0 + $0x68] sm:$0xff]  ;;  %v88_v44 = vpack.c.bf16 %v26_v37, %v25_v36 }
   0xb   :  { %v59_v42 = vld [vmem:[%s1299_s0 + $0x160] sm:$0xff]  ;;  %v60_v43 = vld [vmem:[%s1299_s0 + $0x168] sm:$0xff]  ;;  %v104_v45 = vpack.c.bf16 %v58_v39, %v57_v38  ;;  %v89_v46 = vpack.c.bf16 %v28_v41, %v27_v40  ;;  %v29_v48 = vld [vmem:[%s1299_s0 + $0x70] sm:$0xff] }
   0xc   :  { %650 = vmatmul.mubr.msk.bf16.vlgmr.msra.gmra.mrb[0].mxu0 %vm124_vm0, %v84_v20  ;;  %682 = vmatmul.mubr.msk.bf16.vlgmr.msra.gmra.mrb[0].mxu1 %vm124_vm0, %v100_v21  ;;  %v105_v47 = vpack.c.bf16 %v60_v43, %v59_v42  ;;  %v30_v49 = vld [vmem:[%s1299_s0 + $0x78] sm:$0xff]  ;;  %v61_v50 = vld [vmem:[%s1299_s0 + $0x170] sm:$0xff]  ;;  %v31_v52 = vld [vmem:[%s1299_s0 + $0x80] sm:$0xff] }
   0xd   :  { %653 = vmatprep.mubr.msk.bf16.mxu0 %vm124_vm0, %v85_v22  ;;  %685 = vmatprep.mubr.msk.bf16.mxu1 %vm124_vm0, %v101_v23  ;;  %v62_v51 = vld [vmem:[%s1299_s0 + $0x178] sm:$0xff]  ;;  %v32_v53 = vld [vmem:[%s1299_s0 + $0x88] sm:$0xff]  ;;  %v63_v54 = vld [vmem:[%s1299_s0 + $0x180] sm:$0xff]  ;;  %v90_v56 = vpack.c.bf16 %v30_v49, %v29_v48 }
   0xe   :  { %v64_v55 = vld [vmem:[%s1299_s0 + $0x188] sm:$0xff]  ;;  %v106_v57 = vpack.c.bf16 %v62_v51, %v61_v50  ;;  %v91_v58 = vpack.c.bf16 %v32_v53, %v31_v52  ;;  %v33_v60 = vld [vmem:[%s1299_s0 + $0x90] sm:$0xff]  ;;  %v34_v61 = vld [vmem:[%s1299_s0 + $0x98] sm:$0xff] }
   0xf   :  { %v107_v59 = vpack.c.bf16 %v64_v55, %v63_v54  ;;  %v65_v62 = vld [vmem:[%s1299_s0 + $0x190] sm:$0xff]  ;;  %v66_v63 = vld [vmem:[%s1299_s0 + $0x198] sm:$0xff]  ;;  %v35_v0 = vld [vmem:[%s1299_s0 + $0xa0] sm:$0xff]  ;;  %v92_v4 = vpack.c.bf16 %v34_v61, %v33_v60 }
  0x10   :  { %v36_v1 = vld [vmem:[%s1299_s0 + $0xa8] sm:$0xff]  ;;  %v67_v2 = vld [vmem:[%s1299_s0 + $0x1a0] sm:$0xff]  ;;  %v108_v5 = vpack.c.bf16 %v66_v63, %v65_v62  ;;  %v37_v8 = vld [vmem:[%s1299_s0 + $0xb0] sm:$0xff] }
  0x11   :  { %v68_v3 = vld [vmem:[%s1299_s0 + $0x1a8] sm:$0xff]  ;;  %v93_v6 = vpack.c.bf16 %v36_v1, %v35_v0  ;;  %v38_v9 = vld [vmem:[%s1299_s0 + $0xb8] sm:$0xff]  ;;  %v69_v10 = vld [vmem:[%s1299_s0 + $0x1b0] sm:$0xff] }
  0x12   :  { %v109_v7 = vpack.c.bf16 %v68_v3, %v67_v2  ;;  %v70_v11 = vld [vmem:[%s1299_s0 + $0x1b8] sm:$0xff]  ;;  %v39_v12 = vld [vmem:[%s1299_s0 + $0xc0] sm:$0xff]  ;;  %v40_v13 = vld [vmem:[%s1299_s0 + $0xc8] sm:$0xff]  ;;  %v94_v16 = vpack.c.bf16 %v38_v9, %v37_v8 }
  0x13   :  { %v71_v14 = vld [vmem:[%s1299_s0 + $0x1c0] sm:$0xff]  ;;  %v72_v15 = vld [vmem:[%s1299_s0 + $0x1c8] sm:$0xff]  ;;  %v110_v17 = vpack.c.bf16 %v70_v11, %v69_v10  ;;  %v95_v18 = vpack.c.bf16 %v40_v13, %v39_v12  ;;  %v41_v20 = vld [vmem:[%s1299_s0 + $0xd0] sm:$0xff] }
  0x14   :  { %654 = vmatmul.mubr.msk.bf16.gmra.mrb[4].mxu0 %vm124_vm0, %v86_v32  ;;  %686 = vmatmul.mubr.msk.bf16.gmra.mrb[4].mxu1 %vm124_vm0, %v102_v33  ;;  %v111_v19 = vpack.c.bf16 %v72_v15, %v71_v14  ;;  %v42_v21 = vld [vmem:[%s1299_s0 + $0xd8] sm:$0xff]  ;;  %v73_v22 = vld [vmem:[%s1299_s0 + $0x1d0] sm:$0xff]  ;;  %v43_v24 = vld [vmem:[%s1299_s0 + $0xe0] sm:$0xff] }
  0x15   :  { %657 = vmatprep.mubr.msk.bf16.mxu0 %vm124_vm0, %v87_v34  ;;  %689 = vmatprep.mubr.msk.bf16.mxu1 %vm124_vm0, %v103_v35  ;;  %v74_v23 = vld [vmem:[%s1299_s0 + $0x1d8] sm:$0xff]  ;;  %v44_v25 = vld [vmem:[%s1299_s0 + $0xe8] sm:$0xff]  ;;  %v75_v26 = vld [vmem:[%s1299_s0 + $0x1e0] sm:$0xff]  ;;  %v96_v28 = vpack.c.bf16 %v42_v21, %v41_v20 }
  0x16   :  { %v76_v27 = vld [vmem:[%s1299_s0 + $0x1e8] sm:$0xff]  ;;  %v112_v29 = vpack.c.bf16 %v74_v23, %v73_v22  ;;  %v97_v30 = vpack.c.bf16 %v44_v25, %v43_v24  ;;  %v45_v32 = vld [vmem:[%s1299_s0 + $0xf0] sm:$0xff]  ;;  %v46_v33 = vld [vmem:[%s1299_s0 + $0xf8] sm:$0xff] }
  0x17   :  { %v113_v31 = vpack.c.bf16 %v76_v27, %v75_v26  ;;  %v77_v34 = vld [vmem:[%s1299_s0 + $0x1f0] sm:$0xff]  ;;  %v78_v35 = vld [vmem:[%s1299_s0 + $0x1f8] sm:$0xff]  ;;  %v98_v36 = vpack.c.bf16 %v46_v33, %v45_v32  ;;  %v976_v38 = vld [vmem:[%s1300_s2] ss:$0 sm:$0xff] }
  0x18   :  { %v114_v37 = vpack.c.bf16 %v78_v35, %v77_v34 }
  0x1c   :  { %658 = vmatmul.mubr.msk.bf16.gmra.mrb[8].mxu0 %vm124_vm0, %v88_v44  ;;  %690 = vmatmul.mubr.msk.bf16.gmra.mrb[8].mxu1 %vm124_vm0, %v104_v45 }
  0x1d   :  { %661 = vmatprep.mubr.msk.bf16.mxu0 %vm124_vm0, %v89_v46  ;;  %693 = vmatprep.mubr.msk.bf16.mxu1 %vm124_vm0, %v105_v47 }
  0x24   :  { %662 = vmatmul.mubr.msk.bf16.gmra.mrb[12].mxu0 %vm124_vm0, %v90_v56  ;;  %694 = vmatmul.mubr.msk.bf16.gmra.mrb[12].mxu1 %vm124_vm0, %v106_v57 }
  0x25   :  { %665 = vmatprep.mubr.msk.bf16.mxu0 %vm124_vm0, %v91_v58  ;;  %697 = vmatprep.mubr.msk.bf16.mxu1 %vm124_vm0, %v107_v59 }
  0x2c   :  { %666 = vmatmul.mubr.msk.bf16.gmra.mrb[16].mxu0 %vm124_vm0, %v92_v4  ;;  %698 = vmatmul.mubr.msk.bf16.gmra.mrb[16].mxu1 %vm124_vm0, %v108_v5 }
  0x2d   :  { %669 = vmatprep.mubr.msk.bf16.mxu0 %vm124_vm0, %v93_v6  ;;  %701 = vmatprep.mubr.msk.bf16.mxu1 %vm124_vm0, %v109_v7 }
  0x34   :  { %670 = vmatmul.mubr.msk.bf16.gmra.mrb[20].mxu0 %vm124_vm0, %v94_v16  ;;  %702 = vmatmul.mubr.msk.bf16.gmra.mrb[20].mxu1 %vm124_vm0, %v110_v17 }
  0x35   :  { %673 = vmatprep.mubr.msk.bf16.mxu0 %vm124_vm0, %v95_v18  ;;  %705 = vmatprep.mubr.msk.bf16.mxu1 %vm124_vm0, %v111_v19 }
  0x3c   :  { %674 = vmatmul.mubr.msk.bf16.gmra.mrb[24].mxu0 %vm124_vm0, %v96_v28  ;;  %706 = vmatmul.mubr.msk.bf16.gmra.mrb[24].mxu1 %vm124_vm0, %v112_v29 }
  0x3d   :  { %677 = vmatprep.mubr.msk.bf16.mxu0 %vm124_vm0, %v97_v30  ;;  %709 = vmatprep.mubr.msk.bf16.mxu1 %vm124_vm0, %v113_v31 }
  0x44   :  { %678 = vmatmul.mubr.msk.bf16.gmra.mrb[28].mxu0 %vm124_vm0, %v98_v36  ;;  %710 = vmatmul.mubr.msk.bf16.gmra.mrb[28].mxu1 %vm124_vm0, %v114_v37 }
  0xdf   :  { %v651_v39 = vpop.f32.mrb[0].mxu0  ;;  %v683_v40 = vpop.f32.mrb[0].mxu1 }
  0xe0   :  { %v264_v41 = vadd.f32 %v651_v39, %v976_v38  ;;  %v392_v42 = vadd.f32 %v683_v40, %v976_v38  ;;  %v255_v43 = vpop.f32.mrb[1].mxu0  ;;  %v383_v44 = vpop.f32.mrb[1].mxu1 }
  0xe1   :  { %v256_v45 = vadd.f32 %v976_v38, %v255_v43  ;;  %v384_v46 = vadd.f32 %v976_v38, %v383_v44  ;;  %v652_v47 = vpop.f32.mrb[2].mxu0  ;;  %v684_v48 = vpop.f32.mrb[2].mxu1 }
  0xe2   :  { %512 = vst.msk [vmem:[%s1301_s3 + $0x10] sm:$0xff] %vm124_vm0, %v264_v41  ;;  %544 = vst.msk [vmem:[%s1301_s3 + $0x110] sm:$0xff] %vm124_vm0, %v392_v42  ;;  %v267_v49 = vadd.f32 %v652_v47, %v976_v38  ;;  %v395_v50 = vadd.f32 %v684_v48, %v976_v38  ;;  %v258_v51 = vpop.f32.mrb[3].mxu0  ;;  %v386_v52 = vpop.f32.mrb[3].mxu1 }
  0xe3   :  { %510 = vst.msk [vmem:[%s1301_s3] sm:$0xff] %vm124_vm0, %v256_v45  ;;  %542 = vst.msk [vmem:[%s1301_s3 + $0x100] sm:$0xff] %vm124_vm0, %v384_v46  ;;  %v259_v53 = vadd.f32 %v976_v38, %v258_v51  ;;  %v387_v54 = vadd.f32 %v976_v38, %v386_v52 }
  0xe4   :  { %513 = vst.msk [vmem:[%s1301_s3 + $0x18] sm:$0xff] %vm124_vm0, %v267_v49  ;;  %545 = vst.msk [vmem:[%s1301_s3 + $0x118] sm:$0xff] %vm124_vm0, %v395_v50 }
  0xe5   :  { %511 = vst.msk [vmem:[%s1301_s3 + $0x8] sm:$0xff] %vm124_vm0, %v259_v53  ;;  %543 = vst.msk [vmem:[%s1301_s3 + $0x108] sm:$0xff] %vm124_vm0, %v387_v54 }
  0xe7   :  { %v655_v55 = vpop.f32.mrb[4].mxu0  ;;  %v687_v56 = vpop.f32.mrb[4].mxu1 }
  0xe8   :  { %v280_v57 = vadd.f32 %v655_v55, %v976_v38  ;;  %v408_v58 = vadd.f32 %v687_v56, %v976_v38  ;;  %v271_v59 = vpop.f32.mrb[5].mxu0  ;;  %v399_v60 = vpop.f32.mrb[5].mxu1 }
  0xe9   :  { %v272_v61 = vadd.f32 %v976_v38, %v271_v59  ;;  %v400_v62 = vadd.f32 %v976_v38, %v399_v60  ;;  %v656_v63 = vpop.f32.mrb[6].mxu0  ;;  %v688_v0 = vpop.f32.mrb[6].mxu1 }
  0xea   :  { %516 = vst.msk [vmem:[%s1301_s3 + $0x30] sm:$0xff] %vm124_vm0, %v280_v57  ;;  %548 = vst.msk [vmem:[%s1301_s3 + $0x130] sm:$0xff] %vm124_vm0, %v408_v58  ;;  %v283_v1 = vadd.f32 %v656_v63, %v976_v38  ;;  %v411_v2 = vadd.f32 %v688_v0, %v976_v38  ;;  %v274_v3 = vpop.f32.mrb[7].mxu0  ;;  %v402_v4 = vpop.f32.mrb[7].mxu1 }
  0xeb   :  { %514 = vst.msk [vmem:[%s1301_s3 + $0x20] sm:$0xff] %vm124_vm0, %v272_v61  ;;  %546 = vst.msk [vmem:[%s1301_s3 + $0x120] sm:$0xff] %vm124_vm0, %v400_v62  ;;  %v275_v5 = vadd.f32 %v976_v38, %v274_v3  ;;  %v403_v6 = vadd.f32 %v976_v38, %v402_v4 }
  0xec   :  { %517 = vst.msk [vmem:[%s1301_s3 + $0x38] sm:$0xff] %vm124_vm0, %v283_v1  ;;  %549 = vst.msk [vmem:[%s1301_s3 + $0x138] sm:$0xff] %vm124_vm0, %v411_v2 }
  0xed   :  { %515 = vst.msk [vmem:[%s1301_s3 + $0x28] sm:$0xff] %vm124_vm0, %v275_v5  ;;  %547 = vst.msk [vmem:[%s1301_s3 + $0x128] sm:$0xff] %vm124_vm0, %v403_v6 }
  0xef   :  { %v659_v7 = vpop.f32.mrb[8].mxu0  ;;  %v691_v8 = vpop.f32.mrb[8].mxu1 }
  0xf0   :  { %v296_v9 = vadd.f32 %v659_v7, %v976_v38  ;;  %v424_v10 = vadd.f32 %v691_v8, %v976_v38  ;;  %v287_v11 = vpop.f32.mrb[9].mxu0  ;;  %v415_v12 = vpop.f32.mrb[9].mxu1 }
  0xf1   :  { %v288_v13 = vadd.f32 %v976_v38, %v287_v11  ;;  %v416_v14 = vadd.f32 %v976_v38, %v415_v12  ;;  %v660_v15 = vpop.f32.mrb[10].mxu0  ;;  %v692_v16 = vpop.f32.mrb[10].mxu1 }
  0xf2   :  { %520 = vst.msk [vmem:[%s1301_s3 + $0x50] sm:$0xff] %vm124_vm0, %v296_v9  ;;  %552 = vst.msk [vmem:[%s1301_s3 + $0x150] sm:$0xff] %vm124_vm0, %v424_v10  ;;  %v299_v17 = vadd.f32 %v660_v15, %v976_v38  ;;  %v427_v18 = vadd.f32 %v692_v16, %v976_v38  ;;  %v290_v19 = vpop.f32.mrb[11].mxu0  ;;  %v418_v20 = vpop.f32.mrb[11].mxu1 }
  0xf3   :  { %518 = vst.msk [vmem:[%s1301_s3 + $0x40] sm:$0xff] %vm124_vm0, %v288_v13  ;;  %550 = vst.msk [vmem:[%s1301_s3 + $0x140] sm:$0xff] %vm124_vm0, %v416_v14  ;;  %v291_v21 = vadd.f32 %v976_v38, %v290_v19  ;;  %v419_v22 = vadd.f32 %v976_v38, %v418_v20 }
  0xf4   :  { %521 = vst.msk [vmem:[%s1301_s3 + $0x58] sm:$0xff] %vm124_vm0, %v299_v17  ;;  %553 = vst.msk [vmem:[%s1301_s3 + $0x158] sm:$0xff] %vm124_vm0, %v427_v18 }
  0xf5   :  { %519 = vst.msk [vmem:[%s1301_s3 + $0x48] sm:$0xff] %vm124_vm0, %v291_v21  ;;  %551 = vst.msk [vmem:[%s1301_s3 + $0x148] sm:$0xff] %vm124_vm0, %v419_v22 }
  0xf7   :  { %v663_v23 = vpop.f32.mrb[12].mxu0  ;;  %v695_v24 = vpop.f32.mrb[12].mxu1 }
  0xf8   :  { %v312_v25 = vadd.f32 %v663_v23, %v976_v38  ;;  %v440_v26 = vadd.f32 %v695_v24, %v976_v38  ;;  %v303_v27 = vpop.f32.mrb[13].mxu0  ;;  %v431_v28 = vpop.f32.mrb[13].mxu1 }
  0xf9   :  { %v304_v29 = vadd.f32 %v976_v38, %v303_v27  ;;  %v432_v30 = vadd.f32 %v976_v38, %v431_v28  ;;  %v664_v31 = vpop.f32.mrb[14].mxu0  ;;  %v696_v32 = vpop.f32.mrb[14].mxu1 }
  0xfa   :  { %524 = vst.msk [vmem:[%s1301_s3 + $0x70] sm:$0xff] %vm124_vm0, %v312_v25  ;;  %556 = vst.msk [vmem:[%s1301_s3 + $0x170] sm:$0xff] %vm124_vm0, %v440_v26  ;;  %v315_v33 = vadd.f32 %v664_v31, %v976_v38  ;;  %v443_v34 = vadd.f32 %v696_v32, %v976_v38  ;;  %v306_v35 = vpop.f32.mrb[15].mxu0  ;;  %v434_v36 = vpop.f32.mrb[15].mxu1 }
  0xfb   :  { %522 = vst.msk [vmem:[%s1301_s3 + $0x60] sm:$0xff] %vm124_vm0, %v304_v29  ;;  %554 = vst.msk [vmem:[%s1301_s3 + $0x160] sm:$0xff] %vm124_vm0, %v432_v30  ;;  %v307_v37 = vadd.f32 %v976_v38, %v306_v35  ;;  %v435_v39 = vadd.f32 %v976_v38, %v434_v36 }
  0xfc   :  { %525 = vst.msk [vmem:[%s1301_s3 + $0x78] sm:$0xff] %vm124_vm0, %v315_v33  ;;  %557 = vst.msk [vmem:[%s1301_s3 + $0x178] sm:$0xff] %vm124_vm0, %v443_v34 }
  0xfd   :  { %523 = vst.msk [vmem:[%s1301_s3 + $0x68] sm:$0xff] %vm124_vm0, %v307_v37  ;;  %555 = vst.msk [vmem:[%s1301_s3 + $0x168] sm:$0xff] %vm124_vm0, %v435_v39 }
  0xff   :  { %v667_v40 = vpop.f32.mrb[16].mxu0  ;;  %v699_v41 = vpop.f32.mrb[16].mxu1 }
 0x100   :  { %v328_v42 = vadd.f32 %v667_v40, %v976_v38  ;;  %v456_v43 = vadd.f32 %v699_v41, %v976_v38  ;;  %v319_v44 = vpop.f32.mrb[17].mxu0  ;;  %v447_v45 = vpop.f32.mrb[17].mxu1 }
 0x101   :  { %v320_v46 = vadd.f32 %v976_v38, %v319_v44  ;;  %v448_v47 = vadd.f32 %v976_v38, %v447_v45  ;;  %v668_v48 = vpop.f32.mrb[18].mxu0  ;;  %v700_v49 = vpop.f32.mrb[18].mxu1 }
 0x102   :  { %528 = vst.msk [vmem:[%s1301_s3 + $0x90] sm:$0xff] %vm124_vm0, %v328_v42  ;;  %560 = vst.msk [vmem:[%s1301_s3 + $0x190] sm:$0xff] %vm124_vm0, %v456_v43  ;;  %v331_v50 = vadd.f32 %v668_v48, %v976_v38  ;;  %v459_v51 = vadd.f32 %v700_v49, %v976_v38  ;;  %v322_v52 = vpop.f32.mrb[19].mxu0  ;;  %v450_v53 = vpop.f32.mrb[19].mxu1 }
 0x103   :  { %526 = vst.msk [vmem:[%s1301_s3 + $0x80] sm:$0xff] %vm124_vm0, %v320_v46  ;;  %558 = vst.msk [vmem:[%s1301_s3 + $0x180] sm:$0xff] %vm124_vm0, %v448_v47  ;;  %v323_v54 = vadd.f32 %v976_v38, %v322_v52  ;;  %v451_v55 = vadd.f32 %v976_v38, %v450_v53 }
 0x104   :  { %529 = vst.msk [vmem:[%s1301_s3 + $0x98] sm:$0xff] %vm124_vm0, %v331_v50  ;;  %561 = vst.msk [vmem:[%s1301_s3 + $0x198] sm:$0xff] %vm124_vm0, %v459_v51 }
 0x105   :  { %527 = vst.msk [vmem:[%s1301_s3 + $0x88] sm:$0xff] %vm124_vm0, %v323_v54  ;;  %559 = vst.msk [vmem:[%s1301_s3 + $0x188] sm:$0xff] %vm124_vm0, %v451_v55 }
 0x107   :  { %v671_v56 = vpop.f32.mrb[20].mxu0  ;;  %v703_v57 = vpop.f32.mrb[20].mxu1 }
 0x108   :  { %v344_v58 = vadd.f32 %v671_v56, %v976_v38  ;;  %v472_v59 = vadd.f32 %v703_v57, %v976_v38  ;;  %v335_v60 = vpop.f32.mrb[21].mxu0  ;;  %v463_v61 = vpop.f32.mrb[21].mxu1 }
 0x109   :  { %v336_v62 = vadd.f32 %v976_v38, %v335_v60  ;;  %v464_v63 = vadd.f32 %v976_v38, %v463_v61  ;;  %v672_v0 = vpop.f32.mrb[22].mxu0  ;;  %v704_v1 = vpop.f32.mrb[22].mxu1 }
 0x10a   :  { %532 = vst.msk [vmem:[%s1301_s3 + $0xb0] sm:$0xff] %vm124_vm0, %v344_v58  ;;  %564 = vst.msk [vmem:[%s1301_s3 + $0x1b0] sm:$0xff] %vm124_vm0, %v472_v59  ;;  %v347_v2 = vadd.f32 %v672_v0, %v976_v38  ;;  %v475_v3 = vadd.f32 %v704_v1, %v976_v38  ;;  %v338_v4 = vpop.f32.mrb[23].mxu0  ;;  %v466_v5 = vpop.f32.mrb[23].mxu1 }
 0x10b   :  { %530 = vst.msk [vmem:[%s1301_s3 + $0xa0] sm:$0xff] %vm124_vm0, %v336_v62  ;;  %562 = vst.msk [vmem:[%s1301_s3 + $0x1a0] sm:$0xff] %vm124_vm0, %v464_v63  ;;  %v339_v6 = vadd.f32 %v976_v38, %v338_v4  ;;  %v467_v7 = vadd.f32 %v976_v38, %v466_v5 }
 0x10c   :  { %533 = vst.msk [vmem:[%s1301_s3 + $0xb8] sm:$0xff] %vm124_vm0, %v347_v2  ;;  %565 = vst.msk [vmem:[%s1301_s3 + $0x1b8] sm:$0xff] %vm124_vm0, %v475_v3 }
 0x10d   :  { %531 = vst.msk [vmem:[%s1301_s3 + $0xa8] sm:$0xff] %vm124_vm0, %v339_v6  ;;  %563 = vst.msk [vmem:[%s1301_s3 + $0x1a8] sm:$0xff] %vm124_vm0, %v467_v7 }
 0x10f   :  { %v675_v8 = vpop.f32.mrb[24].mxu0  ;;  %v707_v9 = vpop.f32.mrb[24].mxu1 }
 0x110   :  { %v360_v10 = vadd.f32 %v675_v8, %v976_v38  ;;  %v488_v11 = vadd.f32 %v707_v9, %v976_v38  ;;  %v351_v12 = vpop.f32.mrb[25].mxu0  ;;  %v479_v13 = vpop.f32.mrb[25].mxu1 }
 0x111   :  { %v352_v14 = vadd.f32 %v976_v38, %v351_v12  ;;  %v480_v15 = vadd.f32 %v976_v38, %v479_v13  ;;  %v676_v16 = vpop.f32.mrb[26].mxu0  ;;  %v708_v17 = vpop.f32.mrb[26].mxu1 }
 0x112   :  { %536 = vst.msk [vmem:[%s1301_s3 + $0xd0] sm:$0xff] %vm124_vm0, %v360_v10  ;;  %568 = vst.msk [vmem:[%s1301_s3 + $0x1d0] sm:$0xff] %vm124_vm0, %v488_v11  ;;  %v363_v18 = vadd.f32 %v676_v16, %v976_v38  ;;  %v491_v19 = vadd.f32 %v708_v17, %v976_v38  ;;  %v354_v20 = vpop.f32.mrb[27].mxu0  ;;  %v482_v21 = vpop.f32.mrb[27].mxu1 }
 0x113   :  { %534 = vst.msk [vmem:[%s1301_s3 + $0xc0] sm:$0xff] %vm124_vm0, %v352_v14  ;;  %566 = vst.msk [vmem:[%s1301_s3 + $0x1c0] sm:$0xff] %vm124_vm0, %v480_v15  ;;  %v355_v22 = vadd.f32 %v976_v38, %v354_v20  ;;  %v483_v23 = vadd.f32 %v976_v38, %v482_v21 }
 0x114   :  { %537 = vst.msk [vmem:[%s1301_s3 + $0xd8] sm:$0xff] %vm124_vm0, %v363_v18  ;;  %569 = vst.msk [vmem:[%s1301_s3 + $0x1d8] sm:$0xff] %vm124_vm0, %v491_v19 }
 0x115   :  { %535 = vst.msk [vmem:[%s1301_s3 + $0xc8] sm:$0xff] %vm124_vm0, %v355_v22  ;;  %567 = vst.msk [vmem:[%s1301_s3 + $0x1c8] sm:$0xff] %vm124_vm0, %v483_v23 }
 0x117   :  { %v679_v24 = vpop.f32.mrb[28].mxu0  ;;  %v711_v25 = vpop.f32.mrb[28].mxu1 }
 0x118   :  { %v376_v26 = vadd.f32 %v679_v24, %v976_v38  ;;  %v504_v27 = vadd.f32 %v711_v25, %v976_v38  ;;  %v367_v28 = vpop.f32.mrb[29].mxu0  ;;  %v495_v29 = vpop.f32.mrb[29].mxu1 }
 0x119   :  { %v368_v30 = vadd.f32 %v976_v38, %v367_v28  ;;  %v496_v31 = vadd.f32 %v976_v38, %v495_v29  ;;  %v680_v32 = vpop.f32.mrb[30].mxu0  ;;  %v712_v33 = vpop.f32.mrb[30].mxu1 }
 0x11a   :  { %540 = vst.msk [vmem:[%s1301_s3 + $0xf0] sm:$0xff] %vm124_vm0, %v376_v26  ;;  %572 = vst.msk [vmem:[%s1301_s3 + $0x1f0] sm:$0xff] %vm124_vm0, %v504_v27  ;;  %v379_v34 = vadd.f32 %v680_v32, %v976_v38  ;;  %v507_v35 = vadd.f32 %v712_v33, %v976_v38  ;;  %v370_v36 = vpop.f32.mrb[31].mxu0  ;;  %v498_v37 = vpop.f32.mrb[31].mxu1 }
 0x11b   :  { %538 = vst.msk [vmem:[%s1301_s3 + $0xe0] sm:$0xff] %vm124_vm0, %v368_v30  ;;  %570 = vst.msk [vmem:[%s1301_s3 + $0x1e0] sm:$0xff] %vm124_vm0, %v496_v31  ;;  %v371_v39 = vadd.f32 %v976_v38, %v370_v36  ;;  %v499_v40 = vadd.f32 %v976_v38, %v498_v37 }
 0x11c   :  { %541 = vst.msk [vmem:[%s1301_s3 + $0xf8] sm:$0xff] %vm124_vm0, %v379_v34  ;;  %573 = vst.msk [vmem:[%s1301_s3 + $0x1f8] sm:$0xff] %vm124_vm0, %v507_v35 }
 0x11d   :  { %539 = vst.msk [vmem:[%s1301_s3 + $0xe8] sm:$0xff] %vm124_vm0, %v371_v39  ;;  %571 = vst.msk [vmem:[%s1301_s3 + $0x1e8] sm:$0xff] %vm124_vm0, %v499_v40 }

// kernel: _lambda_.18
= control target key start
LH: loop header
LB: loop body
LE: loop exit
PB: predicated region body
PF: predicated region fallthrough
CT: control target
= control target key end

     0   :  { %vm121_vm0 = vcmask 130048   ;;  %vm1083_vm1 = vcmask 261120   ;;  %s2587_s1 = inlined_call_operand.vmem [shape: f32[16,32], index: 1, kind: input, shape index: {}]   ;;  %s2588_s0 = inlined_call_operand.vmem [shape: f32[512,16], index: 0, kind: input, shape index: {}]   ;;  %s2589_s2 = inlined_call_operand.vmem [shape: f32[1,32], index: 2, kind: input, shape index: {}]   ;;  %s2590_s3 = inlined_call_operand.vmem [shape: f32[512,32], index: 3, kind: output, shape index: {}]  }
   0x1   :  { %v79_v0 = vld [vmem:[%s2587_s1] sm:$0xff]  ;;  %v80_v1 = vld [vmem:[%s2587_s1 + $0x8] sm:$0xff]  ;;  %v17_v9 = vld [vmem:[%s2588_s0 + $0x10] sm:$0xff] }
   0x2   :  { %v15_v2 = vld [vmem:[%s2588_s0] sm:$0xff]  ;;  %v113_v3 = vpack.c.bf16 %v80_v1, %v79_v0  ;;  %v16_v4 = vld [vmem:[%s2588_s0 + $0x8] sm:$0xff]  ;;  %v18_v10 = vld [vmem:[%s2588_s0 + $0x18] sm:$0xff] }
   0x3   :  { %v47_v5 = vld [vmem:[%s2588_s0 + $0x100] sm:$0xff]  ;;  %v48_v6 = vld [vmem:[%s2588_s0 + $0x108] sm:$0xff]  ;;  %v81_v7 = vpack.c.bf16 %v16_v4, %v15_v2  ;;  %v49_v11 = vld [vmem:[%s2588_s0 + $0x110] sm:$0xff]  ;;  %v82_v12 = vpack.c.bf16 %v18_v10, %v17_v9 }
   0x4   :  { %v97_v8 = vpack.c.bf16 %v48_v6, %v47_v5  ;;  %1218 = vmatprep.subr.bf16.mxu0 %v113_v3  ;;  %1284 = vmatprep.subr.bf16.mxu1 %v113_v3  ;;  %v50_v13 = vld [vmem:[%s2588_s0 + $0x118] sm:$0xff]  ;;  %v19_v14 = vld [vmem:[%s2588_s0 + $0x20] sm:$0xff]  ;;  %v20_v15 = vld [vmem:[%s2588_s0 + $0x28] sm:$0xff] }
   0x5   :  { %1219 = vmatpush3.bf16.msra.mxu0 %v113_v3  ;;  %1285 = vmatpush3.bf16.msra.mxu1 %v113_v3  ;;  %v98_v16 = vpack.c.bf16 %v50_v13, %v49_v11  ;;  %v83_v17 = vpack.c.bf16 %v20_v15, %v19_v14  ;;  %v51_v18 = vld [vmem:[%s2588_s0 + $0x120] sm:$0xff]  ;;  %v52_v19 = vld [vmem:[%s2588_s0 + $0x128] sm:$0xff]  ;;  %v21_v21 = vld [vmem:[%s2588_s0 + $0x30] sm:$0xff] }
   0x6   :  { %1220 = vmatprep.mubr.msk.bf16.mxu0 %vm121_vm0, %v81_v7  ;;  %1252 = vmatprep.mubr.msk.bf16.mxu1 %vm121_vm0, %v97_v8  ;;  %v99_v20 = vpack.c.bf16 %v52_v19, %v51_v18  ;;  %v22_v22 = vld [vmem:[%s2588_s0 + $0x38] sm:$0xff]  ;;  %v53_v23 = vld [vmem:[%s2588_s0 + $0x130] sm:$0xff]  ;;  %v23_v25 = vld [vmem:[%s2588_s0 + $0x40] sm:$0xff] }
   0x7   :  { %v54_v24 = vld [vmem:[%s2588_s0 + $0x138] sm:$0xff]  ;;  %v24_v26 = vld [vmem:[%s2588_s0 + $0x48] sm:$0xff]  ;;  %v55_v27 = vld [vmem:[%s2588_s0 + $0x140] sm:$0xff]  ;;  %v84_v29 = vpack.c.bf16 %v22_v22, %v21_v21 }
   0x8   :  { %1221 = vmatmul.mubr.msk.bf16.vlgmr.msra.gmra.mrb[0].mxu0 %vm121_vm0, %v82_v12  ;;  %1253 = vmatmul.mubr.msk.bf16.vlgmr.msra.gmra.mrb[0].mxu1 %vm121_vm0, %v98_v16  ;;  %v56_v28 = vld [vmem:[%s2588_s0 + $0x148] sm:$0xff]  ;;  %v100_v30 = vpack.c.bf16 %v54_v24, %v53_v23  ;;  %v85_v31 = vpack.c.bf16 %v24_v26, %v23_v25  ;;  %v25_v33 = vld [vmem:[%s2588_s0 + $0x50] sm:$0xff]  ;;  %v26_v34 = vld [vmem:[%s2588_s0 + $0x58] sm:$0xff] }
   0x9   :  { %1224 = vmatprep.mubr.msk.bf16.mxu0 %vm121_vm0, %v83_v17  ;;  %1256 = vmatprep.mubr.msk.bf16.mxu1 %vm121_vm0, %v99_v20  ;;  %v101_v32 = vpack.c.bf16 %v56_v28, %v55_v27  ;;  %v57_v35 = vld [vmem:[%s2588_s0 + $0x150] sm:$0xff]  ;;  %v58_v36 = vld [vmem:[%s2588_s0 + $0x158] sm:$0xff]  ;;  %v27_v37 = vld [vmem:[%s2588_s0 + $0x60] sm:$0xff]  ;;  %v86_v41 = vpack.c.bf16 %v26_v34, %v25_v33 }
   0xa   :  { %v28_v38 = vld [vmem:[%s2588_s0 + $0x68] sm:$0xff]  ;;  %v59_v39 = vld [vmem:[%s2588_s0 + $0x160] sm:$0xff]  ;;  %v102_v42 = vpack.c.bf16 %v58_v36, %v57_v35  ;;  %v29_v45 = vld [vmem:[%s2588_s0 + $0x70] sm:$0xff] }
   0xb   :  { %v60_v40 = vld [vmem:[%s2588_s0 + $0x168] sm:$0xff]  ;;  %v87_v43 = vpack.c.bf16 %v28_v38, %v27_v37  ;;  %v30_v46 = vld [vmem:[%s2588_s0 + $0x78] sm:$0xff]  ;;  %v61_v47 = vld [vmem:[%s2588_s0 + $0x170] sm:$0xff] }
   0xc   :  { %v103_v44 = vpack.c.bf16 %v60_v40, %v59_v39  ;;  %v62_v48 = vld [vmem:[%s2588_s0 + $0x178] sm:$0xff]  ;;  %v31_v49 = vld [vmem:[%s2588_s0 + $0x80] sm:$0xff]  ;;  %v32_v50 = vld [vmem:[%s2588_s0 + $0x88] sm:$0xff]  ;;  %v88_v53 = vpack.c.bf16 %v30_v46, %v29_v45 }
   0xd   :  { %v63_v51 = vld [vmem:[%s2588_s0 + $0x180] sm:$0xff]  ;;  %v64_v52 = vld [vmem:[%s2588_s0 + $0x188] sm:$0xff]  ;;  %v104_v54 = vpack.c.bf16 %v62_v48, %v61_v47  ;;  %v89_v55 = vpack.c.bf16 %v32_v50, %v31_v49  ;;  %v33_v57 = vld [vmem:[%s2588_s0 + $0x90] sm:$0xff] }
   0xe   :  { %v105_v56 = vpack.c.bf16 %v64_v52, %v63_v51  ;;  %v34_v58 = vld [vmem:[%s2588_s0 + $0x98] sm:$0xff]  ;;  %v65_v59 = vld [vmem:[%s2588_s0 + $0x190] sm:$0xff]  ;;  %v35_v61 = vld [vmem:[%s2588_s0 + $0xa0] sm:$0xff] }
   0xf   :  { %v66_v60 = vld [vmem:[%s2588_s0 + $0x198] sm:$0xff]  ;;  %v36_v62 = vld [vmem:[%s2588_s0 + $0xa8] sm:$0xff]  ;;  %v67_v63 = vld [vmem:[%s2588_s0 + $0x1a0] sm:$0xff]  ;;  %v90_v1 = vpack.c.bf16 %v34_v58, %v33_v57 }
  0x10   :  { %1225 = vmatmul.mubr.msk.bf16.gmra.mrb[4].mxu0 %vm121_vm0, %v84_v29  ;;  %1257 = vmatmul.mubr.msk.bf16.gmra.mrb[4].mxu1 %vm121_vm0, %v100_v30  ;;  %v68_v0 = vld [vmem:[%s2588_s0 + $0x1a8] sm:$0xff]  ;;  %v106_v2 = vpack.c.bf16 %v66_v60, %v65_v59  ;;  %v91_v3 = vpack.c.bf16 %v36_v62, %v35_v61  ;;  %v37_v5 = vld [vmem:[%s2588_s0 + $0xb0] sm:$0xff]  ;;  %v38_v6 = vld [vmem:[%s2588_s0 + $0xb8] sm:$0xff] }
  0x11   :  { %1228 = vmatprep.mubr.msk.bf16.mxu0 %vm121_vm0, %v85_v31  ;;  %1260 = vmatprep.mubr.msk.bf16.mxu1 %vm121_vm0, %v101_v32  ;;  %v107_v4 = vpack.c.bf16 %v68_v0, %v67_v63  ;;  %v69_v7 = vld [vmem:[%s2588_s0 + $0x1b0] sm:$0xff]  ;;  %v70_v8 = vld [vmem:[%s2588_s0 + $0x1b8] sm:$0xff]  ;;  %v39_v9 = vld [vmem:[%s2588_s0 + $0xc0] sm:$0xff]  ;;  %v92_v13 = vpack.c.bf16 %v38_v6, %v37_v5 }
  0x12   :  { %v40_v10 = vld [vmem:[%s2588_s0 + $0xc8] sm:$0xff]  ;;  %v71_v11 = vld [vmem:[%s2588_s0 + $0x1c0] sm:$0xff]  ;;  %v108_v14 = vpack.c.bf16 %v70_v8, %v69_v7  ;;  %v41_v17 = vld [vmem:[%s2588_s0 + $0xd0] sm:$0xff] }
  0x13   :  { %v72_v12 = vld [vmem:[%s2588_s0 + $0x1c8] sm:$0xff]  ;;  %v93_v15 = vpack.c.bf16 %v40_v10, %v39_v9  ;;  %v42_v18 = vld [vmem:[%s2588_s0 + $0xd8] sm:$0xff]  ;;  %v73_v19 = vld [vmem:[%s2588_s0 + $0x1d0] sm:$0xff] }
  0x14   :  { %v109_v16 = vpack.c.bf16 %v72_v12, %v71_v11  ;;  %v74_v20 = vld [vmem:[%s2588_s0 + $0x1d8] sm:$0xff]  ;;  %v43_v21 = vld [vmem:[%s2588_s0 + $0xe0] sm:$0xff]  ;;  %v44_v22 = vld [vmem:[%s2588_s0 + $0xe8] sm:$0xff]  ;;  %v94_v25 = vpack.c.bf16 %v42_v18, %v41_v17 }
  0x15   :  { %v75_v23 = vld [vmem:[%s2588_s0 + $0x1e0] sm:$0xff]  ;;  %v76_v24 = vld [vmem:[%s2588_s0 + $0x1e8] sm:$0xff]  ;;  %v110_v26 = vpack.c.bf16 %v74_v20, %v73_v19  ;;  %v95_v27 = vpack.c.bf16 %v44_v22, %v43_v21  ;;  %v45_v29 = vld [vmem:[%s2588_s0 + $0xf0] sm:$0xff] }
  0x16   :  { %v111_v28 = vpack.c.bf16 %v76_v24, %v75_v23  ;;  %v46_v30 = vld [vmem:[%s2588_s0 + $0xf8] sm:$0xff]  ;;  %v77_v31 = vld [vmem:[%s2588_s0 + $0x1f0] sm:$0xff]  ;;  %v1668_v35 = vld [vmem:[%s2589_s2] ss:$0 sm:$0xff] }
  0x17   :  { %v78_v32 = vld [vmem:[%s2588_s0 + $0x1f8] sm:$0xff]  ;;  %v96_v33 = vpack.c.bf16 %v46_v30, %v45_v29 }
  0x18   :  { %1229 = vmatmul.mubr.msk.bf16.gmra.mrb[8].mxu0 %vm121_vm0, %v86_v41  ;;  %1261 = vmatmul.mubr.msk.bf16.gmra.mrb[8].mxu1 %vm121_vm0, %v102_v42  ;;  %v112_v34 = vpack.c.bf16 %v78_v32, %v77_v31 }
  0x19   :  { %1232 = vmatprep.mubr.msk.bf16.mxu0 %vm121_vm0, %v87_v43  ;;  %1264 = vmatprep.mubr.msk.bf16.mxu1 %vm121_vm0, %v103_v44 }
  0x20   :  { %1233 = vmatmul.mubr.msk.bf16.gmra.mrb[12].mxu0 %vm121_vm0, %v88_v53  ;;  %1265 = vmatmul.mubr.msk.bf16.gmra.mrb[12].mxu1 %vm121_vm0, %v104_v54 }
  0x21   :  { %1236 = vmatprep.mubr.msk.bf16.mxu0 %vm121_vm0, %v89_v55  ;;  %1268 = vmatprep.mubr.msk.bf16.mxu1 %vm121_vm0, %v105_v56 }
  0x28   :  { %1237 = vmatmul.mubr.msk.bf16.gmra.mrb[16].mxu0 %vm121_vm0, %v90_v1  ;;  %1269 = vmatmul.mubr.msk.bf16.gmra.mrb[16].mxu1 %vm121_vm0, %v106_v2 }
  0x29   :  { %1240 = vmatprep.mubr.msk.bf16.mxu0 %vm121_vm0, %v91_v3  ;;  %1272 = vmatprep.mubr.msk.bf16.mxu1 %vm121_vm0, %v107_v4 }
  0x30   :  { %1241 = vmatmul.mubr.msk.bf16.gmra.mrb[20].mxu0 %vm121_vm0, %v92_v13  ;;  %1273 = vmatmul.mubr.msk.bf16.gmra.mrb[20].mxu1 %vm121_vm0, %v108_v14 }
  0x31   :  { %1244 = vmatprep.mubr.msk.bf16.mxu0 %vm121_vm0, %v93_v15  ;;  %1276 = vmatprep.mubr.msk.bf16.mxu1 %vm121_vm0, %v109_v16 }
  0x38   :  { %1245 = vmatmul.mubr.msk.bf16.gmra.mrb[24].mxu0 %vm121_vm0, %v94_v25  ;;  %1277 = vmatmul.mubr.msk.bf16.gmra.mrb[24].mxu1 %vm121_vm0, %v110_v26 }
  0x39   :  { %1248 = vmatprep.mubr.msk.bf16.mxu0 %vm121_vm0, %v95_v27  ;;  %1280 = vmatprep.mubr.msk.bf16.mxu1 %vm121_vm0, %v111_v28 }
  0x40   :  { %1249 = vmatmul.mubr.msk.bf16.gmra.mrb[28].mxu0 %vm121_vm0, %v96_v33  ;;  %1281 = vmatmul.mubr.msk.bf16.gmra.mrb[28].mxu1 %vm121_vm0, %v112_v34 }
  0xdb   :  { %v1222_v36 = vpop.f32.mrb[0].mxu0  ;;  %v1254_v37 = vpop.f32.mrb[0].mxu1 }
  0xdc   :  { %v1671_v38 = vadd.f32 %v1222_v36, %v1668_v35  ;;  %v1674_v39 = vadd.f32 %v1254_v37, %v1668_v35  ;;  %v252_v40 = vpop.f32.mrb[1].mxu0  ;;  %v380_v41 = vpop.f32.mrb[1].mxu1 }
  0xdd   :  { %v1677_v42 = vadd.f32 %v1668_v35, %v252_v40  ;;  %v1680_v43 = vadd.f32 %v1668_v35, %v380_v41  ;;  %v1223_v44 = vpop.f32.mrb[2].mxu0  ;;  %v1255_v45 = vpop.f32.mrb[2].mxu1 }
  0xde   :  { %v509_v46 = vmul.f32 %v1671_v38, %v1671_v38  ;;  %v541_v47 = vmul.f32 %v1674_v39, %v1674_v39  ;;  %v1687_v48 = vadd.f32 %v1223_v44, %v1668_v35  ;;  %v1690_v49 = vadd.f32 %v1255_v45, %v1668_v35  ;;  %v255_v50 = vpop.f32.mrb[3].mxu0  ;;  %v383_v51 = vpop.f32.mrb[3].mxu1 }
  0xdf   :  { %v507_v52 = vmul.f32 %v1677_v42, %v1677_v42  ;;  %v539_v53 = vmul.f32 %v1680_v43, %v1680_v43  ;;  %v1697_v54 = vadd.f32 %v1668_v35, %v255_v50  ;;  %v1700_v55 = vadd.f32 %v1668_v35, %v383_v51 }
  0xe0   :  { %v573_v56 = vmul.f32 %v509_v46, %v1671_v38  ;;  %v605_v57 = vmul.f32 %v541_v47, %v1674_v39  ;;  %v510_v58 = vmul.f32 %v1687_v48, %v1687_v48  ;;  %v542_v59 = vmul.f32 %v1690_v49, %v1690_v49 }
  0xe1   :  { %v571_v60 = vmul.f32 %v507_v52, %v1677_v42  ;;  %v603_v61 = vmul.f32 %v539_v53, %v1680_v43  ;;  %v508_v62 = vmul.f32 %v1697_v54, %v1697_v54  ;;  %v540_v63 = vmul.f32 %v1700_v55, %v1700_v55 }
  0xe2   :  { %v637_v0 = vmul.f32 0.044715, %v573_v56  ;;  %v669_v1 = vmul.f32 0.044715, %v605_v57  ;;  %v574_v2 = vmul.f32 %v510_v58, %v1687_v48  ;;  %v606_v3 = vmul.f32 %v542_v59, %v1690_v49 }
  0xe3   :  { %v635_v4 = vmul.f32 0.044715, %v571_v60  ;;  %v667_v5 = vmul.f32 0.044715, %v603_v61  ;;  %v572_v6 = vmul.f32 %v508_v62, %v1697_v54  ;;  %v604_v7 = vmul.f32 %v540_v63, %v1700_v55  ;;  %v1226_v8 = vpop.f32.mrb[4].mxu0  ;;  %v1258_v9 = vpop.f32.mrb[4].mxu1 }
  0xe4   :  { %v701_v10 = vadd.f32 %v637_v0, %v1671_v38  ;;  %v733_v11 = vadd.f32 %v669_v1, %v1674_v39  ;;  %v638_v12 = vmul.f32 0.044715, %v574_v2  ;;  %v670_v13 = vmul.f32 0.044715, %v606_v3  ;;  %v268_v14 = vpop.f32.mrb[5].mxu0  ;;  %v396_v15 = vpop.f32.mrb[5].mxu1 }
  0xe5   :  { %v699_v16 = vadd.f32 %v635_v4, %v1677_v42  ;;  %v731_v17 = vadd.f32 %v667_v5, %v1680_v43  ;;  %v636_v18 = vmul.f32 0.044715, %v572_v6  ;;  %v668_v19 = vmul.f32 0.044715, %v604_v7  ;;  %v1227_v20 = vpop.f32.mrb[6].mxu0  ;;  %v1259_v21 = vpop.f32.mrb[6].mxu1 }
  0xe6   :  { %v765_v22 = vmul.f32 0.7978846, %v701_v10  ;;  %v797_v23 = vmul.f32 0.7978846, %v733_v11  ;;  %v702_v24 = vadd.f32 %v638_v12, %v1687_v48  ;;  %v734_v25 = vadd.f32 %v670_v13, %v1690_v49  ;;  %v271_v26 = vpop.f32.mrb[7].mxu0  ;;  %v399_v27 = vpop.f32.mrb[7].mxu1 }
  0xe7   :  { %v763_v28 = vmul.f32 0.7978846, %v699_v16  ;;  %v795_v29 = vmul.f32 0.7978846, %v731_v17  ;;  %v700_v30 = vadd.f32 %v636_v18, %v1697_v54  ;;  %v732_v31 = vadd.f32 %v668_v19, %v1700_v55 }
  0xe8   :  { %1286 = vtanh.f32 %v765_v22  ;;  %v766_v32 = vmul.f32 0.7978846, %v702_v24  ;;  %v798_v33 = vmul.f32 0.7978846, %v734_v25  ;;  %v1727_v34 = vadd.f32 %v1226_v8, %v1668_v35 }
  0xe9   :  { %1288 = vtanh.f32 %v797_v23  ;;  %v764_v36 = vmul.f32 0.7978846, %v700_v30  ;;  %v796_v37 = vmul.f32 0.7978846, %v732_v31  ;;  %v1730_v40 = vadd.f32 %v1258_v9, %v1668_v35 }
  0xea   :  { %1290 = vtanh.f32 %v763_v28  ;;  %v513_v41 = vmul.f32 %v1727_v34, %v1727_v34  ;;  %v1735_v44 = vadd.f32 %v1668_v35, %v268_v14  ;;  %v1738_v45 = vadd.f32 %v1668_v35, %v396_v15 }
  0xeb   :  { %1292 = vtanh.f32 %v795_v29  ;;  %v545_v46 = vmul.f32 %v1730_v40, %v1730_v40  ;;  %v1743_v47 = vadd.f32 %v1227_v20, %v1668_v35  ;;  %v1746_v50 = vadd.f32 %v1259_v21, %v1668_v35  ;;  %v1748_v51 = vpop.f32.mrb[8].mxu0  ;;  %v1750_v52 = vpop.f32.mrb[8].mxu1 }
  0xec   :  { %1294 = vtanh.f32 %v766_v32  ;;  %v577_v53 = vmul.f32 %v513_v41, %v1727_v34  ;;  %v511_v56 = vmul.f32 %v1735_v44, %v1735_v44  ;;  %v543_v57 = vmul.f32 %v1738_v45, %v1738_v45  ;;  %v1757_v58 = vpop.f32.mrb[9].mxu0  ;;  %v1759_v59 = vpop.f32.mrb[9].mxu1 }
  0xed   :  { %1296 = vtanh.f32 %v798_v33  ;;  %v609_v60 = vmul.f32 %v545_v46, %v1730_v40  ;;  %v514_v61 = vmul.f32 %v1743_v47, %v1743_v47  ;;  %v546_v62 = vmul.f32 %v1746_v50, %v1746_v50  ;;  %v1766_v63 = vpop.f32.mrb[10].mxu0  ;;  %v1768_v0 = vpop.f32.mrb[10].mxu1 }
  0xee   :  { %1298 = vtanh.f32 %v764_v36  ;;  %v641_v1 = vmul.f32 0.044715, %v577_v53  ;;  %v575_v2 = vmul.f32 %v511_v56, %v1735_v44  ;;  %v607_v3 = vmul.f32 %v543_v57, %v1738_v45  ;;  %v1772_v4 = vpop.f32.mrb[11].mxu0  ;;  %v1774_v5 = vpop.f32.mrb[11].mxu1 }
  0xef   :  { %1300 = vtanh.f32 %v796_v37  ;;  %v673_v6 = vmul.f32 0.044715, %v609_v60  ;;  %v578_v7 = vmul.f32 %v514_v61, %v1743_v47  ;;  %v610_v8 = vmul.f32 %v546_v62, %v1746_v50 }
  0xf0   :  { %v705_v9 = vadd.f32 %v641_v1, %v1727_v34  ;;  %v639_v10 = vmul.f32 0.044715, %v575_v2  ;;  %v671_v11 = vmul.f32 0.044715, %v607_v3  ;;  %v1780_v12 = vadd.f32 %v1668_v35, %v271_v26 }
  0xf1   :  { %v737_v13 = vadd.f32 %v673_v6, %v1730_v40  ;;  %v642_v14 = vmul.f32 0.044715, %v578_v7  ;;  %v674_v15 = vmul.f32 0.044715, %v610_v8  ;;  %v1784_v16 = vadd.f32 %v1668_v35, %v399_v27 }
  0xf2   :  { %v1287_v17 = vpop.eup %1286  ;;  %v769_v18 = vmul.f32 0.7978846, %v705_v9  ;;  %v703_v19 = vadd.f32 %v639_v10, %v1735_v44  ;;  %v735_v20 = vadd.f32 %v671_v11, %v1738_v45  ;;  %v512_v21 = vmul.f32 %v1780_v12, %v1780_v12 }
  0xf3   :  { %v1289_v22 = vpop.eup %1288  ;;  %v893_v23 = vadd.f32 1.0, %v1287_v17  ;;  %v801_v24 = vmul.f32 0.7978846, %v737_v13  ;;  %v706_v25 = vadd.f32 %v642_v14, %v1743_v47  ;;  %v738_v26 = vadd.f32 %v674_v15, %v1746_v50  ;;  %v1792_v28 = vpop.f32.mrb[12].mxu0 }
  0xf4   :  { %v1794_v27 = vpop.f32.mrb[12].mxu1  ;;  %v1291_v29 = vpop.eup %1290  ;;  %v925_v30 = vadd.f32 1.0, %v1289_v22  ;;  %1302 = vtanh.f32 %v769_v18  ;;  %v767_v31 = vmul.f32 0.7978846, %v703_v19  ;;  %v799_v32 = vmul.f32 0.7978846, %v735_v20 }
  0xf5   :  { %v1796_v33 = vpop.f32.mrb[13].mxu0  ;;  %v1293_v36 = vpop.eup %1292  ;;  %v957_v37 = vmul.f32 0.5, %v893_v23  ;;  %v891_v41 = vadd.f32 1.0, %v1291_v29  ;;  %1304 = vtanh.f32 %v801_v24  ;;  %v770_v46 = vmul.f32 0.7978846, %v706_v25 }
  0xf6   :  { %v1798_v53 = vpop.f32.mrb[13].mxu1  ;;  %v1800_v56 = vpop.f32.mrb[14].mxu0  ;;  %v989_v60 = vmul.f32 0.5, %v925_v30  ;;  %v923_v61 = vadd.f32 1.0, %v1293_v36  ;;  %1306 = vtanh.f32 %v767_v31  ;;  %v802_v62 = vmul.f32 0.7978846, %v738_v26 }
  0xf7   :  { %v1295_v57 = vpop.eup %1294  ;;  %v1802_v1 = vpop.f32.mrb[14].mxu1  ;;  %v1021_v6 = vmul.f32 %v957_v37, %v1671_v38  ;;  %v955_v7 = vmul.f32 0.5, %v891_v41  ;;  %1308 = vtanh.f32 %v799_v32  ;;  %v576_v22 = vmul.f32 %v512_v21, %v1780_v12 }
  0xf8   :  { %v1804_v2 = vpop.f32.mrb[15].mxu0  ;;  %v1297_v3 = vpop.eup %1296  ;;  %v894_v8 = vadd.f32 1.0, %v1295_v57  ;;  %v1053_v11 = vmul.f32 %v989_v60, %v1674_v39  ;;  %v987_v13 = vmul.f32 0.5, %v923_v61  ;;  %1310 = vtanh.f32 %v770_v46 }
  0xf9   :  { %v1807_v9 = vpop.f32.mrb[15].mxu1  ;;  %v1299_v10 = vpop.eup %1298  ;;  %v926_v14 = vadd.f32 1.0, %v1297_v3  ;;  %1086 = vst.msk [vmem:[%s2590_s3 + $0x10] sm:$0xff] %vm1083_vm1, %v1021_v6  ;;  %v1019_v17 = vmul.f32 %v955_v7, %v1677_v42  ;;  %1312 = vtanh.f32 %v802_v62  ;;  %v544_v24 = vmul.f32 %v1784_v16, %v1784_v16 }
  0xfa   :  { %v1301_v15 = vpop.eup %1300  ;;  %v958_v38 = vmul.f32 0.5, %v894_v8  ;;  %v892_v18 = vadd.f32 1.0, %v1299_v10  ;;  %1118 = vst.msk [vmem:[%s2590_s3 + $0x110] sm:$0xff] %vm1083_vm1, %v1053_v11  ;;  %v1051_v39 = vmul.f32 %v987_v13, %v1680_v43  ;;  %v1830_v25 = vadd.f32 %v1748_v51, %v1668_v35 }
  0xfb   :  { %v990_v19 = vmul.f32 0.5, %v926_v14  ;;  %v924_v20 = vadd.f32 1.0, %v1301_v15  ;;  %1084 = vst.msk [vmem:[%s2590_s3] sm:$0xff] %vm1083_vm1, %v1019_v17  ;;  %v1832_v43 = vpop.f32.mrb[16].mxu0  ;;  %v1834_v26 = vpop.f32.mrb[16].mxu1  ;;  %v1843_v30 = vadd.f32 %v1750_v52, %v1668_v35  ;;  %v608_v36 = vmul.f32 %v544_v24, %v1784_v16 }
  0xfc   :  { %v1022_v42 = vmul.f32 %v958_v38, %v1687_v48  ;;  %v956_v23 = vmul.f32 0.5, %v892_v18  ;;  %1116 = vst.msk [vmem:[%s2590_s3 + $0x100] sm:$0xff] %vm1083_vm1, %v1051_v39  ;;  %v640_v29 = vmul.f32 0.044715, %v576_v22  ;;  %v1845_v31 = vpop.f32.mrb[17].mxu0  ;;  %v1847_v51 = vpop.f32.mrb[17].mxu1  ;;  %v1859_v52 = vadd.f32 %v1668_v35, %v1757_v58 }
  0xfd   :  { %v1054_v21 = vmul.f32 %v990_v19, %v1690_v49  ;;  %v988_v48 = vmul.f32 0.5, %v924_v20  ;;  %v517_v49 = vmul.f32 %v1830_v25, %v1830_v25  ;;  %v1861_v37 = vpop.f32.mrb[18].mxu0  ;;  %v1863_v41 = vpop.f32.mrb[18].mxu1  ;;  %v549_v60 = vmul.f32 %v1843_v30, %v1843_v30 }
  0xfe   :  { %1087 = vst.msk [vmem:[%s2590_s3 + $0x18] sm:$0xff] %vm1083_vm1, %v1022_v42  ;;  %v1020_v32 = vmul.f32 %v956_v23, %v1697_v54  ;;  %v1303_v46 = vpop.eup %1302  ;;  %v704_v57 = vadd.f32 %v640_v29, %v1780_v12  ;;  %v1875_v58 = vadd.f32 %v1668_v35, %v1759_v59  ;;  %v1877_v61 = vpop.f32.mrb[19].mxu0  ;;  %v672_v6 = vmul.f32 0.044715, %v608_v36 }
  0xff   :  { %1119 = vst.msk [vmem:[%s2590_s3 + $0x118] sm:$0xff] %vm1083_vm1, %v1054_v21  ;;  %v1052_v54 = vmul.f32 %v988_v48, %v1700_v55  ;;  %v1879_v62 = vpop.f32.mrb[19].mxu1  ;;  %v1305_v3 = vpop.eup %1304  ;;  %v897_v55 = vadd.f32 1.0, %v1303_v46  ;;  %v581_v7 = vmul.f32 %v517_v49, %v1830_v25  ;;  %v515_v8 = vmul.f32 %v1859_v52, %v1859_v52 }
 0x100   :  { %1085 = vst.msk [vmem:[%s2590_s3 + $0x8] sm:$0xff] %vm1083_vm1, %v1020_v32  ;;  %v1307_v10 = vpop.eup %1306  ;;  %v929_v59 = vadd.f32 1.0, %v1305_v3  ;;  %v768_v11 = vmul.f32 0.7978846, %v704_v57  ;;  %v613_v13 = vmul.f32 %v549_v60, %v1843_v30  ;;  %v547_v14 = vmul.f32 %v1875_v58, %v1875_v58 }
 0x101   :  { %1117 = vst.msk [vmem:[%s2590_s3 + $0x108] sm:$0xff] %vm1083_vm1, %v1052_v54  ;;  %v1309_v15 = vpop.eup %1308  ;;  %v961_v17 = vmul.f32 0.5, %v897_v55  ;;  %v895_v38 = vadd.f32 1.0, %v1307_v10  ;;  %v736_v18 = vadd.f32 %v672_v6, %v1784_v16  ;;  %v645_v39 = vmul.f32 0.044715, %v581_v7 }
 0x102   :  { %v1311_v19 = vpop.eup %1310  ;;  %v993_v20 = vmul.f32 0.5, %v929_v59  ;;  %v927_v22 = vadd.f32 1.0, %v1309_v15  ;;  %1314 = vtanh.f32 %v768_v11  ;;  %v677_v42 = vmul.f32 0.044715, %v613_v13 }
 0x103   :  { %v1313_v23 = vpop.eup %1312  ;;  %v1025_v24 = vmul.f32 %v961_v17, %v1727_v34  ;;  %v959_v21 = vmul.f32 0.5, %v895_v38  ;;  %v898_v48 = vadd.f32 1.0, %v1311_v19  ;;  %v800_v29 = vmul.f32 0.7978846, %v736_v18  ;;  %v1897_v32 = vpop.f32.mrb[20].mxu0 }
 0x104   :  { %v1899_v36 = vpop.f32.mrb[20].mxu1  ;;  %v1057_v49 = vmul.f32 %v993_v20, %v1730_v40  ;;  %v991_v46 = vmul.f32 0.5, %v927_v22  ;;  %v930_v54 = vadd.f32 1.0, %v1313_v23  ;;  %v709_v57 = vadd.f32 %v645_v39, %v1830_v25  ;;  %v1903_v60 = vpop.f32.mrb[21].mxu0 }
 0x105   :  { %v1905_v3 = vpop.f32.mrb[21].mxu1  ;;  %1090 = vst.msk [vmem:[%s2590_s3 + $0x30] sm:$0xff] %vm1083_vm1, %v1025_v24  ;;  %v1023_v34 = vmul.f32 %v959_v21, %v1735_v44  ;;  %v962_v55 = vmul.f32 0.5, %v898_v48  ;;  %1316 = vtanh.f32 %v800_v29  ;;  %v741_v6 = vadd.f32 %v677_v42, %v1843_v30  ;;  %v1913_v40 = vpop.f32.mrb[22].mxu0 }
 0x106   :  { %v1915_v7 = vpop.f32.mrb[22].mxu1  ;;  %1122 = vst.msk [vmem:[%s2590_s3 + $0x130] sm:$0xff] %vm1083_vm1, %v1057_v49  ;;  %v1055_v10 = vmul.f32 %v991_v46, %v1738_v45  ;;  %v994_v59 = vmul.f32 0.5, %v930_v54  ;;  %v773_v11 = vmul.f32 0.7978846, %v709_v57  ;;  %v579_v13 = vmul.f32 %v515_v8, %v1859_v52  ;;  %v1923_v44 = vpop.f32.mrb[23].mxu0 }
 0x107   :  { %v1925_v15 = vpop.f32.mrb[23].mxu1  ;;  %1088 = vst.msk [vmem:[%s2590_s3 + $0x20] sm:$0xff] %vm1083_vm1, %v1023_v34  ;;  %v1026_v17 = vmul.f32 %v962_v55, %v1743_v47  ;;  %v805_v38 = vmul.f32 0.7978846, %v741_v6  ;;  %v611_v18 = vmul.f32 %v547_v14, %v1875_v58  ;;  %v1935_v45 = vadd.f32 %v1766_v63, %v1668_v35 }
 0x108   :  { %1120 = vst.msk [vmem:[%s2590_s3 + $0x120] sm:$0xff] %vm1083_vm1, %v1055_v10  ;;  %v1058_v8 = vmul.f32 %v994_v59, %v1746_v50  ;;  %1318 = vtanh.f32 %v773_v11  ;;  %v643_v39 = vmul.f32 0.044715, %v579_v13  ;;  %v1944_v19 = vadd.f32 %v1768_v0, %v1668_v35 }
 0x109   :  { %1091 = vst.msk [vmem:[%s2590_s3 + $0x38] sm:$0xff] %vm1083_vm1, %v1026_v17  ;;  %1320 = vtanh.f32 %v805_v38  ;;  %v675_v47 = vmul.f32 0.044715, %v611_v18  ;;  %v518_v63 = vmul.f32 %v1935_v45, %v1935_v45  ;;  %v1954_v14 = vadd.f32 %v1668_v35, %v1772_v4 }
 0x10a   :  { %1123 = vst.msk [vmem:[%s2590_s3 + $0x138] sm:$0xff] %vm1083_vm1, %v1058_v8  ;;  %v707_v50 = vadd.f32 %v643_v39, %v1859_v52  ;;  %v550_v0 = vmul.f32 %v1944_v19, %v1944_v19  ;;  %v1965_v20 = vadd.f32 %v1668_v35, %v1774_v5  ;;  %v1969_v22 = vadd.f32 %v1792_v28, %v1668_v35 }
 0x10b   :  { %v739_v4 = vadd.f32 %v675_v47, %v1875_v58  ;;  %v582_v42 = vmul.f32 %v518_v63, %v1935_v45  ;;  %v516_v23 = vmul.f32 %v1954_v14, %v1954_v14  ;;  %v1977_v24 = vadd.f32 %v1794_v27, %v1668_v35  ;;  %v1979_v21 = vpop.f32.mrb[24].mxu0  ;;  %v1981_v48 = vpop.f32.mrb[24].mxu1 }
 0x10c   :  { %v1315_v5 = vpop.eup %1314  ;;  %v771_v29 = vmul.f32 0.7978846, %v707_v50  ;;  %v614_v28 = vmul.f32 %v550_v0, %v1944_v19  ;;  %v548_v49 = vmul.f32 %v1965_v20, %v1965_v20  ;;  %v521_v46 = vmul.f32 %v1969_v22, %v1969_v22  ;;  %v1988_v54 = vpop.f32.mrb[25].mxu0 }
 0x10d   :  { %v1990_v57 = vpop.f32.mrb[25].mxu1  ;;  %v896_v27 = vadd.f32 1.0, %v1315_v5  ;;  %v803_v34 = vmul.f32 0.7978846, %v739_v4  ;;  %v646_v55 = vmul.f32 0.044715, %v582_v42  ;;  %v580_v6 = vmul.f32 %v516_v23, %v1954_v14 }
 0x10e   :  { %v1993_v10 = vpop.f32.mrb[26].mxu0  ;;  %1322 = vtanh.f32 %v771_v29  ;;  %v678_v59 = vmul.f32 0.044715, %v614_v28  ;;  %v612_v11 = vmul.f32 %v548_v49, %v1965_v20  ;;  %v585_v13 = vmul.f32 %v521_v46, %v1969_v22  ;;  %v1997_v17 = vpop.f32.mrb[26].mxu1 }
 0x10f   :  { %v1999_v38 = vpop.f32.mrb[27].mxu0  ;;  %v1317_v18 = vpop.eup %1316  ;;  %v960_v8 = vmul.f32 0.5, %v896_v27  ;;  %1324 = vtanh.f32 %v803_v34  ;;  %v710_v39 = vadd.f32 %v646_v55, %v1935_v45  ;;  %v644_v47 = vmul.f32 0.044715, %v580_v6 }
 0x110   :  { %v2002_v63 = vpop.f32.mrb[27].mxu1  ;;  %v928_v50 = vadd.f32 1.0, %v1317_v18  ;;  %v742_v0 = vadd.f32 %v678_v59, %v1944_v19  ;;  %v676_v4 = vmul.f32 0.044715, %v612_v11  ;;  %v649_v42 = vmul.f32 0.044715, %v585_v13 }
 0x111   :  { %v1024_v23 = vmul.f32 %v960_v8, %v1780_v12  ;;  %v774_v5 = vmul.f32 0.7978846, %v710_v39  ;;  %v708_v29 = vadd.f32 %v644_v47, %v1954_v14  ;;  %v553_v28 = vmul.f32 %v1977_v24, %v1977_v24 }
 0x112   :  { %v1319_v49 = vpop.eup %1318  ;;  %v992_v46 = vmul.f32 0.5, %v928_v50  ;;  %v806_v27 = vmul.f32 0.7978846, %v742_v0  ;;  %v740_v34 = vadd.f32 %v676_v4, %v1965_v20  ;;  %v713_v55 = vadd.f32 %v649_v42, %v1969_v22 }
 0x113   :  { %v1321_v6 = vpop.eup %1320  ;;  %1089 = vst.msk [vmem:[%s2590_s3 + $0x28] sm:$0xff] %vm1083_vm1, %v1024_v23  ;;  %v901_v12 = vadd.f32 1.0, %v1319_v49  ;;  %1326 = vtanh.f32 %v774_v5  ;;  %v772_v59 = vmul.f32 0.7978846, %v708_v29  ;;  %v617_v11 = vmul.f32 %v553_v28, %v1977_v24  ;;  %v2016_v13 = vpop.f32.mrb[28].mxu0 }
 0x114   :  { %v2018_v18 = vpop.f32.mrb[28].mxu1  ;;  %v1056_v8 = vmul.f32 %v992_v46, %v1784_v16  ;;  %v933_v39 = vadd.f32 1.0, %v1321_v6  ;;  %1328 = vtanh.f32 %v806_v27  ;;  %v804_v47 = vmul.f32 0.7978846, %v740_v34  ;;  %v2021_v50 = vpop.f32.mrb[29].mxu0 }
 0x115   :  { %v2023_v0 = vpop.f32.mrb[29].mxu1  ;;  %v965_v4 = vmul.f32 0.5, %v901_v12  ;;  %1330 = vtanh.f32 %v772_v59  ;;  %v777_v42 = vmul.f32 0.7978846, %v713_v55  ;;  %v681_v23 = vmul.f32 0.044715, %v617_v11 }
 0x116   :  { %2591 = vst [vmem:[#allocation2_spill] sm:$0xff] %v2023_v0  ;;  %v2025_v5 = vpop.f32.mrb[30].mxu0  ;;  %1121 = vst.msk [vmem:[%s2590_s3 + $0x128] sm:$0xff] %vm1083_vm1, %v1056_v8  ;;  %v997_v29 = vmul.f32 0.5, %v933_v39  ;;  %1332 = vtanh.f32 %v804_v47  ;;  %v2033_v16 = vadd.f32 %v1668_v35, %v1796_v33  ;;  %v2037_v28 = vadd.f32 %v1668_v35, %v1798_v53  ;;  %v2039_v49 = vpop.f32.mrb[30].mxu1 }
 0x117   :  { %2592 = vst [vmem:[#allocation3_spill] sm:$0xff] %v2025_v5  ;;  %2593 = vst [vmem:[#allocation4_spill] sm:$0xff] %v2039_v49  ;;  %v2041_v46 = vpop.f32.mrb[31].mxu0  ;;  %v1029_v27 = vmul.f32 %v965_v4, %v1830_v25  ;;  %1334 = vtanh.f32 %v777_v42  ;;  %v745_v34 = vadd.f32 %v681_v23, %v1977_v24  ;;  %v2047_v55 = vadd.f32 %v1800_v56, %v1668_v35  ;;  %v2049_v6 = vpop.f32.mrb[31].mxu1 }
 0x118   :  { %2594 = vst [vmem:[#allocation5_spill] sm:$0xff] %v2041_v46  ;;  %2595 = vst [vmem:[#allocation6_spill] sm:$0xff] %v2049_v6  ;;  %v1323_v33 = vpop.eup %1322  ;;  %v1061_v12 = vmul.f32 %v997_v29, %v1843_v30  ;;  %v519_v53 = vmul.f32 %v2033_v16, %v2033_v16  ;;  %v551_v59 = vmul.f32 %v2037_v28, %v2037_v28 }
 0x119   :  { %v2058_v25 = vadd.f32 %v1802_v1, %v1668_v35  ;;  %v1325_v11 = vpop.eup %1324  ;;  %1094 = vst.msk [vmem:[%s2590_s3 + $0x50] sm:$0xff] %vm1083_vm1, %v1029_v27  ;;  %v899_v56 = vadd.f32 1.0, %v1323_v33  ;;  %v809_v8 = vmul.f32 0.7978846, %v745_v34  ;;  %v522_v30 = vmul.f32 %v2047_v55, %v2047_v55 }
 0x11a   :  { %v2068_v39 = vadd.f32 %v1668_v35, %v1804_v2  ;;  %1126 = vst.msk [vmem:[%s2590_s3 + $0x150] sm:$0xff] %vm1083_vm1, %v1061_v12  ;;  %v931_v1 = vadd.f32 1.0, %v1325_v11  ;;  %v583_v47 = vmul.f32 %v519_v53, %v2033_v16  ;;  %v615_v4 = vmul.f32 %v551_v59, %v2037_v28 }
 0x11b   :  { %v554_v42 = vmul.f32 %v2058_v25, %v2058_v25  ;;  %v963_v23 = vmul.f32 0.5, %v899_v56  ;;  %1336 = vtanh.f32 %v809_v8  ;;  %v586_v29 = vmul.f32 %v522_v30, %v2047_v55 }
 0x11c   :  { %v520_v2 = vmul.f32 %v2068_v39, %v2068_v39  ;;  %v995_v27 = vmul.f32 0.5, %v931_v1  ;;  %v647_v34 = vmul.f32 0.044715, %v583_v47  ;;  %v679_v33 = vmul.f32 0.044715, %v615_v4 }
 0x11d   :  { %v618_v12 = vmul.f32 %v554_v42, %v2058_v25  ;;  %v1327_v11 = vpop.eup %1326  ;;  %v1027_v53 = vmul.f32 %v963_v23, %v1859_v52  ;;  %v650_v6 = vmul.f32 0.044715, %v586_v29  ;;  %v2086_v56 = vadd.f32 %v1668_v35, %v1807_v9 }
 0x11e   :  { %v584_v59 = vmul.f32 %v520_v2, %v2068_v39  ;;  %v1329_v8 = vpop.eup %1328  ;;  %v1059_v30 = vmul.f32 %v995_v27, %v1875_v58  ;;  %v902_v46 = vadd.f32 1.0, %v1327_v11  ;;  %v711_v1 = vadd.f32 %v647_v34, %v2033_v16 }
 0x11f   :  { %v743_v47 = vadd.f32 %v679_v33, %v2037_v28  ;;  %v1331_v4 = vpop.eup %1330  ;;  %1092 = vst.msk [vmem:[%s2590_s3 + $0x40] sm:$0xff] %vm1083_vm1, %v1027_v53  ;;  %v934_v52 = vadd.f32 1.0, %v1329_v8  ;;  %v714_v42 = vadd.f32 %v650_v6, %v2047_v55  ;;  %v682_v23 = vmul.f32 0.044715, %v618_v12 }
 0x120   :  { %v648_v9 = vmul.f32 0.044715, %v584_v59  ;;  %v1333_v29 = vpop.eup %1332  ;;  %1124 = vst.msk [vmem:[%s2590_s3 + $0x140] sm:$0xff] %vm1083_vm1, %v1059_v30  ;;  %v966_v58 = vmul.f32 0.5, %v902_v46  ;;  %v900_v2 = vadd.f32 1.0, %v1331_v4  ;;  %v2118_v4 = vadd.f32 %v1832_v43, %v1668_v35 }
 0x121   :  { %v775_v27 = vmul.f32 0.7978846, %v711_v1  ;;  %v807_v34 = vmul.f32 0.7978846, %v743_v47  ;;  %v1335_v33 = vpop.eup %1334  ;;  %v998_v11 = vmul.f32 0.5, %v934_v52  ;;  %v932_v49 = vadd.f32 1.0, %v1333_v29 }
 0x122   :  { %v778_v5 = vmul.f32 0.7978846, %v714_v42  ;;  %v746_v53 = vadd.f32 %v682_v23, %v2058_v25  ;;  %v1030_v6 = vmul.f32 %v966_v58, %v1935_v45  ;;  %v964_v12 = vmul.f32 0.5, %v900_v2 }
 0x123   :  { %v905_v59 = vadd.f32 1.0, %v1335_v33  ;;  %1338 = vtanh.f32 %v775_v27  ;;  %v1062_v8 = vmul.f32 %v998_v11, %v1944_v19  ;;  %v996_v0 = vmul.f32 0.5, %v932_v49 }
 0x124   :  { %1340 = vtanh.f32 %v807_v34  ;;  %v810_v30 = vmul.f32 0.7978846, %v746_v53  ;;  %1095 = vst.msk [vmem:[%s2590_s3 + $0x58] sm:$0xff] %vm1083_vm1, %v1030_v6  ;;  %v1028_v46 = vmul.f32 %v964_v12, %v1954_v14  ;;  %v712_v47 = vadd.f32 %v648_v9, %v2068_v39 }
 0x125   :  { %v969_v1 = vmul.f32 0.5, %v905_v59  ;;  %1342 = vtanh.f32 %v778_v5  ;;  %v1337_v45 = vpop.eup %1336  ;;  %1127 = vst.msk [vmem:[%s2590_s3 + $0x158] sm:$0xff] %vm1083_vm1, %v1062_v8  ;;  %v1060_v19 = vmul.f32 %v996_v0, %v1965_v20  ;;  %v552_v49 = vmul.f32 %v2086_v56, %v2086_v56 }
 0x126   :  { %1344 = vtanh.f32 %v810_v30  ;;  %1093 = vst.msk [vmem:[%s2590_s3 + $0x48] sm:$0xff] %vm1083_vm1, %v1028_v46  ;;  %v937_v5 = vadd.f32 1.0, %v1337_v45  ;;  %v776_v52 = vmul.f32 0.7978846, %v712_v47  ;;  %v2127_v20 = vadd.f32 %v1834_v26, %v1668_v35 }
 0x127   :  { %v1033_v14 = vmul.f32 %v969_v1, %v1969_v22  ;;  %1125 = vst.msk [vmem:[%s2590_s3 + $0x148] sm:$0xff] %vm1083_vm1, %v1060_v19  ;;  %v616_v43 = vmul.f32 %v552_v49, %v2086_v56  ;;  %v525_v0 = vmul.f32 %v2118_v4, %v2118_v4  ;;  %v2138_v42 = vadd.f32 %v1668_v35, %v1845_v31 }
 0x128   :  { %v2142_v22 = vadd.f32 %v1668_v35, %v1847_v51  ;;  %v1001_v26 = vmul.f32 0.5, %v937_v5  ;;  %1346 = vtanh.f32 %v776_v52  ;;  %v557_v23 = vmul.f32 %v2127_v20, %v2127_v20 }
 0x129   :  { %1098 = vst.msk [vmem:[%s2590_s3 + $0x70] sm:$0xff] %vm1083_vm1, %v1033_v14  ;;  %v2152_v9 = vadd.f32 %v1861_v37, %v1668_v35  ;;  %v680_v31 = vmul.f32 0.044715, %v616_v43  ;;  %v589_v29 = vmul.f32 %v525_v0, %v2118_v4  ;;  %v523_v51 = vmul.f32 %v2138_v42, %v2138_v42 }
 0x12a   :  { %v555_v58 = vmul.f32 %v2142_v22, %v2142_v22  ;;  %v1065_v2 = vmul.f32 %v1001_v26, %v1977_v24  ;;  %v621_v27 = vmul.f32 %v557_v23, %v2127_v20  ;;  %v2165_v37 = vadd.f32 %v1863_v41, %v1668_v35 }
 0x12b   :  { %v526_v34 = vmul.f32 %v2152_v9, %v2152_v9  ;;  %v744_v33 = vadd.f32 %v680_v31, %v2086_v56  ;;  %v653_v11 = vmul.f32 0.044715, %v589_v29  ;;  %v587_v53 = vmul.f32 %v523_v51, %v2138_v42 }
 0x12c   :  { %v619_v6 = vmul.f32 %v555_v58, %v2142_v22  ;;  %1130 = vst.msk [vmem:[%s2590_s3 + $0x170] sm:$0xff] %vm1083_vm1, %v1065_v2  ;;  %v685_v24 = vmul.f32 0.044715, %v621_v27  ;;  %v558_v41 = vmul.f32 %v2165_v37, %v2165_v37  ;;  %v2179_v8 = vadd.f32 %v1668_v35, %v1877_v61 }
 0x12d   :  { %v1339_v12 = vpop.eup %1338  ;;  %v590_v59 = vmul.f32 %v526_v34, %v2152_v9  ;;  %v808_v1 = vmul.f32 0.7978846, %v744_v33  ;;  %v717_v47 = vadd.f32 %v653_v11, %v2118_v4  ;;  %v651_v45 = vmul.f32 0.044715, %v587_v53 }
 0x12e   :  { %v1341_v30 = vpop.eup %1340  ;;  %v903_v46 = vadd.f32 1.0, %v1339_v12  ;;  %v749_v14 = vadd.f32 %v685_v24, %v2127_v20  ;;  %v683_v5 = vmul.f32 0.044715, %v619_v6 }
 0x12f   :  { %v1343_v19 = vpop.eup %1342  ;;  %v935_v49 = vadd.f32 1.0, %v1341_v30  ;;  %v654_v52 = vmul.f32 0.044715, %v590_v59  ;;  %1348 = vtanh.f32 %v808_v1  ;;  %v781_v23 = vmul.f32 0.7978846, %v717_v47 }
 0x130   :  { %v1345_v43 = vpop.eup %1344  ;;  %v967_v0 = vmul.f32 0.5, %v903_v46  ;;  %v906_v26 = vadd.f32 1.0, %v1343_v19  ;;  %v813_v29 = vmul.f32 0.7978846, %v749_v14  ;;  %v715_v51 = vadd.f32 %v651_v45, %v2138_v42 }
 0x131   :  { %v999_v31 = vmul.f32 0.5, %v935_v49  ;;  %v938_v61 = vadd.f32 1.0, %v1345_v43  ;;  %1350 = vtanh.f32 %v781_v23  ;;  %v747_v27 = vadd.f32 %v683_v5, %v2142_v22 }
 0x132   :  { %v1031_v58 = vmul.f32 %v967_v0, %v2033_v16  ;;  %v970_v2 = vmul.f32 0.5, %v906_v26  ;;  %v1347_v34 = vpop.eup %1346  ;;  %1352 = vtanh.f32 %v813_v29  ;;  %v779_v53 = vmul.f32 0.7978846, %v715_v51 }
 0x133   :  { %v1063_v33 = vmul.f32 %v999_v31, %v2037_v28  ;;  %v1002_v11 = vmul.f32 0.5, %v938_v61  ;;  %v904_v12 = vadd.f32 1.0, %v1347_v34  ;;  %v811_v24 = vmul.f32 0.7978846, %v747_v27 }
 0x134   :  { %1096 = vst.msk [vmem:[%s2590_s3 + $0x60] sm:$0xff] %vm1083_vm1, %v1031_v58  ;;  %v1034_v6 = vmul.f32 %v970_v2, %v2047_v55  ;;  %v718_v16 = vadd.f32 %v654_v52, %v2152_v9  ;;  %1354 = vtanh.f32 %v779_v53  ;;  %v622_v59 = vmul.f32 %v558_v41, %v2165_v37 }
 0x135   :  { %1128 = vst.msk [vmem:[%s2590_s3 + $0x160] sm:$0xff] %vm1083_vm1, %v1063_v33  ;;  %v1066_v28 = vmul.f32 %v1002_v11, %v2058_v25  ;;  %v524_v30 = vmul.f32 %v2179_v8, %v2179_v8  ;;  %v968_v55 = vmul.f32 0.5, %v904_v12  ;;  %1356 = vtanh.f32 %v811_v24 }
 0x136   :  { %1099 = vst.msk [vmem:[%s2590_s3 + $0x78] sm:$0xff] %vm1083_vm1, %v1034_v6  ;;  %v782_v46 = vmul.f32 0.7978846, %v718_v16  ;;  %v2207_v1 = vadd.f32 %v1668_v35, %v1879_v62  ;;  %v686_v25 = vmul.f32 0.044715, %v622_v59  ;;  %v2216_v47 = vadd.f32 %v1897_v32, %v1668_v35 }
 0x137   :  { %1131 = vst.msk [vmem:[%s2590_s3 + $0x178] sm:$0xff] %vm1083_vm1, %v1066_v28  ;;  %v588_v41 = vmul.f32 %v524_v30, %v2179_v8  ;;  %v2220_v45 = vadd.f32 %v1899_v36, %v1668_v35  ;;  %v1032_v19 = vmul.f32 %v968_v55, %v2068_v39  ;;  %v2227_v49 = vadd.f32 %v1668_v35, %v1903_v60 }
 0x138   :  { %1358 = vtanh.f32 %v782_v46  ;;  %v556_v62 = vmul.f32 %v2207_v1, %v2207_v1  ;;  %v750_v14 = vadd.f32 %v686_v25, %v2165_v37  ;;  %v529_v32 = vmul.f32 %v2216_v47, %v2216_v47 }
 0x139   :  { %v652_v5 = vmul.f32 0.044715, %v588_v41  ;;  %v561_v36 = vmul.f32 %v2220_v45, %v2220_v45  ;;  %v1349_v52 = vpop.eup %1348  ;;  %1097 = vst.msk [vmem:[%s2590_s3 + $0x68] sm:$0xff] %vm1083_vm1, %v1032_v19  ;;  %v527_v60 = vmul.f32 %v2227_v49, %v2227_v49  ;;  %v2243_v43 = vadd.f32 %v1668_v35, %v1905_v3 }
 0x13a   :  { %v620_v39 = vmul.f32 %v556_v62, %v2207_v1  ;;  %v2247_v0 = vadd.f32 %v1913_v40, %v1668_v35  ;;  %v936_v26 = vadd.f32 1.0, %v1349_v52  ;;  %v814_v23 = vmul.f32 0.7978846, %v750_v14 }
 0x13b   :  { %v716_v31 = vadd.f32 %v652_v5, %v2179_v8  ;;  %v593_v61 = vmul.f32 %v529_v32, %v2216_v47  ;;  %v1351_v29 = vpop.eup %1350  ;;  %v625_v58 = vmul.f32 %v561_v36, %v2220_v45  ;;  %v591_v2 = vmul.f32 %v527_v60, %v2227_v49 }
 0x13c   :  { %v684_v51 = vmul.f32 0.044715, %v620_v39  ;;  %v559_v3 = vmul.f32 %v2243_v43, %v2243_v43  ;;  %v1353_v27 = vpop.eup %1352  ;;  %v1000_v34 = vmul.f32 0.5, %v936_v26  ;;  %v909_v33 = vadd.f32 1.0, %v1351_v29  ;;  %v2282_v29 = vld [vmem:[%s2589_s2] ss:$0 sm:$0xff] }
 0x13d   :  { %1360 = vtanh.f32 %v814_v23  ;;  %v780_v35 = vmul.f32 0.7978846, %v716_v31  ;;  %v941_v40 = vadd.f32 1.0, %v1353_v27  ;;  %v657_v53 = vmul.f32 0.044715, %v593_v61 }
 0x13e   :  { %v748_v11 = vadd.f32 %v684_v51, %v2207_v1  ;;  %v689_v6 = vmul.f32 0.044715, %v625_v58  ;;  %v1355_v12 = vpop.eup %1354  ;;  %v1064_v24 = vmul.f32 %v1000_v34, %v2086_v56  ;;  %v973_v16 = vmul.f32 0.5, %v909_v33 }
 0x13f   :  { %1362 = vtanh.f32 %v780_v35  ;;  %v655_v28 = vmul.f32 0.044715, %v591_v2  ;;  %v1357_v59 = vpop.eup %1356  ;;  %v1005_v30 = vmul.f32 0.5, %v941_v40  ;;  %v907_v55 = vadd.f32 1.0, %v1355_v12 }
 0x140   :  { %v812_v46 = vmul.f32 0.7978846, %v748_v11  ;;  %v721_v25 = vadd.f32 %v657_v53, %v2216_v47  ;;  %1129 = vst.msk [vmem:[%s2590_s3 + $0x168] sm:$0xff] %vm1083_vm1, %v1064_v24  ;;  %v1037_v41 = vmul.f32 %v973_v16, %v2118_v4  ;;  %v939_v19 = vadd.f32 1.0, %v1357_v59 }
 0x141   :  { %v753_v62 = vadd.f32 %v689_v6, %v2220_v45  ;;  %v719_v56 = vadd.f32 %v655_v28, %v2227_v49  ;;  %v1069_v5 = vmul.f32 %v1005_v30, %v2127_v20  ;;  %v971_v32 = vmul.f32 0.5, %v907_v55 }
 0x142   :  { %v1359_v14 = vpop.eup %1358  ;;  %1364 = vtanh.f32 %v812_v46  ;;  %v785_v36 = vmul.f32 0.7978846, %v721_v25  ;;  %1102 = vst.msk [vmem:[%s2590_s3 + $0x90] sm:$0xff] %vm1083_vm1, %v1037_v41  ;;  %v1003_v52 = vmul.f32 0.5, %v939_v19  ;;  %v623_v20 = vmul.f32 %v559_v3, %v2243_v43 }
 0x143   :  { %v910_v39 = vadd.f32 1.0, %v1359_v14  ;;  %v817_v60 = vmul.f32 0.7978846, %v753_v62  ;;  %v783_v4 = vmul.f32 0.7978846, %v719_v56  ;;  %1134 = vst.msk [vmem:[%s2590_s3 + $0x190] sm:$0xff] %vm1083_vm1, %v1069_v5  ;;  %v1035_v26 = vmul.f32 %v971_v32, %v2138_v42 }
 0x144   :  { %1366 = vtanh.f32 %v785_v36  ;;  %v530_v23 = vmul.f32 %v2247_v0, %v2247_v0  ;;  %v1067_v31 = vmul.f32 %v1003_v52, %v2142_v22  ;;  %v2286_v51 = vadd.f32 %v2282_v29, %v1915_v7 }
 0x145   :  { %v974_v61 = vmul.f32 0.5, %v910_v39  ;;  %1368 = vtanh.f32 %v817_v60  ;;  %1100 = vst.msk [vmem:[%s2590_s3 + $0x80] sm:$0xff] %vm1083_vm1, %v1035_v26  ;;  %v687_v42 = vmul.f32 0.044715, %v623_v20  ;;  %v2295_v58 = vadd.f32 %v2282_v29, %v1923_v44 }
 0x146   :  { %1370 = vtanh.f32 %v783_v4  ;;  %v594_v22 = vmul.f32 %v530_v23, %v2247_v0  ;;  %1132 = vst.msk [vmem:[%s2590_s3 + $0x180] sm:$0xff] %vm1083_vm1, %v1067_v31  ;;  %v562_v3 = vmul.f32 %v2286_v51, %v2286_v51  ;;  %v2306_v27 = vadd.f32 %v2282_v29, %v1925_v15 }
 0x147   :  { %v1361_v2 = vpop.eup %1360  ;;  %v1038_v7 = vmul.f32 %v974_v61, %v2152_v9  ;;  %v2310_v34 = vadd.f32 %v2282_v29, %v1979_v21  ;;  %v751_v33 = vadd.f32 %v687_v42, %v2243_v43  ;;  %v528_v40 = vmul.f32 %v2295_v58, %v2295_v58 }
 0x148   :  { %v942_v44 = vadd.f32 1.0, %v1361_v2  ;;  %v658_v35 = vmul.f32 0.044715, %v594_v22  ;;  %v626_v15 = vmul.f32 %v562_v3, %v2286_v51  ;;  %v560_v9 = vmul.f32 %v2306_v27, %v2306_v27 }
 0x149   :  { %v1363_v11 = vpop.eup %1362  ;;  %1103 = vst.msk [vmem:[%s2590_s3 + $0x98] sm:$0xff] %vm1083_vm1, %v1038_v7  ;;  %v533_v21 = vmul.f32 %v2310_v34, %v2310_v34  ;;  %v2326_v53 = vadd.f32 %v2282_v29, %v1981_v48  ;;  %v815_v24 = vmul.f32 0.7978846, %v751_v33  ;;  %v592_v59 = vmul.f32 %v528_v40, %v2295_v58 }
 0x14a   :  { %v1006_v6 = vmul.f32 0.5, %v942_v44  ;;  %v908_v12 = vadd.f32 1.0, %v1363_v11  ;;  %v722_v16 = vadd.f32 %v658_v35, %v2247_v0  ;;  %v690_v28 = vmul.f32 0.044715, %v626_v15 }
 0x14b   :  { %v624_v30 = vmul.f32 %v560_v9, %v2306_v27  ;;  %v597_v55 = vmul.f32 %v533_v21, %v2310_v34  ;;  %1372 = vtanh.f32 %v815_v24  ;;  %v656_v56 = vmul.f32 0.044715, %v592_v59 }
 0x14c   :  { %v1365_v46 = vpop.eup %1364  ;;  %v1070_v25 = vmul.f32 %v1006_v6, %v2165_v37  ;;  %v972_v41 = vmul.f32 0.5, %v908_v12  ;;  %v786_v19 = vmul.f32 0.7978846, %v722_v16  ;;  %v754_v62 = vadd.f32 %v690_v28, %v2286_v51 }
 0x14d   :  { %v940_v48 = vadd.f32 1.0, %v1365_v46  ;;  %v688_v14 = vmul.f32 0.044715, %v624_v30  ;;  %v661_v36 = vmul.f32 0.044715, %v597_v55  ;;  %v565_v37 = vmul.f32 %v2326_v53, %v2326_v53 }
 0x14e   :  { %v1367_v5 = vpop.eup %1366  ;;  %1135 = vst.msk [vmem:[%s2590_s3 + $0x198] sm:$0xff] %vm1083_vm1, %v1070_v25  ;;  %v1036_v32 = vmul.f32 %v972_v41, %v2179_v8  ;;  %1374 = vtanh.f32 %v786_v19  ;;  %v818_v4 = vmul.f32 0.7978846, %v754_v62  ;;  %v720_v26 = vadd.f32 %v656_v56, %v2295_v58 }
 0x14f   :  { %v1369_v52 = vpop.eup %1368  ;;  %v1004_v39 = vmul.f32 0.5, %v940_v48  ;;  %v913_v60 = vadd.f32 1.0, %v1367_v5  ;;  %v752_v8 = vadd.f32 %v688_v14, %v2306_v27  ;;  %v725_v31 = vadd.f32 %v661_v36, %v2310_v34 }
 0x150   :  { %v1371_v20 = vpop.eup %1370  ;;  %1101 = vst.msk [vmem:[%s2590_s3 + $0x88] sm:$0xff] %vm1083_vm1, %v1036_v32  ;;  %v945_v23 = vadd.f32 1.0, %v1369_v52  ;;  %v629_v61 = vmul.f32 %v565_v37, %v2326_v53  ;;  %1376 = vtanh.f32 %v818_v4  ;;  %v784_v3 = vmul.f32 0.7978846, %v720_v26 }
 0x151   :  { %v1068_v42 = vmul.f32 %v1004_v39, %v2207_v1  ;;  %v977_v22 = vmul.f32 0.5, %v913_v60  ;;  %v911_v2 = vadd.f32 1.0, %v1371_v20  ;;  %v816_v44 = vmul.f32 0.7978846, %v752_v8 }
 0x152   :  { %v1009_v7 = vmul.f32 0.5, %v945_v23  ;;  %v2352_v33 = vadd.f32 %v2282_v29, %v1988_v54  ;;  %v789_v11 = vmul.f32 0.7978846, %v725_v31  ;;  %v693_v1 = vmul.f32 0.044715, %v629_v61 }
 0x153   :  { %1133 = vst.msk [vmem:[%s2590_s3 + $0x188] sm:$0xff] %vm1083_vm1, %v1068_v42  ;;  %v1041_v35 = vmul.f32 %v977_v22, %v2216_v47  ;;  %v975_v40 = vmul.f32 0.5, %v911_v2  ;;  %1378 = vtanh.f32 %v784_v3  ;;  %v2364_v54 = vadd.f32 %v2282_v29, %v1990_v57 }
 0x154   :  { %v1073_v15 = vmul.f32 %v1009_v7, %v2220_v45  ;;  %v531_v9 = vmul.f32 %v2352_v33, %v2352_v33  ;;  %1380 = vtanh.f32 %v816_v44  ;;  %v757_v21 = vadd.f32 %v693_v1, %v2326_v53 }
 0x155   :  { %1106 = vst.msk [vmem:[%s2590_s3 + $0xb0] sm:$0xff] %vm1083_vm1, %v1041_v35  ;;  %v1039_v47 = vmul.f32 %v975_v40, %v2227_v49  ;;  %v2374_v45 = vadd.f32 %v2282_v29, %v1993_v10  ;;  %v1373_v6 = vpop.eup %1372  ;;  %1382 = vtanh.f32 %v789_v11  ;;  %v563_v12 = vmul.f32 %v2364_v54, %v2364_v54 }
 0x156   :  { %1138 = vst.msk [vmem:[%s2590_s3 + $0x1b0] sm:$0xff] %vm1083_vm1, %v1073_v15  ;;  %v595_v57 = vmul.f32 %v531_v9, %v2352_v33  ;;  %v2385_v49 = vadd.f32 %v2282_v29, %v1997_v17  ;;  %v943_v10 = vadd.f32 1.0, %v1373_v6  ;;  %v821_v24 = vmul.f32 0.7978846, %v757_v21 }
 0x157   :  { %1104 = vst.msk [vmem:[%s2590_s3 + $0xa0] sm:$0xff] %vm1083_vm1, %v1039_v47  ;;  %v534_v16 = vmul.f32 %v2374_v45, %v2374_v45  ;;  %v2395_v28 = vadd.f32 %v2282_v29, %v1999_v38  ;;  %v627_v55 = vmul.f32 %v563_v12, %v2364_v54  ;;  %v2402_v46 = vadd.f32 %v2282_v29, %v2002_v63 }
 0x158   :  { %v1375_v59 = vpop.eup %1374  ;;  %v659_v30 = vmul.f32 0.044715, %v595_v57  ;;  %v566_v17 = vmul.f32 %v2385_v49, %v2385_v49  ;;  %v1007_v25 = vmul.f32 0.5, %v943_v10  ;;  %1384 = vtanh.f32 %v821_v24 }
 0x159   :  { %v914_v41 = vadd.f32 1.0, %v1375_v59  ;;  %v598_v19 = vmul.f32 %v534_v16, %v2374_v45  ;;  %v691_v38 = vmul.f32 0.044715, %v627_v55  ;;  %v532_v56 = vmul.f32 %v2395_v28, %v2395_v28 }
 0x15a   :  { %v723_v48 = vadd.f32 %v659_v30, %v2352_v33  ;;  %v630_v62 = vmul.f32 %v566_v17, %v2385_v49  ;;  %v1377_v14 = vpop.eup %1376  ;;  %v1071_v5 = vmul.f32 %v1007_v25, %v2243_v43  ;;  %v564_v63 = vmul.f32 %v2402_v46, %v2402_v46  ;;  %v2596_v25 = vld [vmem:[#allocation2_spill] sm:$0xff] }
 0x15b   :  { %v978_v32 = vmul.f32 0.5, %v914_v41  ;;  %v662_v36 = vmul.f32 0.044715, %v598_v19  ;;  %v946_v37 = vadd.f32 1.0, %v1377_v14  ;;  %v755_v39 = vadd.f32 %v691_v38, %v2364_v54  ;;  %v2597_v19 = vld [vmem:[#allocation3_spill] sm:$0xff]  ;;  %v2598_v38 = vld [vmem:[#allocation4_spill] sm:$0xff] }
 0x15c   :  { %v787_v52 = vmul.f32 0.7978846, %v723_v48  ;;  %v694_v60 = vmul.f32 0.044715, %v630_v62  ;;  %1136 = vst.msk [vmem:[%s2590_s3 + $0x1a0] sm:$0xff] %vm1083_vm1, %v1071_v5  ;;  %v596_v43 = vmul.f32 %v532_v56, %v2395_v28  ;;  %v628_v20 = vmul.f32 %v564_v63, %v2402_v46 }
 0x15d   :  { %v1042_v4 = vmul.f32 %v978_v32, %v2247_v0  ;;  %v726_v26 = vadd.f32 %v662_v36, %v2374_v45  ;;  %v1379_v23 = vpop.eup %1378  ;;  %v1010_v8 = vmul.f32 0.5, %v946_v37  ;;  %v819_v31 = vmul.f32 0.7978846, %v755_v39 }
 0x15e   :  { %1386 = vtanh.f32 %v787_v52  ;;  %v758_v61 = vadd.f32 %v694_v60, %v2385_v49  ;;  %v1381_v42 = vpop.eup %1380  ;;  %v912_v22 = vadd.f32 1.0, %v1379_v23  ;;  %v660_v2 = vmul.f32 0.044715, %v596_v43 }
 0x15f   :  { %1107 = vst.msk [vmem:[%s2590_s3 + $0xb8] sm:$0xff] %vm1083_vm1, %v1042_v4  ;;  %v790_v0 = vmul.f32 0.7978846, %v726_v26  ;;  %v2428_v7 = vadd.f32 %v2282_v29, %v2016_v13  ;;  %v1383_v3 = vpop.eup %1382  ;;  %v1074_v44 = vmul.f32 %v1010_v8, %v2286_v51  ;;  %v944_v35 = vadd.f32 1.0, %v1381_v42  ;;  %v2599_v26 = vld [vmem:[#allocation5_spill] sm:$0xff] }
 0x160   :  { %1388 = vtanh.f32 %v819_v31  ;;  %v822_v40 = vmul.f32 0.7978846, %v758_v61  ;;  %v976_v11 = vmul.f32 0.5, %v912_v22  ;;  %v917_v1 = vadd.f32 1.0, %v1383_v3 }
 0x161   :  { %1390 = vtanh.f32 %v790_v0  ;;  %v724_v15 = vadd.f32 %v660_v2, %v2395_v28  ;;  %1139 = vst.msk [vmem:[%s2590_s3 + $0x1b8] sm:$0xff] %vm1083_vm1, %v1074_v44  ;;  %v1008_v9 = vmul.f32 0.5, %v944_v35  ;;  %v692_v13 = vmul.f32 0.044715, %v628_v20 }
 0x162   :  { %1392 = vtanh.f32 %v822_v40  ;;  %v537_v47 = vmul.f32 %v2428_v7, %v2428_v7  ;;  %v1385_v51 = vpop.eup %1384  ;;  %v1040_v21 = vmul.f32 %v976_v11, %v2295_v58  ;;  %v981_v6 = vmul.f32 0.5, %v917_v1 }
 0x163   :  { %v788_v57 = vmul.f32 0.7978846, %v724_v15  ;;  %v2441_v12 = vadd.f32 %v2282_v29, %v2018_v18  ;;  %v1072_v10 = vmul.f32 %v1008_v9, %v2306_v27  ;;  %v949_v24 = vadd.f32 1.0, %v1385_v51 }
 0x164   :  { %v756_v16 = vadd.f32 %v692_v13, %v2402_v46  ;;  %v601_v59 = vmul.f32 %v537_v47, %v2428_v7  ;;  %1105 = vst.msk [vmem:[%s2590_s3 + $0xa8] sm:$0xff] %vm1083_vm1, %v1040_v21  ;;  %v1045_v58 = vmul.f32 %v981_v6, %v2310_v34  ;;  %v2455_v18 = vadd.f32 %v2282_v29, %v2021_v50 }
 0x165   :  { %1394 = vtanh.f32 %v788_v57  ;;  %v569_v30 = vmul.f32 %v2441_v12, %v2441_v12  ;;  %1137 = vst.msk [vmem:[%s2590_s3 + $0x1a8] sm:$0xff] %vm1083_vm1, %v1072_v10  ;;  %v1013_v27 = vmul.f32 0.5, %v949_v24  ;;  %v2463_v41 = vadd.f32 %v2282_v29, %v2596_v25 }
 0x166   :  { %v820_v55 = vmul.f32 0.7978846, %v756_v16  ;;  %v665_v17 = vmul.f32 0.044715, %v601_v59  ;;  %1110 = vst.msk [vmem:[%s2590_s3 + $0xd0] sm:$0xff] %vm1083_vm1, %v1045_v58  ;;  %v535_v34 = vmul.f32 %v2455_v18, %v2455_v18  ;;  %v2474_v48 = vadd.f32 %v2282_v29, %v2597_v19 }
 0x167   :  { %v633_v50 = vmul.f32 %v569_v30, %v2441_v12  ;;  %v2478_v62 = vadd.f32 %v2282_v29, %v2598_v38  ;;  %v1077_v14 = vmul.f32 %v1013_v27, %v2326_v53  ;;  %v567_v32 = vmul.f32 %v2463_v41, %v2463_v41  ;;  %v2600_v30 = vld [vmem:[#allocation6_spill] sm:$0xff] }
 0x168   :  { %v1387_v56 = vpop.eup %1386  ;;  %1396 = vtanh.f32 %v820_v55  ;;  %v729_v5 = vadd.f32 %v665_v17, %v2428_v7  ;;  %v599_v37 = vmul.f32 %v535_v34, %v2455_v18  ;;  %v538_v52 = vmul.f32 %v2474_v48, %v2474_v48 }
 0x169   :  { %v915_v36 = vadd.f32 1.0, %v1387_v56  ;;  %v697_v63 = vmul.f32 0.044715, %v633_v50  ;;  %1142 = vst.msk [vmem:[%s2590_s3 + $0x1d0] sm:$0xff] %vm1083_vm1, %v1077_v14  ;;  %v631_v60 = vmul.f32 %v567_v32, %v2463_v41  ;;  %v570_v4 = vmul.f32 %v2478_v62, %v2478_v62 }
 0x16a   :  { %v1389_v39 = vpop.eup %1388  ;;  %v793_v53 = vmul.f32 0.7978846, %v729_v5  ;;  %v2496_v43 = vadd.f32 %v2282_v29, %v2599_v26  ;;  %v663_v61 = vmul.f32 0.044715, %v599_v37  ;;  %v602_v2 = vmul.f32 %v538_v52, %v2474_v48 }
 0x16b   :  { %v1391_v20 = vpop.eup %1390  ;;  %v979_v23 = vmul.f32 0.5, %v915_v36  ;;  %v947_v8 = vadd.f32 1.0, %v1389_v39  ;;  %v761_v31 = vadd.f32 %v697_v63, %v2441_v12  ;;  %v695_v0 = vmul.f32 0.044715, %v631_v60 }
 0x16c   :  { %v1393_v42 = vpop.eup %1392  ;;  %v918_v22 = vadd.f32 1.0, %v1391_v20  ;;  %1398 = vtanh.f32 %v793_v53  ;;  %v727_v1 = vadd.f32 %v663_v61, %v2455_v18  ;;  %v666_v9 = vmul.f32 0.044715, %v602_v2 }
 0x16d   :  { %v1043_v3 = vmul.f32 %v979_v23, %v2352_v33  ;;  %v1011_v44 = vmul.f32 0.5, %v947_v8  ;;  %v950_v35 = vadd.f32 1.0, %v1393_v42  ;;  %v825_v40 = vmul.f32 0.7978846, %v761_v31 }
 0x16e   :  { %v982_v11 = vmul.f32 0.5, %v918_v22  ;;  %v759_v15 = vadd.f32 %v695_v0, %v2463_v41  ;;  %v634_v33 = vmul.f32 %v570_v4, %v2478_v62  ;;  %v791_v57 = vmul.f32 0.7978846, %v727_v1 }
 0x16f   :  { %v1395_v13 = vpop.eup %1394  ;;  %1108 = vst.msk [vmem:[%s2590_s3 + $0xc0] sm:$0xff] %vm1083_vm1, %v1043_v3  ;;  %v1075_v47 = vmul.f32 %v1011_v44, %v2364_v54  ;;  %v1014_v51 = vmul.f32 0.5, %v950_v35  ;;  %1400 = vtanh.f32 %v825_v40  ;;  %v730_v16 = vadd.f32 %v666_v9, %v2474_v48 }
 0x170   :  { %v1046_v21 = vmul.f32 %v982_v11, %v2374_v45  ;;  %v916_v6 = vadd.f32 1.0, %v1395_v13  ;;  %v823_v10 = vmul.f32 0.7978846, %v759_v15  ;;  %v698_v59 = vmul.f32 0.044715, %v634_v33 }
 0x171   :  { %1140 = vst.msk [vmem:[%s2590_s3 + $0x1c0] sm:$0xff] %vm1083_vm1, %v1075_v47  ;;  %v1078_v24 = vmul.f32 %v1014_v51, %v2385_v49  ;;  %v536_v54 = vmul.f32 %v2496_v43, %v2496_v43  ;;  %1402 = vtanh.f32 %v791_v57  ;;  %v2524_v27 = vadd.f32 %v2282_v29, %v2600_v30 }
 0x172   :  { %v1397_v58 = vpop.eup %1396  ;;  %1111 = vst.msk [vmem:[%s2590_s3 + $0xd8] sm:$0xff] %vm1083_vm1, %v1046_v21  ;;  %v980_v45 = vmul.f32 0.5, %v916_v6  ;;  %1404 = vtanh.f32 %v823_v10  ;;  %v794_v55 = vmul.f32 0.7978846, %v730_v16  ;;  %v762_v17 = vadd.f32 %v698_v59, %v2478_v62 }
 0x173   :  { %1143 = vst.msk [vmem:[%s2590_s3 + $0x1d8] sm:$0xff] %vm1083_vm1, %v1078_v24  ;;  %v948_v49 = vadd.f32 1.0, %v1397_v58  ;;  %v600_v50 = vmul.f32 %v536_v54, %v2496_v43  ;;  %v568_v34 = vmul.f32 %v2524_v27, %v2524_v27 }
 0x174   :  { %v1044_v25 = vmul.f32 %v980_v45, %v2395_v28  ;;  %1406 = vtanh.f32 %v794_v55  ;;  %v826_v29 = vmul.f32 0.7978846, %v762_v17 }
 0x175   :  { %v1012_v19 = vmul.f32 0.5, %v948_v49  ;;  %v664_v56 = vmul.f32 0.044715, %v600_v50  ;;  %v632_v14 = vmul.f32 %v568_v34, %v2524_v27 }
 0x176   :  { %v1399_v38 = vpop.eup %1398  ;;  %1109 = vst.msk [vmem:[%s2590_s3 + $0xc8] sm:$0xff] %vm1083_vm1, %v1044_v25  ;;  %1408 = vtanh.f32 %v826_v29 }
 0x177   :  { %v1076_v5 = vmul.f32 %v1012_v19, %v2402_v46  ;;  %v921_v28 = vadd.f32 1.0, %v1399_v38  ;;  %v728_v32 = vadd.f32 %v664_v56, %v2496_v43  ;;  %v696_v36 = vmul.f32 0.044715, %v632_v14 }
 0x179   :  { %v1401_v63 = vpop.eup %1400  ;;  %1141 = vst.msk [vmem:[%s2590_s3 + $0x1c8] sm:$0xff] %vm1083_vm1, %v1076_v5  ;;  %v985_v37 = vmul.f32 0.5, %v921_v28  ;;  %v792_v39 = vmul.f32 0.7978846, %v728_v32  ;;  %v760_v53 = vadd.f32 %v696_v36, %v2524_v27 }
 0x17a   :  { %v953_v52 = vadd.f32 1.0, %v1401_v63 }
 0x17b   :  { %v1049_v60 = vmul.f32 %v985_v37, %v2428_v7  ;;  %v1403_v4 = vpop.eup %1402  ;;  %1410 = vtanh.f32 %v792_v39  ;;  %v824_v26 = vmul.f32 0.7978846, %v760_v53 }
 0x17c   :  { %v1017_v46 = vmul.f32 0.5, %v953_v52  ;;  %v1405_v20 = vpop.eup %1404  ;;  %v919_v23 = vadd.f32 1.0, %v1403_v4 }
 0x17d   :  { %1114 = vst.msk [vmem:[%s2590_s3 + $0xf0] sm:$0xff] %vm1083_vm1, %v1049_v60  ;;  %v951_v31 = vadd.f32 1.0, %v1405_v20  ;;  %1412 = vtanh.f32 %v824_v26 }
 0x17e   :  { %v1081_v8 = vmul.f32 %v1017_v46, %v2441_v12  ;;  %v1407_v61 = vpop.eup %1406  ;;  %v983_v42 = vmul.f32 0.5, %v919_v23 }
 0x17f   :  { %v1015_v7 = vmul.f32 0.5, %v951_v31  ;;  %v922_v22 = vadd.f32 1.0, %v1407_v61 }
 0x180   :  { %1146 = vst.msk [vmem:[%s2590_s3 + $0x1f0] sm:$0xff] %vm1083_vm1, %v1081_v8  ;;  %v1409_v0 = vpop.eup %1408  ;;  %v1047_v2 = vmul.f32 %v983_v42, %v2455_v18 }
 0x181   :  { %v1079_v3 = vmul.f32 %v1015_v7, %v2463_v41  ;;  %v986_v44 = vmul.f32 0.5, %v922_v22  ;;  %v954_v35 = vadd.f32 1.0, %v1409_v0 }
 0x182   :  { %1112 = vst.msk [vmem:[%s2590_s3 + $0xe0] sm:$0xff] %vm1083_vm1, %v1047_v2 }
 0x183   :  { %1144 = vst.msk [vmem:[%s2590_s3 + $0x1e0] sm:$0xff] %vm1083_vm1, %v1079_v3  ;;  %v1050_v12 = vmul.f32 %v986_v44, %v2474_v48  ;;  %v1018_v40 = vmul.f32 0.5, %v954_v35 }
 0x185   :  { %v1411_v11 = vpop.eup %1410  ;;  %1115 = vst.msk [vmem:[%s2590_s3 + $0xf8] sm:$0xff] %vm1083_vm1, %v1050_v12  ;;  %v1082_v18 = vmul.f32 %v1018_v40, %v2478_v62 }
 0x186   :  { %v920_v41 = vadd.f32 1.0, %v1411_v11 }
 0x187   :  { %v1413_v1 = vpop.eup %1412  ;;  %1147 = vst.msk [vmem:[%s2590_s3 + $0x1f8] sm:$0xff] %vm1083_vm1, %v1082_v18 }
 0x188   :  { %v984_v15 = vmul.f32 0.5, %v920_v41  ;;  %v952_v9 = vadd.f32 1.0, %v1413_v1 }
 0x18a   :  { %v1048_v48 = vmul.f32 %v984_v15, %v2496_v43  ;;  %v1016_v13 = vmul.f32 0.5, %v952_v9 }
 0x18c   :  { %1113 = vst.msk [vmem:[%s2590_s3 + $0xe8] sm:$0xff] %vm1083_vm1, %v1048_v48  ;;  %v1080_v47 = vmul.f32 %v1016_v13, %v2524_v27 }
 0x18e   :  { %1145 = vst.msk [vmem:[%s2590_s3 + $0x1e8] sm:$0xff] %vm1083_vm1, %v1080_v47 }

// kernel: _lambda_.23
= control target key start
LH: loop header
LB: loop body
LE: loop exit
PB: predicated region body
PF: predicated region fallthrough
CT: control target
= control target key end

     0   :  { %s1248_s0 = inlined_call_operand.vmem [shape: f32[2,8,32], index: 0, kind: input, shape index: {}]   ;;  %s1249_s1 = inlined_call_operand.vmem [shape: f32[2,256,32], index: 1, kind: input, shape index: {}]   ;;  %s1250_s2 = inlined_call_operand.vmem [shape: f32[32,32], index: 2, kind: input, shape index: {}]   ;;  %s1251_s3 = inlined_call_operand.vmem [shape: f32[1,32], index: 3, kind: input, shape index: {}]   ;;  %s1252_s4 = inlined_call_operand.vmem [shape: f32[32,32], index: 4, kind: input, shape index: {}]   ;;  %s1253_s5 = inlined_call_operand.vmem [shape: f32[1,32], index: 5, kind: input, shape index: {}]   ;;  %s1254_s6 = inlined_call_operand.vmem [shape: f32[32,32], index: 6, kind: input, shape index: {}]   ;;  %s1255_s7 = inlined_call_operand.vmem [shape: f32[1,32], index: 7, kind: input, shape index: {}]   ;;  %s1256_s8 = inlined_call_operand.hbm [shape: f32[2,8,32], index: 8, kind: output, shape index: {0}]   ;;  %s1257_s9 = inlined_call_operand.vmem [shape: f32[2,8,256], index: 9, kind: output, shape index: {1}]  }
   0x1   :  { %1258 = sst [smem:[#allocation5_spill]] %s1248_s0 }
   0x2   :  { %15 = vsyncpa [#allocation3], 0 }
   0x3   :  { %17 = vsyncpa [#allocation3 + $0x1], 0  ;;  %s1039_s30 = smov 0   ;;  %s1041_s10 = smov 0  }
   0x4   :  { %s1043_s11 = smov 0   ;;  %s1045_s12 = smov 0  }
   0x5 LB: > { %s1060_s13 = sadd.s32 4294967295, %s984_s12   ;;  %s799_s14 = sadd.s32 4294967294, %s984_s12   ;;  %s984_s12 = sphi %s1045_s12, %s1265_s12   ;;  %s980_s11 = sphi %s1043_s11, %s1264_s11   ;;  %s976_s10 = sphi %s1041_s10, %s1263_s10   ;;  %s972_s30 = sphi %s1039_s30, %s1262_s30  }
   0x6   : > { %s1064_s15 = sadd.s32 1, %s984_s12   ;;  %s208_s16 = sadd.s32 1, %s980_s11 }
   0x7   : > { %s205_s17 = ssub.s32 %s984_s12, %s1064_s15  ;;  %p218_p0 = scmp.ne.s32.totalorder %s980_s11, %s976_s10 }
   0x8   : > { %p206_p1 = scmp.eq.s32.totalorder %s205_s17, 0  ;;  %p219_p2 = scmp.eq.s32.totalorder %s1060_s13, 1 }
   0x9   : > { %p224_p3 = scmp.ne.s32.totalorder %s976_s10, %s972_s30  ;;  %p225_p4 = scmp.eq.s32.totalorder %s799_s14, 1 }
   0xa   : > { %s1075_s18 = scalar_select %p206_p1, %s980_s11, %s208_s16  }
   0xb   : > { %p1077_p5 = por %p219_p2, %p218_p0  ;;  %p1081_p6 = por %p225_p4, %p224_p3 }
   0xc   : > { %p802_p7 = scmp.ge.s32.totalorder %s984_s12, 1  ;;  %p302_p8 = scmp.lt.s32.totalorder %s984_s12, 3 }
   0xe   : > { %p303_p9 = pnand %p802_p7, %p302_p8 }
   0xf   : > { %v363_v0 = vld [vmem:[%s1250_s2] sm:$0xff] (!%p303_p9)  ;;  %v364_v1 = vld [vmem:[%s1250_s2 + $0x8] sm:$0xff] (!%p303_p9)  ;;  %v365_v2 = vld [vmem:[%s1250_s2 + $0x10] sm:$0xff] (!%p303_p9)  ;;  %p347_p10 = scmp.lt.s32.totalorder (!%p303_p9), %s1060_s13, 1  ;;  %v986_v3 = vmov (!%p303_p9), 0.0   ;;  %vm987_vm0 = vmmov (!%p303_p9), 0  }
  0x10   : > { %306 = sbr.rel (%p303_p9) target bundleno = 898 (0x382), region = 52  ;;  %849 = vmatprep.subr.bf16.mxu0 (!%p303_p9), %v986_v3  ;;  %v368_v4 = vpack.c.bf16 (!%p303_p9), %v364_v1, %v363_v0  ;;  %v366_v5 = vld [vmem:[%s1250_s2 + $0x18] sm:$0xff] (!%p303_p9)  ;;  %853 = vmatprep.mubr.msk.bf16.mxu0 (!%p303_p9), %vm987_vm0, %v986_v3  ;;  %v422_v7 = vld [vmem:[%s1252_s4] sm:$0xff] (!%p303_p9)  ;;  %v423_v8 = vld [vmem:[%s1252_s4 + $0x8] sm:$0xff] (!%p303_p9)  ;;  %s1261_s0 = sld [smem:[#allocation5_spill]] (!%p303_p9)  ;;  %vm377_vm1 = vcmask (!%p303_p9), 261120  }
  0x11   : > { %v369_v6 = vpack.c.bf16 (!%p303_p9), %v366_v5, %v365_v2  ;;  %v427_v11 = vpack.c.bf16 (!%p303_p9), %v423_v8, %v422_v7  ;;  %v424_v12 = vld [vmem:[%s1252_s4 + $0x10] sm:$0xff] (!%p303_p9)  ;;  %v425_v13 = vld [vmem:[%s1252_s4 + $0x18] sm:$0xff] (!%p303_p9)  ;;  %v809_v15 = vld [vmem:[%s1251_s3] ss:$0 sm:$0xff] (!%p303_p9)  ;;  %s337_s24 = sand.u32 (!%p303_p9), 1, %s976_s10   ;;  %s817_s16 = sshll.u32 (!%p303_p9), %s1060_s13, 7 }
  0x12   : > { %850 = vmatpush3.bf16.msra.mxu0 (!%p303_p9), %v368_v4  ;;  %v428_v14 = vpack.c.bf16 (!%p303_p9), %v425_v13, %v424_v12  ;;  %v480_v19 = vld [vmem:[%s1254_s6] sm:$0xff] (!%p303_p9)  ;;  %v481_v20 = vld [vmem:[%s1254_s6 + $0x8] sm:$0xff] (!%p303_p9)  ;;  %v482_v26 = vld [vmem:[%s1254_s6 + $0x10] sm:$0xff] (!%p303_p9)  ;;  %s1208_s22 = scalar_lea.hbm (!%p303_p9), %s1256_s8, %s817_s16  ;;  %s682_s23 = scalar_lea.sflag (!%p303_p9), [#allocation3], %s337_s24 }
  0x13   : > { %851 = vmatprep.subr.bf16.mxu0 (!%p303_p9), %v986_v3  ;;  %v485_v24 = vpack.c.bf16 (!%p303_p9), %v481_v20, %v480_v19  ;;  %v483_v27 = vld [vmem:[%s1254_s6 + $0x18] sm:$0xff] (!%p303_p9) }
  0x14   : > { %v486_v28 = vpack.c.bf16 (!%p303_p9), %v483_v27, %v482_v26 }
  0x16   : > { %852 = vmatpush3.bf16.msra.mxu0 (!%p303_p9), %v369_v6 }
  0x17   : > { %s1102_s29 = scalar_select %p347_p10, %s1060_s13, 1  ;;  %857 = vmatprep.subr.bf16.mxu0 %v986_v3 }
  0x19   : > { %s804_s14 = sshll.u32 %s1102_s29, 3 }
  0x1a   : > { %s350_s25 = scalar_lea.vmem %s1261_s0, %s804_s14 }
  0x1b   : > { %v362_v9 = vld [vmem:[%s350_s25] sm:$0xff]  ;;  %s820_s25 = sshll.u32 %s1102_s29, 8 }
  0x1c   : > { %v367_v10 = vpack.c.bf16 %v362_v9, %v362_v9  ;;  %s1143_s21 = scalar_lea.vmem %s1249_s1, %s820_s25  ;;  %s803_s25 = sshll.u32 %s337_s24, 3 }
  0x1d   : > { %v553_v29 = vld [vmem:[%s1143_s21 + $0x80] sm:$0xff]  ;;  %v554_v30 = vld [vmem:[%s1143_s21 + $0x88] sm:$0xff]  ;;  %v555_v34 = vld [vmem:[%s1143_s21 + $0x90] sm:$0xff]  ;;  %s339_s28 = scalar_lea.vmem [#allocation2], %s803_s25  ;;  %s988_s25 = smov [#allocation2]  }
  0x1e   : > { %854 = vmatmul.mubr.msk.bf16.vlgmr.msra.gmra.mrb[0].mxu0 %vm377_vm1, %v367_v10  ;;  %v537_v31 = vld [vmem:[%s1143_s21] sm:$0xff]  ;;  %v579_v32 = vpack.c.bf16 %v554_v30, %v553_v29  ;;  %v538_v33 = vld [vmem:[%s1143_s21 + $0x8] sm:$0xff]  ;;  %v556_v35 = vld [vmem:[%s1143_s21 + $0x98] sm:$0xff]  ;;  %s700_s14 = sshll.u32 %s339_s28, 4  ;;  %s926_s27 = sshll.u32 %s988_s25, 4  ;;  %s701_s14 = int_to_ptr.vmem [resolvable:$true] %s700_s14  ;;  %s927_s27 = int_to_ptr.vmem [resolvable:$false] %s926_s27 }
  0x1f   : > { %858 = vmatpush3.bf16.msra.mxu0 %v427_v11  ;;  %861 = vmatprep.mubr.msk.bf16.mxu0 %vm987_vm0, %v986_v3  ;;  %v571_v36 = vpack.c.bf16 %v538_v33, %v537_v31  ;;  %v580_v37 = vpack.c.bf16 %v556_v35, %v555_v34  ;;  %v539_v38 = vld [vmem:[%s1143_s21 + $0x10] sm:$0xff]  ;;  %v540_v39 = vld [vmem:[%s1143_s21 + $0x18] sm:$0xff]  ;;  %v557_v42 = vld [vmem:[%s1143_s21 + $0xa0] sm:$0xff]  ;;  %s922_s26 = scalar_lea.vmem %s701_s14, 128  ;;  %s928_s0 = scalar_lea.vmem %s927_s27, 256 }
  0x20   : > { %859 = vmatprep.subr.bf16.mxu0 %v986_v3  ;;  %873 = vmatprep.subr.msk.bf16.mxu1 %vm377_vm1, %v579_v32  ;;  %v572_v41 = vpack.c.bf16 %v540_v39, %v539_v38  ;;  %v558_v43 = vld [vmem:[%s1143_s21 + $0xa8] sm:$0xff]  ;;  %v541_v46 = vld [vmem:[%s1143_s21 + $0x20] sm:$0xff]  ;;  %v559_v49 = vld [vmem:[%s1143_s21 + $0xb0] sm:$0xff]  ;;  %p923_p11 = scmp.ne.s32.totalorder %s701_s14, %s922_s26  ;;  %p929_p0 = scmp.lt.s32.totalorder %s701_s14, %s927_s27 }
  0x21   : > { %v591_v40 = vsel %vm377_vm1, %v571_v36, 0  ;;  %v581_v45 = vpack.c.bf16 %v558_v43, %v557_v42  ;;  %v542_v47 = vld [vmem:[%s1143_s21 + $0x28] sm:$0xff]  ;;  %v560_v50 = vld [vmem:[%s1143_s21 + $0xb8] sm:$0xff]  ;;  %v543_v53 = vld [vmem:[%s1143_s21 + $0x30] sm:$0xff]  ;;  %p930_p1 = scmp.lt.s32.totalorder %s928_s0, %s922_s26 }
  0x22   : > { %832 = vmatpush3.bf16.xpose.msra.mxu1 %v591_v40  ;;  %v594_v44 = vsel %vm377_vm1, %v572_v41, 0  ;;  %v573_v48 = vpack.c.bf16 %v542_v47, %v541_v46  ;;  %v582_v52 = vpack.c.bf16 %v560_v50, %v559_v49  ;;  %v544_v54 = vld [vmem:[%s1143_s21 + $0x38] sm:$0xff]  ;;  %v561_v56 = vld [vmem:[%s1143_s21 + $0xc0] sm:$0xff]  ;;  %v562_v57 = vld [vmem:[%s1143_s21 + $0xc8] sm:$0xff]  ;;  %p924_p12 = pnand %p923_p11, %p1077_p5 }
  0x23   : > { %860 = vmatpush3.bf16.msra.mxu0 %v428_v14  ;;  %874 = vmatprep.subr.msk.bf16.mxu1 %vm377_vm1, %v580_v37  ;;  %v574_v55 = vpack.c.bf16 %v544_v54, %v543_v53  ;;  %v583_v59 = vpack.c.bf16 %v562_v57, %v561_v56  ;;  %v545_v60 = vld [vmem:[%s1143_s21 + $0x40] sm:$0xff]  ;;  %v546_v61 = vld [vmem:[%s1143_s21 + $0x48] sm:$0xff]  ;;  %v563_v63 = vld [vmem:[%s1143_s21 + $0xd0] sm:$0xff]  ;;  %p931_p2 = por %p930_p1, %p929_p0 }
  0x24   : > { %865 = vmatprep.subr.bf16.mxu0 %v986_v3  ;;  %v597_v51 = vsel %vm377_vm1, %v573_v48, 0  ;;  %v575_v62 = vpack.c.bf16 %v546_v61, %v545_v60  ;;  %v564_v0 = vld [vmem:[%s1143_s21 + $0xd8] sm:$0xff]  ;;  %v565_v6 = vld [vmem:[%s1143_s21 + $0xe0] sm:$0xff]  ;;  %v566_v7 = vld [vmem:[%s1143_s21 + $0xe8] sm:$0xff]  ;;  %p925_p13 = pneg %p924_p12 }
  0x25   : > { %v600_v58 = vsel %vm377_vm1, %v574_v55, 0  ;;  %v584_v2 = vpack.c.bf16 %v564_v0, %v563_v63  ;;  %v548_v4 = vld [vmem:[%s1143_s21 + $0x58] sm:$0xff]  ;;  %v585_v9 = vpack.c.bf16 %v566_v7, %v565_v6  ;;  %v549_v10 = vld [vmem:[%s1143_s21 + $0x60] sm:$0xff]  ;;  %v550_v11 = vld [vmem:[%s1143_s21 + $0x68] sm:$0xff] }
  0x26   : > { %v603_v1 = vsel %vm377_vm1, %v575_v62, 0  ;;  %v577_v12 = vpack.c.bf16 %v550_v11, %v549_v10  ;;  %v567_v13 = vld [vmem:[%s1143_s21 + $0xf0] sm:$0xff]  ;;  %v568_v14 = vld [vmem:[%s1143_s21 + $0xf8] sm:$0xff]  ;;  %v813_v29 = vld [vmem:[%s1255_s7] ss:$0 sm:$0xff]  ;;  %p932_p3 = pnand %p931_p2, %p925_p13 }
  0x2a   : > { %834 = vmatpush3.bf16.xpose.msra.mxu1 %v594_v44 }
  0x2b   : > { %875 = vmatprep.subr.msk.bf16.mxu1 %vm377_vm1, %v581_v45 }
  0x32   : > { %836 = vmatpush3.bf16.xpose.msra.mxu1 %v597_v51 }
  0x33   : > { %876 = vmatprep.subr.msk.bf16.mxu1 %vm377_vm1, %v582_v52 }
  0x3a   : > { %838 = vmatpush3.bf16.xpose.msra.mxu1 %v600_v58 }
  0x3b   : > { %877 = vmatprep.subr.msk.bf16.mxu1 %vm377_vm1, %v583_v59 }
  0x42   : > { %840 = vmatpush3.bf16.xpose.msra.mxu1 %v603_v1 }
  0x43   : > { %878 = vmatprep.subr.msk.bf16.mxu1 %vm377_vm1, %v584_v2 }
  0xf1   : > { %v415_v16 = vpop.f32.mrb[0].mxu0 }
  0xf2   : > { %v416_v17 = vadd.f32 %v809_v15, %v415_v16  ;;  %v855_v18 = vpop.f32.mrb[1].mxu0  ;;  %v609_v15 = vsel %vm377_vm1, %v577_v12, 0  ;;  %v586_v16 = vpack.c.bf16 %v568_v14, %v567_v13 }
  0xf3   : > { %v418_v21 = vpop.f32.mrb[2].mxu0  ;;  %v552_v18 = vld [vmem:[%s1143_s21 + $0x78] sm:$0xff] }
  0xf4   : > { %v421_v22 = vmax.f32 %v416_v17, 0.0  ;;  %v856_v23 = vpop.f32.mrb[3].mxu0  ;;  %v551_v17 = vld [vmem:[%s1143_s21 + $0x70] sm:$0xff]  ;;  %v811_v21 = vld [vmem:[%s1253_s5] ss:$0 sm:$0xff] }
  0xf5   : > { %v578_v19 = vpack.c.bf16 %v552_v18, %v551_v17 }
  0xf6   : > { %v426_v25 = vpack.c.bf16 %v421_v22, %v421_v22 }
  0xf7   : > { %v612_v20 = vsel %vm377_vm1, %v578_v19, 0 }
  0xf8   : > { %862 = vmatmul.mubr.msk.bf16.vlgmr.msra.gmra.mrb[4].mxu0 %vm377_vm1, %v426_v25 }
  0xf9   : > { %866 = vmatpush3.bf16.msra.mxu0 %v485_v24  ;;  %869 = vmatprep.mubr.msk.bf16.mxu0 %vm987_vm0, %v986_v3 }
  0xfa   : > { %867 = vmatprep.subr.bf16.mxu0 %v986_v3  ;;  %v547_v3 = vld [vmem:[%s1143_s21 + $0x50] sm:$0xff] }
  0xfb   : > { %v576_v5 = vpack.c.bf16 %v548_v4, %v547_v3 }
  0xfd   : > { %868 = vmatpush3.bf16.msra.mxu0 %v486_v28  ;;  %v606_v8 = vsel %vm377_vm1, %v576_v5, 0 }
  0xfe   : > { %842 = vmatpush3.bf16.xpose.msra.mxu1 %v606_v8 }
  0xff   : > { %879 = vmatprep.subr.msk.bf16.mxu1 %vm377_vm1, %v585_v9 }
 0x106   : > { %844 = vmatpush3.bf16.xpose.msra.mxu1 %v609_v15 }
 0x107   : > { %880 = vmatprep.subr.msk.bf16.mxu1 %vm377_vm1, %v586_v16 }
 0x10e   : > { %846 = vmatpush3.bf16.xpose.msra.mxu1 %v612_v20 }
 0x1cb   : > { %v473_v22 = vpop.f32.mrb[4].mxu0 }
 0x1cc   : > { %v474_v23 = vadd.f32 %v811_v21, %v473_v22  ;;  %v863_v24 = vpop.f32.mrb[5].mxu0 }
 0x1cd   : > { %v476_v25 = vpop.f32.mrb[6].mxu0 }
 0x1ce   : > { %v479_v26 = vmax.f32 %v474_v23, 0.0  ;;  %v864_v27 = vpop.f32.mrb[7].mxu0 }
 0x1d0   : > { %v484_v28 = vpack.c.bf16 %v479_v26, %v479_v26 }
 0x1d2   : > { %870 = vmatmul.mubr.msk.bf16.vlgmr.msra.gmra.mrb[8].mxu0 %vm377_vm1, %v484_v28 }
 0x2a5   : > { %v531_v30 = vpop.f32.mrb[8].mxu0 }
 0x2a6   : > { %v532_v31 = vadd.f32 %v813_v29, %v531_v30  ;;  %v871_v32 = vpop.f32.mrb[9].mxu0 }
 0x2a7   : > { %v534_v33 = vpop.f32.mrb[10].mxu0 }
 0x2a8   : > { %v872_v34 = vpop.f32.mrb[11].mxu0  ;;  %v570_v35 = vpack.c.bf16 %v532_v31, %v532_v31  ;;  %569 = vst.msk [vmem:[%s339_s28] sm:$0xff] %vm377_vm1, %v532_v31 }
 0x2aa   : > { %847 = vmatprep.mubr.msk.bf16.mxu1 %vm377_vm1, %v570_v35 }
 0x2ab   : > { %848 = vmatmul.mubr.msk.bf16.vlgmr.msra.gmra.mrb[0].mxu1 %vm377_vm1, %v570_v35 }
 0x2ac   : > { %935 = shalt.err (!%p932_p3)
}
 0x2ad   : > { %s936_s13 = scalar_lea.hbm %s1208_s22, 128  ;;  %s940_s16 = scalar_lea.hbm %s1256_s8, 256 }
 0x2ae   : > { %p937_p4 = scmp.ne.s32.totalorder %s1208_s22, %s936_s13  ;;  %p941_p9 = scmp.lt.u32.totalorder %s1208_s22, %s1256_s8 }
 0x2af   : > { %p942_p10 = scmp.lt.u32.totalorder %s940_s16, %s936_s13  ;;  %p944_p12 = scmp.lt.u32.totalorder %s936_s13, %s1208_s22 }
 0x2b0   : > { %p938_p7 = pnand %p937_p4, %p1077_p5 }
 0x2b1   : > { %p943_p11 = por %p942_p10, %p941_p9 }
 0x2b2   : > { %p939_p8 = pneg %p938_p7 }
 0x2b3   : > { %p945_p13 = por %p944_p12, %p943_p11 }
 0x2b5   : > { %p946_p0 = pnand %p945_p13, %p939_p8 }
 0x2b7   : > { %949 = shalt.err (!%p946_p0)
}
 0x2b8   : > { %881 = dma.vmem_to_hbm [thread:$0]  (%p1077_p5), %s701_s14, 128, %s1208_s22, %s682_s23  }
 0x2b9   : > { %s821_s0 = sshll.u32 %s1102_s29, 4 }
 0x2ba   : > { %s360_s27 = scalar_lea.vmem %s1257_s9, %s821_s0 }
 0x37e   : > { %v672_v36 = vpop.f32.mrb[0].mxu1 }
 0x37f   : > { %679 = vst [vmem:[%s360_s27] sm:$0xff] %v672_v36  ;;  %v674_v37 = vpop.f32.mrb[1].mxu1 }
 0x380   : > { %680 = vst [vmem:[%s360_s27 + $0x8] sm:$0xff] %v674_v37  ;;  %v676_v38 = vpop.f32.mrb[2].mxu1 }
 0x381   : > { %v677_v39 = vpop.f32.mrb[3].mxu1 }
 0x382 PF: > { %p887_p1 = scmp.ge.s32.totalorder %s984_s12, 2  ;;  %s715_s19 = sand.u32 1, %s972_s30  }
 0x383   : > { %s716_s14 = scalar_lea.sflag [#allocation3], %s715_s19 }
 0x384   : > { %p884_p2 = pnand %p887_p1, %p1081_p6 }
 0x386   : > { %967 = dma.done.wait (!%p884_p2), %s716_s14, 128  }
 0x387   : > { %969 = vsyncadd (!%p884_p2), %s716_s14, 4294967168  ;;  %p20_p5 = scmp.ge.s32.totalorder %s1064_s15, 4   ;;  %s1262_s30 = smov %s976_s10 }
 0x388   : > { %s1263_s10 = smov %s980_s11  ;;  %s1264_s11 = smov %s1075_s18 }
 0x389   : > { %s1265_s12 = smov %s1064_s15  ;;  %22 = sbr.rel (!%p20_p5) target bundleno = 5 (0x5), region = 102 }
 0x390   :  { %729 = vsyncpa [#allocation3], 1 }
 0x391   :  { %731 = vsyncpa [#allocation3 + $0x1], 1 }

// kernel: _lambda_.19
= control target key start
LH: loop header
LB: loop body
LE: loop exit
PB: predicated region body
PF: predicated region fallthrough
CT: control target
= control target key end

     0   :  { %vm311_vm0 = vcmask 261120   ;;  %s742_s1 = inlined_call_operand.vmem [shape: f32[128,32], index: 1, kind: input, shape index: {}]   ;;  %s743_s0 = inlined_call_operand.vmem [shape: f32[128,128], index: 0, kind: input, shape index: {}]   ;;  %s744_s2 = inlined_call_operand.vmem [shape: f32[1,32], index: 2, kind: input, shape index: {}]   ;;  %s745_s3 = inlined_call_operand.vmem [shape: f32[128,32], index: 3, kind: output, shape index: {}]  }
   0x1   :  { %v31_v0 = vld [vmem:[%s742_s1] sm:$0xff]  ;;  %v32_v1 = vld [vmem:[%s742_s1 + $0x8] sm:$0xff]  ;;  %v33_v2 = vld [vmem:[%s742_s1 + $0x10] sm:$0xff] }
   0x2   :  { %v55_v3 = vpack.c.bf16 %v32_v1, %v31_v0  ;;  %v34_v4 = vld [vmem:[%s742_s1 + $0x18] sm:$0xff]  ;;  %v35_v6 = vld [vmem:[%s742_s1 + $0x20] sm:$0xff]  ;;  %v36_v7 = vld [vmem:[%s742_s1 + $0x28] sm:$0xff] }
   0x3   :  { %v56_v5 = vpack.c.bf16 %v34_v4, %v33_v2  ;;  %v57_v8 = vpack.c.bf16 %v36_v7, %v35_v6  ;;  %v37_v9 = vld [vmem:[%s742_s1 + $0x30] sm:$0xff]  ;;  %v15_v10 = vld [vmem:[%s743_s0] sm:$0xff]  ;;  %v16_v11 = vld [vmem:[%s743_s0 + $0x8] sm:$0xff] }
   0x4   :  { %349 = vmatprep.subr.bf16.mxu0 %v55_v3  ;;  %381 = vmatprep.subr.bf16.mxu1 %v55_v3  ;;  %v38_v12 = vld [vmem:[%s742_s1 + $0x38] sm:$0xff]  ;;  %v47_v13 = vpack.c.bf16 %v16_v11, %v15_v10  ;;  %v23_v14 = vld [vmem:[%s743_s0 + $0x40] sm:$0xff]  ;;  %v24_v15 = vld [vmem:[%s743_s0 + $0x48] sm:$0xff] }
   0x5   :  { %350 = vmatpush3.bf16.msra.mxu0 %v55_v3  ;;  %389 = vmatpush3.bf16.msra.mxu1 %v55_v3  ;;  %v51_v16 = vpack.c.bf16 %v24_v15, %v23_v14  ;;  %v58_v17 = vpack.c.bf16 %v38_v12, %v37_v9  ;;  %v39_v18 = vld [vmem:[%s742_s1 + $0x40] sm:$0xff]  ;;  %v40_v19 = vld [vmem:[%s742_s1 + $0x48] sm:$0xff]  ;;  %v41_v21 = vld [vmem:[%s742_s1 + $0x50] sm:$0xff] }
   0x6   :  { %351 = vmatprep.subr.bf16.mxu0 %v56_v5  ;;  %382 = vmatprep.subr.bf16.mxu1 %v56_v5  ;;  %v59_v20 = vpack.c.bf16 %v40_v19, %v39_v18  ;;  %v42_v22 = vld [vmem:[%s742_s1 + $0x58] sm:$0xff]  ;;  %v43_v24 = vld [vmem:[%s742_s1 + $0x60] sm:$0xff]  ;;  %v44_v25 = vld [vmem:[%s742_s1 + $0x68] sm:$0xff] }
   0x7   :  { %365 = vmatprep.mubr.bf16.mxu0 %v47_v13  ;;  %373 = vmatprep.mubr.bf16.mxu1 %v51_v16  ;;  %v60_v23 = vpack.c.bf16 %v42_v22, %v41_v21  ;;  %v61_v26 = vpack.c.bf16 %v44_v25, %v43_v24  ;;  %v45_v27 = vld [vmem:[%s742_s1 + $0x70] sm:$0xff]  ;;  %v46_v28 = vld [vmem:[%s742_s1 + $0x78] sm:$0xff]  ;;  %v19_v34 = vld [vmem:[%s743_s0 + $0x20] sm:$0xff] }
   0x8   :  { %v62_v29 = vpack.c.bf16 %v46_v28, %v45_v27  ;;  %v17_v30 = vld [vmem:[%s743_s0 + $0x10] sm:$0xff]  ;;  %v18_v31 = vld [vmem:[%s743_s0 + $0x18] sm:$0xff]  ;;  %v20_v35 = vld [vmem:[%s743_s0 + $0x28] sm:$0xff] }
   0x9   :  { %352 = vmatpush3.bf16.msra.mxu0 %v56_v5  ;;  %390 = vmatpush3.bf16.msra.mxu1 %v56_v5  ;;  %v25_v32 = vld [vmem:[%s743_s0 + $0x50] sm:$0xff]  ;;  %v26_v33 = vld [vmem:[%s743_s0 + $0x58] sm:$0xff]  ;;  %v27_v36 = vld [vmem:[%s743_s0 + $0x60] sm:$0xff]  ;;  %v48_v38 = vpack.c.bf16 %v18_v31, %v17_v30  ;;  %v49_v40 = vpack.c.bf16 %v20_v35, %v19_v34 }
   0xa   :  { %353 = vmatprep.subr.bf16.mxu0 %v57_v8  ;;  %383 = vmatprep.subr.bf16.mxu1 %v57_v8  ;;  %v28_v37 = vld [vmem:[%s743_s0 + $0x68] sm:$0xff]  ;;  %v52_v39 = vpack.c.bf16 %v26_v33, %v25_v32  ;;  %v21_v42 = vld [vmem:[%s743_s0 + $0x30] sm:$0xff]  ;;  %v22_v43 = vld [vmem:[%s743_s0 + $0x38] sm:$0xff] }
   0xb   :  { %v53_v41 = vpack.c.bf16 %v28_v37, %v27_v36  ;;  %v29_v44 = vld [vmem:[%s743_s0 + $0x70] sm:$0xff]  ;;  %v30_v45 = vld [vmem:[%s743_s0 + $0x78] sm:$0xff]  ;;  %v50_v46 = vpack.c.bf16 %v22_v43, %v21_v42  ;;  %v548_v48 = vld [vmem:[%s744_s2] ss:$0 sm:$0xff] }
   0xc   :  { %v54_v47 = vpack.c.bf16 %v30_v45, %v29_v44 }
   0xd   :  { %354 = vmatpush3.bf16.msra.mxu0 %v57_v8  ;;  %391 = vmatpush3.bf16.msra.mxu1 %v57_v8 }
   0xe   :  { %355 = vmatprep.subr.bf16.mxu0 %v58_v17  ;;  %384 = vmatprep.subr.bf16.mxu1 %v58_v17 }
  0x11   :  { %356 = vmatpush3.bf16.msra.mxu0 %v58_v17  ;;  %392 = vmatpush3.bf16.msra.mxu1 %v58_v17 }
  0x12   :  { %357 = vmatprep.subr.bf16.mxu0 %v59_v20  ;;  %385 = vmatprep.subr.bf16.mxu1 %v59_v20 }
  0x15   :  { %358 = vmatpush3.bf16.msra.mxu0 %v59_v20  ;;  %393 = vmatpush3.bf16.msra.mxu1 %v59_v20 }
  0x16   :  { %359 = vmatprep.subr.bf16.mxu0 %v60_v23  ;;  %386 = vmatprep.subr.bf16.mxu1 %v60_v23 }
  0x19   :  { %360 = vmatpush3.bf16.msra.mxu0 %v60_v23  ;;  %394 = vmatpush3.bf16.msra.mxu1 %v60_v23 }
  0x1a   :  { %361 = vmatprep.subr.bf16.mxu0 %v61_v26  ;;  %387 = vmatprep.subr.bf16.mxu1 %v61_v26 }
  0x1d   :  { %362 = vmatpush3.bf16.msra.mxu0 %v61_v26  ;;  %395 = vmatpush3.bf16.msra.mxu1 %v61_v26 }
  0x1e   :  { %363 = vmatprep.subr.bf16.mxu0 %v62_v29  ;;  %388 = vmatprep.subr.bf16.mxu1 %v62_v29 }
  0x21   :  { %364 = vmatpush3.bf16.msra.mxu0 %v62_v29  ;;  %396 = vmatpush3.bf16.msra.mxu1 %v62_v29 }
  0x24   :  { %366 = vmatmul.mubr.bf16.vlgmr.msra.gmra.mrb[0].mxu0 %v48_v38  ;;  %374 = vmatmul.mubr.bf16.vlgmr.msra.gmra.mrb[0].mxu1 %v52_v39 }
  0x25   :  { %369 = vmatprep.mubr.bf16.mxu0 %v49_v40  ;;  %377 = vmatprep.mubr.bf16.mxu1 %v53_v41 }
  0x2c   :  { %370 = vmatmul.mubr.bf16.gmra.mrb[4].mxu0 %v50_v46  ;;  %378 = vmatmul.mubr.bf16.gmra.mrb[4].mxu1 %v54_v47 }
  0xf7   :  { %v367_v49 = vpop.f32.mrb[0].mxu0  ;;  %v375_v50 = vpop.f32.mrb[0].mxu1 }
  0xf8   :  { %v551_v51 = vadd.f32 %v367_v49, %v548_v48  ;;  %v554_v52 = vadd.f32 %v375_v50, %v548_v48  ;;  %v104_v53 = vpop.f32.mrb[1].mxu0  ;;  %v136_v54 = vpop.f32.mrb[1].mxu1 }
  0xf9   :  { %v557_v55 = vadd.f32 %v548_v48, %v104_v53  ;;  %v560_v56 = vadd.f32 %v548_v48, %v136_v54  ;;  %v368_v57 = vpop.f32.mrb[2].mxu0  ;;  %v376_v58 = vpop.f32.mrb[2].mxu1 }
  0xfa   :  { %v169_v59 = vmul.f32 %v551_v51, %v551_v51  ;;  %v177_v60 = vmul.f32 %v554_v52, %v554_v52  ;;  %v567_v61 = vadd.f32 %v368_v57, %v548_v48  ;;  %v570_v62 = vadd.f32 %v376_v58, %v548_v48  ;;  %v107_v63 = vpop.f32.mrb[3].mxu0  ;;  %v139_v0 = vpop.f32.mrb[3].mxu1 }
  0xfb   :  { %v167_v1 = vmul.f32 %v557_v55, %v557_v55  ;;  %v175_v2 = vmul.f32 %v560_v56, %v560_v56  ;;  %v577_v3 = vadd.f32 %v548_v48, %v107_v63  ;;  %v580_v4 = vadd.f32 %v548_v48, %v139_v0 }
  0xfc   :  { %v185_v5 = vmul.f32 %v169_v59, %v551_v51  ;;  %v193_v6 = vmul.f32 %v177_v60, %v554_v52  ;;  %v170_v7 = vmul.f32 %v567_v61, %v567_v61  ;;  %v178_v8 = vmul.f32 %v570_v62, %v570_v62 }
  0xfd   :  { %v183_v9 = vmul.f32 %v167_v1, %v557_v55  ;;  %v191_v10 = vmul.f32 %v175_v2, %v560_v56  ;;  %v168_v11 = vmul.f32 %v577_v3, %v577_v3  ;;  %v176_v12 = vmul.f32 %v580_v4, %v580_v4 }
  0xfe   :  { %v201_v13 = vmul.f32 0.044715, %v185_v5  ;;  %v209_v14 = vmul.f32 0.044715, %v193_v6  ;;  %v186_v15 = vmul.f32 %v170_v7, %v567_v61  ;;  %v194_v16 = vmul.f32 %v178_v8, %v570_v62 }
  0xff   :  { %v199_v17 = vmul.f32 0.044715, %v183_v9  ;;  %v207_v18 = vmul.f32 0.044715, %v191_v10  ;;  %v184_v19 = vmul.f32 %v168_v11, %v577_v3  ;;  %v192_v20 = vmul.f32 %v176_v12, %v580_v4  ;;  %v371_v21 = vpop.f32.mrb[4].mxu0  ;;  %v379_v22 = vpop.f32.mrb[4].mxu1 }
 0x100   :  { %v217_v23 = vadd.f32 %v201_v13, %v551_v51  ;;  %v225_v24 = vadd.f32 %v209_v14, %v554_v52  ;;  %v202_v25 = vmul.f32 0.044715, %v186_v15  ;;  %v210_v26 = vmul.f32 0.044715, %v194_v16  ;;  %v120_v27 = vpop.f32.mrb[5].mxu0  ;;  %v152_v28 = vpop.f32.mrb[5].mxu1 }
 0x101   :  { %v215_v29 = vadd.f32 %v199_v17, %v557_v55  ;;  %v223_v30 = vadd.f32 %v207_v18, %v560_v56  ;;  %v200_v31 = vmul.f32 0.044715, %v184_v19  ;;  %v208_v32 = vmul.f32 0.044715, %v192_v20  ;;  %v372_v33 = vpop.f32.mrb[6].mxu0  ;;  %v380_v34 = vpop.f32.mrb[6].mxu1 }
 0x102   :  { %v233_v35 = vmul.f32 0.7978846, %v217_v23  ;;  %v241_v36 = vmul.f32 0.7978846, %v225_v24  ;;  %v218_v37 = vadd.f32 %v202_v25, %v567_v61  ;;  %v226_v38 = vadd.f32 %v210_v26, %v570_v62  ;;  %v123_v39 = vpop.f32.mrb[7].mxu0  ;;  %v155_v40 = vpop.f32.mrb[7].mxu1 }
 0x103   :  { %v231_v41 = vmul.f32 0.7978846, %v215_v29  ;;  %v239_v42 = vmul.f32 0.7978846, %v223_v30  ;;  %v216_v43 = vadd.f32 %v200_v31, %v577_v3  ;;  %v224_v44 = vadd.f32 %v208_v32, %v580_v4 }
 0x104   :  { %397 = vtanh.f32 %v233_v35  ;;  %v234_v45 = vmul.f32 0.7978846, %v218_v37  ;;  %v242_v46 = vmul.f32 0.7978846, %v226_v38  ;;  %v607_v47 = vadd.f32 %v371_v21, %v548_v48 }
 0x105   :  { %399 = vtanh.f32 %v241_v36  ;;  %v232_v49 = vmul.f32 0.7978846, %v216_v43  ;;  %v240_v50 = vmul.f32 0.7978846, %v224_v44  ;;  %v610_v53 = vadd.f32 %v379_v22, %v548_v48 }
 0x106   :  { %401 = vtanh.f32 %v231_v41  ;;  %v173_v54 = vmul.f32 %v607_v47, %v607_v47  ;;  %v615_v57 = vadd.f32 %v548_v48, %v120_v27  ;;  %v618_v58 = vadd.f32 %v548_v48, %v152_v28 }
 0x107   :  { %403 = vtanh.f32 %v239_v42  ;;  %v181_v59 = vmul.f32 %v610_v53, %v610_v53  ;;  %v623_v60 = vadd.f32 %v372_v33, %v548_v48  ;;  %v626_v63 = vadd.f32 %v380_v34, %v548_v48 }
 0x108   :  { %405 = vtanh.f32 %v234_v45  ;;  %v189_v0 = vmul.f32 %v173_v54, %v607_v47  ;;  %v171_v1 = vmul.f32 %v615_v57, %v615_v57  ;;  %v179_v2 = vmul.f32 %v618_v58, %v618_v58 }
 0x109   :  { %407 = vtanh.f32 %v242_v46  ;;  %v197_v5 = vmul.f32 %v181_v59, %v610_v53  ;;  %v174_v6 = vmul.f32 %v623_v60, %v623_v60  ;;  %v182_v7 = vmul.f32 %v626_v63, %v626_v63 }
 0x10a   :  { %409 = vtanh.f32 %v232_v49  ;;  %v205_v8 = vmul.f32 0.044715, %v189_v0  ;;  %v187_v9 = vmul.f32 %v171_v1, %v615_v57  ;;  %v195_v10 = vmul.f32 %v179_v2, %v618_v58 }
 0x10b   :  { %411 = vtanh.f32 %v240_v50  ;;  %v213_v11 = vmul.f32 0.044715, %v197_v5  ;;  %v190_v12 = vmul.f32 %v174_v6, %v623_v60  ;;  %v198_v13 = vmul.f32 %v182_v7, %v626_v63 }
 0x10c   :  { %v221_v14 = vadd.f32 %v205_v8, %v607_v47  ;;  %v203_v15 = vmul.f32 0.044715, %v187_v9  ;;  %v211_v16 = vmul.f32 0.044715, %v195_v10  ;;  %v644_v17 = vadd.f32 %v548_v48, %v123_v39 }
 0x10d   :  { %v229_v18 = vadd.f32 %v213_v11, %v610_v53  ;;  %v206_v19 = vmul.f32 0.044715, %v190_v12  ;;  %v214_v20 = vmul.f32 0.044715, %v198_v13  ;;  %v648_v21 = vadd.f32 %v548_v48, %v155_v40 }
 0x10e   :  { %v398_v22 = vpop.eup %397  ;;  %v237_v23 = vmul.f32 0.7978846, %v221_v14  ;;  %v219_v24 = vadd.f32 %v203_v15, %v615_v57  ;;  %v227_v25 = vadd.f32 %v211_v16, %v618_v58  ;;  %v172_v26 = vmul.f32 %v644_v17, %v644_v17 }
 0x10f   :  { %v400_v27 = vpop.eup %399  ;;  %v265_v28 = vadd.f32 1.0, %v398_v22  ;;  %v245_v29 = vmul.f32 0.7978846, %v229_v18  ;;  %v222_v30 = vadd.f32 %v206_v19, %v623_v60  ;;  %v230_v31 = vadd.f32 %v214_v20, %v626_v63 }
 0x110   :  { %v402_v32 = vpop.eup %401  ;;  %v273_v33 = vadd.f32 1.0, %v400_v27  ;;  %413 = vtanh.f32 %v237_v23  ;;  %v235_v48 = vmul.f32 0.7978846, %v219_v24  ;;  %v243_v34 = vmul.f32 0.7978846, %v227_v25 }
 0x111   :  { %v404_v35 = vpop.eup %403  ;;  %v281_v36 = vmul.f32 0.5, %v265_v28  ;;  %v263_v37 = vadd.f32 1.0, %v402_v32  ;;  %415 = vtanh.f32 %v245_v29  ;;  %v238_v38 = vmul.f32 0.7978846, %v222_v30 }
 0x112   :  { %v406_v39 = vpop.eup %405  ;;  %v289_v40 = vmul.f32 0.5, %v273_v33  ;;  %v271_v41 = vadd.f32 1.0, %v404_v35  ;;  %417 = vtanh.f32 %v235_v48  ;;  %v246_v42 = vmul.f32 0.7978846, %v230_v31 }
 0x113   :  { %v408_v43 = vpop.eup %407  ;;  %v297_v44 = vmul.f32 %v281_v36, %v551_v51  ;;  %v279_v45 = vmul.f32 0.5, %v263_v37  ;;  %v266_v46 = vadd.f32 1.0, %v406_v39  ;;  %419 = vtanh.f32 %v243_v34 }
 0x114   :  { %v410_v49 = vpop.eup %409  ;;  %v305_v50 = vmul.f32 %v289_v40, %v554_v52  ;;  %v287_v54 = vmul.f32 0.5, %v271_v41  ;;  %v274_v59 = vadd.f32 1.0, %v408_v43  ;;  %421 = vtanh.f32 %v238_v38 }
 0x115   :  { %v412_v0 = vpop.eup %411  ;;  %314 = vst.msk [vmem:[%s745_s3 + $0x10] sm:$0xff] %vm311_vm0, %v297_v44  ;;  %v295_v1 = vmul.f32 %v279_v45, %v557_v55  ;;  %v282_v2 = vmul.f32 0.5, %v266_v46  ;;  %v264_v5 = vadd.f32 1.0, %v410_v49  ;;  %423 = vtanh.f32 %v246_v42 }
 0x116   :  { %322 = vst.msk [vmem:[%s745_s3 + $0x50] sm:$0xff] %vm311_vm0, %v305_v50  ;;  %v303_v51 = vmul.f32 %v287_v54, %v560_v56  ;;  %v290_v52 = vmul.f32 0.5, %v274_v59  ;;  %v272_v6 = vadd.f32 1.0, %v412_v0  ;;  %v188_v7 = vmul.f32 %v172_v26, %v644_v17 }
 0x117   :  { %312 = vst.msk [vmem:[%s745_s3] sm:$0xff] %vm311_vm0, %v295_v1  ;;  %v298_v55 = vmul.f32 %v282_v2, %v567_v61  ;;  %v280_v8 = vmul.f32 0.5, %v264_v5  ;;  %v180_v9 = vmul.f32 %v648_v21, %v648_v21 }
 0x118   :  { %320 = vst.msk [vmem:[%s745_s3 + $0x40] sm:$0xff] %vm311_vm0, %v303_v51  ;;  %v306_v56 = vmul.f32 %v290_v52, %v570_v62  ;;  %v288_v10 = vmul.f32 0.5, %v272_v6  ;;  %v204_v11 = vmul.f32 0.044715, %v188_v7 }
 0x119   :  { %315 = vst.msk [vmem:[%s745_s3 + $0x18] sm:$0xff] %vm311_vm0, %v298_v55  ;;  %v296_v61 = vmul.f32 %v280_v8, %v577_v3  ;;  %v196_v12 = vmul.f32 %v180_v9, %v648_v21 }
 0x11a   :  { %v414_v13 = vpop.eup %413  ;;  %323 = vst.msk [vmem:[%s745_s3 + $0x58] sm:$0xff] %vm311_vm0, %v306_v56  ;;  %v304_v14 = vmul.f32 %v288_v10, %v580_v4  ;;  %v220_v62 = vadd.f32 %v204_v11, %v644_v17 }
 0x11b   :  { %v416_v15 = vpop.eup %415  ;;  %313 = vst.msk [vmem:[%s745_s3 + $0x8] sm:$0xff] %vm311_vm0, %v296_v61  ;;  %v269_v16 = vadd.f32 1.0, %v414_v13  ;;  %v212_v3 = vmul.f32 0.044715, %v196_v12 }
 0x11c   :  { %v418_v18 = vpop.eup %417  ;;  %321 = vst.msk [vmem:[%s745_s3 + $0x48] sm:$0xff] %vm311_vm0, %v304_v14  ;;  %v277_v19 = vadd.f32 1.0, %v416_v15  ;;  %v236_v20 = vmul.f32 0.7978846, %v220_v62 }
 0x11d   :  { %v420_v22 = vpop.eup %419  ;;  %v285_v4 = vmul.f32 0.5, %v269_v16  ;;  %v267_v23 = vadd.f32 1.0, %v418_v18  ;;  %v228_v24 = vadd.f32 %v212_v3, %v648_v21 }
 0x11e   :  { %v422_v25 = vpop.eup %421  ;;  %v293_v26 = vmul.f32 0.5, %v277_v19  ;;  %v275_v27 = vadd.f32 1.0, %v420_v22  ;;  %425 = vtanh.f32 %v236_v20 }
 0x11f   :  { %v424_v28 = vpop.eup %423  ;;  %v301_v29 = vmul.f32 %v285_v4, %v607_v47  ;;  %v283_v30 = vmul.f32 0.5, %v267_v23  ;;  %v270_v31 = vadd.f32 1.0, %v422_v25  ;;  %v244_v32 = vmul.f32 0.7978846, %v228_v24 }
 0x120   :  { %v309_v33 = vmul.f32 %v293_v26, %v610_v53  ;;  %v291_v48 = vmul.f32 0.5, %v275_v27  ;;  %v278_v34 = vadd.f32 1.0, %v424_v28 }
 0x121   :  { %318 = vst.msk [vmem:[%s745_s3 + $0x30] sm:$0xff] %vm311_vm0, %v301_v29  ;;  %v299_v35 = vmul.f32 %v283_v30, %v615_v57  ;;  %v286_v36 = vmul.f32 0.5, %v270_v31  ;;  %427 = vtanh.f32 %v244_v32 }
 0x122   :  { %326 = vst.msk [vmem:[%s745_s3 + $0x70] sm:$0xff] %vm311_vm0, %v309_v33  ;;  %v307_v47 = vmul.f32 %v291_v48, %v618_v58  ;;  %v294_v37 = vmul.f32 0.5, %v278_v34 }
 0x123   :  { %316 = vst.msk [vmem:[%s745_s3 + $0x20] sm:$0xff] %vm311_vm0, %v299_v35  ;;  %v302_v53 = vmul.f32 %v286_v36, %v623_v60 }
 0x124   :  { %324 = vst.msk [vmem:[%s745_s3 + $0x60] sm:$0xff] %vm311_vm0, %v307_v47  ;;  %v310_v57 = vmul.f32 %v294_v37, %v626_v63 }
 0x125   :  { %319 = vst.msk [vmem:[%s745_s3 + $0x38] sm:$0xff] %vm311_vm0, %v302_v53 }
 0x126   :  { %327 = vst.msk [vmem:[%s745_s3 + $0x78] sm:$0xff] %vm311_vm0, %v310_v57 }
 0x128   :  { %v426_v58 = vpop.eup %425 }
 0x129   :  { %v268_v38 = vadd.f32 1.0, %v426_v58 }
 0x12b   :  { %v428_v60 = vpop.eup %427  ;;  %v284_v39 = vmul.f32 0.5, %v268_v38 }
 0x12c   :  { %v276_v40 = vadd.f32 1.0, %v428_v60 }
 0x12d   :  { %v300_v41 = vmul.f32 %v284_v39, %v644_v17 }
 0x12e   :  { %v292_v42 = vmul.f32 0.5, %v276_v40 }
 0x12f   :  { %317 = vst.msk [vmem:[%s745_s3 + $0x28] sm:$0xff] %vm311_vm0, %v300_v41 }
 0x130   :  { %v308_v63 = vmul.f32 %v292_v42, %v648_v21 }
 0x132   :  { %325 = vst.msk [vmem:[%s745_s3 + $0x68] sm:$0xff] %vm311_vm0, %v308_v63 }

// kernel: _lambda_.20
= control target key start
LH: loop header
LB: loop body
LE: loop exit
PB: predicated region body
PF: predicated region fallthrough
CT: control target
= control target key end

     0   :  { %vm137_vm0 = vcmask 261120   ;;  %s280_s1 = inlined_call_operand.vmem [shape: f32[128,32], index: 1, kind: input, shape index: {}]   ;;  %s281_s0 = inlined_call_operand.vmem [shape: f32[32,128], index: 0, kind: input, shape index: {}]   ;;  %s282_s2 = inlined_call_operand.vmem [shape: f32[1,32], index: 2, kind: input, shape index: {}]   ;;  %s283_s3 = inlined_call_operand.vmem [shape: f32[32,32], index: 3, kind: output, shape index: {}]  }
   0x1   :  { %v19_v0 = vld [vmem:[%s280_s1] sm:$0xff]  ;;  %v20_v1 = vld [vmem:[%s280_s1 + $0x8] sm:$0xff]  ;;  %v21_v2 = vld [vmem:[%s280_s1 + $0x10] sm:$0xff] }
   0x2   :  { %v37_v3 = vpack.c.bf16 %v20_v1, %v19_v0  ;;  %v22_v4 = vld [vmem:[%s280_s1 + $0x18] sm:$0xff]  ;;  %v23_v6 = vld [vmem:[%s280_s1 + $0x20] sm:$0xff]  ;;  %v24_v7 = vld [vmem:[%s280_s1 + $0x28] sm:$0xff] }
   0x3   :  { %v38_v5 = vpack.c.bf16 %v22_v4, %v21_v2  ;;  %v39_v8 = vpack.c.bf16 %v24_v7, %v23_v6  ;;  %v15_v9 = vld [vmem:[%s281_s0] sm:$0xff]  ;;  %v16_v10 = vld [vmem:[%s281_s0 + $0x8] sm:$0xff]  ;;  %v25_v11 = vld [vmem:[%s280_s1 + $0x30] sm:$0xff] }
   0x4   :  { %157 = vmatprep.subr.bf16.mxu0 %v37_v3  ;;  %v26_v12 = vld [vmem:[%s280_s1 + $0x38] sm:$0xff]  ;;  %v35_v13 = vpack.c.bf16 %v16_v10, %v15_v9  ;;  %v27_v15 = vld [vmem:[%s280_s1 + $0x40] sm:$0xff]  ;;  %v28_v16 = vld [vmem:[%s280_s1 + $0x48] sm:$0xff] }
   0x5   :  { %158 = vmatpush3.bf16.msra.mxu0 %v37_v3  ;;  %v40_v14 = vpack.c.bf16 %v26_v12, %v25_v11  ;;  %v41_v17 = vpack.c.bf16 %v28_v16, %v27_v15  ;;  %v29_v18 = vld [vmem:[%s280_s1 + $0x50] sm:$0xff]  ;;  %v30_v19 = vld [vmem:[%s280_s1 + $0x58] sm:$0xff]  ;;  %v31_v21 = vld [vmem:[%s280_s1 + $0x60] sm:$0xff] }
   0x6   :  { %159 = vmatprep.subr.bf16.mxu0 %v38_v5  ;;  %173 = vmatprep.mubr.bf16.mxu0 %v35_v13  ;;  %v42_v20 = vpack.c.bf16 %v30_v19, %v29_v18  ;;  %v32_v22 = vld [vmem:[%s280_s1 + $0x68] sm:$0xff]  ;;  %v33_v24 = vld [vmem:[%s280_s1 + $0x70] sm:$0xff]  ;;  %v34_v25 = vld [vmem:[%s280_s1 + $0x78] sm:$0xff] }
   0x7   :  { %v43_v23 = vpack.c.bf16 %v32_v22, %v31_v21  ;;  %v44_v26 = vpack.c.bf16 %v34_v25, %v33_v24  ;;  %v17_v27 = vld [vmem:[%s281_s0 + $0x10] sm:$0xff]  ;;  %v18_v28 = vld [vmem:[%s281_s0 + $0x18] sm:$0xff]  ;;  %v146_v30 = vld [vmem:[%s282_s2] ss:$0 sm:$0xff] }
   0x8   :  { %v36_v29 = vpack.c.bf16 %v18_v28, %v17_v27 }
   0x9   :  { %160 = vmatpush3.bf16.msra.mxu0 %v38_v5 }
   0xa   :  { %161 = vmatprep.subr.bf16.mxu0 %v39_v8 }
   0xd   :  { %162 = vmatpush3.bf16.msra.mxu0 %v39_v8 }
   0xe   :  { %163 = vmatprep.subr.bf16.mxu0 %v40_v14 }
  0x11   :  { %164 = vmatpush3.bf16.msra.mxu0 %v40_v14 }
  0x12   :  { %165 = vmatprep.subr.bf16.mxu0 %v41_v17 }
  0x15   :  { %166 = vmatpush3.bf16.msra.mxu0 %v41_v17 }
  0x16   :  { %167 = vmatprep.subr.bf16.mxu0 %v42_v20 }
  0x19   :  { %168 = vmatpush3.bf16.msra.mxu0 %v42_v20 }
  0x1a   :  { %169 = vmatprep.subr.bf16.mxu0 %v43_v23 }
  0x1d   :  { %170 = vmatpush3.bf16.msra.mxu0 %v43_v23 }
  0x1e   :  { %171 = vmatprep.subr.bf16.mxu0 %v44_v26 }
  0x21   :  { %172 = vmatpush3.bf16.msra.mxu0 %v44_v26 }
  0x24   :  { %174 = vmatmul.mubr.bf16.vlgmr.msra.gmra.mrb[0].mxu0 %v36_v29 }
  0xf7   :  { %v175_v31 = vpop.f32.mrb[0].mxu0 }
  0xf8   :  { %v95_v32 = vadd.f32 %v175_v31, %v146_v30  ;;  %v86_v33 = vpop.f32.mrb[1].mxu0 }
  0xf9   :  { %v87_v34 = vadd.f32 %v146_v30, %v86_v33  ;;  %v176_v35 = vpop.f32.mrb[2].mxu0 }
  0xfa   :  { %v103_v36 = vmul.f32 %v95_v32, %v95_v32  ;;  %v98_v37 = vadd.f32 %v176_v35, %v146_v30  ;;  %v89_v38 = vpop.f32.mrb[3].mxu0 }
  0xfb   :  { %v101_v39 = vmul.f32 %v87_v34, %v87_v34  ;;  %v90_v40 = vadd.f32 %v146_v30, %v89_v38 }
  0xfc   :  { %v107_v41 = vmul.f32 %v103_v36, %v95_v32  ;;  %v104_v42 = vmul.f32 %v98_v37, %v98_v37 }
  0xfd   :  { %v105_v43 = vmul.f32 %v101_v39, %v87_v34  ;;  %v102_v44 = vmul.f32 %v90_v40, %v90_v40 }
  0xfe   :  { %v111_v45 = vmul.f32 0.044715, %v107_v41  ;;  %v108_v46 = vmul.f32 %v104_v42, %v98_v37 }
  0xff   :  { %v109_v47 = vmul.f32 0.044715, %v105_v43  ;;  %v106_v48 = vmul.f32 %v102_v44, %v90_v40 }
 0x100   :  { %v115_v49 = vadd.f32 %v111_v45, %v95_v32  ;;  %v112_v50 = vmul.f32 0.044715, %v108_v46 }
 0x101   :  { %v113_v51 = vadd.f32 %v109_v47, %v87_v34  ;;  %v110_v52 = vmul.f32 0.044715, %v106_v48 }
 0x102   :  { %v119_v53 = vmul.f32 0.7978846, %v115_v49  ;;  %v116_v54 = vadd.f32 %v112_v50, %v98_v37 }
 0x103   :  { %v117_v55 = vmul.f32 0.7978846, %v113_v51  ;;  %v114_v56 = vadd.f32 %v110_v52, %v90_v40 }
 0x104   :  { %177 = vtanh.f32 %v119_v53  ;;  %v120_v57 = vmul.f32 0.7978846, %v116_v54 }
 0x105   :  { %179 = vtanh.f32 %v117_v55  ;;  %v118_v58 = vmul.f32 0.7978846, %v114_v56 }
 0x106   :  { %181 = vtanh.f32 %v120_v57 }
 0x107   :  { %183 = vtanh.f32 %v118_v58 }
 0x10e   :  { %v178_v59 = vpop.eup %177 }
 0x10f   :  { %v180_v60 = vpop.eup %179  ;;  %v127_v61 = vadd.f32 1.0, %v178_v59 }
 0x110   :  { %v182_v62 = vpop.eup %181  ;;  %v125_v63 = vadd.f32 1.0, %v180_v60 }
 0x111   :  { %v184_v0 = vpop.eup %183  ;;  %v131_v1 = vmul.f32 0.5, %v127_v61  ;;  %v128_v2 = vadd.f32 1.0, %v182_v62 }
 0x112   :  { %v129_v3 = vmul.f32 0.5, %v125_v63  ;;  %v126_v4 = vadd.f32 1.0, %v184_v0 }
 0x113   :  { %v135_v5 = vmul.f32 %v131_v1, %v95_v32  ;;  %v132_v6 = vmul.f32 0.5, %v128_v2 }
 0x114   :  { %v133_v7 = vmul.f32 %v129_v3, %v87_v34  ;;  %v130_v8 = vmul.f32 0.5, %v126_v4 }
 0x115   :  { %140 = vst.msk [vmem:[%s283_s3 + $0x10] sm:$0xff] %vm137_vm0, %v135_v5  ;;  %v136_v9 = vmul.f32 %v132_v6, %v98_v37 }
 0x116   :  { %138 = vst.msk [vmem:[%s283_s3] sm:$0xff] %vm137_vm0, %v133_v7  ;;  %v134_v10 = vmul.f32 %v130_v8, %v90_v40 }
 0x117   :  { %141 = vst.msk [vmem:[%s283_s3 + $0x18] sm:$0xff] %vm137_vm0, %v136_v9 }
 0x118   :  { %139 = vst.msk [vmem:[%s283_s3 + $0x8] sm:$0xff] %vm137_vm0, %v134_v10 }

// kernel: _lambda_.21
= control target key start
LH: loop header
LB: loop body
LE: loop exit
PB: predicated region body
PF: predicated region fallthrough
CT: control target
= control target key end

     0   :  { %v137_v0 = vmov 0.0   ;;  %vm138_vm0 = vmmov 0   ;;  %vm97_vm1 = vcmask 261120   ;;  %s216_s1 = inlined_call_operand.vmem [shape: f32[128,32], index: 1, kind: input, shape index: {}]   ;;  %s217_s0 = inlined_call_operand.vmem [shape: f32[8,128], index: 0, kind: input, shape index: {}]   ;;  %s218_s2 = inlined_call_operand.vmem [shape: f32[1,32], index: 2, kind: input, shape index: {}]   ;;  %s219_s3 = inlined_call_operand.vmem [shape: f32[8,32], index: 3, kind: output, shape index: {}]  }
   0x1   :  { %113 = vmatprep.subr.bf16.mxu0 %v137_v0  ;;  %v16_v1 = vld [vmem:[%s216_s1] sm:$0xff]  ;;  %v17_v2 = vld [vmem:[%s216_s1 + $0x8] sm:$0xff]  ;;  %v18_v3 = vld [vmem:[%s216_s1 + $0x10] sm:$0xff]  ;;  %129 = vmatprep.mubr.msk.bf16.mxu0 %vm138_vm0, %v137_v0 }
   0x2   :  { %v33_v4 = vpack.c.bf16 %v17_v2, %v16_v1  ;;  %v19_v5 = vld [vmem:[%s216_s1 + $0x18] sm:$0xff]  ;;  %v20_v7 = vld [vmem:[%s216_s1 + $0x20] sm:$0xff]  ;;  %v21_v8 = vld [vmem:[%s216_s1 + $0x28] sm:$0xff] }
   0x3   :  { %v34_v6 = vpack.c.bf16 %v19_v5, %v18_v3  ;;  %v35_v9 = vpack.c.bf16 %v21_v8, %v20_v7  ;;  %v22_v10 = vld [vmem:[%s216_s1 + $0x30] sm:$0xff]  ;;  %v23_v11 = vld [vmem:[%s216_s1 + $0x38] sm:$0xff]  ;;  %v24_v13 = vld [vmem:[%s216_s1 + $0x40] sm:$0xff] }
   0x4   :  { %114 = vmatpush3.bf16.msra.mxu0 %v33_v4  ;;  %v36_v12 = vpack.c.bf16 %v23_v11, %v22_v10  ;;  %v25_v14 = vld [vmem:[%s216_s1 + $0x48] sm:$0xff]  ;;  %v26_v16 = vld [vmem:[%s216_s1 + $0x50] sm:$0xff]  ;;  %v27_v17 = vld [vmem:[%s216_s1 + $0x58] sm:$0xff] }
   0x5   :  { %115 = vmatprep.subr.bf16.mxu0 %v137_v0  ;;  %v37_v15 = vpack.c.bf16 %v25_v14, %v24_v13  ;;  %v38_v18 = vpack.c.bf16 %v27_v17, %v26_v16  ;;  %v28_v19 = vld [vmem:[%s216_s1 + $0x60] sm:$0xff]  ;;  %v29_v20 = vld [vmem:[%s216_s1 + $0x68] sm:$0xff]  ;;  %v30_v22 = vld [vmem:[%s216_s1 + $0x70] sm:$0xff] }
   0x6   :  { %v39_v21 = vpack.c.bf16 %v29_v20, %v28_v19  ;;  %v31_v23 = vld [vmem:[%s216_s1 + $0x78] sm:$0xff]  ;;  %v15_v25 = vld [vmem:[%s217_s0] sm:$0xff] }
   0x7   :  { %v40_v24 = vpack.c.bf16 %v31_v23, %v30_v22  ;;  %v32_v26 = vpack.c.bf16 %v15_v25, %v15_v25  ;;  %v103_v27 = vld [vmem:[%s218_s2] ss:$0 sm:$0xff] }
   0x8   :  { %116 = vmatpush3.bf16.msra.mxu0 %v34_v6 }
   0x9   :  { %117 = vmatprep.subr.bf16.mxu0 %v137_v0 }
   0xc   :  { %118 = vmatpush3.bf16.msra.mxu0 %v35_v9 }
   0xd   :  { %119 = vmatprep.subr.bf16.mxu0 %v137_v0 }
  0x10   :  { %120 = vmatpush3.bf16.msra.mxu0 %v36_v12 }
  0x11   :  { %121 = vmatprep.subr.bf16.mxu0 %v137_v0 }
  0x14   :  { %122 = vmatpush3.bf16.msra.mxu0 %v37_v15 }
  0x15   :  { %123 = vmatprep.subr.bf16.mxu0 %v137_v0 }
  0x18   :  { %124 = vmatpush3.bf16.msra.mxu0 %v38_v18 }
  0x19   :  { %125 = vmatprep.subr.bf16.mxu0 %v137_v0 }
  0x1c   :  { %126 = vmatpush3.bf16.msra.mxu0 %v39_v21 }
  0x1d   :  { %127 = vmatprep.subr.bf16.mxu0 %v137_v0 }
  0x20   :  { %128 = vmatpush3.bf16.msra.mxu0 %v40_v24 }
  0x23   :  { %130 = vmatmul.mubr.bf16.vlgmr.msra.gmra.mrb[0].mxu0 %v32_v26 }
  0xf6   :  { %v82_v28 = vpop.f32.mrb[0].mxu0 }
  0xf7   :  { %v83_v29 = vadd.f32 %v103_v27, %v82_v28  ;;  %v131_v30 = vpop.f32.mrb[1].mxu0 }
  0xf8   :  { %v85_v31 = vpop.f32.mrb[2].mxu0 }
  0xf9   :  { %v88_v32 = vmul.f32 %v83_v29, %v83_v29  ;;  %v132_v33 = vpop.f32.mrb[3].mxu0 }
  0xfb   :  { %v89_v34 = vmul.f32 %v88_v32, %v83_v29 }
  0xfd   :  { %v90_v35 = vmul.f32 0.044715, %v89_v34 }
  0xff   :  { %v91_v36 = vadd.f32 %v90_v35, %v83_v29 }
 0x101   :  { %v92_v37 = vmul.f32 0.7978846, %v91_v36 }
 0x103   :  { %135 = vtanh.f32 %v92_v37 }
 0x10d   :  { %v136_v38 = vpop.eup %135 }
 0x10e   :  { %v94_v39 = vadd.f32 1.0, %v136_v38 }
 0x110   :  { %v95_v40 = vmul.f32 0.5, %v94_v39 }
 0x112   :  { %v96_v41 = vmul.f32 %v95_v40, %v83_v29 }
 0x114   :  { %98 = vst.msk [vmem:[%s219_s3] sm:$0xff] %vm97_vm1, %v96_v41 }

// kernel: _lambda_.26
= control target key start
LH: loop header
LB: loop body
LE: loop exit
PB: predicated region body
PF: predicated region fallthrough
CT: control target
= control target key end

     0   :  { %v287_v0 = vmov 0.0   ;;  %vm288_vm0 = vmmov 0   ;;  %vm43_vm1 = vcmask 261120   ;;  %s428_s1 = inlined_call_operand.vmem [shape: f32[32,128], index: 1, kind: input, shape index: {}]   ;;  %s429_s0 = inlined_call_operand.vmem [shape: f32[16,32], index: 0, kind: input, shape index: {}]   ;;  %s430_s3 = inlined_call_operand.vmem [shape: f32[128,32], index: 3, kind: input, shape index: {}]   ;;  %s431_s2 = inlined_call_operand.vmem [shape: f32[1,128], index: 2, kind: input, shape index: {}]   ;;  %s432_s4 = inlined_call_operand.vmem [shape: f32[1,32], index: 4, kind: input, shape index: {}]   ;;  %s433_s5 = inlined_call_operand.vmem [shape: f32[1,32], index: 5, kind: input, shape index: {}]   ;;  %s434_s6 = inlined_call_operand.vmem [shape: f32[1,32], index: 6, kind: input, shape index: {}]   ;;  %s435_s7 = inlined_call_operand.vmem [shape: f32[16,32], index: 7, kind: output, shape index: {}]  }
   0x1   :  { %249 = vmatprep.subr.bf16.mxu0 %v287_v0  ;;  %v29_v1 = vld [vmem:[%s428_s1] sm:$0xff]  ;;  %v30_v2 = vld [vmem:[%s428_s1 + $0x8] sm:$0xff]  ;;  %v31_v3 = vld [vmem:[%s428_s1 + $0x10] sm:$0xff]  ;;  %253 = vmatprep.mubr.msk.bf16.mxu0 %vm288_vm0, %v287_v0 }
   0x2   :  { %v34_v4 = vpack.c.bf16 %v30_v2, %v29_v1  ;;  %v32_v5 = vld [vmem:[%s428_s1 + $0x18] sm:$0xff]  ;;  %257 = vmatprep.subr.bf16.mxu1 %v287_v0  ;;  %273 = vmatprep.mubr.msk.bf16.mxu1 %vm288_vm0, %v287_v0  ;;  %v344_v7 = vld [vmem:[%s429_s0] sm:$0xff]  ;;  %v349_v8 = vld [vmem:[%s429_s0 + $0x8] sm:$0xff] }
   0x3   :  { %v35_v6 = vpack.c.bf16 %v32_v5, %v31_v3  ;;  %v33_v9 = vpack.c.bf16 %v349_v8, %v344_v7  ;;  %v106_v10 = vld [vmem:[%s430_s3] sm:$0xff]  ;;  %v107_v11 = vld [vmem:[%s430_s3 + $0x8] sm:$0xff]  ;;  %v108_v13 = vld [vmem:[%s430_s3 + $0x10] sm:$0xff] }
   0x4   :  { %250 = vmatpush3.bf16.msra.mxu0 %v34_v4  ;;  %v123_v12 = vpack.c.bf16 %v107_v11, %v106_v10  ;;  %v109_v14 = vld [vmem:[%s430_s3 + $0x18] sm:$0xff]  ;;  %v110_v16 = vld [vmem:[%s430_s3 + $0x20] sm:$0xff]  ;;  %v111_v17 = vld [vmem:[%s430_s3 + $0x28] sm:$0xff] }
   0x5   :  { %251 = vmatprep.subr.bf16.mxu0 %v287_v0  ;;  %v124_v15 = vpack.c.bf16 %v109_v14, %v108_v13  ;;  %v125_v18 = vpack.c.bf16 %v111_v17, %v110_v16  ;;  %v112_v19 = vld [vmem:[%s430_s3 + $0x30] sm:$0xff]  ;;  %v113_v20 = vld [vmem:[%s430_s3 + $0x38] sm:$0xff]  ;;  %v114_v22 = vld [vmem:[%s430_s3 + $0x40] sm:$0xff] }
   0x6   :  { %258 = vmatpush3.bf16.msra.mxu1 %v123_v12  ;;  %v126_v21 = vpack.c.bf16 %v113_v20, %v112_v19  ;;  %v115_v23 = vld [vmem:[%s430_s3 + $0x48] sm:$0xff]  ;;  %v116_v25 = vld [vmem:[%s430_s3 + $0x50] sm:$0xff]  ;;  %v117_v26 = vld [vmem:[%s430_s3 + $0x58] sm:$0xff] }
   0x7   :  { %259 = vmatprep.subr.bf16.mxu1 %v287_v0  ;;  %v127_v24 = vpack.c.bf16 %v115_v23, %v114_v22  ;;  %v128_v27 = vpack.c.bf16 %v117_v26, %v116_v25  ;;  %v118_v28 = vld [vmem:[%s430_s3 + $0x60] sm:$0xff]  ;;  %v119_v29 = vld [vmem:[%s430_s3 + $0x68] sm:$0xff]  ;;  %v120_v31 = vld [vmem:[%s430_s3 + $0x70] sm:$0xff] }
   0x8   :  { %252 = vmatpush3.bf16.msra.mxu0 %v35_v6  ;;  %v129_v30 = vpack.c.bf16 %v119_v29, %v118_v28  ;;  %v121_v32 = vld [vmem:[%s430_s3 + $0x78] sm:$0xff]  ;;  %v232_v34 = vld [vmem:[%s431_s2] ss:$0 sm:$0xff] }
   0x9   :  { %v130_v33 = vpack.c.bf16 %v121_v32, %v120_v31  ;;  %v234_v60 = vld [vmem:[%s432_s4] ss:$0 sm:$0xff] }
   0xa   :  { %260 = vmatpush3.bf16.msra.mxu1 %v124_v15  ;;  %v236_v26 = vld [vmem:[%s434_s6] ss:$0 sm:$0xff] }
   0xb   :  { %254 = vmatmul.mubr.msk.bf16.vlgmr.msra.gmra.mrb[0].mxu0 %vm43_vm1, %v33_v9  ;;  %261 = vmatprep.subr.bf16.mxu1 %v287_v0 }
   0xe   :  { %262 = vmatpush3.bf16.msra.mxu1 %v125_v18 }
   0xf   :  { %263 = vmatprep.subr.bf16.mxu1 %v287_v0 }
  0x12   :  { %264 = vmatpush3.bf16.msra.mxu1 %v126_v21 }
  0x13   :  { %265 = vmatprep.subr.bf16.mxu1 %v287_v0 }
  0x16   :  { %266 = vmatpush3.bf16.msra.mxu1 %v127_v24  ;;  %v235_v24 = vld [vmem:[%s433_s5] ss:$0 sm:$0xff] }
  0x17   :  { %267 = vmatprep.subr.bf16.mxu1 %v287_v0 }
  0x1a   :  { %268 = vmatpush3.bf16.msra.mxu1 %v128_v27 }
  0x1b   :  { %269 = vmatprep.subr.bf16.mxu1 %v287_v0 }
  0x1e   :  { %270 = vmatpush3.bf16.msra.mxu1 %v129_v30 }
  0x1f   :  { %271 = vmatprep.subr.bf16.mxu1 %v287_v0 }
  0x22   :  { %272 = vmatpush3.bf16.msra.mxu1 %v130_v33 }
  0xde   :  { %v81_v35 = vpop.f32.mrb[0].mxu0 }
  0xdf   :  { %v82_v36 = vadd.f32 %v232_v34, %v81_v35  ;;  %v255_v37 = vpop.f32.mrb[1].mxu0 }
  0xe0   :  { %v84_v38 = vpop.f32.mrb[2].mxu0 }
  0xe1   :  { %v88_v39 = vmul.f32 %v82_v36, %v82_v36  ;;  %v85_v40 = vadd.f32 %v232_v34, %v84_v38  ;;  %v256_v41 = vpop.f32.mrb[3].mxu0 }
  0xe3   :  { %v90_v42 = vmul.f32 %v88_v39, %v82_v36  ;;  %v89_v43 = vmul.f32 %v85_v40, %v85_v40 }
  0xe5   :  { %v92_v44 = vmul.f32 0.044715, %v90_v42  ;;  %v91_v45 = vmul.f32 %v89_v43, %v85_v40 }
  0xe7   :  { %v94_v46 = vadd.f32 %v92_v44, %v82_v36  ;;  %v93_v47 = vmul.f32 0.044715, %v91_v45 }
  0xe9   :  { %v96_v48 = vmul.f32 0.7978846, %v94_v46  ;;  %v95_v49 = vadd.f32 %v93_v47, %v85_v40 }
  0xeb   :  { %279 = vtanh.f32 %v96_v48  ;;  %v97_v50 = vmul.f32 0.7978846, %v95_v49 }
  0xed   :  { %281 = vtanh.f32 %v97_v50 }
  0xf5   :  { %v280_v51 = vpop.eup %279 }
  0xf6   :  { %v100_v52 = vadd.f32 1.0, %v280_v51 }
  0xf7   :  { %v282_v53 = vpop.eup %281 }
  0xf8   :  { %v101_v54 = vadd.f32 1.0, %v282_v53  ;;  %v102_v55 = vmul.f32 0.5, %v100_v52 }
  0xfa   :  { %v103_v56 = vmul.f32 0.5, %v101_v54  ;;  %v104_v57 = vmul.f32 %v102_v55, %v82_v36 }
  0xfc   :  { %v105_v58 = vmul.f32 %v103_v56, %v85_v40 }
  0xfe   :  { %v122_v59 = vpack.c.bf16 %v105_v58, %v104_v57 }
 0x100   :  { %274 = vmatmul.mubr.bf16.vlgmr.msra.gmra.mrb[0].mxu1 %v122_v59 }
 0x1d3   :  { %v172_v61 = vpop.f32.mrb[0].mxu1 }
 0x1d4   :  { %v173_v62 = vadd.f32 %v234_v60, %v172_v61  ;;  %v275_v63 = vpop.f32.mrb[1].mxu1 }
 0x1d5   :  { %v175_v0 = vpop.f32.mrb[2].mxu1 }
 0x1d6   :  { %v176_v1 = vadd.f32 %v234_v60, %v175_v0  ;;  %v276_v2 = vpop.f32.mrb[3].mxu1  ;;  %v179_v3 = vadd.f32 %v173_v62, %v344_v7 }
 0x1d8   :  { %v183_v4 = vsel %vm43_vm1, %v179_v3, 0.0  ;;  %v180_v5 = vadd.f32 %v176_v1, %v349_v8 }
 0x1d9   :  { %184 = vadd.xlane.f32.xlu0 %v183_v4 }
 0x1da   :  { %v186_v6 = vsel %vm43_vm1, %v180_v5, 0.0 }
 0x1dd   :  { %187 = vadd.xlane.f32.xlu0 %v186_v6 }
 0x266   :  { %v185_v9 = vpop.xlane.xlu0 %184 }
 0x267   :  { %v190_v10 = vmul.f32 0.03125, %v185_v9 }
 0x269   :  { %v192_v11 = vsub.f32 %v179_v3, %v190_v10 }
 0x26a   :  { %v188_v12 = vpop.xlane.xlu0 %187 }
 0x26b   :  { %v191_v13 = vmul.f32 0.03125, %v188_v12  ;;  %v194_v14 = vmul.f32 %v192_v11, %v192_v11 }
 0x26d   :  { %v193_v15 = vsub.f32 %v180_v5, %v191_v13  ;;  %v196_v16 = vsel %vm43_vm1, %v194_v14, 0.0 }
 0x26e   :  { %197 = vadd.xlane.f32.xlu1 %v196_v16 }
 0x26f   :  { %v195_v17 = vmul.f32 %v193_v15, %v193_v15 }
 0x271   :  { %v199_v7 = vsel %vm43_vm1, %v195_v17, 0.0 }
 0x272   :  { %200 = vadd.xlane.f32.xlu1 %v199_v7 }
 0x2fb   :  { %v198_v18 = vpop.xlane.xlu1 %197 }
 0x2fc   :  { %v202_v8 = vmul.f32 0.03125, %v198_v18 }
 0x2fe   :  { %v204_v19 = vadd.f32 1e-05, %v202_v8 }
 0x2ff   :  { %v201_v20 = vpop.xlane.xlu1 %200 }
 0x300   :  { %283 = vrsqrt.f32 %v204_v19  ;;  %v203_v21 = vmul.f32 0.03125, %v201_v20 }
 0x302   :  { %v205_v22 = vadd.f32 1e-05, %v203_v21 }
 0x304   :  { %285 = vrsqrt.f32 %v205_v22 }
 0x30a   :  { %v284_v23 = vpop.eup %283 }
 0x30b   :  { %v208_v25 = vmul.f32 %v284_v23, %v192_v11 }
 0x30d   :  { %v216_v27 = vmul.f32 %v235_v24, %v208_v25 }
 0x30e   :  { %v286_v28 = vpop.eup %285 }
 0x30f   :  { %v224_v29 = vadd.f32 %v236_v26, %v216_v27  ;;  %v209_v30 = vmul.f32 %v286_v28, %v193_v15 }
 0x311   :  { %226 = vst.msk [vmem:[%s435_s7] sm:$0xff] %vm43_vm1, %v224_v29  ;;  %v217_v31 = vmul.f32 %v235_v24, %v209_v30 }
 0x313   :  { %v225_v32 = vadd.f32 %v236_v26, %v217_v31 }
 0x315   :  { %227 = vst.msk [vmem:[%s435_s7 + $0x8] sm:$0xff] %vm43_vm1, %v225_v32 }

// kernel: _lambda_.24
= control target key start
LH: loop header
LB: loop body
LE: loop exit
PB: predicated region body
PF: predicated region fallthrough
CT: control target
= control target key end

     0   :  { %s1634_s18 = smov 0   ;;  %s1827_s0 = inlined_call_operand.vmem [shape: f32[2,8,32], index: 0, kind: input, shape index: {}]   ;;  %s1828_s1 = inlined_call_operand.vmem [shape: f32[8,32], index: 1, kind: input, shape index: {}]   ;;  %s1829_s2 = inlined_call_operand.vmem [shape: f32[2,4,32], index: 2, kind: input, shape index: {}]   ;;  %s1830_s3 = inlined_call_operand.vmem [shape: f32[2,4,32], index: 3, kind: input, shape index: {}]   ;;  %s1831_s4 = inlined_call_operand.vmem [shape: f32[2,8,4], index: 4, kind: input, shape index: {}]   ;;  %s1832_s5 = inlined_call_operand.vmem [shape: f32[32,32], index: 5, kind: input, shape index: {}]   ;;  %s1833_s6 = inlined_call_operand.vmem [shape: f32[1,32], index: 6, kind: input, shape index: {}]   ;;  %s1834_s7 = inlined_call_operand.vmem [shape: f32[32,32], index: 7, kind: input, shape index: {}]   ;;  %s1835_s8 = inlined_call_operand.vmem [shape: f32[1,32], index: 8, kind: input, shape index: {}]   ;;  %s1836_s9 = inlined_call_operand.vmem [shape: f32[32,32], index: 9, kind: input, shape index: {}]   ;;  %s1837_s10 = inlined_call_operand.vmem [shape: f32[1,32], index: 10, kind: input, shape index: {}]   ;;  %s1838_s11 = inlined_call_operand.vmem [shape: f32[32,32], index: 11, kind: input, shape index: {}]   ;;  %s1839_s12 = inlined_call_operand.vmem [shape: f32[1,32], index: 12, kind: input, shape index: {}]   ;;  %s1840_s13 = inlined_call_operand.vmem [shape: f32[1,32], index: 13, kind: input, shape index: {}]   ;;  %s1841_s14 = inlined_call_operand.vmem [shape: f32[1,32], index: 14, kind: input, shape index: {}]   ;;  %s1842_s15 = inlined_call_operand.vmem [shape: f32[2,8,32], index: 15, kind: output, shape index: {}]  }
   0x1 LB: > { %s1366_s19 = sadd.s32 4294967295, %s1544_s18   ;;  %p1370_p0 = scmp.ge.s32.totalorder %s1544_s18, 1  ;;  %s1544_s18 = sphi %s1634_s18, %s25_s18  }
   0x2   : > { %p463_p1 = scmp.lt.s32.totalorder %s1544_s18, 3 }
   0x4   : > { %p464_p2 = pnand %p1370_p0, %p463_p1 }
   0x5   : > { %v606_v0 = vld [vmem:[%s1834_s7] sm:$0xff] (!%p464_p2)  ;;  %v607_v1 = vld [vmem:[%s1834_s7 + $0x8] sm:$0xff] (!%p464_p2)  ;;  %p521_p3 = scmp.lt.s32.totalorder (!%p464_p2), %s1366_s19, 1  ;;  %v1546_v3 = vmov (!%p464_p2), 0.0   ;;  %v608_v6 = vld [vmem:[%s1834_s7 + $0x10] sm:$0xff] (!%p464_p2)  ;;  %vm1547_vm0 = vmmov (!%p464_p2), 0  }
   0x6   : > { %467 = sbr.rel (%p464_p2) target bundleno = 1612 (0x64c), region = 80  ;;  %v548_v2 = vld [vmem:[%s1832_s5] sm:$0xff] (!%p464_p2)  ;;  %1432 = vmatprep.subr.bf16.mxu1 (!%p464_p2), %v1546_v3  ;;  %v611_v4 = vpack.c.bf16 (!%p464_p2), %v607_v1, %v606_v0  ;;  %1424 = vmatprep.subr.bf16.mxu0 (!%p464_p2), %v1546_v3  ;;  %v549_v5 = vld [vmem:[%s1832_s5 + $0x8] sm:$0xff] (!%p464_p2)  ;;  %v609_v7 = vld [vmem:[%s1834_s7 + $0x18] sm:$0xff] (!%p464_p2)  ;;  %vm562_vm1 = vcmask (!%p464_p2), 261120   ;;  %vm722_vm2 = vcmask (!%p464_p2), 64512  }
   0x7   : > { %v553_v8 = vpack.c.bf16 (!%p464_p2), %v549_v5, %v548_v2  ;;  %1436 = vmatprep.mubr.msk.bf16.mxu1 (!%p464_p2), %vm1547_vm0, %v1546_v3  ;;  %v550_v9 = vld [vmem:[%s1832_s5 + $0x10] sm:$0xff] (!%p464_p2)  ;;  %v551_v10 = vld [vmem:[%s1832_s5 + $0x18] sm:$0xff] (!%p464_p2)  ;;  %1428 = vmatprep.mubr.msk.bf16.mxu0 (!%p464_p2), %vm1547_vm0, %v1546_v3  ;;  %v612_v11 = vpack.c.bf16 (!%p464_p2), %v609_v7, %v608_v6  ;;  %v543_v13 = vld [vmem:[%s1828_s1] sm:$0xff] (!%p464_p2)  ;;  %s1843_s26 = smov (!%p464_p2), 112   ;;  %s1844_s28 = smov (!%p464_p2), 104   ;;  %vm771_vm3 = vcmask (!%p464_p2), 31744  }
   0x8   : > { %1433 = vmatpush3.bf16.msra.mxu1 (!%p464_p2), %v611_v4  ;;  %v554_v12 = vpack.c.bf16 (!%p464_p2), %v551_v10, %v550_v9  ;;  %v1378_v19 = vld [vmem:[%s1835_s8] ss:$0 sm:$0xff] (!%p464_p2)  ;;  %v664_v35 = vld [vmem:[%s1836_s9 + $0x8] sm:$0xff] (!%p464_p2)  ;;  %v665_v36 = vld [vmem:[%s1836_s9 + $0x10] sm:$0xff] (!%p464_p2)  ;;  %vm787_vm4 = vcmask (!%p464_p2), 1041408   ;;  %s1846_s29 = smov (!%p464_p2), 120  }
   0x9   : > { %1434 = vmatprep.subr.bf16.mxu1 (!%p464_p2), %v1546_v3  ;;  %1425 = vmatpush3.bf16.msra.mxu0 (!%p464_p2), %v553_v8  ;;  %v1376_v21 = vld [vmem:[%s1833_s6] ss:$0 sm:$0xff] (!%p464_p2)  ;;  %v666_v38 = vld [vmem:[%s1836_s9 + $0x18] sm:$0xff] (!%p464_p2)  ;;  %s1847_s30 = smov (!%p464_p2), 104   ;;  %s1551_s25 = smov (!%p464_p2), 8   ;;  %vm1184_vm5 = vcmask (!%p464_p2), 130048  }
   0xa   : > { %1426 = vmatprep.subr.bf16.mxu0 (!%p464_p2), %v1546_v3  ;;  %v663_v34 = vld [vmem:[%s1836_s9] sm:$0xff] (!%p464_p2)  ;;  %v669_v40 = vpack.c.bf16 (!%p464_p2), %v666_v38, %v665_v36  ;;  %vm1186_vm6 = vcmask (!%p464_p2), 195584  }
   0xb   : > { %v668_v37 = vpack.c.bf16 (!%p464_p2), %v664_v35, %v663_v34  ;;  %v1380_v59 = vld [vmem:[%s1837_s10] ss:$0 sm:$0xff] (!%p464_p2) }
   0xc   : > { %1435 = vmatpush3.bf16.msra.mxu1 (!%p464_p2), %v612_v11 }
   0xd   : > { %s1850_s19 = smov (!%p521_p3, %s1366_s19), 1  ;;  %1427 = vmatpush3.bf16.msra.mxu0 %v554_v12  ;;  %1448 = vmatprep.subr.bf16.mxu1 %v1546_v3 }
   0xe   : > { %s1372_s23 = sshll.u32 %s1850_s19, 2  ;;  %s1677_s24 = sshll.u32 %s1850_s19, 3  ;;  %1440 = vmatprep.subr.bf16.mxu0 %v1546_v3 }
   0xf   : > { %s528_s27 = scalar_lea.vmem %s1829_s2, %s1372_s23  ;;  %s524_s17 = scalar_lea.vmem %s1827_s0, %s1677_s24 }
  0x10   : > { %v545_v14 = vld [vmem:[%s528_s27] sm:$0xf]  ;;  %s1845_s27 = smov 120   ;;  %s532_s16 = scalar_lea.vmem %s1830_s3, %s1372_s23 }
  0x11   : > { %v610_v15 = vpack.c.bf16 %v545_v14, %v545_v14  ;;  %v1692_v16 = vld [vmem:[%s524_s17] sm:$0xff]  ;;  %s540_s23 = scalar_lea.vmem %s1842_s15, %s1677_s24 }
  0x12   : > { %v544_v17 = vadd.f32 %v543_v13, %v1692_v16  ;;  %v546_v39 = vld [vmem:[%s532_s16] sm:$0xf]  ;;  %s1848_s16 = smov 112  }
  0x13   : > { %1437 = vmatmul.mubr.msk.bf16.vlgmr.msra.gmra.mrb[0].mxu1 %vm562_vm1, %v610_v15  ;;  %v667_v41 = vpack.c.bf16 %v546_v39, %v546_v39 }
  0x14   : > { %v552_v18 = vpack.c.bf16 %v544_v17, %v544_v17  ;;  %1450 = vmatprep.mubr.msk.bf16.mxu1 %vm1547_vm0, %v1546_v3 }
  0x16   : > { %1429 = vmatmul.mubr.msk.bf16.vlgmr.msra.gmra.mrb[0].mxu0 %vm562_vm1, %v552_v18 }
  0x17   : > { %1444 = vmatprep.mubr.msk.bf16.mxu0 %vm1547_vm0, %v1546_v3  ;;  %1441 = vmatpush3.bf16.msra.mxu0 %v668_v37 }
  0x18   : > { %1442 = vmatprep.subr.bf16.mxu0 %v1546_v3 }
  0x1b   : > { %1443 = vmatpush3.bf16.msra.mxu0 %v669_v40 }
  0x1c   : > { %1454 = vmatprep.subr.bf16.mxu0 %v1546_v3 }
  0x1e   : > { %1445 = vmatmul.mubr.msk.bf16.vlgmr.msra.gmra.mrb[4].mxu0 %vm562_vm1, %v667_v41 }
  0x1f   : > { %1456 = vmatprep.mubr.msk.bf16.mxu0 %vm1547_vm0, %v1546_v3 }
  0xe6   : > { %v657_v20 = vpop.f32.mrb[0].mxu1 }
  0xe7   : > { %v658_v22 = vadd.f32 %v1378_v19, %v657_v20  ;;  %v1438_v23 = vpop.f32.mrb[1].mxu1 }
  0xe8   : > { %v660_v24 = vpop.f32.mrb[2].mxu1 }
  0xe9   : > { %v600_v25 = vpop.f32.mrb[0].mxu0  ;;  %v721_v26 = vpack.c.bf16 %v658_v22, %v658_v22  ;;  %v1439_v27 = vpop.f32.mrb[3].mxu1 }
  0xea   : > { %v601_v28 = vadd.f32 %v1376_v21, %v600_v25  ;;  %v1430_v29 = vpop.f32.mrb[1].mxu0 }
  0xeb   : > { %v603_v30 = vpop.f32.mrb[2].mxu0  ;;  %949 = vrot.lane.b32.xlu1 %v721_v26, %s1843_s26  ;;  %836 = vrot.lane.b32.xlu0 %v721_v26, %s1845_s27  ;;  %v727_v32 = vsel %vm722_vm2, %v721_v26, 0 }
  0xec   : > { %v720_v31 = vpack.c.bf16 %v601_v28, %v601_v28  ;;  %v1431_v33 = vpop.f32.mrb[3].mxu0  ;;  %1449 = vmatpush3.bf16.xpose.msra.mxu1 %v727_v32 }
  0xed   : > { %1460 = vmatprep.subr.bf16.mxu1 %v1546_v3 }
  0xef   : > { %947 = vrot.lane.b32.xlu1 %v720_v31, %s1843_s26  ;;  %833 = vrot.lane.b32.xlu0 %v720_v31, %s1845_s27  ;;  %s536_s26 = scalar_lea.vmem %s1831_s4, %s1677_s24 }
  0xf0   : > { %v547_v52 = vld [vmem:[%s536_s26] sm:$0xff] }
  0xf1   : > { %v714_v60 = vpop.f32.mrb[4].mxu0 }
  0xf2   : > { %v715_v61 = vadd.f32 %v1380_v59, %v714_v60  ;;  %v1446_v62 = vpop.f32.mrb[5].mxu0 }
  0xf3   : > { %1059 = vrot.lane.b32.xlu1 %v720_v31, %s1844_s28  ;;  %1061 = vrot.lane.b32.xlu0 %v721_v26, %s1844_s28  ;;  %v717_v63 = vpop.f32.mrb[6].mxu0  ;;  %v1188_v62 = vld [vmem:[%s1838_s11] sm:$0xff]  ;;  %s1552_s28 = smov 16  }
  0xf4   : > { %1451 = vmatmul.mubr.msk.bf16.vlgmr.msra.gmra.mrb[4].mxu1 %vm722_vm2, %v720_v31  ;;  %v1447_v0 = vpop.f32.mrb[7].mxu0  ;;  %v783_v1 = vpack.c.bf16 %v715_v61, %v715_v61  ;;  %v1189_v63 = vld [vmem:[%s1838_s11 + $0x8] sm:$0xff] }
  0xf5   : > { %1462 = vmatprep.mubr.msk.bf16.mxu1 %vm1547_vm0, %v1546_v3  ;;  %v1193_v0 = vpack.c.bf16 %v1189_v63, %v1188_v62 }
  0xf6   : > { %v789_v2 = vsel %vm787_vm4, %v783_v1, 0 }
  0xf7   : > { %1455 = vmatpush3.bf16.msra.mxu0 %v789_v2 }
  0xf8   : > { %1466 = vmatprep.subr.bf16.mxu0 %v1546_v3 }
 0x15d   : > { %v837_v42 = vpop.permute.xlu0 %836  ;;  %v950_v44 = vpop.permute.xlu1 %949 }
 0x15e   : > { %v842_v43 = vsel %vm722_vm2, %v837_v42, 0  ;;  %v955_v46 = vsel %vm722_vm2, %v950_v44, 0 }
 0x15f   : > { %1461 = vmatpush3.bf16.xpose.msra.mxu1 %v842_v43 }
 0x160   : > { %1472 = vmatprep.subr.bf16.mxu1 %v1546_v3 }
 0x161   : > { %v834_v45 = vpop.permute.xlu0 %833  ;;  %v948_v48 = vpop.permute.xlu1 %947 }
 0x165   : > { %v1062_v47 = vpop.permute.xlu0 %1061  ;;  %v1060_v50 = vpop.permute.xlu1 %1059 }
 0x166   : > { %1463 = vmatmul.mubr.msk.bf16.vlgmr.msra.gmra.mrb[8].mxu1 %vm722_vm2, %v834_v45  ;;  %v1067_v49 = vsel %vm722_vm2, %v1062_v47, 0 }
 0x167   : > { %1473 = vmatpush3.bf16.xpose.msra.mxu1 %v955_v46  ;;  %1474 = vmatprep.mubr.msk.bf16.mxu1 %vm1547_vm0, %v1546_v3 }
 0x168   : > { %1484 = vmatprep.subr.bf16.mxu1 %v1546_v3 }
 0x16e   : > { %1475 = vmatmul.mubr.msk.bf16.vlgmr.msra.gmra.mrb[12].mxu1 %vm722_vm2, %v948_v48 }
 0x16f   : > { %1485 = vmatpush3.bf16.xpose.msra.mxu1 %v1067_v49  ;;  %1486 = vmatprep.mubr.msk.bf16.mxu1 %vm1547_vm0, %v1546_v3 }
 0x170   : > { %1496 = vmatprep.subr.bf16.mxu1 %v1546_v3 }
 0x176   : > { %1487 = vmatmul.mubr.msk.bf16.vlgmr.msra.gmra.mrb[16].mxu1 %vm722_vm2, %v1060_v50 }
 0x177   : > { %1500 = vmatprep.mubr.msk.bf16.mxu1 %vm1547_vm0, %v1546_v3  ;;  %1497 = vmatpush3.bf16.msra.mxu1 %v1193_v0 }
 0x178   : > { %1498 = vmatprep.subr.bf16.mxu1 %v1546_v3 }
 0x1c7   : > { %v763_v51 = vpop.f32.mrb[4].mxu1 }
 0x1c8   : > { %v769_v53 = vmul.f32 0.35355338, %v763_v51  ;;  %v1452_v54 = vpop.f32.mrb[5].mxu1 }
 0x1c9   : > { %v766_v55 = vpop.f32.mrb[6].mxu1 }
 0x1ca   : > { %v1453_v56 = vpop.f32.mrb[7].mxu1  ;;  %v770_v57 = vadd.f32 %v769_v53, %v547_v52 }
 0x1cc   : > { %v772_v58 = vsel %vm771_vm3, %v770_v57, -inf }
 0x1cd   : > { %773 = vmax.xlane.f32.xlu0 %v772_v58 }
 0x239   : > { %v878_v4 = vpop.f32.mrb[8].mxu1 }
 0x23a   : > { %v884_v5 = vmul.f32 0.35355338, %v878_v4  ;;  %v1464_v6 = vpop.f32.mrb[9].mxu1 }
 0x23b   : > { %v881_v7 = vpop.f32.mrb[10].mxu1 }
 0x23c   : > { %v1465_v8 = vpop.f32.mrb[11].mxu1  ;;  %v885_v9 = vadd.f32 %v884_v5, %v547_v52 }
 0x23e   : > { %v886_v10 = vsel %vm771_vm3, %v885_v9, -inf }
 0x23f   : > { %887 = vmax.xlane.f32.xlu1 %v886_v10  ;;  %v1191_v10 = vld [vmem:[%s1838_s11 + $0x18] sm:$0xff] }
 0x241   : > { %v991_v11 = vpop.f32.mrb[12].mxu1 }
 0x242   : > { %v997_v12 = vmul.f32 0.35355338, %v991_v11  ;;  %v1476_v13 = vpop.f32.mrb[13].mxu1 }
 0x243   : > { %v994_v14 = vpop.f32.mrb[14].mxu1 }
 0x244   : > { %v1477_v15 = vpop.f32.mrb[15].mxu1  ;;  %v998_v17 = vadd.f32 %v997_v12, %v547_v52 }
 0x246   : > { %v999_v18 = vsel %vm771_vm3, %v998_v17, -inf }
 0x247   : > { %1000 = vmax.xlane.f32.xlu0 %v999_v18 }
 0x249   : > { %v1103_v19 = vpop.f32.mrb[16].mxu1 }
 0x24a   : > { %v1109_v20 = vmul.f32 0.35355338, %v1103_v19  ;;  %v1488_v21 = vpop.f32.mrb[17].mxu1 }
 0x24b   : > { %v1106_v22 = vpop.f32.mrb[18].mxu1 }
 0x24c   : > { %v1489_v23 = vpop.f32.mrb[19].mxu1  ;;  %v1110_v24 = vadd.f32 %v1109_v20, %v547_v52 }
 0x24e   : > { %v1111_v25 = vsel %vm771_vm3, %v1110_v24, -inf }
 0x24f   : > { %1112 = vmax.xlane.f32.xlu0 %v1111_v25 }
 0x250   : > { %898 = vrot.lane.b32.xlu1 %v783_v1, %s1846_s29  ;;  %s1553_s29 = smov 24  }
 0x254   : > { %1122 = vrot.lane.b32.xlu1 %v783_v1, %s1847_s30 }
 0x25a   : > { %v774_v26 = vpop.xlane.xlu0 %773 }
 0x25b   : > { %v775_v27 = vsub.f32 %v770_v57, %v774_v26 }
 0x25d   : > { %v776_v28 = vmul.f32 1.442695, %v775_v27 }
 0x25f   : > { %1520 = vpow2.f32 %v776_v28 }
 0x265   : > { %1010 = vrot.lane.b32.xlu0 %v783_v1, %s1848_s16 }
 0x269   : > { %v1521_v29 = vpop.eup %1520 }
 0x26a   : > { %v782_v30 = vpack.c.bf16 %v1521_v29, %v1521_v29  ;;  %v778_v46 = vsel %vm771_vm3, %v1521_v29, 0.0 }
 0x26c   : > { %1457 = vmatmul.mubr.msk.bf16.vlgmr.msra.gmra.mrb[8].mxu0 %vm771_vm3, %v782_v30 }
 0x26d   : > { %1468 = vmatprep.mubr.msk.bf16.mxu0 %vm1547_vm0, %v1546_v3 }
 0x2cc   : > { %v888_v31 = vpop.xlane.xlu1 %887 }
 0x2cd   : > { %v889_v32 = vsub.f32 %v885_v9, %v888_v31  ;;  %v1190_v9 = vld [vmem:[%s1838_s11 + $0x10] sm:$0xff] }
 0x2ce   : > { %v1194_v11 = vpack.c.bf16 %v1191_v10, %v1190_v9 }
 0x2cf   : > { %v890_v33 = vmul.f32 1.442695, %v889_v32 }
 0x2d0   : > { %v899_v34 = vpop.permute.xlu1 %898  ;;  %1499 = vmatpush3.bf16.msra.mxu1 %v1194_v11 }
 0x2d1   : > { %1522 = vpow2.f32 %v890_v33  ;;  %v904_v35 = vsel %vm787_vm4, %v899_v34, 0  ;;  %v1390_v34 = vld [vmem:[%s1839_s12] ss:$0 sm:$0xff] }
 0x2d2   : > { %1467 = vmatpush3.bf16.msra.mxu0 %v904_v35 }
 0x2d3   : > { %1478 = vmatprep.subr.bf16.mxu0 %v1546_v3 }
 0x2d4   : > { %v1001_v36 = vpop.xlane.xlu0 %1000  ;;  %v1123_v49 = vpop.permute.xlu1 %1122 }
 0x2d5   : > { %v1002_v37 = vsub.f32 %v998_v17, %v1001_v36  ;;  %v1128_v52 = vsel %vm787_vm4, %v1123_v49, 0 }
 0x2d7   : > { %v1003_v38 = vmul.f32 1.442695, %v1002_v37 }
 0x2d9   : > { %1524 = vpow2.f32 %v1003_v38 }
 0x2db   : > { %v1523_v39 = vpop.eup %1522 }
 0x2dc   : > { %v1113_v40 = vpop.xlane.xlu0 %1112  ;;  %v892_v41 = vsel %vm771_vm3, %v1523_v39, 0.0  ;;  %v896_v42 = vpack.c.bf16 %v1523_v39, %v1523_v39 }
 0x2dd   : > { %v1114_v43 = vsub.f32 %v1110_v24, %v1113_v40  ;;  %893 = vadd.xlane.f32.xlu1 %v892_v41 }
 0x2de   : > { %1469 = vmatmul.mubr.msk.bf16.vlgmr.msra.gmra.mrb[12].mxu0 %vm771_vm3, %v896_v42 }
 0x2df   : > { %v1115_v44 = vmul.f32 1.442695, %v1114_v43  ;;  %1480 = vmatprep.mubr.msk.bf16.mxu0 %vm1547_vm0, %v1546_v3 }
 0x2e0   : > { %v1011_v45 = vpop.permute.xlu0 %1010 }
 0x2e1   : > { %1526 = vpow2.f32 %v1115_v44  ;;  %v1016_v47 = vsel %vm787_vm4, %v1011_v45, 0  ;;  %779 = vadd.xlane.f32.xlu1 %v778_v46 }
 0x2e2   : > { %1479 = vmatpush3.bf16.msra.mxu0 %v1016_v47 }
 0x2e3   : > { %v1525_v48 = vpop.eup %1524  ;;  %1490 = vmatprep.subr.bf16.mxu0 %v1546_v3 }
 0x2e4   : > { %v1005_v50 = vsel %vm771_vm3, %v1525_v48, 0.0  ;;  %v1009_v51 = vpack.c.bf16 %v1525_v48, %v1525_v48 }
 0x2e5   : > { %1006 = vadd.xlane.f32.xlu0 %v1005_v50 }
 0x2e6   : > { %1481 = vmatmul.mubr.msk.bf16.vlgmr.msra.gmra.mrb[16].mxu0 %vm771_vm3, %v1009_v51 }
 0x2e7   : > { %1491 = vmatpush3.bf16.msra.mxu0 %v1128_v52  ;;  %1492 = vmatprep.mubr.msk.bf16.mxu0 %vm1547_vm0, %v1546_v3  ;;  %v1393_v52 = vld [vmem:[%s1841_s14] ss:$0 sm:$0xff] }
 0x2eb   : > { %v1527_v53 = vpop.eup %1526 }
 0x2ec   : > { %v1117_v54 = vsel %vm771_vm3, %v1527_v53, 0.0  ;;  %v1121_v55 = vpack.c.bf16 %v1527_v53, %v1527_v53 }
 0x2ed   : > { %1118 = vadd.xlane.f32.xlu0 %v1117_v54 }
 0x2ee   : > { %1493 = vmatmul.mubr.msk.bf16.vlgmr.msra.gmra.mrb[20].mxu0 %vm771_vm3, %v1121_v55 }
 0x33f   : > { %v825_v56 = vpop.f32.mrb[8].mxu0 }
 0x340   : > { %v1458_v57 = vpop.f32.mrb[9].mxu0 }
 0x341   : > { %v828_v58 = vpop.f32.mrb[10].mxu0 }
 0x342   : > { %v1459_v59 = vpop.f32.mrb[11].mxu0 }
 0x36a   : > { %v894_v60 = vpop.xlane.xlu1 %893 }
 0x36b   : > { %1528 = vrcp.f32 %v894_v60 }
 0x36e   : > { %v780_v24 = vpop.xlane.xlu1 %779 }
 0x372   : > { %v1007_v61 = vpop.xlane.xlu0 %1006 }
 0x373   : > { %1530 = vrcp.f32 %v1007_v61 }
 0x375   : > { %v1529_v1 = vpop.eup %1528 }
 0x37a   : > { %v1119_v7 = vpop.xlane.xlu0 %1118 }
 0x37b   : > { %1532 = vrcp.f32 %v1119_v7 }
 0x37c   : > { %1534 = vrcp.f32 %v780_v24 }
 0x37d   : > { %v1531_v12 = vpop.eup %1530 }
 0x385   : > { %v1533_v18 = vpop.eup %1532 }
 0x386   : > { %v1535_v25 = vpop.eup %1534 }
 0x387   : > { %v831_v28 = vmul.f32 %v1535_v25, %v825_v56 }
 0x3b1   : > { %v940_v2 = vpop.f32.mrb[12].mxu0 }
 0x3b2   : > { %v946_v4 = vmul.f32 %v1529_v1, %v940_v2  ;;  %v1470_v5 = vpop.f32.mrb[13].mxu0 }
 0x3b3   : > { %v943_v6 = vpop.f32.mrb[14].mxu0 }
 0x3b4   : > { %1172 = vrot.lane.b32.xlu0 %v946_v4, %s1551_s25  ;;  %v1471_v8 = vpop.f32.mrb[15].mxu0 }
 0x3b9   : > { %v1052_v13 = vpop.f32.mrb[16].mxu0 }
 0x3ba   : > { %v1058_v14 = vmul.f32 %v1531_v12, %v1052_v13  ;;  %v1482_v15 = vpop.f32.mrb[17].mxu0 }
 0x3bb   : > { %v1055_v3 = vpop.f32.mrb[18].mxu0 }
 0x3bc   : > { %1176 = vrot.lane.b32.xlu1 %v1058_v14, %s1552_s28  ;;  %v1483_v17 = vpop.f32.mrb[19].mxu0 }
 0x3c1   : > { %v1164_v19 = vpop.f32.mrb[20].mxu0 }
 0x3c2   : > { %v1170_v20 = vmul.f32 %v1533_v18, %v1164_v19  ;;  %v1494_v21 = vpop.f32.mrb[21].mxu0 }
 0x3c3   : > { %v1167_v22 = vpop.f32.mrb[22].mxu0 }
 0x3c4   : > { %1180 = vrot.lane.b32.xlu1 %v1170_v20, %s1553_s29  ;;  %v1495_v23 = vpop.f32.mrb[23].mxu0 }
 0x426   : > { %v1173_v26 = vpop.permute.xlu0 %1172 }
 0x427   : > { %v1183_v29 = vsel %vm722_vm2, %v831_v28, %v1173_v26 }
 0x42e   : > { %v1177_v27 = vpop.permute.xlu1 %1176 }
 0x42f   : > { %v1185_v30 = vsel %vm1184_vm5, %v1183_v29, %v1177_v27 }
 0x436   : > { %v1181_v31 = vpop.permute.xlu1 %1180 }
 0x437   : > { %v1187_v32 = vsel %vm1186_vm6, %v1185_v30, %v1181_v31 }
 0x438   : > { %v1192_v33 = vpack.c.bf16 %v1187_v32, %v1187_v32 }
 0x43a   : > { %1501 = vmatmul.mubr.msk.bf16.vlgmr.msra.gmra.mrb[20].mxu1 %vm562_vm1, %v1192_v33 }
 0x50d   : > { %v1239_v35 = vpop.f32.mrb[20].mxu1 }
 0x50e   : > { %v1240_v36 = vadd.f32 %v1390_v34, %v1239_v35  ;;  %v1502_v37 = vpop.f32.mrb[21].mxu1 }
 0x50f   : > { %v1242_v38 = vpop.f32.mrb[22].mxu1 }
 0x510   : > { %v1503_v39 = vpop.f32.mrb[23].mxu1  ;;  %v1245_v40 = vadd.f32 %v1240_v36, %v1692_v16  ;;  %v1392_v16 = vld [vmem:[%s1840_s13] ss:$0 sm:$0xff] }
 0x512   : > { %v1248_v41 = vsel %vm562_vm1, %v1245_v40, 0.0 }
 0x513   : > { %1249 = vadd.xlane.f32.xlu0 %v1248_v41 }
 0x5a0   : > { %v1250_v42 = vpop.xlane.xlu0 %1249 }
 0x5a1   : > { %v1252_v43 = vmul.f32 0.03125, %v1250_v42 }
 0x5a3   : > { %v1253_v44 = vsub.f32 %v1245_v40, %v1252_v43 }
 0x5a5   : > { %v1254_v45 = vmul.f32 %v1253_v44, %v1253_v44 }
 0x5a7   : > { %v1255_v46 = vsel %vm562_vm1, %v1254_v45, 0.0 }
 0x5a8   : > { %1256 = vadd.xlane.f32.xlu1 %v1255_v46 }
 0x635   : > { %v1257_v47 = vpop.xlane.xlu1 %1256 }
 0x636   : > { %v1258_v48 = vmul.f32 0.03125, %v1257_v47 }
 0x638   : > { %v1259_v49 = vadd.f32 1e-05, %v1258_v48 }
 0x63a   : > { %1536 = vrsqrt.f32 %v1259_v49 }
 0x644   : > { %v1537_v50 = vpop.eup %1536 }
 0x645   : > { %v1261_v51 = vmul.f32 %v1537_v50, %v1253_v44 }
 0x647   : > { %v1268_v53 = vmul.f32 %v1392_v16, %v1261_v51 }
 0x649   : > { %v1275_v54 = vadd.f32 %v1393_v52, %v1268_v53 }
 0x64b   : > { %1276 = vst.msk [vmem:[%s540_s23] sm:$0xff] %vm562_vm1, %v1275_v54 }
 0x64c PF: > { %s25_s18 = sadd.s32 1, %s1544_s18  }
 0x64d   : > { %p22_p4 = scmp.ge.s32.totalorder %s25_s18, 4  }
 0x64f   :  { %24 = sbr.rel (!%p22_p4) target bundleno = 1 (0x1), region = 119 }

// kernel: _lambda_.25
= control target key start
LH: loop header
LB: loop body
LE: loop exit
PB: predicated region body
PF: predicated region fallthrough
CT: control target
= control target key end

     0   :  { %s1633_s18 = smov 0   ;;  %s1820_s0 = inlined_call_operand.vmem [shape: f32[2,8,32], index: 0, kind: input, shape index: {}, may-alias: {0,3}]   ;;  %s1821_s1 = inlined_call_operand.vmem [shape: f32[8,32], index: 1, kind: input, shape index: {}]   ;;  %s1822_s2 = inlined_call_operand.vmem [shape: f32[2,8,32], index: 2, kind: input, shape index: {}]   ;;  %s1823_s3 = inlined_call_operand.vmem [shape: f32[2,8,32], index: 3, kind: input, shape index: {}, may-alias: {0,3}]   ;;  %s1824_s4 = inlined_call_operand.vmem [shape: f32[2,8,8], index: 4, kind: input, shape index: {}]   ;;  %s1825_s5 = inlined_call_operand.vmem [shape: f32[32,32], index: 5, kind: input, shape index: {}]   ;;  %s1826_s6 = inlined_call_operand.vmem [shape: f32[1,32], index: 6, kind: input, shape index: {}]   ;;  %s1827_s7 = inlined_call_operand.vmem [shape: f32[32,32], index: 7, kind: input, shape index: {}]   ;;  %s1828_s8 = inlined_call_operand.vmem [shape: f32[1,32], index: 8, kind: input, shape index: {}]   ;;  %s1829_s9 = inlined_call_operand.vmem [shape: f32[32,32], index: 9, kind: input, shape index: {}]   ;;  %s1830_s10 = inlined_call_operand.vmem [shape: f32[1,32], index: 10, kind: input, shape index: {}]   ;;  %s1831_s11 = inlined_call_operand.vmem [shape: f32[32,32], index: 11, kind: input, shape index: {}]   ;;  %s1832_s12 = inlined_call_operand.vmem [shape: f32[1,32], index: 12, kind: input, shape index: {}]   ;;  %s1833_s13 = inlined_call_operand.vmem [shape: f32[1,32], index: 13, kind: input, shape index: {}]   ;;  %s1834_s14 = inlined_call_operand.vmem [shape: f32[1,32], index: 14, kind: input, shape index: {}]   ;;  %s1835_s15 = inlined_call_operand.vmem [shape: f32[2,8,32], index: 15, kind: output, shape index: {}]  }
   0x1 LB: > { %s1365_s19 = sadd.s32 4294967295, %s1543_s18   ;;  %p1369_p0 = scmp.ge.s32.totalorder %s1543_s18, 1  ;;  %s1543_s18 = sphi %s1633_s18, %s25_s18  }
   0x2   : > { %p463_p1 = scmp.lt.s32.totalorder %s1543_s18, 3 }
   0x4   : > { %p464_p2 = pnand %p1369_p0, %p463_p1 }
   0x5   : > { %v606_v0 = vld [vmem:[%s1827_s7] sm:$0xff] (!%p464_p2)  ;;  %v607_v1 = vld [vmem:[%s1827_s7 + $0x8] sm:$0xff] (!%p464_p2)  ;;  %p521_p3 = scmp.lt.s32.totalorder (!%p464_p2), %s1365_s19, 1  ;;  %v1545_v3 = vmov (!%p464_p2), 0.0   ;;  %v608_v6 = vld [vmem:[%s1827_s7 + $0x10] sm:$0xff] (!%p464_p2)  ;;  %vm1546_vm0 = vmmov (!%p464_p2), 0  }
   0x6   : > { %467 = sbr.rel (%p464_p2) target bundleno = 1612 (0x64c), region = 80  ;;  %v548_v2 = vld [vmem:[%s1825_s5] sm:$0xff] (!%p464_p2)  ;;  %1431 = vmatprep.subr.bf16.mxu1 (!%p464_p2), %v1545_v3  ;;  %v611_v4 = vpack.c.bf16 (!%p464_p2), %v607_v1, %v606_v0  ;;  %1423 = vmatprep.subr.bf16.mxu0 (!%p464_p2), %v1545_v3  ;;  %v549_v5 = vld [vmem:[%s1825_s5 + $0x8] sm:$0xff] (!%p464_p2)  ;;  %v609_v7 = vld [vmem:[%s1827_s7 + $0x18] sm:$0xff] (!%p464_p2)  ;;  %vm562_vm1 = vcmask (!%p464_p2), 261120   ;;  %vm722_vm2 = vcmask (!%p464_p2), 64512  }
   0x7   : > { %v553_v8 = vpack.c.bf16 (!%p464_p2), %v549_v5, %v548_v2  ;;  %1435 = vmatprep.mubr.msk.bf16.mxu1 (!%p464_p2), %vm1546_vm0, %v1545_v3  ;;  %v550_v9 = vld [vmem:[%s1825_s5 + $0x10] sm:$0xff] (!%p464_p2)  ;;  %v551_v10 = vld [vmem:[%s1825_s5 + $0x18] sm:$0xff] (!%p464_p2)  ;;  %1427 = vmatprep.mubr.msk.bf16.mxu0 (!%p464_p2), %vm1546_vm0, %v1545_v3  ;;  %v612_v11 = vpack.c.bf16 (!%p464_p2), %v609_v7, %v608_v6  ;;  %v543_v13 = vld [vmem:[%s1821_s1] sm:$0xff] (!%p464_p2)  ;;  %s1836_s22 = smov (!%p464_p2), 112   ;;  %s1548_s24 = smov (!%p464_p2), 120   ;;  %vm786_vm3 = vcmask (!%p464_p2), 1043456  }
   0x8   : > { %1432 = vmatpush3.bf16.msra.mxu1 (!%p464_p2), %v611_v4  ;;  %v554_v12 = vpack.c.bf16 (!%p464_p2), %v551_v10, %v550_v9  ;;  %v1377_v19 = vld [vmem:[%s1828_s8] ss:$0 sm:$0xff] (!%p464_p2)  ;;  %s1549_s25 = smov (!%p464_p2), 104   ;;  %v664_v35 = vld [vmem:[%s1829_s9 + $0x8] sm:$0xff] (!%p464_p2)  ;;  %v665_v36 = vld [vmem:[%s1829_s9 + $0x10] sm:$0xff] (!%p464_p2)  ;;  %s1837_s30 = smov (!%p464_p2), 112  }
   0x9   : > { %1433 = vmatprep.subr.bf16.mxu1 (!%p464_p2), %v1545_v3  ;;  %1424 = vmatpush3.bf16.msra.mxu0 (!%p464_p2), %v553_v8  ;;  %v1375_v21 = vld [vmem:[%s1826_s6] ss:$0 sm:$0xff] (!%p464_p2)  ;;  %v666_v38 = vld [vmem:[%s1829_s9 + $0x18] sm:$0xff] (!%p464_p2)  ;;  %s1550_s17 = smov (!%p464_p2), 8   ;;  %s1552_s28 = smov (!%p464_p2), 24   ;;  %vm1183_vm4 = vcmask (!%p464_p2), 130048  }
   0xa   : > { %1425 = vmatprep.subr.bf16.mxu0 (!%p464_p2), %v1545_v3  ;;  %v663_v34 = vld [vmem:[%s1829_s9] sm:$0xff] (!%p464_p2)  ;;  %v669_v39 = vpack.c.bf16 (!%p464_p2), %v666_v38, %v665_v36  ;;  %vm1185_vm5 = vcmask (!%p464_p2), 195584  }
   0xb   : > { %v668_v37 = vpack.c.bf16 (!%p464_p2), %v664_v35, %v663_v34  ;;  %v1379_v59 = vld [vmem:[%s1830_s10] ss:$0 sm:$0xff] (!%p464_p2) }
   0xc   : > { %1434 = vmatpush3.bf16.msra.mxu1 (!%p464_p2), %v612_v11 }
   0xd   : > { %s1839_s19 = smov (!%p521_p3, %s1365_s19), 1  ;;  %1426 = vmatpush3.bf16.msra.mxu0 %v554_v12  ;;  %1447 = vmatprep.subr.bf16.mxu1 %v1545_v3 }
   0xe   : > { %s1672_s23 = sshll.u32 %s1839_s19, 3  ;;  %1439 = vmatprep.subr.bf16.mxu0 %v1545_v3 }
   0xf   : > { %s528_s26 = scalar_lea.vmem %s1822_s2, %s1672_s23  ;;  %s524_s16 = scalar_lea.vmem %s1820_s0, %s1672_s23 }
  0x10   : > { %v545_v14 = vld [vmem:[%s528_s26] sm:$0xff]  ;;  %s532_s20 = scalar_lea.vmem %s1823_s3, %s1672_s23  ;;  %s536_s27 = scalar_lea.vmem %s1824_s4, %s1672_s23 }
  0x11   : > { %v610_v15 = vpack.c.bf16 %v545_v14, %v545_v14  ;;  %v1686_v16 = vld [vmem:[%s524_s16] sm:$0xff]  ;;  %s540_s21 = scalar_lea.vmem %s1835_s15, %s1672_s23 }
  0x12   : > { %v544_v17 = vadd.f32 %v543_v13, %v1686_v16  ;;  %v546_v40 = vld [vmem:[%s532_s20] sm:$0xff] }
  0x13   : > { %1436 = vmatmul.mubr.msk.bf16.vlgmr.msra.gmra.mrb[0].mxu1 %vm562_vm1, %v610_v15  ;;  %v667_v41 = vpack.c.bf16 %v546_v40, %v546_v40  ;;  %v547_v52 = vld [vmem:[%s536_s27] sm:$0xff]  ;;  %s1551_s27 = smov 16  }
  0x14   : > { %v552_v18 = vpack.c.bf16 %v544_v17, %v544_v17  ;;  %1449 = vmatprep.mubr.msk.bf16.mxu1 %vm1546_vm0, %v1545_v3 }
  0x16   : > { %1428 = vmatmul.mubr.msk.bf16.vlgmr.msra.gmra.mrb[0].mxu0 %vm562_vm1, %v552_v18 }
  0x17   : > { %1443 = vmatprep.mubr.msk.bf16.mxu0 %vm1546_vm0, %v1545_v3  ;;  %1440 = vmatpush3.bf16.msra.mxu0 %v668_v37 }
  0x18   : > { %1441 = vmatprep.subr.bf16.mxu0 %v1545_v3 }
  0x1b   : > { %1442 = vmatpush3.bf16.msra.mxu0 %v669_v39 }
  0x1c   : > { %1453 = vmatprep.subr.bf16.mxu0 %v1545_v3 }
  0x1e   : > { %1444 = vmatmul.mubr.msk.bf16.vlgmr.msra.gmra.mrb[4].mxu0 %vm562_vm1, %v667_v41 }
  0x1f   : > { %1455 = vmatprep.mubr.msk.bf16.mxu0 %vm1546_vm0, %v1545_v3 }
  0xe6   : > { %v657_v20 = vpop.f32.mrb[0].mxu1 }
  0xe7   : > { %v658_v22 = vadd.f32 %v1377_v19, %v657_v20  ;;  %v1437_v23 = vpop.f32.mrb[1].mxu1 }
  0xe8   : > { %v660_v24 = vpop.f32.mrb[2].mxu1 }
  0xe9   : > { %v600_v25 = vpop.f32.mrb[0].mxu0  ;;  %v721_v26 = vpack.c.bf16 %v658_v22, %v658_v22  ;;  %v1438_v27 = vpop.f32.mrb[3].mxu1 }
  0xea   : > { %v601_v28 = vadd.f32 %v1375_v21, %v600_v25  ;;  %v1429_v29 = vpop.f32.mrb[1].mxu0 }
  0xeb   : > { %v603_v30 = vpop.f32.mrb[2].mxu0  ;;  %948 = vrot.lane.b32.xlu1 %v721_v26, %s1836_s22  ;;  %835 = vrot.lane.b32.xlu0 %v721_v26, %s1548_s24  ;;  %v727_v32 = vsel %vm722_vm2, %v721_v26, 0 }
  0xec   : > { %v720_v31 = vpack.c.bf16 %v601_v28, %v601_v28  ;;  %v1430_v33 = vpop.f32.mrb[3].mxu0  ;;  %1448 = vmatpush3.bf16.xpose.msra.mxu1 %v727_v32 }
  0xed   : > { %1459 = vmatprep.subr.bf16.mxu1 %v1545_v3 }
  0xef   : > { %946 = vrot.lane.b32.xlu1 %v720_v31, %s1836_s22  ;;  %832 = vrot.lane.b32.xlu0 %v720_v31, %s1548_s24 }
  0xf1   : > { %v714_v60 = vpop.f32.mrb[4].mxu0 }
  0xf2   : > { %v715_v61 = vadd.f32 %v1379_v59, %v714_v60  ;;  %v1445_v62 = vpop.f32.mrb[5].mxu0 }
  0xf3   : > { %1058 = vrot.lane.b32.xlu1 %v720_v31, %s1549_s25  ;;  %1060 = vrot.lane.b32.xlu0 %v721_v26, %s1549_s25  ;;  %v717_v63 = vpop.f32.mrb[6].mxu0  ;;  %v1187_v62 = vld [vmem:[%s1831_s11] sm:$0xff] }
  0xf4   : > { %1450 = vmatmul.mubr.msk.bf16.vlgmr.msra.gmra.mrb[4].mxu1 %vm722_vm2, %v720_v31  ;;  %v1446_v0 = vpop.f32.mrb[7].mxu0  ;;  %v782_v1 = vpack.c.bf16 %v715_v61, %v715_v61  ;;  %v1188_v63 = vld [vmem:[%s1831_s11 + $0x8] sm:$0xff] }
  0xf5   : > { %1461 = vmatprep.mubr.msk.bf16.mxu1 %vm1546_vm0, %v1545_v3  ;;  %v1192_v0 = vpack.c.bf16 %v1188_v63, %v1187_v62 }
  0xf6   : > { %v788_v2 = vsel %vm786_vm3, %v782_v1, 0 }
  0xf7   : > { %1454 = vmatpush3.bf16.msra.mxu0 %v788_v2 }
  0xf8   : > { %1465 = vmatprep.subr.bf16.mxu0 %v1545_v3 }
 0x15d   : > { %v836_v42 = vpop.permute.xlu0 %835  ;;  %v949_v44 = vpop.permute.xlu1 %948 }
 0x15e   : > { %v841_v43 = vsel %vm722_vm2, %v836_v42, 0  ;;  %v954_v46 = vsel %vm722_vm2, %v949_v44, 0 }
 0x15f   : > { %1460 = vmatpush3.bf16.xpose.msra.mxu1 %v841_v43 }
 0x160   : > { %1471 = vmatprep.subr.bf16.mxu1 %v1545_v3 }
 0x161   : > { %v833_v45 = vpop.permute.xlu0 %832  ;;  %v947_v48 = vpop.permute.xlu1 %946 }
 0x165   : > { %v1061_v47 = vpop.permute.xlu0 %1060  ;;  %v1059_v50 = vpop.permute.xlu1 %1058 }
 0x166   : > { %1462 = vmatmul.mubr.msk.bf16.vlgmr.msra.gmra.mrb[8].mxu1 %vm722_vm2, %v833_v45  ;;  %v1066_v49 = vsel %vm722_vm2, %v1061_v47, 0 }
 0x167   : > { %1472 = vmatpush3.bf16.xpose.msra.mxu1 %v954_v46  ;;  %1473 = vmatprep.mubr.msk.bf16.mxu1 %vm1546_vm0, %v1545_v3 }
 0x168   : > { %1483 = vmatprep.subr.bf16.mxu1 %v1545_v3 }
 0x16e   : > { %1474 = vmatmul.mubr.msk.bf16.vlgmr.msra.gmra.mrb[12].mxu1 %vm722_vm2, %v947_v48 }
 0x16f   : > { %1484 = vmatpush3.bf16.xpose.msra.mxu1 %v1066_v49  ;;  %1485 = vmatprep.mubr.msk.bf16.mxu1 %vm1546_vm0, %v1545_v3 }
 0x170   : > { %1495 = vmatprep.subr.bf16.mxu1 %v1545_v3 }
 0x176   : > { %1486 = vmatmul.mubr.msk.bf16.vlgmr.msra.gmra.mrb[16].mxu1 %vm722_vm2, %v1059_v50 }
 0x177   : > { %1499 = vmatprep.mubr.msk.bf16.mxu1 %vm1546_vm0, %v1545_v3  ;;  %1496 = vmatpush3.bf16.msra.mxu1 %v1192_v0 }
 0x178   : > { %1497 = vmatprep.subr.bf16.mxu1 %v1545_v3 }
 0x1c7   : > { %v763_v51 = vpop.f32.mrb[4].mxu1 }
 0x1c8   : > { %v769_v53 = vmul.f32 0.35355338, %v763_v51  ;;  %v1451_v54 = vpop.f32.mrb[5].mxu1 }
 0x1c9   : > { %v766_v55 = vpop.f32.mrb[6].mxu1 }
 0x1ca   : > { %v1452_v56 = vpop.f32.mrb[7].mxu1  ;;  %v770_v57 = vadd.f32 %v769_v53, %v547_v52 }
 0x1cc   : > { %v771_v58 = vsel %vm722_vm2, %v770_v57, -inf }
 0x1cd   : > { %772 = vmax.xlane.f32.xlu0 %v771_v58 }
 0x239   : > { %v877_v4 = vpop.f32.mrb[8].mxu1 }
 0x23a   : > { %v883_v5 = vmul.f32 0.35355338, %v877_v4  ;;  %v1463_v6 = vpop.f32.mrb[9].mxu1 }
 0x23b   : > { %v880_v7 = vpop.f32.mrb[10].mxu1 }
 0x23c   : > { %v1464_v8 = vpop.f32.mrb[11].mxu1  ;;  %v884_v9 = vadd.f32 %v883_v5, %v547_v52 }
 0x23e   : > { %v885_v10 = vsel %vm722_vm2, %v884_v9, -inf }
 0x23f   : > { %886 = vmax.xlane.f32.xlu1 %v885_v10  ;;  %v1190_v10 = vld [vmem:[%s1831_s11 + $0x18] sm:$0xff] }
 0x241   : > { %v990_v11 = vpop.f32.mrb[12].mxu1 }
 0x242   : > { %v996_v12 = vmul.f32 0.35355338, %v990_v11  ;;  %v1475_v13 = vpop.f32.mrb[13].mxu1 }
 0x243   : > { %v993_v14 = vpop.f32.mrb[14].mxu1 }
 0x244   : > { %v1476_v15 = vpop.f32.mrb[15].mxu1  ;;  %v997_v17 = vadd.f32 %v996_v12, %v547_v52 }
 0x246   : > { %v998_v18 = vsel %vm722_vm2, %v997_v17, -inf }
 0x247   : > { %999 = vmax.xlane.f32.xlu0 %v998_v18 }
 0x249   : > { %v1102_v19 = vpop.f32.mrb[16].mxu1 }
 0x24a   : > { %v1108_v20 = vmul.f32 0.35355338, %v1102_v19  ;;  %v1487_v21 = vpop.f32.mrb[17].mxu1 }
 0x24b   : > { %v1105_v22 = vpop.f32.mrb[18].mxu1 }
 0x24c   : > { %v1488_v23 = vpop.f32.mrb[19].mxu1  ;;  %v1109_v24 = vadd.f32 %v1108_v20, %v547_v52 }
 0x24e   : > { %v1110_v25 = vsel %vm722_vm2, %v1109_v24, -inf }
 0x24f   : > { %1111 = vmax.xlane.f32.xlu0 %v1110_v25 }
 0x250   : > { %897 = vrot.lane.b32.xlu1 %v782_v1, %s1548_s24 }
 0x254   : > { %1121 = vrot.lane.b32.xlu1 %v782_v1, %s1549_s25 }
 0x25a   : > { %v773_v26 = vpop.xlane.xlu0 %772 }
 0x25b   : > { %v774_v27 = vsub.f32 %v770_v57, %v773_v26 }
 0x25d   : > { %v775_v28 = vmul.f32 1.442695, %v774_v27 }
 0x25f   : > { %1519 = vpow2.f32 %v775_v28 }
 0x265   : > { %1009 = vrot.lane.b32.xlu0 %v782_v1, %s1837_s30 }
 0x269   : > { %v1520_v29 = vpop.eup %1519 }
 0x26a   : > { %v781_v30 = vpack.c.bf16 %v1520_v29, %v1520_v29  ;;  %v777_v46 = vsel %vm722_vm2, %v1520_v29, 0.0 }
 0x26c   : > { %1456 = vmatmul.mubr.msk.bf16.vlgmr.msra.gmra.mrb[8].mxu0 %vm722_vm2, %v781_v30 }
 0x26d   : > { %1467 = vmatprep.mubr.msk.bf16.mxu0 %vm1546_vm0, %v1545_v3 }
 0x2cc   : > { %v887_v31 = vpop.xlane.xlu1 %886 }
 0x2cd   : > { %v888_v32 = vsub.f32 %v884_v9, %v887_v31  ;;  %v1189_v9 = vld [vmem:[%s1831_s11 + $0x10] sm:$0xff] }
 0x2ce   : > { %v1193_v11 = vpack.c.bf16 %v1190_v10, %v1189_v9 }
 0x2cf   : > { %v889_v33 = vmul.f32 1.442695, %v888_v32 }
 0x2d0   : > { %v898_v34 = vpop.permute.xlu1 %897  ;;  %1498 = vmatpush3.bf16.msra.mxu1 %v1193_v11 }
 0x2d1   : > { %1521 = vpow2.f32 %v889_v33  ;;  %v903_v35 = vsel %vm786_vm3, %v898_v34, 0  ;;  %v1389_v34 = vld [vmem:[%s1832_s12] ss:$0 sm:$0xff] }
 0x2d2   : > { %1466 = vmatpush3.bf16.msra.mxu0 %v903_v35 }
 0x2d3   : > { %1477 = vmatprep.subr.bf16.mxu0 %v1545_v3 }
 0x2d4   : > { %v1000_v36 = vpop.xlane.xlu0 %999  ;;  %v1122_v49 = vpop.permute.xlu1 %1121 }
 0x2d5   : > { %v1001_v37 = vsub.f32 %v997_v17, %v1000_v36  ;;  %v1127_v52 = vsel %vm786_vm3, %v1122_v49, 0 }
 0x2d7   : > { %v1002_v38 = vmul.f32 1.442695, %v1001_v37 }
 0x2d9   : > { %1523 = vpow2.f32 %v1002_v38 }
 0x2db   : > { %v1522_v39 = vpop.eup %1521 }
 0x2dc   : > { %v1112_v40 = vpop.xlane.xlu0 %1111  ;;  %v891_v41 = vsel %vm722_vm2, %v1522_v39, 0.0  ;;  %v895_v42 = vpack.c.bf16 %v1522_v39, %v1522_v39 }
 0x2dd   : > { %v1113_v43 = vsub.f32 %v1109_v24, %v1112_v40  ;;  %892 = vadd.xlane.f32.xlu1 %v891_v41 }
 0x2de   : > { %1468 = vmatmul.mubr.msk.bf16.vlgmr.msra.gmra.mrb[12].mxu0 %vm722_vm2, %v895_v42 }
 0x2df   : > { %v1114_v44 = vmul.f32 1.442695, %v1113_v43  ;;  %1479 = vmatprep.mubr.msk.bf16.mxu0 %vm1546_vm0, %v1545_v3 }
 0x2e0   : > { %v1010_v45 = vpop.permute.xlu0 %1009 }
 0x2e1   : > { %1525 = vpow2.f32 %v1114_v44  ;;  %v1015_v47 = vsel %vm786_vm3, %v1010_v45, 0  ;;  %778 = vadd.xlane.f32.xlu1 %v777_v46 }
 0x2e2   : > { %1478 = vmatpush3.bf16.msra.mxu0 %v1015_v47 }
 0x2e3   : > { %v1524_v48 = vpop.eup %1523  ;;  %1489 = vmatprep.subr.bf16.mxu0 %v1545_v3 }
 0x2e4   : > { %v1004_v50 = vsel %vm722_vm2, %v1524_v48, 0.0  ;;  %v1008_v51 = vpack.c.bf16 %v1524_v48, %v1524_v48 }
 0x2e5   : > { %1005 = vadd.xlane.f32.xlu0 %v1004_v50 }
 0x2e6   : > { %1480 = vmatmul.mubr.msk.bf16.vlgmr.msra.gmra.mrb[16].mxu0 %vm722_vm2, %v1008_v51 }
 0x2e7   : > { %1490 = vmatpush3.bf16.msra.mxu0 %v1127_v52  ;;  %1491 = vmatprep.mubr.msk.bf16.mxu0 %vm1546_vm0, %v1545_v3  ;;  %v1392_v52 = vld [vmem:[%s1834_s14] ss:$0 sm:$0xff] }
 0x2eb   : > { %v1526_v53 = vpop.eup %1525 }
 0x2ec   : > { %v1116_v54 = vsel %vm722_vm2, %v1526_v53, 0.0  ;;  %v1120_v55 = vpack.c.bf16 %v1526_v53, %v1526_v53 }
 0x2ed   : > { %1117 = vadd.xlane.f32.xlu0 %v1116_v54 }
 0x2ee   : > { %1492 = vmatmul.mubr.msk.bf16.vlgmr.msra.gmra.mrb[20].mxu0 %vm722_vm2, %v1120_v55 }
 0x33f   : > { %v824_v56 = vpop.f32.mrb[8].mxu0 }
 0x340   : > { %v1457_v57 = vpop.f32.mrb[9].mxu0 }
 0x341   : > { %v827_v58 = vpop.f32.mrb[10].mxu0 }
 0x342   : > { %v1458_v59 = vpop.f32.mrb[11].mxu0 }
 0x36a   : > { %v893_v60 = vpop.xlane.xlu1 %892 }
 0x36b   : > { %1527 = vrcp.f32 %v893_v60 }
 0x36e   : > { %v779_v24 = vpop.xlane.xlu1 %778 }
 0x372   : > { %v1006_v61 = vpop.xlane.xlu0 %1005 }
 0x373   : > { %1529 = vrcp.f32 %v1006_v61 }
 0x375   : > { %v1528_v1 = vpop.eup %1527 }
 0x37a   : > { %v1118_v7 = vpop.xlane.xlu0 %1117 }
 0x37b   : > { %1531 = vrcp.f32 %v1118_v7 }
 0x37c   : > { %1533 = vrcp.f32 %v779_v24 }
 0x37d   : > { %v1530_v12 = vpop.eup %1529 }
 0x385   : > { %v1532_v18 = vpop.eup %1531 }
 0x386   : > { %v1534_v25 = vpop.eup %1533 }
 0x387   : > { %v830_v28 = vmul.f32 %v1534_v25, %v824_v56 }
 0x3b1   : > { %v939_v2 = vpop.f32.mrb[12].mxu0 }
 0x3b2   : > { %v945_v4 = vmul.f32 %v1528_v1, %v939_v2  ;;  %v1469_v5 = vpop.f32.mrb[13].mxu0 }
 0x3b3   : > { %v942_v6 = vpop.f32.mrb[14].mxu0 }
 0x3b4   : > { %1171 = vrot.lane.b32.xlu0 %v945_v4, %s1550_s17  ;;  %v1470_v8 = vpop.f32.mrb[15].mxu0 }
 0x3b9   : > { %v1051_v13 = vpop.f32.mrb[16].mxu0 }
 0x3ba   : > { %v1057_v14 = vmul.f32 %v1530_v12, %v1051_v13  ;;  %v1481_v15 = vpop.f32.mrb[17].mxu0 }
 0x3bb   : > { %v1054_v3 = vpop.f32.mrb[18].mxu0 }
 0x3bc   : > { %1175 = vrot.lane.b32.xlu1 %v1057_v14, %s1551_s27  ;;  %v1482_v17 = vpop.f32.mrb[19].mxu0 }
 0x3c1   : > { %v1163_v19 = vpop.f32.mrb[20].mxu0 }
 0x3c2   : > { %v1169_v20 = vmul.f32 %v1532_v18, %v1163_v19  ;;  %v1493_v21 = vpop.f32.mrb[21].mxu0 }
 0x3c3   : > { %v1166_v22 = vpop.f32.mrb[22].mxu0 }
 0x3c4   : > { %1179 = vrot.lane.b32.xlu1 %v1169_v20, %s1552_s28  ;;  %v1494_v23 = vpop.f32.mrb[23].mxu0 }
 0x426   : > { %v1172_v26 = vpop.permute.xlu0 %1171 }
 0x427   : > { %v1182_v29 = vsel %vm722_vm2, %v830_v28, %v1172_v26 }
 0x42e   : > { %v1176_v27 = vpop.permute.xlu1 %1175 }
 0x42f   : > { %v1184_v30 = vsel %vm1183_vm4, %v1182_v29, %v1176_v27 }
 0x436   : > { %v1180_v31 = vpop.permute.xlu1 %1179 }
 0x437   : > { %v1186_v32 = vsel %vm1185_vm5, %v1184_v30, %v1180_v31 }
 0x438   : > { %v1191_v33 = vpack.c.bf16 %v1186_v32, %v1186_v32 }
 0x43a   : > { %1500 = vmatmul.mubr.msk.bf16.vlgmr.msra.gmra.mrb[20].mxu1 %vm562_vm1, %v1191_v33 }
 0x50d   : > { %v1238_v35 = vpop.f32.mrb[20].mxu1 }
 0x50e   : > { %v1239_v36 = vadd.f32 %v1389_v34, %v1238_v35  ;;  %v1501_v37 = vpop.f32.mrb[21].mxu1 }
 0x50f   : > { %v1241_v38 = vpop.f32.mrb[22].mxu1 }
 0x510   : > { %v1502_v39 = vpop.f32.mrb[23].mxu1  ;;  %v1244_v40 = vadd.f32 %v1239_v36, %v1686_v16  ;;  %v1391_v16 = vld [vmem:[%s1833_s13] ss:$0 sm:$0xff] }
 0x512   : > { %v1247_v41 = vsel %vm562_vm1, %v1244_v40, 0.0 }
 0x513   : > { %1248 = vadd.xlane.f32.xlu0 %v1247_v41 }
 0x5a0   : > { %v1249_v42 = vpop.xlane.xlu0 %1248 }
 0x5a1   : > { %v1251_v43 = vmul.f32 0.03125, %v1249_v42 }
 0x5a3   : > { %v1252_v44 = vsub.f32 %v1244_v40, %v1251_v43 }
 0x5a5   : > { %v1253_v45 = vmul.f32 %v1252_v44, %v1252_v44 }
 0x5a7   : > { %v1254_v46 = vsel %vm562_vm1, %v1253_v45, 0.0 }
 0x5a8   : > { %1255 = vadd.xlane.f32.xlu1 %v1254_v46 }
 0x635   : > { %v1256_v47 = vpop.xlane.xlu1 %1255 }
 0x636   : > { %v1257_v48 = vmul.f32 0.03125, %v1256_v47 }
 0x638   : > { %v1258_v49 = vadd.f32 1e-05, %v1257_v48 }
 0x63a   : > { %1535 = vrsqrt.f32 %v1258_v49 }
 0x644   : > { %v1536_v50 = vpop.eup %1535 }
 0x645   : > { %v1260_v51 = vmul.f32 %v1536_v50, %v1252_v44 }
 0x647   : > { %v1267_v53 = vmul.f32 %v1391_v16, %v1260_v51 }
 0x649   : > { %v1274_v54 = vadd.f32 %v1392_v52, %v1267_v53 }
 0x64b   : > { %1275 = vst.msk [vmem:[%s540_s21] sm:$0xff] %vm562_vm1, %v1274_v54 }
 0x64c PF: > { %s25_s18 = sadd.s32 1, %s1543_s18  }
 0x64d   : > { %p22_p4 = scmp.ge.s32.totalorder %s25_s18, 4  }
 0x64f   :  { %24 = sbr.rel (!%p22_p4) target bundleno = 1 (0x1), region = 119 }

// kernel: _lambda_.28
= control target key start
LH: loop header
LB: loop body
LE: loop exit
PB: predicated region body
PF: predicated region fallthrough
CT: control target
= control target key end

     0   :  { %s1637_s18 = smov 0   ;;  %s1827_s0 = inlined_call_operand.vmem [shape: f32[2,8,32], index: 0, kind: input, shape index: {}]   ;;  %s1828_s1 = inlined_call_operand.vmem [shape: f32[8,32], index: 1, kind: input, shape index: {}]   ;;  %s1829_s2 = inlined_call_operand.vmem [shape: f32[2,16,32], index: 2, kind: input, shape index: {}]   ;;  %s1830_s3 = inlined_call_operand.vmem [shape: f32[2,16,32], index: 3, kind: input, shape index: {}]   ;;  %s1831_s4 = inlined_call_operand.vmem [shape: f32[2,8,16], index: 4, kind: input, shape index: {}]   ;;  %s1832_s5 = inlined_call_operand.vmem [shape: f32[32,32], index: 5, kind: input, shape index: {}]   ;;  %s1833_s6 = inlined_call_operand.vmem [shape: f32[1,32], index: 6, kind: input, shape index: {}]   ;;  %s1834_s7 = inlined_call_operand.vmem [shape: f32[32,32], index: 7, kind: input, shape index: {}]   ;;  %s1835_s8 = inlined_call_operand.vmem [shape: f32[1,32], index: 8, kind: input, shape index: {}]   ;;  %s1836_s9 = inlined_call_operand.vmem [shape: f32[32,32], index: 9, kind: input, shape index: {}]   ;;  %s1837_s10 = inlined_call_operand.vmem [shape: f32[1,32], index: 10, kind: input, shape index: {}]   ;;  %s1838_s11 = inlined_call_operand.vmem [shape: f32[32,32], index: 11, kind: input, shape index: {}]   ;;  %s1839_s12 = inlined_call_operand.vmem [shape: f32[1,32], index: 12, kind: input, shape index: {}]   ;;  %s1840_s13 = inlined_call_operand.vmem [shape: f32[1,32], index: 13, kind: input, shape index: {}]   ;;  %s1841_s14 = inlined_call_operand.vmem [shape: f32[1,32], index: 14, kind: input, shape index: {}]   ;;  %s1842_s15 = inlined_call_operand.vmem [shape: f32[2,8,32], index: 15, kind: output, shape index: {}]  }
   0x1 LB: > { %s1365_s19 = sadd.s32 4294967295, %s1547_s18   ;;  %p1369_p0 = scmp.ge.s32.totalorder %s1547_s18, 1  ;;  %s1547_s18 = sphi %s1637_s18, %s25_s18  }
   0x2   : > { %p465_p1 = scmp.lt.s32.totalorder %s1547_s18, 3 }
   0x4   : > { %p466_p2 = pnand %p1369_p0, %p465_p1 }
   0x5   : > { %v614_v0 = vld [vmem:[%s1834_s7] sm:$0xff] (!%p466_p2)  ;;  %v615_v1 = vld [vmem:[%s1834_s7 + $0x8] sm:$0xff] (!%p466_p2)  ;;  %v616_v2 = vld [vmem:[%s1834_s7 + $0x10] sm:$0xff] (!%p466_p2)  ;;  %p525_p3 = scmp.lt.s32.totalorder (!%p466_p2), %s1365_s19, 1  ;;  %v1549_v3 = vmov (!%p466_p2), 0.0   ;;  %vm1550_vm0 = vmmov (!%p466_p2), 0  }
   0x6   : > { %469 = sbr.rel (%p466_p2) target bundleno = 1614 (0x64e), region = 80  ;;  %1435 = vmatprep.subr.bf16.mxu1 (!%p466_p2), %v1549_v3  ;;  %v619_v4 = vpack.c.bf16 (!%p466_p2), %v615_v1, %v614_v0  ;;  %v617_v5 = vld [vmem:[%s1834_s7 + $0x18] sm:$0xff] (!%p466_p2)  ;;  %1427 = vmatprep.subr.bf16.mxu0 (!%p466_p2), %v1549_v3  ;;  %v556_v6 = vld [vmem:[%s1832_s5] sm:$0xff] (!%p466_p2)  ;;  %v557_v7 = vld [vmem:[%s1832_s5 + $0x8] sm:$0xff] (!%p466_p2)  ;;  %vm570_vm1 = vcmask (!%p466_p2), 261120   ;;  %vm732_vm2 = vcmask (!%p466_p2), 64512  }
   0x7   : > { %v561_v8 = vpack.c.bf16 (!%p466_p2), %v557_v7, %v556_v6  ;;  %1439 = vmatprep.mubr.msk.bf16.mxu1 (!%p466_p2), %vm1550_vm0, %v1549_v3  ;;  %v558_v9 = vld [vmem:[%s1832_s5 + $0x10] sm:$0xff] (!%p466_p2)  ;;  %v559_v10 = vld [vmem:[%s1832_s5 + $0x18] sm:$0xff] (!%p466_p2)  ;;  %1431 = vmatprep.mubr.msk.bf16.mxu0 (!%p466_p2), %vm1550_vm0, %v1549_v3  ;;  %v620_v11 = vpack.c.bf16 (!%p466_p2), %v617_v5, %v616_v2  ;;  %v549_v13 = vld [vmem:[%s1828_s1] sm:$0xff] (!%p466_p2)  ;;  %s1843_s26 = smov (!%p466_p2), 112   ;;  %s1844_s28 = smov (!%p466_p2), 104   ;;  %vm781_vm3 = vcmask (!%p466_p2), 130048  }
   0x8   : > { %1436 = vmatpush3.bf16.msra.mxu1 (!%p466_p2), %v619_v4  ;;  %v562_v12 = vpack.c.bf16 (!%p466_p2), %v559_v10, %v558_v9  ;;  %v1379_v20 = vld [vmem:[%s1835_s8] ss:$0 sm:$0xff] (!%p466_p2)  ;;  %v673_v37 = vld [vmem:[%s1836_s9 + $0x8] sm:$0xff] (!%p466_p2)  ;;  %v674_v38 = vld [vmem:[%s1836_s9 + $0x10] sm:$0xff] (!%p466_p2)  ;;  %s1846_s29 = smov (!%p466_p2), 120   ;;  %s1847_s30 = smov (!%p466_p2), 104  }
   0x9   : > { %1437 = vmatprep.subr.bf16.mxu1 (!%p466_p2), %v1549_v3  ;;  %1428 = vmatpush3.bf16.msra.mxu0 (!%p466_p2), %v561_v8  ;;  %v1377_v22 = vld [vmem:[%s1833_s6] ss:$0 sm:$0xff] (!%p466_p2)  ;;  %v675_v40 = vld [vmem:[%s1836_s9 + $0x18] sm:$0xff] (!%p466_p2)  ;;  %s1554_s25 = smov (!%p466_p2), 8   ;;  %vm1185_vm4 = vcmask (!%p466_p2), 195584  }
   0xa   : > { %1429 = vmatprep.subr.bf16.mxu0 (!%p466_p2), %v1549_v3  ;;  %v672_v36 = vld [vmem:[%s1836_s9] sm:$0xff] (!%p466_p2)  ;;  %v678_v43 = vpack.c.bf16 (!%p466_p2), %v675_v40, %v674_v38 }
   0xb   : > { %v677_v39 = vpack.c.bf16 (!%p466_p2), %v673_v37, %v672_v36  ;;  %v1381_v0 = vld [vmem:[%s1837_s10] ss:$0 sm:$0xff] (!%p466_p2) }
   0xc   : > { %1438 = vmatpush3.bf16.msra.mxu1 (!%p466_p2), %v620_v11 }
   0xd   : > { %s1850_s19 = smov (!%p525_p3, %s1365_s19), 1  ;;  %1430 = vmatpush3.bf16.msra.mxu0 %v562_v12  ;;  %1451 = vmatprep.subr.bf16.mxu1 %v1549_v3 }
   0xe   : > { %s1397_s23 = sshll.u32 %s1850_s19, 4  ;;  %s1680_s24 = sshll.u32 %s1850_s19, 3  ;;  %1443 = vmatprep.subr.bf16.mxu0 %v1549_v3 }
   0xf   : > { %s533_s27 = scalar_lea.vmem %s1829_s2, %s1397_s23  ;;  %s528_s17 = scalar_lea.vmem %s1827_s0, %s1680_s24 }
  0x10   : > { %v551_v14 = vld [vmem:[%s533_s27] sm:$0xff]  ;;  %v552_v15 = vld [vmem:[%s533_s27 + $0x8] sm:$0xff]  ;;  %s1845_s27 = smov 120   ;;  %s538_s16 = scalar_lea.vmem %s1830_s3, %s1397_s23 }
  0x11   : > { %v618_v16 = vpack.c.bf16 %v552_v15, %v551_v14  ;;  %v1695_v17 = vld [vmem:[%s528_s17] sm:$0xff]  ;;  %v554_v42 = vld [vmem:[%s538_s16 + $0x8] sm:$0xff]  ;;  %s546_s23 = scalar_lea.vmem %s1842_s15, %s1680_s24 }
  0x12   : > { %v550_v18 = vadd.f32 %v549_v13, %v1695_v17  ;;  %v553_v41 = vld [vmem:[%s538_s16] sm:$0xff]  ;;  %s1848_s16 = smov 112  }
  0x13   : > { %1440 = vmatmul.mubr.msk.bf16.vlgmr.msra.gmra.mrb[0].mxu1 %vm570_vm1, %v618_v16  ;;  %v676_v44 = vpack.c.bf16 %v554_v42, %v553_v41 }
  0x14   : > { %v560_v19 = vpack.c.bf16 %v550_v18, %v550_v18  ;;  %1453 = vmatprep.mubr.msk.bf16.mxu1 %vm1550_vm0, %v1549_v3 }
  0x16   : > { %1432 = vmatmul.mubr.msk.bf16.vlgmr.msra.gmra.mrb[0].mxu0 %vm570_vm1, %v560_v19 }
  0x17   : > { %1447 = vmatprep.mubr.msk.bf16.mxu0 %vm1550_vm0, %v1549_v3  ;;  %1444 = vmatpush3.bf16.msra.mxu0 %v677_v39 }
  0x18   : > { %1445 = vmatprep.subr.bf16.mxu0 %v1549_v3 }
  0x1b   : > { %1446 = vmatpush3.bf16.msra.mxu0 %v678_v43 }
  0x1c   : > { %1457 = vmatprep.subr.bf16.mxu0 %v1549_v3 }
  0x1e   : > { %1448 = vmatmul.mubr.msk.bf16.vlgmr.msra.gmra.mrb[4].mxu0 %vm570_vm1, %v676_v44 }
  0x1f   : > { %1459 = vmatprep.mubr.msk.bf16.mxu0 %vm1550_vm0, %v1549_v3 }
  0xe6   : > { %v665_v21 = vpop.f32.mrb[0].mxu1 }
  0xe7   : > { %v1441_v23 = vpop.f32.mrb[1].mxu1  ;;  %v666_v26 = vadd.f32 %v1379_v20, %v665_v21 }
  0xe8   : > { %v668_v24 = vpop.f32.mrb[2].mxu1 }
  0xe9   : > { %v608_v25 = vpop.f32.mrb[0].mxu0  ;;  %v669_v27 = vadd.f32 %v1379_v20, %v668_v24  ;;  %v1442_v28 = vpop.f32.mrb[3].mxu1 }
  0xea   : > { %v609_v29 = vadd.f32 %v1377_v22, %v608_v25  ;;  %v1433_v30 = vpop.f32.mrb[1].mxu0 }
  0xeb   : > { %v611_v31 = vpop.f32.mrb[2].mxu0  ;;  %v731_v32 = vpack.c.bf16 %v669_v27, %v666_v26 }
  0xec   : > { %v1434_v33 = vpop.f32.mrb[3].mxu0  ;;  %v730_v34 = vpack.c.bf16 %v609_v29, %v609_v29 }
  0xed   : > { %953 = vrot.lane.b32.xlu1 %v731_v32, %s1843_s26  ;;  %842 = vrot.lane.b32.xlu0 %v731_v32, %s1845_s27  ;;  %v737_v35 = vsel %vm732_vm2, %v731_v32, 0 }
  0xee   : > { %1452 = vmatpush3.bf16.xpose.msra.mxu1 %v737_v35 }
  0xef   : > { %1463 = vmatprep.subr.bf16.mxu1 %v1549_v3 }
  0xf1   : > { %951 = vrot.lane.b32.xlu1 %v730_v34, %s1843_s26  ;;  %839 = vrot.lane.b32.xlu0 %v730_v34, %s1845_s27  ;;  %s542_s26 = scalar_lea.vmem %s1831_s4, %s1680_s24  ;;  %v723_v62 = vpop.f32.mrb[4].mxu0 }
  0xf2   : > { %v555_v55 = vld [vmem:[%s542_s26] sm:$0xff]  ;;  %v1449_v63 = vpop.f32.mrb[5].mxu0  ;;  %v724_v2 = vadd.f32 %v1381_v0, %v723_v62 }
  0xf3   : > { %v726_v1 = vpop.f32.mrb[6].mxu0  ;;  %v1187_v62 = vld [vmem:[%s1838_s11] sm:$0xff]  ;;  %v1188_v63 = vld [vmem:[%s1838_s11 + $0x8] sm:$0xff] }
  0xf4   : > { %v727_v4 = vadd.f32 %v1381_v0, %v726_v1  ;;  %v1450_v5 = vpop.f32.mrb[7].mxu0  ;;  %v1192_v0 = vpack.c.bf16 %v1188_v63, %v1187_v62 }
  0xf5   : > { %1061 = vrot.lane.b32.xlu1 %v730_v34, %s1844_s28  ;;  %1063 = vrot.lane.b32.xlu0 %v731_v32, %s1844_s28  ;;  %s1555_s28 = smov 16  }
  0xf6   : > { %1454 = vmatmul.mubr.msk.bf16.vlgmr.msra.gmra.mrb[4].mxu1 %vm732_vm2, %v730_v34  ;;  %v793_v6 = vpack.c.bf16 %v727_v4, %v724_v2 }
  0xf7   : > { %1465 = vmatprep.mubr.msk.bf16.mxu1 %vm1550_vm0, %v1549_v3 }
  0xf8   : > { %1458 = vmatpush3.bf16.msra.mxu0 %v793_v6 }
  0xf9   : > { %1469 = vmatprep.subr.bf16.mxu0 %v1549_v3 }
 0x15f   : > { %v843_v45 = vpop.permute.xlu0 %842  ;;  %v954_v47 = vpop.permute.xlu1 %953 }
 0x160   : > { %v848_v46 = vsel %vm732_vm2, %v843_v45, 0  ;;  %v959_v49 = vsel %vm732_vm2, %v954_v47, 0 }
 0x161   : > { %1464 = vmatpush3.bf16.xpose.msra.mxu1 %v848_v46 }
 0x162   : > { %1475 = vmatprep.subr.bf16.mxu1 %v1549_v3 }
 0x163   : > { %v840_v48 = vpop.permute.xlu0 %839  ;;  %v952_v51 = vpop.permute.xlu1 %951 }
 0x167   : > { %v1064_v50 = vpop.permute.xlu0 %1063  ;;  %v1062_v53 = vpop.permute.xlu1 %1061 }
 0x168   : > { %1466 = vmatmul.mubr.msk.bf16.vlgmr.msra.gmra.mrb[8].mxu1 %vm732_vm2, %v840_v48  ;;  %v1069_v52 = vsel %vm732_vm2, %v1064_v50, 0 }
 0x169   : > { %1476 = vmatpush3.bf16.xpose.msra.mxu1 %v959_v49  ;;  %1477 = vmatprep.mubr.msk.bf16.mxu1 %vm1550_vm0, %v1549_v3 }
 0x16a   : > { %1487 = vmatprep.subr.bf16.mxu1 %v1549_v3 }
 0x170   : > { %1478 = vmatmul.mubr.msk.bf16.vlgmr.msra.gmra.mrb[12].mxu1 %vm732_vm2, %v952_v51 }
 0x171   : > { %1488 = vmatpush3.bf16.xpose.msra.mxu1 %v1069_v52  ;;  %1489 = vmatprep.mubr.msk.bf16.mxu1 %vm1550_vm0, %v1549_v3 }
 0x172   : > { %1499 = vmatprep.subr.bf16.mxu1 %v1549_v3 }
 0x178   : > { %1490 = vmatmul.mubr.msk.bf16.vlgmr.msra.gmra.mrb[16].mxu1 %vm732_vm2, %v1062_v53 }
 0x179   : > { %1503 = vmatprep.mubr.msk.bf16.mxu1 %vm1550_vm0, %v1549_v3  ;;  %1500 = vmatpush3.bf16.msra.mxu1 %v1192_v0 }
 0x17a   : > { %1501 = vmatprep.subr.bf16.mxu1 %v1549_v3 }
 0x1c9   : > { %v773_v54 = vpop.f32.mrb[4].mxu1 }
 0x1ca   : > { %v779_v56 = vmul.f32 0.35355338, %v773_v54  ;;  %v1455_v57 = vpop.f32.mrb[5].mxu1 }
 0x1cb   : > { %v776_v58 = vpop.f32.mrb[6].mxu1 }
 0x1cc   : > { %v1456_v59 = vpop.f32.mrb[7].mxu1  ;;  %v780_v60 = vadd.f32 %v779_v56, %v555_v55 }
 0x1ce   : > { %v782_v61 = vsel %vm781_vm3, %v780_v60, -inf }
 0x1cf   : > { %783 = vmax.xlane.f32.xlu0 %v782_v61 }
 0x23b   : > { %v884_v7 = vpop.f32.mrb[8].mxu1 }
 0x23c   : > { %v890_v8 = vmul.f32 0.35355338, %v884_v7  ;;  %v1467_v9 = vpop.f32.mrb[9].mxu1 }
 0x23d   : > { %v887_v10 = vpop.f32.mrb[10].mxu1  ;;  %v1189_v9 = vld [vmem:[%s1838_s11 + $0x10] sm:$0xff] }
 0x23e   : > { %v1468_v11 = vpop.f32.mrb[11].mxu1  ;;  %v891_v12 = vadd.f32 %v890_v8, %v555_v55  ;;  %v1190_v10 = vld [vmem:[%s1838_s11 + $0x18] sm:$0xff] }
 0x23f   : > { %v1193_v11 = vpack.c.bf16 %v1190_v10, %v1189_v9 }
 0x240   : > { %v892_v13 = vsel %vm781_vm3, %v891_v12, -inf }
 0x241   : > { %893 = vmax.xlane.f32.xlu1 %v892_v13  ;;  %1502 = vmatpush3.bf16.msra.mxu1 %v1193_v11 }
 0x243   : > { %v995_v14 = vpop.f32.mrb[12].mxu1 }
 0x244   : > { %v1001_v15 = vmul.f32 0.35355338, %v995_v14  ;;  %v1479_v16 = vpop.f32.mrb[13].mxu1 }
 0x245   : > { %v998_v18 = vpop.f32.mrb[14].mxu1 }
 0x246   : > { %v1480_v19 = vpop.f32.mrb[15].mxu1  ;;  %v1002_v20 = vadd.f32 %v1001_v15, %v555_v55 }
 0x248   : > { %v1003_v21 = vsel %vm781_vm3, %v1002_v20, -inf }
 0x249   : > { %1004 = vmax.xlane.f32.xlu0 %v1003_v21 }
 0x24b   : > { %v1105_v22 = vpop.f32.mrb[16].mxu1 }
 0x24c   : > { %v1111_v23 = vmul.f32 0.35355338, %v1105_v22  ;;  %v1491_v24 = vpop.f32.mrb[17].mxu1 }
 0x24d   : > { %v1108_v25 = vpop.f32.mrb[18].mxu1 }
 0x24e   : > { %v1492_v26 = vpop.f32.mrb[19].mxu1  ;;  %v1112_v27 = vadd.f32 %v1111_v23, %v555_v55 }
 0x250   : > { %v1113_v28 = vsel %vm781_vm3, %v1112_v27, -inf }
 0x251   : > { %1114 = vmax.xlane.f32.xlu0 %v1113_v28 }
 0x252   : > { %904 = vrot.lane.b32.xlu1 %v793_v6, %s1846_s29  ;;  %s1556_s29 = smov 24  }
 0x256   : > { %1124 = vrot.lane.b32.xlu1 %v793_v6, %s1847_s30 }
 0x25c   : > { %v784_v29 = vpop.xlane.xlu0 %783 }
 0x25d   : > { %v785_v30 = vsub.f32 %v780_v60, %v784_v29 }
 0x25f   : > { %v786_v31 = vmul.f32 1.442695, %v785_v30 }
 0x261   : > { %1523 = vpow2.f32 %v786_v31 }
 0x267   : > { %1014 = vrot.lane.b32.xlu0 %v793_v6, %s1848_s16 }
 0x26b   : > { %v1524_v32 = vpop.eup %1523 }
 0x26c   : > { %v792_v33 = vpack.c.bf16 %v1524_v32, %v1524_v32  ;;  %v788_v48 = vsel %vm781_vm3, %v1524_v32, 0.0 }
 0x26e   : > { %1460 = vmatmul.mubr.msk.bf16.vlgmr.msra.gmra.mrb[8].mxu0 %vm781_vm3, %v792_v33 }
 0x26f   : > { %1471 = vmatprep.mubr.msk.bf16.mxu0 %vm1550_vm0, %v1549_v3 }
 0x2ce   : > { %v894_v34 = vpop.xlane.xlu1 %893 }
 0x2cf   : > { %v895_v35 = vsub.f32 %v891_v12, %v894_v34  ;;  %v1391_v34 = vld [vmem:[%s1839_s12] ss:$0 sm:$0xff] }
 0x2d1   : > { %v896_v36 = vmul.f32 1.442695, %v895_v35 }
 0x2d2   : > { %v905_v37 = vpop.permute.xlu1 %904 }
 0x2d3   : > { %1525 = vpow2.f32 %v896_v36  ;;  %1470 = vmatpush3.bf16.msra.mxu0 %v905_v37 }
 0x2d4   : > { %1481 = vmatprep.subr.bf16.mxu0 %v1549_v3 }
 0x2d6   : > { %v1005_v38 = vpop.xlane.xlu0 %1004  ;;  %v1125_v52 = vpop.permute.xlu1 %1124 }
 0x2d7   : > { %v1006_v39 = vsub.f32 %v1002_v20, %v1005_v38 }
 0x2d9   : > { %v1007_v40 = vmul.f32 1.442695, %v1006_v39 }
 0x2db   : > { %1527 = vpow2.f32 %v1007_v40 }
 0x2dd   : > { %v1526_v41 = vpop.eup %1525 }
 0x2de   : > { %v1115_v42 = vpop.xlane.xlu0 %1114  ;;  %v898_v43 = vsel %vm781_vm3, %v1526_v41, 0.0  ;;  %v902_v44 = vpack.c.bf16 %v1526_v41, %v1526_v41 }
 0x2df   : > { %v1116_v45 = vsub.f32 %v1112_v27, %v1115_v42  ;;  %899 = vadd.xlane.f32.xlu1 %v898_v43 }
 0x2e0   : > { %1472 = vmatmul.mubr.msk.bf16.vlgmr.msra.gmra.mrb[12].mxu0 %vm781_vm3, %v902_v44 }
 0x2e1   : > { %v1117_v46 = vmul.f32 1.442695, %v1116_v45  ;;  %1483 = vmatprep.mubr.msk.bf16.mxu0 %vm1550_vm0, %v1549_v3 }
 0x2e2   : > { %v1015_v47 = vpop.permute.xlu0 %1014 }
 0x2e3   : > { %1529 = vpow2.f32 %v1117_v46  ;;  %789 = vadd.xlane.f32.xlu1 %v788_v48  ;;  %1482 = vmatpush3.bf16.msra.mxu0 %v1015_v47 }
 0x2e4   : > { %1493 = vmatprep.subr.bf16.mxu0 %v1549_v3 }
 0x2e5   : > { %v1528_v49 = vpop.eup %1527 }
 0x2e6   : > { %v1009_v50 = vsel %vm781_vm3, %v1528_v49, 0.0  ;;  %v1013_v51 = vpack.c.bf16 %v1528_v49, %v1528_v49 }
 0x2e7   : > { %1010 = vadd.xlane.f32.xlu0 %v1009_v50 }
 0x2e8   : > { %1484 = vmatmul.mubr.msk.bf16.vlgmr.msra.gmra.mrb[16].mxu0 %vm781_vm3, %v1013_v51 }
 0x2e9   : > { %1494 = vmatpush3.bf16.msra.mxu0 %v1125_v52  ;;  %1495 = vmatprep.mubr.msk.bf16.mxu0 %vm1550_vm0, %v1549_v3  ;;  %v1394_v52 = vld [vmem:[%s1841_s14] ss:$0 sm:$0xff] }
 0x2ed   : > { %v1530_v53 = vpop.eup %1529 }
 0x2ee   : > { %v1119_v54 = vsel %vm781_vm3, %v1530_v53, 0.0  ;;  %v1123_v55 = vpack.c.bf16 %v1530_v53, %v1530_v53 }
 0x2ef   : > { %1120 = vadd.xlane.f32.xlu0 %v1119_v54 }
 0x2f0   : > { %1496 = vmatmul.mubr.msk.bf16.vlgmr.msra.gmra.mrb[20].mxu0 %vm781_vm3, %v1123_v55 }
 0x341   : > { %v831_v56 = vpop.f32.mrb[8].mxu0 }
 0x342   : > { %v1461_v57 = vpop.f32.mrb[9].mxu0 }
 0x343   : > { %v834_v58 = vpop.f32.mrb[10].mxu0 }
 0x344   : > { %v1462_v59 = vpop.f32.mrb[11].mxu0 }
 0x36c   : > { %v900_v60 = vpop.xlane.xlu1 %899 }
 0x36d   : > { %1531 = vrcp.f32 %v900_v60 }
 0x370   : > { %v790_v24 = vpop.xlane.xlu1 %789 }
 0x374   : > { %v1011_v61 = vpop.xlane.xlu0 %1010 }
 0x375   : > { %1533 = vrcp.f32 %v1011_v61 }
 0x377   : > { %v1532_v1 = vpop.eup %1531 }
 0x37c   : > { %v1121_v7 = vpop.xlane.xlu0 %1120 }
 0x37d   : > { %1535 = vrcp.f32 %v1121_v7 }
 0x37e   : > { %1537 = vrcp.f32 %v790_v24 }
 0x37f   : > { %v1534_v12 = vpop.eup %1533 }
 0x387   : > { %v1536_v18 = vpop.eup %1535 }
 0x388   : > { %v1538_v25 = vpop.eup %1537 }
 0x389   : > { %v837_v28 = vmul.f32 %v1538_v25, %v831_v56 }
 0x3b3   : > { %v944_v2 = vpop.f32.mrb[12].mxu0 }
 0x3b4   : > { %v950_v4 = vmul.f32 %v1532_v1, %v944_v2  ;;  %v1473_v5 = vpop.f32.mrb[13].mxu0 }
 0x3b5   : > { %v947_v6 = vpop.f32.mrb[14].mxu0 }
 0x3b6   : > { %1172 = vrot.lane.b32.xlu0 %v950_v4, %s1554_s25  ;;  %v1474_v8 = vpop.f32.mrb[15].mxu0 }
 0x3bb   : > { %v1054_v13 = vpop.f32.mrb[16].mxu0 }
 0x3bc   : > { %v1060_v14 = vmul.f32 %v1534_v12, %v1054_v13  ;;  %v1485_v15 = vpop.f32.mrb[17].mxu0 }
 0x3bd   : > { %v1057_v3 = vpop.f32.mrb[18].mxu0 }
 0x3be   : > { %1176 = vrot.lane.b32.xlu1 %v1060_v14, %s1555_s28  ;;  %v1486_v16 = vpop.f32.mrb[19].mxu0 }
 0x3c3   : > { %v1164_v19 = vpop.f32.mrb[20].mxu0 }
 0x3c4   : > { %v1170_v20 = vmul.f32 %v1536_v18, %v1164_v19  ;;  %v1497_v21 = vpop.f32.mrb[21].mxu0 }
 0x3c5   : > { %v1167_v22 = vpop.f32.mrb[22].mxu0 }
 0x3c6   : > { %1180 = vrot.lane.b32.xlu1 %v1170_v20, %s1556_s29  ;;  %v1498_v23 = vpop.f32.mrb[23].mxu0 }
 0x428   : > { %v1173_v26 = vpop.permute.xlu0 %1172 }
 0x429   : > { %v1183_v29 = vsel %vm732_vm2, %v837_v28, %v1173_v26 }
 0x430   : > { %v1177_v27 = vpop.permute.xlu1 %1176 }
 0x431   : > { %v1184_v30 = vsel %vm781_vm3, %v1183_v29, %v1177_v27 }
 0x438   : > { %v1181_v31 = vpop.permute.xlu1 %1180 }
 0x439   : > { %v1186_v32 = vsel %vm1185_vm4, %v1184_v30, %v1181_v31 }
 0x43a   : > { %v1191_v33 = vpack.c.bf16 %v1186_v32, %v1186_v32 }
 0x43c   : > { %1504 = vmatmul.mubr.msk.bf16.vlgmr.msra.gmra.mrb[20].mxu1 %vm570_vm1, %v1191_v33 }
 0x50f   : > { %v1238_v35 = vpop.f32.mrb[20].mxu1 }
 0x510   : > { %v1239_v36 = vadd.f32 %v1391_v34, %v1238_v35  ;;  %v1505_v37 = vpop.f32.mrb[21].mxu1 }
 0x511   : > { %v1241_v38 = vpop.f32.mrb[22].mxu1 }
 0x512   : > { %v1506_v39 = vpop.f32.mrb[23].mxu1  ;;  %v1244_v40 = vadd.f32 %v1239_v36, %v1695_v17  ;;  %v1393_v17 = vld [vmem:[%s1840_s13] ss:$0 sm:$0xff] }
 0x514   : > { %v1247_v41 = vsel %vm570_vm1, %v1244_v40, 0.0 }
 0x515   : > { %1248 = vadd.xlane.f32.xlu0 %v1247_v41 }
 0x5a2   : > { %v1249_v42 = vpop.xlane.xlu0 %1248 }
 0x5a3   : > { %v1251_v43 = vmul.f32 0.03125, %v1249_v42 }
 0x5a5   : > { %v1252_v44 = vsub.f32 %v1244_v40, %v1251_v43 }
 0x5a7   : > { %v1253_v45 = vmul.f32 %v1252_v44, %v1252_v44 }
 0x5a9   : > { %v1254_v46 = vsel %vm570_vm1, %v1253_v45, 0.0 }
 0x5aa   : > { %1255 = vadd.xlane.f32.xlu1 %v1254_v46 }
 0x637   : > { %v1256_v47 = vpop.xlane.xlu1 %1255 }
 0x638   : > { %v1257_v48 = vmul.f32 0.03125, %v1256_v47 }
 0x63a   : > { %v1258_v49 = vadd.f32 1e-05, %v1257_v48 }
 0x63c   : > { %1539 = vrsqrt.f32 %v1258_v49 }
 0x646   : > { %v1540_v50 = vpop.eup %1539 }
 0x647   : > { %v1260_v51 = vmul.f32 %v1540_v50, %v1252_v44 }
 0x649   : > { %v1267_v53 = vmul.f32 %v1393_v17, %v1260_v51 }
 0x64b   : > { %v1274_v54 = vadd.f32 %v1394_v52, %v1267_v53 }
 0x64d   : > { %1275 = vst.msk [vmem:[%s546_s23] sm:$0xff] %vm570_vm1, %v1274_v54 }
 0x64e PF: > { %s25_s18 = sadd.s32 1, %s1547_s18  }
 0x64f   : > { %p22_p4 = scmp.ge.s32.totalorder %s25_s18, 4  }
 0x651   :  { %24 = sbr.rel (!%p22_p4) target bundleno = 1 (0x1), region = 119 }

// kernel: _lambda_.32
= control target key start
LH: loop header
LB: loop body
LE: loop exit
PB: predicated region body
PF: predicated region fallthrough
CT: control target
= control target key end

     0   :  { %s1907_s18 = smov 0   ;;  %s2219_s0 = inlined_call_operand.vmem [shape: f32[2,8,32], index: 0, kind: input, shape index: {}]   ;;  %s2220_s1 = inlined_call_operand.vmem [shape: f32[8,32], index: 1, kind: input, shape index: {}]   ;;  %s2221_s2 = inlined_call_operand.vmem [shape: f32[2,64,32], index: 2, kind: input, shape index: {}]   ;;  %s2222_s3 = inlined_call_operand.vmem [shape: f32[2,64,32], index: 3, kind: input, shape index: {}]   ;;  %s2223_s4 = inlined_call_operand.vmem [shape: f32[2,8,64], index: 4, kind: input, shape index: {}]   ;;  %s2224_s5 = inlined_call_operand.vmem [shape: f32[32,32], index: 5, kind: input, shape index: {}]   ;;  %s2225_s6 = inlined_call_operand.vmem [shape: f32[1,32], index: 6, kind: input, shape index: {}]   ;;  %s2226_s7 = inlined_call_operand.vmem [shape: f32[32,32], index: 7, kind: input, shape index: {}]   ;;  %s2227_s8 = inlined_call_operand.vmem [shape: f32[1,32], index: 8, kind: input, shape index: {}]   ;;  %s2228_s9 = inlined_call_operand.vmem [shape: f32[32,32], index: 9, kind: input, shape index: {}]   ;;  %s2229_s10 = inlined_call_operand.vmem [shape: f32[1,32], index: 10, kind: input, shape index: {}]   ;;  %s2230_s11 = inlined_call_operand.vmem [shape: f32[32,32], index: 11, kind: input, shape index: {}]   ;;  %s2231_s12 = inlined_call_operand.vmem [shape: f32[1,32], index: 12, kind: input, shape index: {}]   ;;  %s2232_s13 = inlined_call_operand.vmem [shape: f32[1,32], index: 13, kind: input, shape index: {}]   ;;  %s2233_s14 = inlined_call_operand.vmem [shape: f32[1,32], index: 14, kind: input, shape index: {}]   ;;  %s2234_s15 = inlined_call_operand.vmem [shape: f32[2,8,32], index: 15, kind: output, shape index: {}]  }
   0x1 LB: > { %s1543_s19 = sadd.s32 4294967295, %s1817_s18   ;;  %p1547_p0 = scmp.ge.s32.totalorder %s1817_s18, 1  ;;  %s1817_s18 = sphi %s1907_s18, %s25_s18  }
   0x2   : > { %p465_p1 = scmp.lt.s32.totalorder %s1817_s18, 3 }
   0x4   : > { %p466_p2 = pnand %p1547_p0, %p465_p1 }
   0x5   : > { %v626_v0 = vld [vmem:[%s2226_s7] sm:$0xff] (!%p466_p2)  ;;  %v627_v1 = vld [vmem:[%s2226_s7 + $0x8] sm:$0xff] (!%p466_p2)  ;;  %v628_v2 = vld [vmem:[%s2226_s7 + $0x10] sm:$0xff] (!%p466_p2)  ;;  %p525_p3 = scmp.lt.s32.totalorder (!%p466_p2), %s1543_s19, 1  ;;  %v1819_v5 = vmov (!%p466_p2), 0.0   ;;  %vm1820_vm0 = vmmov (!%p466_p2), 0  }
   0x6   : > { %469 = sbr.rel (%p466_p2) target bundleno = 2733 (0xaad), region = 80  ;;  %v634_v3 = vpack.c.bf16 (!%p466_p2), %v627_v1, %v626_v0  ;;  %v629_v4 = vld [vmem:[%s2226_s7 + $0x18] sm:$0xff] (!%p466_p2)  ;;  %1641 = vmatprep.subr.bf16.mxu0 (!%p466_p2), %v1819_v5  ;;  %v568_v6 = vld [vmem:[%s2224_s5] sm:$0xff] (!%p466_p2)  ;;  %v569_v7 = vld [vmem:[%s2224_s5 + $0x8] sm:$0xff] (!%p466_p2)  ;;  %1645 = vmatprep.mubr.msk.bf16.mxu0 (!%p466_p2), %vm1820_vm0, %v1819_v5  ;;  %vm582_vm1 = vcmask (!%p466_p2), 261120   ;;  %vm819_vm2 = vcmask (!%p466_p2), 64512  }
   0x7   : > { %v635_v8 = vpack.c.bf16 (!%p466_p2), %v629_v4, %v628_v2  ;;  %v573_v9 = vpack.c.bf16 (!%p466_p2), %v569_v7, %v568_v6  ;;  %v570_v10 = vld [vmem:[%s2224_s5 + $0x10] sm:$0xff] (!%p466_p2)  ;;  %v571_v11 = vld [vmem:[%s2224_s5 + $0x18] sm:$0xff] (!%p466_p2)  ;;  %v549_v13 = vld [vmem:[%s2220_s1] sm:$0xff] (!%p466_p2)  ;;  %s1821_s20 = smov (!%p466_p2), 120   ;;  %vm877_vm3 = vcmask (!%p466_p2), 523264   ;;  %s1822_s30 = smov (!%p466_p2), 112  }
   0x8   : > { %1649 = vmatprep.subr.bf16.mxu1 (!%p466_p2), %v634_v3  ;;  %v574_v12 = vpack.c.bf16 (!%p466_p2), %v571_v11, %v570_v10  ;;  %v720_v29 = vld [vmem:[%s2228_s9] sm:$0xff] (!%p466_p2)  ;;  %v721_v30 = vld [vmem:[%s2228_s9 + $0x8] sm:$0xff] (!%p466_p2)  ;;  %v722_v31 = vld [vmem:[%s2228_s9 + $0x10] sm:$0xff] (!%p466_p2)  ;;  %s1823_s16 = smov (!%p466_p2), 104   ;;  %vm1361_vm4 = vcmask (!%p466_p2), 130048   ;;  %vm1363_vm5 = vcmask (!%p466_p2), 195584  }
   0x9   : > { %1650 = vmatpush3.bf16.msra.mxu1 (!%p466_p2), %v634_v3  ;;  %1642 = vmatpush3.bf16.msra.mxu0 (!%p466_p2), %v573_v9  ;;  %v728_v32 = vpack.c.bf16 (!%p466_p2), %v721_v30, %v720_v29  ;;  %v723_v33 = vld [vmem:[%s2228_s9 + $0x18] sm:$0xff] (!%p466_p2)  ;;  %v1557_v48 = vld [vmem:[%s2227_s8] ss:$0 sm:$0xff] (!%p466_p2) }
   0xa   : > { %1651 = vmatprep.subr.bf16.mxu1 (!%p466_p2), %v635_v8  ;;  %1643 = vmatprep.subr.bf16.mxu0 (!%p466_p2), %v1819_v5  ;;  %v729_v36 = vpack.c.bf16 (!%p466_p2), %v723_v33, %v722_v31  ;;  %v1555_v9 = vld [vmem:[%s2225_s6] ss:$0 sm:$0xff] (!%p466_p2) }
   0xd   : > { %s2236_s19 = smov (!%p525_p3, %s1543_s19), 1  ;;  %1652 = vmatpush3.bf16.msra.mxu1 %v635_v8  ;;  %1644 = vmatpush3.bf16.msra.mxu0 %v574_v12 }
   0xe   : > { %s1581_s23 = sshll.u32 %s2236_s19, 6  ;;  %s1946_s24 = sshll.u32 %s2236_s19, 3  ;;  %1673 = vmatprep.subr.bf16.mxu1 %v1819_v5  ;;  %1661 = vmatprep.subr.bf16.mxu0 %v728_v32 }
   0xf   : > { %s533_s27 = scalar_lea.vmem %s2221_s2, %s1581_s23  ;;  %s528_s17 = scalar_lea.vmem %s2219_s0, %s1946_s24 }
  0x10   : > { %v551_v14 = vld [vmem:[%s533_s27] sm:$0xff]  ;;  %v552_v15 = vld [vmem:[%s533_s27 + $0x8] sm:$0xff]  ;;  %v553_v16 = vld [vmem:[%s533_s27 + $0x10] sm:$0xff]  ;;  %s538_s22 = scalar_lea.vmem %s2222_s3, %s1581_s23  ;;  %s1825_s19 = smov 8  }
  0x11   : > { %v630_v17 = vpack.c.bf16 %v552_v15, %v551_v14  ;;  %v554_v18 = vld [vmem:[%s533_s27 + $0x18] sm:$0xff]  ;;  %v555_v19 = vld [vmem:[%s533_s27 + $0x20] sm:$0xff]  ;;  %v556_v20 = vld [vmem:[%s533_s27 + $0x28] sm:$0xff]  ;;  %s546_s25 = scalar_lea.vmem %s2234_s15, %s1946_s24 }
  0x12   : > { %v631_v21 = vpack.c.bf16 %v554_v18, %v553_v16  ;;  %v632_v22 = vpack.c.bf16 %v556_v20, %v555_v19  ;;  %v1961_v23 = vld [vmem:[%s528_s17] sm:$0xff]  ;;  %v557_v26 = vld [vmem:[%s533_s27 + $0x30] sm:$0xff]  ;;  %v558_v27 = vld [vmem:[%s533_s27 + $0x38] sm:$0xff]  ;;  %s542_s27 = scalar_lea.vmem %s2223_s4, %s1946_s24  ;;  %s1824_s17 = smov 16  }
  0x13   : > { %1653 = vmatprep.mubr.msk.bf16.mxu1 %vm582_vm1, %v630_v17  ;;  %v550_v24 = vadd.f32 %v549_v13, %v1961_v23  ;;  %v633_v28 = vpack.c.bf16 %v558_v27, %v557_v26  ;;  %v559_v34 = vld [vmem:[%s538_s22] sm:$0xff]  ;;  %v560_v35 = vld [vmem:[%s538_s22 + $0x8] sm:$0xff]  ;;  %v561_v38 = vld [vmem:[%s538_s22 + $0x10] sm:$0xff] }
  0x14   : > { %1654 = vmatmul.mubr.msk.bf16.vlgmr.msra.gmra.mrb[0].mxu1 %vm582_vm1, %v631_v21  ;;  %v724_v37 = vpack.c.bf16 %v560_v35, %v559_v34  ;;  %v562_v39 = vld [vmem:[%s538_s22 + $0x18] sm:$0xff]  ;;  %v563_v40 = vld [vmem:[%s538_s22 + $0x20] sm:$0xff]  ;;  %v564_v41 = vld [vmem:[%s538_s22 + $0x28] sm:$0xff] }
  0x15   : > { %v572_v25 = vpack.c.bf16 %v550_v24, %v550_v24  ;;  %1657 = vmatprep.mubr.msk.bf16.mxu1 %vm582_vm1, %v632_v22  ;;  %v725_v42 = vpack.c.bf16 %v562_v39, %v561_v38  ;;  %v726_v43 = vpack.c.bf16 %v564_v41, %v563_v40  ;;  %v565_v44 = vld [vmem:[%s538_s22 + $0x30] sm:$0xff]  ;;  %v566_v45 = vld [vmem:[%s538_s22 + $0x38] sm:$0xff]  ;;  %v1562_v16 = vld [vmem:[%s2229_s10] ss:$0 sm:$0xff] }
  0x16   : > { %v727_v46 = vpack.c.bf16 %v566_v45, %v565_v44  ;;  %v2059_v39 = vld [vmem:[%s542_s27] sm:$0xff]  ;;  %s1826_s27 = smov 24  }
  0x17   : > { %1646 = vmatmul.mubr.msk.bf16.vlgmr.msra.gmra.mrb[0].mxu0 %vm582_vm1, %v572_v25 }
  0x18   : > { %1662 = vmatpush3.bf16.msra.mxu0 %v728_v32  ;;  %1665 = vmatprep.mubr.msk.bf16.mxu0 %vm582_vm1, %v724_v37 }
  0x19   : > { %1663 = vmatprep.subr.bf16.mxu0 %v729_v36 }
  0x1c   : > { %1658 = vmatmul.mubr.msk.bf16.gmra.mrb[4].mxu1 %vm582_vm1, %v633_v28  ;;  %1664 = vmatpush3.bf16.msra.mxu0 %v729_v36 }
  0x1d   : > { %1681 = vmatprep.mubr.msk.bf16.mxu1 %vm1820_vm0, %v1819_v5  ;;  %1685 = vmatprep.subr.bf16.mxu0 %v1819_v5 }
  0x1f   : > { %1666 = vmatmul.mubr.msk.bf16.vlgmr.msra.gmra.mrb[4].mxu0 %vm582_vm1, %v725_v42 }
  0x20   : > { %1669 = vmatprep.mubr.msk.bf16.mxu0 %vm582_vm1, %v726_v43 }
  0x27   : > { %1670 = vmatmul.mubr.msk.bf16.gmra.mrb[8].mxu0 %vm582_vm1, %v727_v46 }
  0x28   : > { %1693 = vmatprep.mubr.msk.bf16.mxu0 %vm1820_vm0, %v1819_v5 }
  0xe7   : > { %v1655_v47 = vpop.f32.mrb[0].mxu1 }
  0xe8   : > { %v689_v49 = vpop.f32.mrb[1].mxu1  ;;  %v698_v52 = vadd.f32 %v1655_v47, %v1557_v48 }
  0xe9   : > { %v1656_v50 = vpop.f32.mrb[2].mxu1  ;;  %v690_v56 = vadd.f32 %v1557_v48, %v689_v49 }
  0xea   : > { %v620_v51 = vpop.f32.mrb[0].mxu0  ;;  %v701_v53 = vadd.f32 %v1656_v50, %v1557_v48  ;;  %v692_v54 = vpop.f32.mrb[3].mxu1 }
  0xeb   : > { %v1647_v55 = vpop.f32.mrb[1].mxu0  ;;  %v693_v57 = vadd.f32 %v1557_v48, %v692_v54  ;;  %v621_v12 = vadd.f32 %v1555_v9, %v620_v51 }
  0xec   : > { %v623_v58 = vpop.f32.mrb[2].mxu0  ;;  %v1999_v59 = vpack.c.bf16 %v701_v53, %v698_v52 }
  0xed   : > { %v1648_v60 = vpop.f32.mrb[3].mxu0  ;;  %v2001_v61 = vpack.c.bf16 %v693_v57, %v690_v56  ;;  %v2022_v13 = vpack.c.bf16 %v621_v12, %v621_v12 }
  0xee   : > { %946 = vrot.lane.b32.xlu1 %v1999_v59, %s1821_s20  ;;  %v827_v11 = vsel %vm819_vm2, %v1999_v59, 0 }
  0xef   : > { %v1659_v62 = vpop.f32.mrb[4].mxu1  ;;  %v824_v63 = vsel %vm819_vm2, %v2001_v61, 0 }
  0xf0   : > { %v714_v0 = vadd.f32 %v1659_v62, %v1557_v48  ;;  %1674 = vmatpush3.bf16.xpose.msra.mxu1 %v824_v63  ;;  %v705_v1 = vpop.f32.mrb[5].mxu1 }
  0xf1   : > { %v706_v2 = vadd.f32 %v1557_v48, %v705_v1  ;;  %v1660_v3 = vpop.f32.mrb[6].mxu1  ;;  %1675 = vmatprep.subr.bf16.mxu1 %v1819_v5 }
  0xf2   : > { %v717_v4 = vadd.f32 %v1660_v3, %v1557_v48  ;;  %v708_v6 = vpop.f32.mrb[7].mxu1  ;;  %v1667_v17 = vpop.f32.mrb[4].mxu0 }
  0xf3   : > { %v709_v7 = vadd.f32 %v1557_v48, %v708_v6  ;;  %v792_v18 = vadd.f32 %v1667_v17, %v1562_v16  ;;  %v783_v19 = vpop.f32.mrb[5].mxu0 }
  0xf4   : > { %v2008_v8 = vpack.c.bf16 %v717_v4, %v714_v0  ;;  %v784_v20 = vadd.f32 %v1562_v16, %v783_v19  ;;  %v1668_v21 = vpop.f32.mrb[6].mxu0 }
  0xf5   : > { %v2013_v10 = vpack.c.bf16 %v709_v7, %v706_v2  ;;  %v795_v22 = vadd.f32 %v1668_v21, %v1562_v16  ;;  %v786_v24 = vpop.f32.mrb[7].mxu0 }
  0xf6   : > { %v833_v15 = vsel %vm819_vm2, %v2008_v8, 0  ;;  %v787_v25 = vadd.f32 %v1562_v16, %v786_v24 }
  0xf7   : > { %948 = vrot.lane.b32.xlu1 %v2013_v10, %s1821_s20  ;;  %v830_v14 = vsel %vm819_vm2, %v2013_v10, 0  ;;  %v2039_v26 = vpack.c.bf16 %v795_v22, %v792_v18 }
  0xf8   : > { %1676 = vmatpush3.bf16.xpose.msra.mxu1 %v827_v11  ;;  %v2041_v27 = vpack.c.bf16 %v787_v25, %v784_v20 }
  0xf9   : > { %1677 = vmatprep.subr.bf16.mxu1 %v1819_v5 }
  0xfa   : > { %1686 = vmatpush3.bf16.msra.mxu0 %v2041_v27  ;;  %v1671_v28 = vpop.f32.mrb[8].mxu0 }
  0xfb   : > { %950 = vrot.lane.b32.xlu1 %v2008_v8, %s1821_s20  ;;  %1687 = vmatprep.subr.bf16.mxu0 %v1819_v5  ;;  %v808_v29 = vadd.f32 %v1671_v28, %v1562_v16  ;;  %v799_v30 = vpop.f32.mrb[9].mxu0 }
  0xfc   : > { %v800_v31 = vadd.f32 %v1562_v16, %v799_v30  ;;  %v1672_v32 = vpop.f32.mrb[10].mxu0 }
  0xfd   : > { %v811_v33 = vadd.f32 %v1672_v32, %v1562_v16  ;;  %v802_v34 = vpop.f32.mrb[11].mxu0 }
  0xfe   : > { %1688 = vmatpush3.bf16.msra.mxu0 %v2039_v26  ;;  %v803_v35 = vadd.f32 %v1562_v16, %v802_v34 }
  0xff   : > { %938 = vrot.lane.b32.xlu1 %v2022_v13, %s1821_s20  ;;  %1689 = vmatprep.subr.bf16.mxu0 %v1819_v5  ;;  %v2047_v36 = vpack.c.bf16 %v811_v33, %v808_v29 }
 0x100   : > { %1678 = vmatpush3.bf16.xpose.msra.mxu1 %v830_v14  ;;  %v2049_v37 = vpack.c.bf16 %v803_v35, %v800_v31 }
 0x101   : > { %1679 = vmatprep.subr.bf16.mxu1 %v1819_v5 }
 0x102   : > { %1690 = vmatpush3.bf16.msra.mxu0 %v2049_v37 }
 0x103   : > { %1691 = vmatprep.subr.bf16.mxu0 %v1819_v5 }
 0x106   : > { %1692 = vmatpush3.bf16.msra.mxu0 %v2047_v36 }
 0x107   : > { %1697 = vmatprep.subr.bf16.mxu0 %v1819_v5 }
 0x108   : > { %1680 = vmatpush3.bf16.xpose.msra.mxu1 %v833_v15 }
 0x109   : > { %1709 = vmatprep.subr.bf16.mxu1 %v1819_v5 }
 0x10f   : > { %1682 = vmatmul.mubr.msk.bf16.vlgmr.msra.gmra.mrb[8].mxu1 %vm819_vm2, %v2022_v13 }
 0x110   : > { %1717 = vmatprep.mubr.msk.bf16.mxu1 %vm1820_vm0, %v1819_v5 }
 0x160   : > { %v947_v57 = vpop.permute.xlu1 %946 }
 0x161   : > { %v959_v58 = vsel %vm819_vm2, %v947_v57, 0 }
 0x169   : > { %v949_v60 = vpop.permute.xlu1 %948 }
 0x16a   : > { %v962_v62 = vsel %vm819_vm2, %v949_v60, 0 }
 0x16d   : > { %v951_v63 = vpop.permute.xlu1 %950 }
 0x16e   : > { %v965_v0 = vsel %vm819_vm2, %v951_v63, 0 }
 0x171   : > { %v939_v1 = vpop.permute.xlu1 %938 }
 0x1e2   : > { %v869_v38 = vpop.f32.mrb[8].mxu1 }
 0x1e3   : > { %v875_v40 = vmul.f32 0.35355338, %v869_v38  ;;  %v1683_v41 = vpop.f32.mrb[9].mxu1 }
 0x1e4   : > { %v872_v42 = vpop.f32.mrb[10].mxu1 }
 0x1e5   : > { %v1684_v43 = vpop.f32.mrb[11].mxu1  ;;  %v876_v44 = vadd.f32 %v875_v40, %v2059_v39 }
 0x1e7   : > { %v878_v45 = vsel %vm877_vm3, %v876_v44, -inf }
 0x1e8   : > { %879 = vmax.xlane.f32.xlu0 %v878_v45 }
 0x1fe   : > { %944 = vrot.lane.b32.xlu0 %v2001_v61, %s1821_s20 }
 0x202   : > { %1024 = vrot.lane.b32.xlu0 %v2041_v27, %s1821_s20 }
 0x206   : > { %1026 = vrot.lane.b32.xlu0 %v2039_v26, %s1821_s20 }
 0x20a   : > { %1028 = vrot.lane.b32.xlu0 %v2049_v37, %s1821_s20 }
 0x20e   : > { %1030 = vrot.lane.b32.xlu0 %v2047_v36, %s1821_s20 }
 0x212   : > { %1082 = vrot.lane.b32.xlu0 %v2001_v61, %s1822_s30 }
 0x216   : > { %1084 = vrot.lane.b32.xlu0 %v1999_v59, %s1822_s30 }
 0x21a   : > { %1086 = vrot.lane.b32.xlu0 %v2013_v10, %s1822_s30 }
 0x21e   : > { %1080 = vrot.lane.b32.xlu0 %v2022_v13, %s1822_s30 }
 0x275   : > { %v880_v46 = vpop.xlane.xlu0 %879 }
 0x276   : > { %v881_v47 = vsub.f32 %v876_v44, %v880_v46 }
 0x278   : > { %v882_v48 = vmul.f32 1.442695, %v881_v47 }
 0x279   : > { %v945_v49 = vpop.permute.xlu0 %944 }
 0x27a   : > { %1793 = vpow2.f32 %v882_v48  ;;  %v956_v55 = vsel %vm819_vm2, %v945_v49, 0 }
 0x27d   : > { %v1025_v50 = vpop.permute.xlu0 %1024 }
 0x27e   : > { %1710 = vmatpush3.bf16.msra.mxu1 %v1025_v50 }
 0x27f   : > { %1711 = vmatprep.subr.bf16.mxu1 %v1819_v5 }
 0x281   : > { %v1027_v51 = vpop.permute.xlu0 %1026 }
 0x282   : > { %1712 = vmatpush3.bf16.msra.mxu1 %v1027_v51 }
 0x283   : > { %1713 = vmatprep.subr.bf16.mxu1 %v1819_v5 }
 0x284   : > { %v2083_v52 = vpop.eup %1793 }
 0x285   : > { %v888_v53 = vpack.c.bf16 %v2083_v52, %v2083_v52  ;;  %v1029_v54 = vpop.permute.xlu0 %1028 }
 0x286   : > { %1714 = vmatpush3.bf16.msra.mxu1 %v1029_v54 }
 0x287   : > { %1694 = vmatmul.mubr.msk.bf16.vlgmr.msra.gmra.mrb[12].mxu0 %vm877_vm3, %v888_v53  ;;  %1715 = vmatprep.subr.bf16.mxu1 %v1819_v5 }
 0x288   : > { %1698 = vmatpush3.bf16.xpose.msra.mxu0 %v956_v55  ;;  %1705 = vmatprep.mubr.msk.bf16.mxu0 %vm1820_vm0, %v1819_v5 }
 0x289   : > { %v1031_v56 = vpop.permute.xlu0 %1030  ;;  %1699 = vmatprep.subr.bf16.mxu0 %v1819_v5 }
 0x28a   : > { %1716 = vmatpush3.bf16.msra.mxu1 %v1031_v56 }
 0x28b   : > { %1721 = vmatprep.subr.bf16.mxu1 %v1819_v5 }
 0x290   : > { %1700 = vmatpush3.bf16.xpose.msra.mxu0 %v959_v58 }
 0x291   : > { %1701 = vmatprep.subr.bf16.mxu0 %v1819_v5 }
 0x298   : > { %1702 = vmatpush3.bf16.xpose.msra.mxu0 %v962_v62 }
 0x299   : > { %1703 = vmatprep.subr.bf16.mxu0 %v1819_v5 }
 0x2a0   : > { %1704 = vmatpush3.bf16.xpose.msra.mxu0 %v965_v0 }
 0x2a1   : > { %1733 = vmatprep.subr.bf16.mxu0 %v1819_v5 }
 0x2a7   : > { %1706 = vmatmul.mubr.msk.bf16.vlgmr.msra.gmra.mrb[16].mxu0 %vm819_vm2, %v939_v1 }
 0x2a8   : > { %1741 = vmatprep.mubr.msk.bf16.mxu0 %vm1820_vm0, %v1819_v5 }
 0x35a   : > { %v2103_v2 = vpop.f32.mrb[12].mxu0 }
 0x35b   : > { %v1695_v3 = vpop.f32.mrb[13].mxu0 }
 0x35c   : > { %v933_v4 = vpop.f32.mrb[14].mxu0 }
 0x35d   : > { %v1696_v6 = vpop.f32.mrb[15].mxu0 }
 0x37a   : > { %v1001_v7 = vpop.f32.mrb[16].mxu0 }
 0x37b   : > { %v1007_v9 = vmul.f32 0.35355338, %v1001_v7  ;;  %v1707_v11 = vpop.f32.mrb[17].mxu0 }
 0x37c   : > { %v1004_v12 = vpop.f32.mrb[18].mxu0 }
 0x37d   : > { %v1708_v14 = vpop.f32.mrb[19].mxu0  ;;  %v1008_v15 = vadd.f32 %v1007_v9, %v2059_v39 }
 0x37f   : > { %v1009_v16 = vsel %vm877_vm3, %v1008_v15, -inf }
 0x380   : > { %1010 = vmax.xlane.f32.xlu1 %v1009_v16 }
 0x391   : > { %1088 = vrot.lane.b32.xlu1 %v2008_v8, %s1822_s30 }
 0x395   : > { %1158 = vrot.lane.b32.xlu1 %v2041_v27, %s1822_s30 }
 0x399   : > { %1160 = vrot.lane.b32.xlu1 %v2039_v26, %s1822_s30 }
 0x39d   : > { %1162 = vrot.lane.b32.xlu1 %v2049_v37, %s1822_s30 }
 0x3a1   : > { %1164 = vrot.lane.b32.xlu1 %v2047_v36, %s1822_s30 }
 0x3a5   : > { %1216 = vrot.lane.b32.xlu1 %v2001_v61, %s1823_s16 }
 0x3a9   : > { %1220 = vrot.lane.b32.xlu1 %v2013_v10, %s1823_s16  ;;  %v1083_v10 = vpop.permute.xlu0 %1082 }
 0x3ad   : > { %1222 = vrot.lane.b32.xlu1 %v2008_v8, %s1823_s16  ;;  %v1085_v28 = vpop.permute.xlu0 %1084 }
 0x3ae   : > { %v1097_v29 = vsel %vm819_vm2, %v1085_v28, 0 }
 0x3b1   : > { %1214 = vrot.lane.b32.xlu1 %v2022_v13, %s1823_s16  ;;  %v1094_v13 = vsel %vm819_vm2, %v1083_v10, 0  ;;  %v1087_v30 = vpop.permute.xlu0 %1086 }
 0x3b2   : > { %v1100_v31 = vsel %vm819_vm2, %v1087_v30, 0  ;;  %v1366_v30 = vld [vmem:[%s2230_s11 + $0x8] sm:$0xff] }
 0x3b5   : > { %v1081_v33 = vpop.permute.xlu0 %1080 }
 0x40d   : > { %v1011_v17 = vpop.xlane.xlu1 %1010 }
 0x40e   : > { %v1012_v18 = vsub.f32 %v1008_v15, %v1011_v17 }
 0x410   : > { %v1013_v19 = vmul.f32 1.442695, %v1012_v18 }
 0x411   : > { %v1089_v20 = vpop.permute.xlu1 %1088 }
 0x412   : > { %1795 = vpow2.f32 %v1013_v19  ;;  %v1103_v32 = vsel %vm819_vm2, %v1089_v20, 0 }
 0x415   : > { %v1159_v21 = vpop.permute.xlu1 %1158 }
 0x416   : > { %1734 = vmatpush3.bf16.msra.mxu0 %v1159_v21 }
 0x417   : > { %1735 = vmatprep.subr.bf16.mxu0 %v1819_v5 }
 0x419   : > { %v1161_v22 = vpop.permute.xlu1 %1160 }
 0x41a   : > { %1736 = vmatpush3.bf16.msra.mxu0 %v1161_v22 }
 0x41b   : > { %1737 = vmatprep.subr.bf16.mxu0 %v1819_v5 }
 0x41c   : > { %v1796_v61 = vpop.eup %1795 }
 0x41d   : > { %v1163_v24 = vpop.permute.xlu1 %1162  ;;  %v1019_v8 = vpack.c.bf16 %v1796_v61, %v1796_v61  ;;  %v1015_v48 = vsel %vm877_vm3, %v1796_v61, 0.0 }
 0x41e   : > { %1738 = vmatpush3.bf16.msra.mxu0 %v1163_v24 }
 0x41f   : > { %1718 = vmatmul.mubr.msk.bf16.vlgmr.msra.gmra.mrb[12].mxu1 %vm877_vm3, %v1019_v8  ;;  %1739 = vmatprep.subr.bf16.mxu0 %v1819_v5 }
 0x420   : > { %1722 = vmatpush3.bf16.xpose.msra.mxu1 %v1094_v13  ;;  %1729 = vmatprep.mubr.msk.bf16.mxu1 %vm1820_vm0, %v1819_v5  ;;  %v884_v13 = vsel %vm877_vm3, %v2083_v52, 0.0 }
 0x421   : > { %v1165_v25 = vpop.permute.xlu1 %1164  ;;  %1723 = vmatprep.subr.bf16.mxu1 %v1819_v5 }
 0x422   : > { %1740 = vmatpush3.bf16.msra.mxu0 %v1165_v25 }
 0x423   : > { %1745 = vmatprep.subr.bf16.mxu0 %v1819_v5 }
 0x428   : > { %1724 = vmatpush3.bf16.xpose.msra.mxu1 %v1097_v29  ;;  %v1365_v29 = vld [vmem:[%s2230_s11] sm:$0xff] }
 0x429   : > { %1725 = vmatprep.subr.bf16.mxu1 %v1819_v5  ;;  %v1370_v52 = vpack.c.bf16 %v1366_v30, %v1365_v29 }
 0x430   : > { %1726 = vmatpush3.bf16.xpose.msra.mxu1 %v1100_v31  ;;  %v1367_v31 = vld [vmem:[%s2230_s11 + $0x10] sm:$0xff] }
 0x431   : > { %1727 = vmatprep.subr.bf16.mxu1 %v1819_v5 }
 0x438   : > { %1728 = vmatpush3.bf16.xpose.msra.mxu1 %v1103_v32  ;;  %v1368_v32 = vld [vmem:[%s2230_s11 + $0x18] sm:$0xff] }
 0x439   : > { %1757 = vmatprep.subr.bf16.mxu1 %v1819_v5 }
 0x43f   : > { %1730 = vmatmul.mubr.msk.bf16.vlgmr.msra.gmra.mrb[16].mxu1 %vm819_vm2, %v1081_v33  ;;  %v1371_v33 = vpack.c.bf16 %v1368_v32, %v1367_v31 }
 0x440   : > { %1765 = vmatprep.mubr.msk.bf16.mxu1 %vm1820_vm0, %v1819_v5 }
 0x4f2   : > { %v2143_v34 = vpop.f32.mrb[12].mxu1 }
 0x4f3   : > { %v1719_v35 = vpop.f32.mrb[13].mxu1 }
 0x4f4   : > { %v1076_v38 = vpop.f32.mrb[14].mxu1 }
 0x4f5   : > { %v1720_v40 = vpop.f32.mrb[15].mxu1 }
 0x512   : > { %v1139_v41 = vpop.f32.mrb[16].mxu1 }
 0x513   : > { %v1145_v42 = vmul.f32 0.35355338, %v1139_v41  ;;  %v1731_v43 = vpop.f32.mrb[17].mxu1 }
 0x514   : > { %v1142_v44 = vpop.f32.mrb[18].mxu1 }
 0x515   : > { %v1732_v45 = vpop.f32.mrb[19].mxu1  ;;  %v1146_v46 = vadd.f32 %v1145_v42, %v2059_v39 }
 0x517   : > { %v1147_v47 = vsel %vm877_vm3, %v1146_v46, -inf }
 0x518   : > { %1148 = vmax.xlane.f32.xlu0 %v1147_v47 }
 0x52e   : > { %1218 = vrot.lane.b32.xlu0 %v1999_v59, %s1823_s16 }
 0x532   : > { %1292 = vrot.lane.b32.xlu0 %v2041_v27, %s1823_s16 }
 0x536   : > { %1294 = vrot.lane.b32.xlu0 %v2039_v26, %s1823_s16 }
 0x53a   : > { %1296 = vrot.lane.b32.xlu0 %v2049_v37, %s1823_s16  ;;  %v1217_v37 = vpop.permute.xlu1 %1216 }
 0x53b   : > { %v1228_v55 = vsel %vm819_vm2, %v1217_v37, 0 }
 0x53e   : > { %1298 = vrot.lane.b32.xlu0 %v2047_v36, %s1823_s16  ;;  %v1221_v58 = vpop.permute.xlu1 %1220 }
 0x53f   : > { %v1234_v60 = vsel %vm819_vm2, %v1221_v58, 0 }
 0x542   : > { %v1223_v62 = vpop.permute.xlu1 %1222 }
 0x543   : > { %v1237_v63 = vsel %vm819_vm2, %v1223_v62, 0 }
 0x546   : > { %v1215_v0 = vpop.permute.xlu1 %1214 }
 0x55d   : > { %1016 = vadd.xlane.f32.xlu0 %v1015_v48 }
 0x5a5   : > { %v1149_v49 = vpop.xlane.xlu0 %1148 }
 0x5a6   : > { %v1150_v50 = vsub.f32 %v1146_v46, %v1149_v49 }
 0x5a8   : > { %v1151_v51 = vmul.f32 1.442695, %v1150_v50 }
 0x5a9   : > { %v1219_v53 = vpop.permute.xlu0 %1218 }
 0x5aa   : > { %1797 = vpow2.f32 %v1151_v51  ;;  %v1231_v57 = vsel %vm819_vm2, %v1219_v53, 0 }
 0x5ad   : > { %v1293_v59 = vpop.permute.xlu0 %1292 }
 0x5ae   : > { %1758 = vmatpush3.bf16.msra.mxu1 %v1293_v59  ;;  %v1575_v59 = vld [vmem:[%s2231_s12] ss:$0 sm:$0xff] }
 0x5af   : > { %1759 = vmatprep.subr.bf16.mxu1 %v1819_v5 }
 0x5b1   : > { %v1295_v27 = vpop.permute.xlu0 %1294 }
 0x5b2   : > { %1760 = vmatpush3.bf16.msra.mxu1 %v1295_v27 }
 0x5b3   : > { %1761 = vmatprep.subr.bf16.mxu1 %v1819_v5 }
 0x5b4   : > { %v1798_v26 = vpop.eup %1797 }
 0x5b5   : > { %v1297_v54 = vpop.permute.xlu0 %1296  ;;  %v1157_v36 = vpack.c.bf16 %v1798_v26, %v1798_v26  ;;  %v1153_v17 = vsel %vm877_vm3, %v1798_v26, 0.0 }
 0x5b6   : > { %1762 = vmatpush3.bf16.msra.mxu1 %v1297_v54 }
 0x5b7   : > { %1742 = vmatmul.mubr.msk.bf16.vlgmr.msra.gmra.mrb[20].mxu0 %vm877_vm3, %v1157_v36  ;;  %1763 = vmatprep.subr.bf16.mxu1 %v1819_v5 }
 0x5b8   : > { %1746 = vmatpush3.bf16.xpose.msra.mxu0 %v1228_v55  ;;  %1753 = vmatprep.mubr.msk.bf16.mxu0 %vm1820_vm0, %v1819_v5 }
 0x5b9   : > { %v1299_v56 = vpop.permute.xlu0 %1298  ;;  %1747 = vmatprep.subr.bf16.mxu0 %v1819_v5 }
 0x5ba   : > { %1764 = vmatpush3.bf16.msra.mxu1 %v1299_v56 }
 0x5bb   : > { %1769 = vmatprep.subr.bf16.mxu1 %v1819_v5 }
 0x5c0   : > { %1748 = vmatpush3.bf16.xpose.msra.mxu0 %v1231_v57 }
 0x5c1   : > { %1749 = vmatprep.subr.bf16.mxu0 %v1819_v5 }
 0x5c8   : > { %1750 = vmatpush3.bf16.xpose.msra.mxu0 %v1234_v60 }
 0x5c9   : > { %1751 = vmatprep.subr.bf16.mxu0 %v1819_v5 }
 0x5d0   : > { %1752 = vmatpush3.bf16.xpose.msra.mxu0 %v1237_v63 }
 0x5d7   : > { %1754 = vmatmul.mubr.msk.bf16.vlgmr.msra.gmra.mrb[24].mxu0 %vm819_vm2, %v1215_v0 }
 0x68a   : > { %v1207_v1 = vpop.f32.mrb[20].mxu0 }
 0x68b   : > { %v1743_v3 = vpop.f32.mrb[21].mxu0 }
 0x68c   : > { %v1210_v4 = vpop.f32.mrb[22].mxu0 }
 0x68d   : > { %v1744_v6 = vpop.f32.mrb[23].mxu0 }
 0x68e   : > { %v1578_v6 = vld [vmem:[%s2233_s14] ss:$0 sm:$0xff] }
 0x6aa   : > { %v1273_v7 = vpop.f32.mrb[24].mxu0 }
 0x6ab   : > { %v1279_v9 = vmul.f32 0.35355338, %v1273_v7  ;;  %v1755_v11 = vpop.f32.mrb[25].mxu0 }
 0x6ac   : > { %v1276_v12 = vpop.f32.mrb[26].mxu0 }
 0x6ad   : > { %v1756_v14 = vpop.f32.mrb[27].mxu0  ;;  %v1280_v15 = vadd.f32 %v1279_v9, %v2059_v39  ;;  %v1017_v39 = vpop.xlane.xlu0 %1016 }
 0x6af   : > { %v1281_v16 = vsel %vm877_vm3, %v1280_v15, -inf }
 0x6b0   : > { %1282 = vmax.xlane.f32.xlu1 %v1281_v16 }
 0x6b4   : > { %1154 = vadd.xlane.f32.xlu1 %v1153_v17 }
 0x73d   : > { %v1283_v18 = vpop.xlane.xlu1 %1282 }
 0x73e   : > { %v1284_v19 = vsub.f32 %v1280_v15, %v1283_v18 }
 0x740   : > { %v1285_v20 = vmul.f32 1.442695, %v1284_v19 }
 0x741   : > { %v1155_v21 = vpop.xlane.xlu1 %1154 }
 0x742   : > { %1799 = vpow2.f32 %v1285_v20 }
 0x743   : > { %1801 = vrcp.f32 %v1155_v21 }
 0x744   : > { %1803 = vrcp.f32 %v1017_v39 }
 0x74c   : > { %v1800_v22 = vpop.eup %1799 }
 0x74d   : > { %v1802_v61 = vpop.eup %1801  ;;  %v1287_v10 = vsel %vm877_vm3, %v1800_v22, 0.0  ;;  %v1291_v24 = vpack.c.bf16 %v1800_v22, %v1800_v22 }
 0x74e   : > { %1288 = vadd.xlane.f32.xlu1 %v1287_v10  ;;  %v1213_v8 = vmul.f32 %v1802_v61, %v1207_v1  ;;  %v1804_v25 = vpop.eup %1803 }
 0x74f   : > { %1766 = vmatmul.mubr.msk.bf16.vlgmr.msra.gmra.mrb[20].mxu1 %vm877_vm3, %v1291_v24  ;;  %v1079_v28 = vmul.f32 %v1804_v25, %v2143_v34 }
 0x750   : > { %1353 = vrot.lane.b32.xlu0 %v1213_v8, %s1824_s17  ;;  %1773 = vmatprep.mubr.msk.bf16.mxu1 %vm1820_vm0, %v1819_v5 }
 0x751   : > { %1770 = vmatpush3.bf16.msra.mxu1 %v1370_v52 }
 0x752   : > { %885 = vadd.xlane.f32.xlu1 %v884_v13  ;;  %1771 = vmatprep.subr.bf16.mxu1 %v1819_v5 }
 0x755   : > { %1772 = vmatpush3.bf16.msra.mxu1 %v1371_v33 }
 0x763   : > { %1349 = vrot.lane.b32.xlu1 %v1079_v28, %s1825_s19 }
 0x7c2   : > { %v1354_v5 = vpop.permute.xlu0 %1353 }
 0x7db   : > { %v1289_v34 = vpop.xlane.xlu1 %1288 }
 0x7dc   : > { %1805 = vrcp.f32 %v1289_v34 }
 0x7df   : > { %v886_v44 = vpop.xlane.xlu1 %885 }
 0x7e0   : > { %1807 = vrcp.f32 %v886_v44 }
 0x7e3   : > { %v1350_v47 = vpop.permute.xlu1 %1349 }
 0x7e6   : > { %v1806_v35 = vpop.eup %1805 }
 0x7ea   : > { %v1808_v45 = vpop.eup %1807 }
 0x7eb   : > { %v936_v46 = vmul.f32 %v1808_v45, %v2103_v2 }
 0x7ed   : > { %v1360_v48 = vsel %vm819_vm2, %v936_v46, %v1350_v47 }
 0x7ee   : > { %v1362_v49 = vsel %vm1361_vm4, %v1360_v48, %v1354_v5 }
 0x822   : > { %v1341_v38 = vpop.f32.mrb[20].mxu1 }
 0x823   : > { %v1347_v40 = vmul.f32 %v1806_v35, %v1341_v38  ;;  %v1767_v41 = vpop.f32.mrb[21].mxu1 }
 0x824   : > { %v1344_v42 = vpop.f32.mrb[22].mxu1 }
 0x825   : > { %v1768_v43 = vpop.f32.mrb[23].mxu1  ;;  %1357 = vrot.lane.b32.xlu1 %v1347_v40, %s1826_s27 }
 0x897   : > { %v1358_v50 = vpop.permute.xlu1 %1357 }
 0x898   : > { %v1364_v51 = vsel %vm1363_vm5, %v1362_v49, %v1358_v50 }
 0x899   : > { %v1369_v53 = vpack.c.bf16 %v1364_v51, %v1364_v51 }
 0x89b   : > { %1774 = vmatmul.mubr.msk.bf16.vlgmr.msra.gmra.mrb[24].mxu1 %vm582_vm1, %v1369_v53 }
 0x96e   : > { %v1416_v27 = vpop.f32.mrb[24].mxu1 }
 0x96f   : > { %v1417_v26 = vadd.f32 %v1575_v59, %v1416_v27  ;;  %v1775_v37 = vpop.f32.mrb[25].mxu1 }
 0x970   : > { %v1419_v2 = vpop.f32.mrb[26].mxu1 }
 0x971   : > { %v1776_v54 = vpop.f32.mrb[27].mxu1  ;;  %v1422_v36 = vadd.f32 %v1417_v26, %v1961_v23  ;;  %v1577_v23 = vld [vmem:[%s2232_s13] ss:$0 sm:$0xff] }
 0x973   : > { %v1425_v55 = vsel %vm582_vm1, %v1422_v36, 0.0 }
 0x974   : > { %1426 = vadd.xlane.f32.xlu1 %v1425_v55 }
 0xa01   : > { %v1427_v56 = vpop.xlane.xlu1 %1426 }
 0xa02   : > { %v1429_v57 = vmul.f32 0.03125, %v1427_v56 }
 0xa04   : > { %v1430_v58 = vsub.f32 %v1422_v36, %v1429_v57 }
 0xa06   : > { %v1431_v60 = vmul.f32 %v1430_v58, %v1430_v58 }
 0xa08   : > { %v1432_v62 = vsel %vm582_vm1, %v1431_v60, 0.0 }
 0xa09   : > { %1433 = vadd.xlane.f32.xlu0 %v1432_v62 }
 0xa96   : > { %v1434_v63 = vpop.xlane.xlu0 %1433 }
 0xa97   : > { %v1435_v0 = vmul.f32 0.03125, %v1434_v63 }
 0xa99   : > { %v1436_v1 = vadd.f32 1e-05, %v1435_v0 }
 0xa9b   : > { %1809 = vrsqrt.f32 %v1436_v1 }
 0xaa5   : > { %v1810_v3 = vpop.eup %1809 }
 0xaa6   : > { %v1438_v4 = vmul.f32 %v1810_v3, %v1430_v58 }
 0xaa8   : > { %v1445_v7 = vmul.f32 %v1577_v23, %v1438_v4 }
 0xaaa   : > { %v1452_v9 = vadd.f32 %v1578_v6, %v1445_v7 }
 0xaac   : > { %1453 = vst.msk [vmem:[%s546_s25] sm:$0xff] %vm582_vm1, %v1452_v9 }
 0xaad PF: > { %s25_s18 = sadd.s32 1, %s1817_s18  }
 0xaae   : > { %p22_p4 = scmp.ge.s32.totalorder %s25_s18, 4  }
 0xab0   :  { %24 = sbr.rel (!%p22_p4) target bundleno = 1 (0x1), region = 119 }

</bundles_post_ra>
